<compile_context>
chip_gen: v7x
topology: tpu7x:2x2x1
jax: 0.10.0
libtpu: 0.0.40
codegen_flags: <defaults>
</compile_context>

<pallas_src>
import functools

import jax
import jax.numpy as jnp
from jax.experimental import pallas as pl
from jax.experimental.pallas import tpu as pltpu


def _testnet1_kernel(x_ref, wc_ref, bc_ref, pool_ref, wf_ref, bf_ref, o_ref,
                     *, kh_sz, kw_sz):
    """conv3x3(valid) -> ReLU -> global avg pool -> FC, fully fused.

    x_ref   : (B, H, W, Cin)        NHWC input (f32)
    wc_ref  : (KH*KW*Cin, COUT_P)   im2col conv weights, bf16, Cout zero-padded
    bc_ref  : (1, COUT_P)           conv bias (f32, zero-padded)
    pool_ref: (B, B*Ho*Wo)          global-average-pool matrix (f32)
    wf_ref  : (COUT_P, NCLS_P)      fc weights (f32, zero-padded)
    bf_ref  : (1, NCLS_P)           fc bias (f32, zero-padded)
    o_ref   : (B, NCLS_P)           lane-dense logits (real classes in [:, :ncls])
    """
    B, H, W, Cin = x_ref.shape
    Ho = H - kh_sz + 1
    Wo = W - kw_sz + 1
    N = B * Ho * Wo

    # --- im2col: static unroll of the KH*KW shifted windows, concatenated on
    #     the K (lane) axis -> single wide-K MXU matmul instead of 9 K=Cin dots.
    cols = []
    for kh in range(kh_sz):
        for kw in range(kw_sz):
            cols.append(x_ref[:, kh:kh + Ho, kw:kw + Wo, :].reshape(N, Cin))
    patches = jnp.concatenate(cols, axis=1).astype(jnp.bfloat16)      # (N, K)

    # --- cnnbody: one matmul (bf16 operands, f32 accumulate) + bias + ReLU
    #     in a single lane-dense VPU pass.
    acc = jnp.dot(patches, wc_ref[...],
                  preferred_element_type=jnp.float32)                 # (N, COUT_P)
    acc = jnp.maximum(acc + bc_ref[...], 0.0)

    # --- global average pool as a matmul with the (B, N) pooling matrix (MXU,
    #     no tile-boundary-crossing reshape / XLU reduction).
    pooled = jnp.dot(pool_ref[...], acc,
                     preferred_element_type=jnp.float32)              # (B, COUT_P)

    # --- fullyconnected (classes padded to 128 lanes; sliced outside).
    logits = jnp.dot(pooled, wf_ref[...],
                     preferred_element_type=jnp.float32) + bf_ref[...]
    o_ref[...] = logits.astype(o_ref.dtype)                           # lane-dense store


@functools.partial(jax.jit, static_argnames=("num_classes",))
def testnet1_forward(x_nchw, conv_w, conv_b, fc_w, fc_b, *, num_classes=10):
    """PyTorch-style entry: x is NCHW, conv_w is torch-layout (Cout, Cin, KH, KW)."""
    B, Cin, H, W = x_nchw.shape
    Cout, _, KH, KW = conv_w.shape
    Ho, Wo = H - KH + 1, W - KW + 1
    N = B * Ho * Wo
    COUT_P = 128          # lane-dense channel padding
    NCLS_P = 128          # lane-dense class padding

    # --- layout plumbing (once, outside the kernel) ---
    x = jnp.transpose(x_nchw, (0, 2, 3, 1)).astype(jnp.float32)       # NHWC
    # torch (Cout, Cin, KH, KW) -> im2col (KH*KW*Cin, Cout) -> pad -> bf16.
    wc2d = jnp.transpose(conv_w, (2, 3, 1, 0)).reshape(KH * KW * Cin, Cout)
    wc2d = jnp.pad(wc2d, ((0, 0), (0, COUT_P - Cout))).astype(jnp.bfloat16)
    bc_p = jnp.pad(conv_b.reshape(1, Cout).astype(jnp.float32),
                   ((0, 0), (0, COUT_P - Cout)))
    wf_p = jnp.pad(fc_w.astype(jnp.float32),
                   ((0, COUT_P - Cout), (0, NCLS_P - num_classes)))
    bf_p = jnp.pad(fc_b.reshape(1, num_classes).astype(jnp.float32),
                   ((0, 0), (0, NCLS_P - num_classes)))
    # Pooling matrix: pool[b, b*Ho*Wo : (b+1)*Ho*Wo] = 1 / (Ho*Wo).
    pool = jnp.repeat(jnp.eye(B, dtype=jnp.float32), Ho * Wo, axis=1) / (Ho * Wo)

    kernel = functools.partial(_testnet1_kernel, kh_sz=KH, kw_sz=KW)

    flops = (2 * N * (KH * KW * Cin) * COUT_P
             + 2 * B * N * COUT_P
             + 2 * B * COUT_P * NCLS_P)
    bytes_accessed = (x.size * 4 + wc2d.size * 2 + bc_p.size * 4
                      + pool.size * 4 + wf_p.size * 4 + bf_p.size * 4
                      + B * NCLS_P * 4)

    im4 = lambda i: (0, 0, 0, 0)
    im2 = lambda i: (0, 0)

    out_padded = pl.pallas_call(
        kernel,
        out_shape=jax.ShapeDtypeStruct((B, NCLS_P), jnp.float32),
        grid=(1,),
        in_specs=[
            pl.BlockSpec(x.shape, im4),      # whole (tiny) input resident in VMEM
            pl.BlockSpec(wc2d.shape, im2),
            pl.BlockSpec(bc_p.shape, im2),
            pl.BlockSpec(pool.shape, im2),
            pl.BlockSpec(wf_p.shape, im2),
            pl.BlockSpec(bf_p.shape, im2),
        ],
        out_specs=pl.BlockSpec((B, NCLS_P), im2),
        compiler_params=pltpu.CompilerParams(
            dimension_semantics=("arbitrary",)),
        cost_estimate=pl.CostEstimate(
            flops=flops, transcendentals=0, bytes_accessed=bytes_accessed),
    )(x, wc2d, bc_p, pool, wf_p, bf_p)

    return out_padded[:, :num_classes]


def init_params(key, cin, cout, kh, kw, num_classes):
    k1, k2, k3, k4 = jax.random.split(key, 4)
    conv_w = jax.random.normal(k1, (cout, cin, kh, kw), jnp.float32) * 0.1  # torch layout
    conv_b = jax.random.normal(k2, (cout,), jnp.float32) * 0.01
    fc_w = jax.random.normal(k3, (cout, num_classes), jnp.float32) * 0.1
    fc_b = jax.random.normal(k4, (num_classes,), jnp.float32) * 0.01
    return conv_w, conv_b, fc_w, fc_b


if __name__ == "__main__":
    key = jax.random.PRNGKey(0)
    kx, kp = jax.random.split(key)

    # Small shapes consistent with the module (channels-first like PyTorch).
    B, C_IN, H, W = 2, 8, 16, 16
    C_OUT, KH, KW = 16, 3, 3
    NUM_CLASSES = 10

    x = jax.random.normal(kx, (B, C_IN, H, W), jnp.float32)
    conv_w, conv_b, fc_w, fc_b = init_params(kp, C_IN, C_OUT, KH, KW, NUM_CLASSES)

    out = testnet1_forward(x, conv_w, conv_b, fc_w, fc_b, num_classes=NUM_CLASSES)
    jax.block_until_ready(out)
    assert out.shape == (B, NUM_CLASSES)
    assert bool(jnp.all(jnp.isfinite(out)))
    print("KERNEL_OK")
</pallas_src>

<mosaic_0001>
module attributes {stable_mosaic.version = 11 : i64} {
  func.func @_testnet1_kernel(%arg0: i32, %arg1: memref<2x16x16x8xf32, #tpu.memory_space<vmem>>, %arg2: memref<72x128xbf16, #tpu.memory_space<vmem>>, %arg3: memref<1x128xf32, #tpu.memory_space<vmem>>, %arg4: memref<2x392xf32, #tpu.memory_space<vmem>>, %arg5: memref<128x128xf32, #tpu.memory_space<vmem>>, %arg6: memref<1x128xf32, #tpu.memory_space<vmem>>, %arg7: memref<2x128xf32, #tpu.memory_space<vmem>>) attributes {dimension_semantics = [#tpu.dimension_semantics<arbitrary>], iteration_bounds = array<i64: 1>, scalar_prefetch = 0 : i64, scratch_operands = 0 : i64, tpu.core_type = #tpu.core_type<tc>, window_params = [{pipeline_mode = #tpu.pipeline_mode<synchronous>, transform_indices = @transform_0, window_bounds = array<i64: 2, 16, 16, 8>}, {pipeline_mode = #tpu.pipeline_mode<synchronous>, transform_indices = @transform_1, window_bounds = array<i64: 72, 128>}, {pipeline_mode = #tpu.pipeline_mode<synchronous>, transform_indices = @transform_2, window_bounds = array<i64: 1, 128>}, {pipeline_mode = #tpu.pipeline_mode<synchronous>, transform_indices = @transform_3, window_bounds = array<i64: 2, 392>}, {pipeline_mode = #tpu.pipeline_mode<synchronous>, transform_indices = @transform_4, window_bounds = array<i64: 128, 128>}, {pipeline_mode = #tpu.pipeline_mode<synchronous>, transform_indices = @transform_5, window_bounds = array<i64: 1, 128>}, {pipeline_mode = #tpu.pipeline_mode<synchronous>, transform_indices = @transform_6, window_bounds = array<i64: 2, 128>}]} {
    %c0 = arith.constant 0 : index
    %c0_0 = arith.constant 0 : index
    %c0_1 = arith.constant 0 : index
    %c0_2 = arith.constant 0 : index
    %0 = vector.load %arg1[%c0, %c0_0, %c0_1, %c0_2] : memref<2x16x16x8xf32, #tpu.memory_space<vmem>>, vector<2x14x14x8xf32>
    %1 = vector.shape_cast %0 : vector<2x14x14x8xf32> to vector<392x8xf32>
    %c0_3 = arith.constant 0 : index
    %c0_4 = arith.constant 0 : index
    %c1 = arith.constant 1 : index
    %c0_5 = arith.constant 0 : index
    %2 = vector.load %arg1[%c0_3, %c0_4, %c1, %c0_5] : memref<2x16x16x8xf32, #tpu.memory_space<vmem>>, vector<2x14x14x8xf32>
    %3 = vector.shape_cast %2 : vector<2x14x14x8xf32> to vector<392x8xf32>
    %c0_6 = arith.constant 0 : index
    %c0_7 = arith.constant 0 : index
    %c2 = arith.constant 2 : index
    %c0_8 = arith.constant 0 : index
    %4 = vector.load %arg1[%c0_6, %c0_7, %c2, %c0_8] : memref<2x16x16x8xf32, #tpu.memory_space<vmem>>, vector<2x14x14x8xf32>
    %5 = vector.shape_cast %4 : vector<2x14x14x8xf32> to vector<392x8xf32>
    %c0_9 = arith.constant 0 : index
    %c1_10 = arith.constant 1 : index
    %c0_11 = arith.constant 0 : index
    %c0_12 = arith.constant 0 : index
    %6 = vector.load %arg1[%c0_9, %c1_10, %c0_11, %c0_12] : memref<2x16x16x8xf32, #tpu.memory_space<vmem>>, vector<2x14x14x8xf32>
    %7 = vector.shape_cast %6 : vector<2x14x14x8xf32> to vector<392x8xf32>
    %c0_13 = arith.constant 0 : index
    %c1_14 = arith.constant 1 : index
    %c1_15 = arith.constant 1 : index
    %c0_16 = arith.constant 0 : index
    %8 = vector.load %arg1[%c0_13, %c1_14, %c1_15, %c0_16] : memref<2x16x16x8xf32, #tpu.memory_space<vmem>>, vector<2x14x14x8xf32>
    %9 = vector.shape_cast %8 : vector<2x14x14x8xf32> to vector<392x8xf32>
    %c0_17 = arith.constant 0 : index
    %c1_18 = arith.constant 1 : index
    %c2_19 = arith.constant 2 : index
    %c0_20 = arith.constant 0 : index
    %10 = vector.load %arg1[%c0_17, %c1_18, %c2_19, %c0_20] : memref<2x16x16x8xf32, #tpu.memory_space<vmem>>, vector<2x14x14x8xf32>
    %11 = vector.shape_cast %10 : vector<2x14x14x8xf32> to vector<392x8xf32>
    %c0_21 = arith.constant 0 : index
    %c2_22 = arith.constant 2 : index
    %c0_23 = arith.constant 0 : index
    %c0_24 = arith.constant 0 : index
    %12 = vector.load %arg1[%c0_21, %c2_22, %c0_23, %c0_24] : memref<2x16x16x8xf32, #tpu.memory_space<vmem>>, vector<2x14x14x8xf32>
    %13 = vector.shape_cast %12 : vector<2x14x14x8xf32> to vector<392x8xf32>
    %c0_25 = arith.constant 0 : index
    %c2_26 = arith.constant 2 : index
    %c1_27 = arith.constant 1 : index
    %c0_28 = arith.constant 0 : index
    %14 = vector.load %arg1[%c0_25, %c2_26, %c1_27, %c0_28] : memref<2x16x16x8xf32, #tpu.memory_space<vmem>>, vector<2x14x14x8xf32>
    %15 = vector.shape_cast %14 : vector<2x14x14x8xf32> to vector<392x8xf32>
    %c0_29 = arith.constant 0 : index
    %c2_30 = arith.constant 2 : index
    %c2_31 = arith.constant 2 : index
    %c0_32 = arith.constant 0 : index
    %16 = vector.load %arg1[%c0_29, %c2_30, %c2_31, %c0_32] : memref<2x16x16x8xf32, #tpu.memory_space<vmem>>, vector<2x14x14x8xf32>
    %17 = vector.shape_cast %16 : vector<2x14x14x8xf32> to vector<392x8xf32>
    %18 = tpu.concatenate %1, %3, %5, %7, %9, %11, %13, %15, %17 in 1 : vector<392x8xf32>, vector<392x8xf32>, vector<392x8xf32>, vector<392x8xf32>, vector<392x8xf32>, vector<392x8xf32>, vector<392x8xf32>, vector<392x8xf32>, vector<392x8xf32> -> vector<392x72xf32>
    %19 = arith.truncf %18 : vector<392x72xf32> to vector<392x72xbf16>
    %c0_33 = arith.constant 0 : index
    %c0_34 = arith.constant 0 : index
    %20 = vector.load %arg2[%c0_33, %c0_34] : memref<72x128xbf16, #tpu.memory_space<vmem>>, vector<72x128xbf16>
    %cst = arith.constant dense<0.000000e+00> : vector<392x128xf32>
    %21 = tpu.matmul %19, %20, %cst {dimension_numbers = #tpu.dot_dimension_numbers<[1], [0], [0], [1], [0, 0, 1, 1], [], []>} : vector<392x72xbf16>, vector<72x128xbf16>, vector<392x128xf32> -> vector<392x128xf32>
    %c0_35 = arith.constant 0 : index
    %c0_36 = arith.constant 0 : index
    %22 = vector.load %arg3[%c0_35, %c0_36] : memref<1x128xf32, #tpu.memory_space<vmem>>, vector<1x128xf32>
    %23 = vector.broadcast %22 : vector<1x128xf32> to vector<392x128xf32>
    %24 = arith.addf %21, %23 : vector<392x128xf32>
    %cst_37 = arith.constant 0.000000e+00 : f32
    %25 = vector.broadcast %cst_37 : f32 to vector<392x128xf32>
    %26 = arith.maximumf %24, %25 : vector<392x128xf32>
    %c0_38 = arith.constant 0 : index
    %c0_39 = arith.constant 0 : index
    %27 = vector.load %arg4[%c0_38, %c0_39] : memref<2x392xf32, #tpu.memory_space<vmem>>, vector<2x392xf32>
    %cst_40 = arith.constant dense<0.000000e+00> : vector<2x128xf32>
    %28 = tpu.matmul %27, %26, %cst_40 {dimension_numbers = #tpu.dot_dimension_numbers<[1], [0], [0], [1], [0, 0, 1, 1], [], []>} : vector<2x392xf32>, vector<392x128xf32>, vector<2x128xf32> -> vector<2x128xf32>
    %c0_41 = arith.constant 0 : index
    %c0_42 = arith.constant 0 : index
    %29 = vector.load %arg5[%c0_41, %c0_42] : memref<128x128xf32, #tpu.memory_space<vmem>>, vector<128x128xf32>
    %cst_43 = arith.constant dense<0.000000e+00> : vector<2x128xf32>
    %30 = tpu.matmul %28, %29, %cst_43 {dimension_numbers = #tpu.dot_dimension_numbers<[1], [0], [0], [1], [0, 0, 1, 1], [], []>} : vector<2x128xf32>, vector<128x128xf32>, vector<2x128xf32> -> vector<2x128xf32>
    %c0_44 = arith.constant 0 : index
    %c0_45 = arith.constant 0 : index
    %31 = vector.load %arg6[%c0_44, %c0_45] : memref<1x128xf32, #tpu.memory_space<vmem>>, vector<1x128xf32>
    %32 = vector.broadcast %31 : vector<1x128xf32> to vector<2x128xf32>
    %33 = arith.addf %30, %32 : vector<2x128xf32>
    %c0_46 = arith.constant 0 : index
    %c0_47 = arith.constant 0 : index
    %34 = vector.load %arg7[%c0_46, %c0_47] : memref<2x128xf32, #tpu.memory_space<vmem>>, vector<2x128xf32>
    tpu.vector_store %arg7[%c0_46, %c0_47], %33 {strides = array<i32>} : memref<2x128xf32, #tpu.memory_space<vmem>>, vector<2x128xf32>,
    return
  }
  func.func @transform_0(%arg0: i32) -> (i32, i32, i32, i32) {
    %c0_i32 = arith.constant 0 : i32
    %c0_i32_0 = arith.constant 0 : i32
    %c0_i32_1 = arith.constant 0 : i32
    %c0_i32_2 = arith.constant 0 : i32
    %c0_i32_3 = arith.constant 0 : i32
    return %c0_i32, %c0_i32_0, %c0_i32_1, %c0_i32_2 : i32, i32, i32, i32
  }
  func.func @transform_1(%arg0: i32) -> (i32, i32) {
    %c0_i32 = arith.constant 0 : i32
    %c0_i32_0 = arith.constant 0 : i32
    %c0_i32_1 = arith.constant 0 : i32
    return %c0_i32, %c0_i32_0 : i32, i32
  }
  func.func @transform_2(%arg0: i32) -> (i32, i32) {
    %c0_i32 = arith.constant 0 : i32
    %c0_i32_0 = arith.constant 0 : i32
    %c0_i32_1 = arith.constant 0 : i32
    return %c0_i32, %c0_i32_0 : i32, i32
  }
  func.func @transform_3(%arg0: i32) -> (i32, i32) {
    %c0_i32 = arith.constant 0 : i32
    %c0_i32_0 = arith.constant 0 : i32
    %c0_i32_1 = arith.constant 0 : i32
    return %c0_i32, %c0_i32_0 : i32, i32
  }
  func.func @transform_4(%arg0: i32) -> (i32, i32) {
    %c0_i32 = arith.constant 0 : i32
    %c0_i32_0 = arith.constant 0 : i32
    %c0_i32_1 = arith.constant 0 : i32
    return %c0_i32, %c0_i32_0 : i32, i32
  }
  func.func @transform_5(%arg0: i32) -> (i32, i32) {
    %c0_i32 = arith.constant 0 : i32
    %c0_i32_0 = arith.constant 0 : i32
    %c0_i32_1 = arith.constant 0 : i32
    return %c0_i32, %c0_i32_0 : i32, i32
  }
  func.func @transform_6(%arg0: i32) -> (i32, i32) {
    %c0_i32 = arith.constant 0 : i32
    %c0_i32_0 = arith.constant 0 : i32
    %c0_i32_1 = arith.constant 0 : i32
    return %c0_i32, %c0_i32_0 : i32, i32
  }
}

</mosaic_0001>

<bundles_post_ra>
// kernel: testnet1_forward.1
= control target key start
LH: loop header
LB: loop body
LE: loop exit
PB: predicated region body
PF: predicated region fallthrough
CT: control target
= control target key end

     0   :  { %v141_v0 = vlaneseq  ;;  %v21276_v4 = vmov 1983009808   ;;  %s21277_s9 = smov 24   ;;  %s28419_s0 = inlined_call_operand.vmem [shape: f32[2,16,16,8], index: 0, kind: input, shape index: {}]   ;;  %s28420_s1 = inlined_call_operand.vmem [shape: bf16[72,128], index: 1, kind: input, shape index: {}]   ;;  %s28421_s2 = inlined_call_operand.vmem [shape: f32[1,128], index: 2, kind: input, shape index: {}]   ;;  %s28422_s3 = inlined_call_operand.vmem [shape: f32[2,392], index: 3, kind: input, shape index: {}]   ;;  %s28423_s4 = inlined_call_operand.vmem [shape: f32[128,128], index: 4, kind: input, shape index: {}]   ;;  %s28424_s5 = inlined_call_operand.vmem [shape: f32[1,128], index: 5, kind: input, shape index: {}]   ;;  %s28425_s6 = inlined_call_operand.hbm [shape: f32[2,128], index: 6, kind: output, shape index: {}]  }
   0x1   :  { %v19174_v1 = vld [vmem:[%s28419_s0 + $0x10] sm:$0xff]  ;;  %v19175_v2 = vld [vmem:[%s28419_s0 + $0x18] sm:$0x3f]  ;;  %v21333_v3 = vld [vmem:[%s28419_s0 + $0x20] sm:$0xff]  ;;  %v139_v5 = vunpack.c.l.s4 %v21276_v4 }
   0x2   :  { %v3246_v6 = vcombine.high %v19174_v1, %v19174_v1  ;;  %v1061_v7 = vld [vmem:[%s28419_s0 + $0x1] sm:$0xff]  ;;  %v1062_v8 = vld [vmem:[%s28419_s0 + $0x9] sm:$0x3f]  ;;  %v21344_v9 = vld [vmem:[%s28419_s0 + $0x11] sm:$0xff]  ;;  %v142_v10 = vshrl.u32 %v141_v0, 7  ;;  %v3263_v11 = vcombine.high %v19175_v2, %v19175_v2  ;;  %v3279_v12 = vcombine.high %v21333_v3, %v21333_v3 }
   0x3   :  { %v1173_v13 = vcombine.high %v1061_v7, %v1061_v7  ;;  %v21351_v14 = vld [vmem:[%s28419_s0 + $0x19] sm:$0x3f]  ;;  %v21356_v15 = vld [vmem:[%s28419_s0 + $0x21] sm:$0xff]  ;;  %v140_v17 = vunpack.c.0.s8 %v139_v5  ;;  %v1190_v18 = vcombine.high %v1062_v8, %v1062_v8  ;;  %v1206_v19 = vcombine.high %v21344_v9, %v21344_v9  ;;  %v21370_v21 = vld [vmem:[%s28419_s0 + $0xa] sm:$0x3f] }
   0x4   :  { %v21361_v16 = vld [vmem:[%s28419_s0 + $0x2] sm:$0xff]  ;;  %v4299_v20 = vcombine.high %v21351_v14, %v21351_v14  ;;  %v21375_v22 = vld [vmem:[%s28419_s0 + $0x12] sm:$0xff]  ;;  %v2226_v25 = vcombine.high %v21370_v21, %v21370_v21  ;;  %v21396_v28 = vld [vmem:[%s28419_s0 + $0x1a] sm:$0x3f]  ;;  %v7391_v30 = vcombine.high %v21356_v15, %v21356_v15 }
   0x5   :  { %v21380_v23 = vld [vmem:[%s28419_s0 + $0x28] sm:$0x3f]  ;;  %v2209_v24 = vcombine.high %v21361_v16, %v21361_v16  ;;  %v21389_v26 = vld [vmem:[%s28419_s0 + $0x30] sm:$0xff]  ;;  %v21405_v31 = vsub.s32 %v140_v17, %v142_v10  ;;  %v5318_v32 = vcombine.high %v21375_v22, %v21375_v22  ;;  %v5335_v33 = vcombine.high %v21396_v28, %v21396_v28 }
   0x6   :  { %v6372_v27 = vcombine.high %v21380_v23, %v21380_v23  ;;  %v21401_v29 = vld [vmem:[%s28419_s0 + $0x22] sm:$0xff]  ;;  %v21414_v34 = vld [vmem:[%s28419_s0 + $0x2a] sm:$0x3f]  ;;  %v21419_v35 = vld [vmem:[%s28419_s0 + $0x32] sm:$0xff]  ;;  %v6388_v40 = vcombine.high %v21389_v26, %v21389_v26 }
   0x7   :  { %v8427_v36 = vcombine.high %v21401_v29, %v21401_v29  ;;  %v21426_v37 = vld [vmem:[%s28419_s0 + $0x29] sm:$0x3f]  ;;  %v8444_v38 = vcombine.high %v21414_v34, %v21414_v34  ;;  %v8460_v41 = vcombine.high %v21419_v35, %v21419_v35  ;;  %v3253_v42 = vrot.slane %v19174_v1, %v21405_v31 }
   0x8   :  { %v7408_v39 = vcombine.high %v21426_v37, %v21426_v37  ;;  %v3260_v43 = vrot.slane %v3246_v6, %v21405_v31  ;;  %v3270_v44 = vrot.slane %v19175_v2, %v21405_v31  ;;  %v3277_v45 = vrot.slane %v3263_v11, %v21405_v31 }
   0x9   :  { %v21442_v46 = vrot.slane %v21333_v3, %v21405_v31  ;;  %v1180_v47 = vrot.slane %v1061_v7, %v21405_v31  ;;  %v1187_v48 = vrot.slane %v1173_v13, %v21405_v31  ;;  %v1197_v49 = vrot.slane %v1062_v8, %v21405_v31 }
   0xa   :  { %v3261_v50 = vcombine.high %v3253_v42, %v3253_v42  ;;  %v3262_v51 = vcombine.high %v3260_v43, %v3260_v43  ;;  %v3278_v52 = vcombine.high %v3270_v44, %v3270_v44  ;;  %v1204_v53 = vrot.slane %v1190_v18, %v21405_v31 }
   0xb   :  { %v21450_v54 = vcombine.high %v21442_v46, %v21442_v46  ;;  %v12211_v55 = vcombine.low %v3277_v45, %v21442_v46  ;;  %v1188_v56 = vcombine.high %v1180_v47, %v1180_v47  ;;  %v1189_v57 = vcombine.high %v1187_v48, %v1187_v48 }
   0xc   :  { %v12193_v58 = vcombine.low %v3253_v42, %v3261_v50  ;;  %v12194_v59 = vcombine.low %v3260_v43, %v3262_v51  ;;  %v12210_v60 = vcombine.low %v3270_v44, %v3278_v52  ;;  %v1205_v61 = vcombine.high %v1197_v49, %v1197_v49 }
   0xd   :  { %v12225_v62 = vrot.slane %v12211_v55, %v21405_v31  ;;  %v1213_v63 = vrot.slane %v21344_v9, %v21405_v31  ;;  %v10233_v0 = vcombine.low %v1180_v47, %v1188_v56  ;;  %v10234_v1 = vcombine.low %v1187_v48, %v1189_v57 }
   0xe   :  { %v12201_v2 = vrot.slane %v12193_v58, %v21405_v31  ;;  %v12208_v4 = vrot.slane %v12194_v59, %v21405_v31  ;;  %v12218_v5 = vrot.slane %v12210_v60, %v21405_v31  ;;  %v10250_v6 = vcombine.low %v1197_v49, %v1205_v61 }
   0xf   :  { %v21459_v7 = vcombine.high %v1213_v63, %v1213_v63  ;;  %v10241_v8 = vrot.slane %v10233_v0, %v21405_v31  ;;  %v10248_v10 = vrot.slane %v10234_v1, %v21405_v31  ;;  %v10251_v11 = vcombine.low %v1204_v53, %v1213_v63 }
  0x10   :  { %v12209_v13 = vcombine.low %v12201_v2, %v12208_v4  ;;  %v12226_v17 = vcombine.low %v12218_v5, %v12225_v62  ;;  %v10258_v9 = vrot.slane %v10250_v6, %v21405_v31  ;;  %v21465_v18 = vrot.slane %v1206_v19, %v21405_v31 }
  0x11   :  { %v10249_v42 = vcombine.low %v10241_v8, %v10248_v10  ;;  %v10265_v43 = vrot.slane %v10251_v11, %v21405_v31  ;;  %v4306_v44 = vrot.slane %v21351_v14, %v21405_v31  ;;  %v4313_v45 = vrot.slane %v4299_v20, %v21405_v31 }
  0x12   :  { %v19883_v47 = vpack.i.bf16 %v12226_v17, %v12209_v13  ;;  %v21473_v48 = vcombine.high %v21465_v18, %v21465_v18  ;;  %v21477_v49 = vrot.slane %v21356_v15, %v21405_v31  ;;  %v13173_v19 = vcombine.low %v1213_v63, %v21459_v7 }
  0x13   :  { %v10266_v50 = vcombine.low %v10258_v9, %v10265_v43  ;;  %v4314_v51 = vcombine.high %v4306_v44, %v4306_v44  ;;  %v2216_v52 = vrot.slane %v21361_v16, %v21405_v31  ;;  %v2223_v14 = vrot.slane %v2209_v24, %v21405_v31 }
  0x14   :  { %19884 = vrot.lane.b32.xlu1 %v19883_v47, %s21277_s9  ;;  %v13174_v20 = vcombine.low %v21465_v18, %v21473_v48  ;;  %v13181_v53 = vrot.slane %v13173_v19, %v21405_v31  ;;  %v13191_v55 = vcombine.low %v4313_v45, %v21477_v49  ;;  %v2233_v56 = vrot.slane %v21370_v21, %v21405_v31 }
  0x15   :  { %v19873_v57 = vpack.i.bf16 %v10266_v50, %v10249_v42  ;;  %v13190_v58 = vcombine.low %v4306_v44, %v4314_v51  ;;  %v2224_v59 = vcombine.high %v2216_v52, %v2216_v52  ;;  %v2225_v60 = vcombine.high %v2223_v14, %v2223_v14 }
  0x16   :  { %v13188_v16 = vrot.slane %v13174_v20, %v21405_v31  ;;  %v13205_v24 = vrot.slane %v13191_v55, %v21405_v31  ;;  %v2240_v61 = vrot.slane %v2226_v25, %v21405_v31  ;;  %v2241_v62 = vcombine.high %v2233_v56, %v2233_v56 }
  0x17   :  { %11 = vsyncpa [#allocation3], 0  ;;  %s21278_s10 = smov 8   ;;  %v13198_v63 = vrot.slane %v13190_v58, %v21405_v31  ;;  %v2249_v0 = vrot.slane %v21375_v22, %v21405_v31  ;;  %v11213_v1 = vcombine.low %v2216_v52, %v2224_v59  ;;  %v11214_v2 = vcombine.low %v2223_v14, %v2225_v60  ;;  %s21279_s11 = smov 32  }
  0x18   :  { %19874 = vrot.lane.b32.xlu0 %v19873_v57, %s21278_s10  ;;  %v13189_v4 = vcombine.low %v13181_v53, %v13188_v16  ;;  %v11230_v5 = vcombine.low %v2233_v56, %v2241_v62  ;;  %v21507_v21 = vrot.slane %v3279_v12, %v21405_v31  ;;  %v6379_v25 = vrot.slane %v21380_v23, %v21405_v31  ;;  %s21280_s12 = smov 16   ;;  %s21281_s13 = smov 48  }
  0x19   :  { %v13206_v6 = vcombine.low %v13198_v63, %v13205_v24  ;;  %v11221_v8 = vrot.slane %v11213_v1, %v21405_v31  ;;  %v11228_v10 = vrot.slane %v11214_v2, %v21405_v31  ;;  %v11231_v11 = vcombine.low %v2240_v61, %v2249_v0  ;;  %s21282_s18 = smov 40   ;;  %s21283_s21 = smov 64  }
  0x1a   :  { %v11238_v13 = vrot.slane %v11230_v5, %v21405_v31  ;;  %v21516_v17 = vcombine.high %v21507_v21, %v21507_v21  ;;  %v6386_v3 = vrot.slane %v6372_v27, %v21405_v31  ;;  %v6387_v12 = vcombine.high %v6379_v25, %v6379_v25  ;;  %s21284_s24 = smov 56   ;;  %s21288_s28 = smov [#allocation2]  }
  0x1b   :  { %v19888_v9 = vpack.i.bf16 %v13206_v6, %v13189_v4  ;;  %v11229_v42 = vcombine.low %v11221_v8, %v11228_v10  ;;  %v11245_v43 = vrot.slane %v11231_v11, %v21405_v31  ;;  %v21525_v44 = vrot.slane %v21389_v26, %v21405_v31  ;;  %s19166_s29 = sshll.u32 %s21288_s28, 4  ;;  %s19167_s29 = int_to_ptr.vmem [resolvable:$true] %s19166_s29 }
  0x1c   :  { %v15133_v45 = vcombine.low %v21442_v46, %v21450_v54  ;;  %v15134_v47 = vcombine.low %v21507_v21, %v21516_v17  ;;  %v15150_v19 = vcombine.low %v6379_v25, %v6387_v12  ;;  %v21535_v23 = vrot.slane %v5318_v32, %v21405_v31  ;;  %v21605_v12 = vld [vmem:[%s28419_s0 + $0x31] sm:$0xff]  ;;  %p21257_p1 = scmp.lt.s32.totalorder %s19167_s29, %s19167_s29 }
  0x1d   :  { %19889 = vrot.lane.b32.xlu1 %v19888_v9, %s21279_s11  ;;  %v11246_v27 = vcombine.low %v11238_v13, %v11245_v43  ;;  %v15151_v50 = vcombine.low %v6386_v3, %v21525_v44  ;;  %v21539_v51 = vcombine.high %v2249_v0, %v2249_v0  ;;  %v5342_v46 = vrot.slane %v21396_v28, %v21405_v31 }
  0x1e   :  { %v15141_v52 = vrot.slane %v15133_v45, %v21405_v31  ;;  %v15148_v14 = vrot.slane %v15134_v47, %v21405_v31  ;;  %v15158_v20 = vrot.slane %v15150_v19, %v21405_v31  ;;  %v21548_v22 = vcombine.high %v21535_v23, %v21535_v23  ;;  %v2100_v45 = vld [vmem:[%s28419_s0 + $0x1a] sm:$0x3f] }
  0x1f   :  { %v19878_v32 = vpack.i.bf16 %v11246_v27, %v11229_v42  ;;  %v15165_v53 = vrot.slane %v15151_v50, %v21405_v31  ;;  %v5349_v55 = vrot.slane %v5335_v33, %v21405_v31  ;;  %v5350_v56 = vcombine.high %v5342_v46, %v5342_v46 }
  0x20   :  { %v15149_v57 = vcombine.low %v15141_v52, %v15148_v14  ;;  %v5358_v58 = vrot.slane %v21401_v29, %v21405_v31  ;;  %v14153_v59 = vcombine.low %v2249_v0, %v21539_v51  ;;  %v14154_v60 = vcombine.low %v21535_v23, %v21548_v22 }
  0x21   :  { %19879 = vrot.lane.b32.xlu0 %v19878_v32, %s21280_s12  ;;  %v15166_v16 = vcombine.low %v15158_v20, %v15165_v53  ;;  %v14170_v24 = vcombine.low %v5342_v46, %v5350_v56  ;;  %v21565_v28 = vrot.slane %v8427_v36, %v21405_v31  ;;  %v8451_v33 = vrot.slane %v21414_v34, %v21405_v31 }
  0x22   :  { %v14161_v61 = vrot.slane %v14153_v59, %v21405_v31  ;;  %v14168_v62 = vrot.slane %v14154_v60, %v21405_v31  ;;  %v14171_v63 = vcombine.low %v5349_v55, %v5358_v58  ;;  %v21571_v0 = vcombine.high %v5358_v58, %v5358_v58 }
  0x23   :  { %v19898_v1 = vpack.i.bf16 %v15166_v16, %v15149_v57  ;;  %v14178_v2 = vrot.slane %v14170_v24, %v21405_v31  ;;  %v21576_v4 = vcombine.high %v21565_v28, %v21565_v28  ;;  %v8458_v29 = vrot.slane %v8444_v38, %v21405_v31 }
  0x24   :  { %v14169_v36 = vcombine.low %v14161_v61, %v14168_v62  ;;  %v14185_v5 = vrot.slane %v14171_v63, %v21405_v31  ;;  %v8459_v25 = vcombine.high %v8451_v33, %v8451_v33  ;;  %v21585_v6 = vrot.slane %v21419_v35, %v21405_v31 }
  0x25   :  { %19899 = vrot.lane.b32.xlu1 %v19898_v1, %s21281_s13  ;;  %v17093_v8 = vcombine.low %v5358_v58, %v21571_v0  ;;  %v17094_v10 = vcombine.low %v21565_v28, %v21576_v4  ;;  %v21595_v34 = vrot.slane %v7391_v30, %v21405_v31  ;;  %v21599_v38 = vcombine.high %v21477_v49, %v21477_v49 }
  0x26   :  { %v14186_v11 = vcombine.low %v14178_v2, %v14185_v5  ;;  %v17110_v13 = vcombine.low %v8451_v33, %v8459_v25  ;;  %v17111_v3 = vcombine.low %v8458_v29, %v21585_v6  ;;  %v7415_v9 = vrot.slane %v21426_v37, %v21405_v31 }
  0x27   :  { %v17101_v15 = vrot.slane %v17093_v8, %v21405_v31  ;;  %v21611_v30 = vrot.slane %v17094_v10, %v21405_v31  ;;  %v21615_v42 = vcombine.high %v21595_v34, %v21595_v34  ;;  %v7422_v43 = vrot.slane %v7408_v39, %v21405_v31 }
  0x28   :  { %v19893_v47 = vpack.i.bf16 %v14186_v11, %v14169_v36  ;;  %v17118_v19 = vrot.slane %v17110_v13, %v21405_v31  ;;  %v17125_v27 = vrot.slane %v17111_v3, %v21405_v31  ;;  %v7423_v50 = vcombine.high %v7415_v9, %v7415_v9 }
  0x29   :  { %v17109_v46 = vcombine.low %v17101_v15, %v21611_v30  ;;  %v21629_v52 = vrot.slane %v21605_v12, %v21405_v31  ;;  %v16113_v37 = vcombine.low %v21477_v49, %v21599_v38  ;;  %v16114_v39 = vcombine.low %v21595_v34, %v21615_v42  ;;  %v1064_v49 = vld [vmem:[%s28419_s0 + $0x19] sm:$0x3f] }
  0x2a   :  { %19894 = vrot.lane.b32.xlu0 %v19893_v47, %s21282_s18  ;;  %v17126_v14 = vcombine.low %v17118_v19, %v17125_v27  ;;  %v16130_v20 = vcombine.low %v7415_v9, %v7423_v50  ;;  %v2259_v32 = vcombine.high %v2100_v45, %v2100_v45  ;;  %v2266_v57 = vrot.slane %v2100_v45, %v21405_v31 }
  0x2b   :  { %v16121_v53 = vrot.slane %v16113_v37, %v21405_v31  ;;  %v21638_v55 = vrot.slane %v16114_v39, %v21405_v31  ;;  %v16131_v56 = vcombine.low %v7422_v43, %v21629_v52  ;;  %v11247_v61 = vcombine.low %v21539_v51, %v21535_v23  ;;  %v19233_v23 = vld [vmem:[%s28419_s0 + $0x29] sm:$0x3f] }
  0x2c   :  { %v19908_v58 = vpack.i.bf16 %v17126_v14, %v17109_v46  ;;  %v16138_v59 = vrot.slane %v16130_v20, %v21405_v31  ;;  %v2273_v60 = vrot.slane %v2259_v32, %v21405_v31  ;;  %v2274_v33 = vcombine.high %v2266_v57, %v2266_v57 }
  0x2d   :  { %v16129_v16 = vcombine.low %v16121_v53, %v21638_v55  ;;  %v16145_v24 = vrot.slane %v16131_v56, %v21405_v31  ;;  %v11248_v62 = vcombine.low %v21548_v22, %v2266_v57  ;;  %v1223_v63 = vcombine.high %v1064_v49, %v1064_v49 }
  0x2e   :  { %19909 = vrot.lane.b32.xlu1 %v19908_v58, %s21283_s21  ;;  %v11255_v2 = vrot.slane %v11247_v61, %v21405_v31  ;;  %v11264_v29 = vcombine.low %v2274_v33, %v2273_v60  ;;  %v1230_v36 = vrot.slane %v1064_v49, %v21405_v31  ;;  %v10267_v11 = vcombine.low %v21459_v7, %v21465_v18  ;;  %v19177_v7 = vld [vmem:[%s28419_s0 + $0x28] sm:$0x3f] }
  0x2f   :  { %v16146_v1 = vcombine.low %v16138_v59, %v16145_v24  ;;  %v11262_v5 = vrot.slane %v11248_v62, %v21405_v31  ;;  %v1237_v25 = vrot.slane %v1223_v63, %v21405_v31  ;;  %v4332_v43 = vcombine.high %v19233_v23, %v19233_v23 }
  0x30   :  { %v11272_v8 = vrot.slane %v11264_v29, %v21405_v31  ;;  %v1238_v10 = vcombine.high %v1230_v36, %v1230_v36  ;;  %v10268_v13 = vcombine.low %v21473_v48, %v1230_v36  ;;  %v10275_v45 = vrot.slane %v10267_v11, %v21405_v31  ;;  %v21708_v29 = vld [vmem:[%s28419_s0 + $0x40] sm:$0xff] }
  0x31   :  { %v19903_v51 = vpack.i.bf16 %v16146_v1, %v16129_v16  ;;  %v11263_v22 = vcombine.low %v11255_v2, %v11262_v5  ;;  %v4339_v19 = vrot.slane %v19233_v23, %v21405_v31  ;;  %v21670_v27 = vcombine.high %v21629_v52, %v21629_v52 }
  0x32   :  { %v11280_v3 = vcombine.low %v11272_v8, %v17101_v15  ;;  %v10284_v9 = vcombine.low %v1238_v10, %v1237_v25  ;;  %v10282_v47 = vrot.slane %v10268_v13, %v21405_v31  ;;  %v4346_v15 = vrot.slane %v4332_v43, %v21405_v31 }
  0x33   :  { %19904 = vrot.lane.b32.xlu0 %v19903_v51, %s21284_s24  ;;  %v4347_v46 = vcombine.high %v4339_v19, %v4339_v19  ;;  %v13207_v37 = vcombine.low %v21599_v38, %v21595_v34  ;;  %v13208_v39 = vcombine.low %v21615_v42, %v4339_v19  ;;  %v13225_v20 = vcombine.low %v21629_v52, %v21670_v27  ;;  %v19345_v38 = vld [vmem:[%s28419_s0 + $0x38] sm:$0x3f] }
  0x34   :  { %v19918_v18 = vpack.i.bf16 %v11280_v3, %v11263_v22  ;;  %v10292_v48 = vrot.slane %v10284_v9, %v21405_v31  ;;  %v10283_v50 = vcombine.low %v10275_v45, %v10282_v47  ;;  %v3296_v32 = vcombine.high %v19177_v7, %v19177_v7 }
  0x35   :  { %v13215_v56 = vrot.slane %v13207_v37, %v21405_v31  ;;  %v13222_v57 = vrot.slane %v13208_v39, %v21405_v31  ;;  %v13224_v49 = vcombine.low %v4347_v46, %v4346_v15  ;;  %v3303_v58 = vrot.slane %v19177_v7, %v21405_v31  ;;  %v19457_v39 = vld [vmem:[%s28419_s0 + $0x3a] sm:$0x3f] }
  0x36   :  { %19919 = vrot.lane.b32.xlu1 %v19918_v18, %s21280_s12  ;;  %v10300_v14 = vcombine.low %v10292_v48, %v16121_v53  ;;  %v13239_v60 = vrot.slane %v13225_v20, %v21405_v31  ;;  %v3310_v34 = vrot.slane %v3296_v32, %v21405_v31  ;;  %v3327_v24 = vcombine.high %v21525_v44, %v21525_v44 }
  0x37   :  { %v13223_v42 = vcombine.low %v13215_v56, %v13222_v57  ;;  %v13232_v53 = vrot.slane %v13224_v49, %v21405_v31  ;;  %v3311_v16 = vcombine.high %v3303_v58, %v3303_v58  ;;  %v12227_v33 = vcombine.low %v21450_v54, %v21507_v21  ;;  %v21754_v56 = vld [vmem:[%s28419_s0 + $0x42] sm:$0xff] }
  0x38   :  { %v19913_v59 = vpack.i.bf16 %v10300_v14, %v10283_v50  ;;  %v12228_v61 = vcombine.low %v21516_v17, %v3303_v58  ;;  %v21702_v62 = vrot.slane %v6388_v40, %v21405_v31  ;;  %v12245_v2 = vcombine.low %v21525_v44, %v3327_v24  ;;  %v19289_v40 = vld [vmem:[%s28419_s0 + $0x2a] sm:$0x3f] }
  0x39   :  { %v13240_v63 = vcombine.low %v13232_v53, %v13239_v60  ;;  %v12244_v1 = vcombine.low %v3311_v16, %v3310_v34  ;;  %v6405_v36 = vcombine.high %v19345_v38, %v19345_v38  ;;  %v12235_v54 = vrot.slane %v12227_v33, %v21405_v31 }
  0x3a   :  { %19914 = vrot.lane.b32.xlu0 %v19913_v59, %s21278_s10  ;;  %v12242_v21 = vrot.slane %v12228_v61, %v21405_v31  ;;  %v21714_v17 = vcombine.high %v21702_v62, %v21702_v62  ;;  %v6412_v26 = vrot.slane %v19345_v38, %v21405_v31  ;;  %v12259_v25 = vrot.slane %v12245_v2, %v21405_v31 }
  0x3b   :  { %v19928_v44 = vpack.i.bf16 %v13240_v63, %v13223_v42  ;;  %v12252_v5 = vrot.slane %v12244_v1, %v21405_v31  ;;  %v6419_v23 = vrot.slane %v6405_v36, %v21405_v31  ;;  %v21725_v10 = vrot.slane %v21708_v29, %v21405_v31  ;;  %v19402_v36 = vld [vmem:[%s28419_s0 + $0x41] sm:$0xff] }
  0x3c   :  { %v12243_v51 = vcombine.low %v12235_v54, %v12242_v21  ;;  %v6420_v8 = vcombine.high %v6412_v26, %v6412_v26  ;;  %v15167_v22 = vcombine.low %v3327_v24, %v21702_v62  ;;  %v15168_v13 = vcombine.low %v21714_v17, %v6412_v26  ;;  %v19401_v24 = vld [vmem:[%s28419_s0 + $0x39] sm:$0x3f] }
  0x3d   :  { %19929 = vrot.lane.b32.xlu1 %v19928_v44, %s21279_s11  ;;  %v12260_v11 = vcombine.low %v12252_v5, %v12259_v25  ;;  %v5368_v3 = vcombine.high %v19289_v40, %v19289_v40  ;;  %v21732_v9 = vcombine.high %v21725_v10, %v21725_v10  ;;  %v5375_v47 = vrot.slane %v19289_v40, %v21405_v31 }
  0x3e   :  { %v15175_v43 = vrot.slane %v15167_v22, %v21405_v31  ;;  %v15184_v45 = vcombine.low %v6420_v8, %v6419_v23  ;;  %v15182_v7 = vrot.slane %v15168_v13, %v21405_v31  ;;  %v5399_v48 = vcombine.high %v21585_v6, %v21585_v6  ;;  %v2102_v22 = vld [vmem:[%s28419_s0 + $0x2a] sm:$0x3f] }
  0x3f   :  { %v19923_v19 = vpack.i.bf16 %v12260_v11, %v12243_v51  ;;  %v5382_v18 = vrot.slane %v5368_v3, %v21405_v31  ;;  %v15185_v15 = vcombine.low %v21725_v10, %v21732_v9  ;;  %v5383_v46 = vcombine.high %v5375_v47, %v5375_v47 }
  0x40   :  { %v15192_v50 = vrot.slane %v15184_v45, %v21405_v31  ;;  %v14187_v37 = vcombine.low %v21571_v0, %v21565_v28  ;;  %v15183_v14 = vcombine.low %v15175_v43, %v15182_v7  ;;  %v14188_v20 = vcombine.low %v21576_v4, %v5375_v47  ;;  %v1066_v45 = vld [vmem:[%s28419_s0 + $0x29] sm:$0x3f] }
  0x41   :  { %19924 = vrot.lane.b32.xlu0 %v19923_v19, %s21277_s9  ;;  %v14205_v32 = vcombine.low %v21585_v6, %v5399_v48  ;;  %v21760_v28 = vrot.slane %v8460_v41, %v21405_v31  ;;  %v15199_v0 = vrot.slane %v15185_v15, %v21405_v31  ;;  %v14204_v49 = vcombine.low %v5383_v46, %v5382_v18 }
  0x42   :  { %v14195_v57 = vrot.slane %v14187_v37, %v21405_v31  ;;  %v14202_v4 = vrot.slane %v14188_v20, %v21405_v31  ;;  %v8477_v60 = vcombine.high %v19457_v39, %v19457_v39  ;;  %v8484_v35 = vrot.slane %v19457_v39, %v21405_v31  ;;  %v19235_v20 = vld [vmem:[%s28419_s0 + $0x39] sm:$0x3f] }
  0x43   :  { %v14219_v58 = vrot.slane %v14205_v32, %v21405_v31  ;;  %v21768_v59 = vcombine.high %v21760_v28, %v21760_v28  ;;  %v15200_v34 = vcombine.low %v15192_v50, %v15199_v0  ;;  %v14212_v38 = vrot.slane %v14204_v49, %v21405_v31 }
  0x44   :  { %v21774_v41 = vrot.slane %v21754_v56, %v21405_v31  ;;  %v14203_v42 = vcombine.low %v14195_v57, %v14202_v4  ;;  %v8491_v53 = vrot.slane %v8477_v60, %v21405_v31  ;;  %v17127_v16 = vcombine.low %v5399_v48, %v21760_v28 }
  0x45   :  { %v7424_v33 = vcombine.high %v21605_v12, %v21605_v12  ;;  %v19938_v61 = vpack.i.bf16 %v15200_v34, %v15183_v14  ;;  %v14220_v63 = vcombine.low %v14212_v38, %v14219_v58  ;;  %v8492_v1 = vcombine.high %v8484_v35, %v8484_v35 }
  0x46   :  { %v21785_v2 = vcombine.high %v21774_v41, %v21774_v41  ;;  %v17128_v54 = vcombine.low %v21768_v59, %v8484_v35  ;;  %v21792_v21 = vrot.slane %v17127_v16, %v21405_v31  ;;  %v7441_v5 = vcombine.high %v19401_v24, %v19401_v24 }
  0x47   :  { %v21795_v26 = vrot.slane %v7424_v33, %v21405_v31  ;;  %19939 = vrot.lane.b32.xlu1 %v19938_v61, %s21281_s13  ;;  %v19933_v12 = vpack.i.bf16 %v14220_v63, %v14203_v42  ;;  %v17144_v40 = vcombine.low %v8492_v1, %v8491_v53  ;;  %v7448_v51 = vrot.slane %v19401_v24, %v21405_v31 }
  0x48   :  { %v17145_v44 = vcombine.low %v21774_v41, %v21785_v2  ;;  %v17142_v25 = vrot.slane %v17128_v54, %v21405_v31  ;;  %v21807_v8 = vrot.slane %v19402_v36, %v21405_v31  ;;  %v7455_v3 = vrot.slane %v7441_v5, %v21405_v31 }
  0x49   :  { %v21803_v23 = vcombine.high %v21795_v26, %v21795_v26  ;;  %19934 = vrot.lane.b32.xlu0 %v19933_v12, %s21282_s18  ;;  %v17152_v11 = vrot.slane %v17144_v40, %v21405_v31  ;;  %v16147_v43 = vcombine.low %v21670_v27, %v21795_v26  ;;  %v7456_v19 = vcombine.high %v7448_v51, %v7448_v51 }
  0x4a   :  { %v21815_v13 = vrot.slane %v17145_v44, %v21405_v31  ;;  %v17143_v47 = vcombine.low %v21792_v21, %v17142_v25  ;;  %v7472_v7 = vcombine.high %v21807_v8, %v21807_v8  ;;  %v2292_v50 = vcombine.high %v2102_v22, %v2102_v22 }
  0x4b   :  { %v16148_v18 = vcombine.low %v21803_v23, %v7448_v51  ;;  %v16155_v15 = vrot.slane %v16147_v43, %v21405_v31  ;;  %v2299_v46 = vrot.slane %v2102_v22, %v21405_v31  ;;  %v16164_v37 = vcombine.low %v7456_v19, %v7455_v3 }
  0x4c   :  { %v17160_v48 = vcombine.low %v17152_v11, %v21815_v13  ;;  %v16165_v39 = vcombine.low %v21807_v8, %v7472_v7  ;;  %v1256_v14 = vcombine.high %v1066_v45, %v1066_v45  ;;  %v2306_v0 = vrot.slane %v2292_v50, %v21405_v31 }
  0x4d   :  { %v16162_v27 = vrot.slane %v16148_v18, %v21405_v31  ;;  %v2307_v57 = vcombine.high %v2299_v46, %v2299_v46  ;;  %v1263_v49 = vrot.slane %v1066_v45, %v21405_v31  ;;  %v16172_v58 = vrot.slane %v16164_v37, %v21405_v31 }
  0x4e   :  { %v19948_v32 = vpack.i.bf16 %v17160_v48, %v17143_v47  ;;  %v21839_v60 = vrot.slane %v16165_v39, %v21405_v31  ;;  %v1270_v34 = vrot.slane %v1256_v14, %v21405_v31  ;;  %v11298_v35 = vcombine.low %v2306_v0, %v21585_v6 }
  0x4f   :  { %v16163_v4 = vcombine.low %v16155_v15, %v16162_v27  ;;  %v11282_v38 = vcombine.low %v2299_v46, %v2307_v57  ;;  %v1271_v42 = vcombine.high %v1263_v49, %v1263_v49  ;;  %v4365_v53 = vcombine.high %v19235_v20, %v19235_v20  ;;  %v19348_v27 = vld [vmem:[%s28419_s0 + $0x50] sm:$0xff] }
  0x50   :  { %19949 = vrot.lane.b32.xlu1 %v19948_v32, %s21283_s21  ;;  %v16180_v16 = vcombine.low %v16172_v58, %v21839_v60  ;;  %v10318_v24 = vcombine.low %v1270_v34, %v21629_v52  ;;  %v4372_v33 = vrot.slane %v19235_v20, %v21405_v31  ;;  %v4381_v61 = vcombine.high %v19402_v36, %v19402_v36  ;;  %v19179_v52 = vld [vmem:[%s28419_s0 + $0x38] sm:$0x3f] }
  0x51   :  { %v11296_v63 = vrot.slane %v11282_v38, %v21405_v31  ;;  %v11306_v1 = vrot.slane %v11298_v35, %v21405_v31  ;;  %v10302_v54 = vcombine.low %v1263_v49, %v1271_v42  ;;  %v4379_v12 = vrot.slane %v4365_v53, %v21405_v31 }
  0x52   :  { %v19943_v40 = vpack.i.bf16 %v16180_v16, %v16163_v4  ;;  %v10326_v44 = vrot.slane %v10318_v24, %v21405_v31  ;;  %v4380_v6 = vcombine.high %v4372_v33, %v4372_v33  ;;  %v21852_v5 = vrot.slane %v4381_v61, %v21405_v31 }
  0x53   :  { %v11297_v36 = vcombine.low %v21611_v30, %v11296_v63  ;;  %v11314_v25 = vcombine.low %v11306_v1, %v21792_v21  ;;  %v10316_v51 = vrot.slane %v10302_v54, %v21405_v31  ;;  %v13241_v22 = vcombine.low %v21795_v26, %v21803_v23  ;;  %v19347_v21 = vld [vmem:[%s28419_s0 + $0x48] sm:$0x3f] }
  0x54   :  { %19944 = vrot.lane.b32.xlu0 %v19943_v40, %s21284_s24  ;;  %v10334_v11 = vcombine.low %v10326_v44, %v16155_v15  ;;  %v13242_v3 = vcombine.low %v4372_v33, %v4380_v6  ;;  %v13258_v43 = vcombine.low %v4379_v12, %v21807_v8  ;;  %v13259_v45 = vcombine.low %v7472_v7, %v21852_v5 }
  0x55   :  { %v19958_v47 = vpack.i.bf16 %v11314_v25, %v11297_v36  ;;  %v10317_v19 = vcombine.low %v21638_v55, %v10316_v51  ;;  %v13249_v30 = vrot.slane %v13241_v22, %v21405_v31  ;;  %v3329_v18 = vcombine.high %v19179_v52, %v19179_v52  ;;  %v19459_v25 = vld [vmem:[%s28419_s0 + $0x4a] sm:$0x3f] }
  0x56   :  { %v13256_v26 = vrot.slane %v13242_v3, %v21405_v31  ;;  %v13266_v48 = vrot.slane %v13258_v43, %v21405_v31  ;;  %v13273_v15 = vrot.slane %v13259_v45, %v21405_v31  ;;  %v3336_v8 = vrot.slane %v19179_v52, %v21405_v31  ;;  %v19460_v43 = vld [vmem:[%s28419_s0 + $0x52] sm:$0xff] }
  0x57   :  { %19959 = vrot.lane.b32.xlu1 %v19958_v47, %s21280_s12  ;;  %v19953_v7 = vpack.i.bf16 %v10334_v11, %v10317_v19  ;;  %v3343_v55 = vrot.slane %v3329_v18, %v21405_v31  ;;  %v3345_v50 = vcombine.high %v21708_v29, %v21708_v29  ;;  %v12261_v46 = vcombine.low %v21702_v62, %v21714_v17  ;;  %v19291_v62 = vld [vmem:[%s28419_s0 + $0x3a] sm:$0x3f] }
  0x58   :  { %v13257_v37 = vcombine.low %v13249_v30, %v13256_v26  ;;  %v13274_v39 = vcombine.low %v13266_v48, %v13273_v15  ;;  %v3344_v14 = vcombine.high %v3336_v8, %v3336_v8  ;;  %v6438_v20 = vcombine.high %v19347_v21, %v19347_v21 }
  0x59   :  { %19954 = vrot.lane.b32.xlu0 %v19953_v7, %s21278_s10  ;;  %v3359_v32 = vrot.slane %v3345_v50, %v21405_v31  ;;  %v12269_v0 = vrot.slane %v12261_v46, %v21405_v31  ;;  %v12278_v57 = vcombine.low %v3343_v55, %v21725_v10  ;;  %v6445_v29 = vrot.slane %v19347_v21, %v21405_v31  ;;  %v19403_v46 = vld [vmem:[%s28419_s0 + $0x49] sm:$0x3f] }
  0x5a   :  { %v19968_v17 = vpack.i.bf16 %v13274_v39, %v13257_v37  ;;  %v12262_v49 = vcombine.low %v3336_v8, %v3344_v14  ;;  %v6452_v4 = vrot.slane %v6438_v20, %v21405_v31  ;;  %v6454_v58 = vcombine.high %v19348_v27, %v19348_v27 }
  0x5b   :  { %v12279_v34 = vcombine.low %v21732_v9, %v3359_v32  ;;  %v12286_v38 = vrot.slane %v12278_v57, %v21405_v31  ;;  %v21894_v35 = vcombine.high %v3359_v32, %v3359_v32  ;;  %v6453_v42 = vcombine.high %v6445_v29, %v6445_v29 }
  0x5c   :  { %19969 = vrot.lane.b32.xlu1 %v19968_v17, %s21279_s11  ;;  %v12276_v10 = vrot.slane %v12262_v49, %v21405_v31  ;;  %v21899_v53 = vrot.slane %v19348_v27, %v21405_v31  ;;  %v21902_v16 = vrot.slane %v6454_v58, %v21405_v31  ;;  %v5401_v24 = vcombine.high %v19291_v62, %v19291_v62 }
  0x5d   :  { %v12293_v33 = vrot.slane %v12279_v34, %v21405_v31  ;;  %v15201_v9 = vcombine.low %v3359_v32, %v21894_v35  ;;  %v15202_v61 = vcombine.low %v6445_v29, %v6453_v42  ;;  %v5408_v63 = vrot.slane %v19291_v62, %v21405_v31  ;;  %v2104_v42 = vld [vmem:[%s28419_s0 + $0x3a] sm:$0x3f] }
  0x5e   :  { %v12277_v1 = vcombine.low %v12269_v0, %v12276_v10  ;;  %v21909_v54 = vcombine.high %v21899_v53, %v21899_v53  ;;  %v15218_v12 = vcombine.low %v6452_v4, %v21899_v53  ;;  %v5415_v40 = vrot.slane %v5401_v24, %v21405_v31 }
  0x5f   :  { %v12294_v44 = vcombine.low %v12286_v38, %v12293_v33  ;;  %v15209_v6 = vrot.slane %v15201_v9, %v21405_v31  ;;  %v15216_v52 = vrot.slane %v15202_v61, %v21405_v31  ;;  %v5416_v36 = vcombine.high %v5408_v63, %v5408_v63 }
  0x60   :  { %v15219_v51 = vcombine.low %v21909_v54, %v21902_v16  ;;  %v15226_v22 = vrot.slane %v15218_v12, %v21405_v31  ;;  %v5417_v11 = vcombine.high %v21754_v56, %v21754_v56  ;;  %v14221_v3 = vcombine.low %v21760_v28, %v21768_v59 }
  0x61   :  { %v19963_v45 = vpack.i.bf16 %v12294_v44, %v12277_v1  ;;  %v15217_v47 = vcombine.low %v15209_v6, %v15216_v52  ;;  %v14222_v19 = vcombine.low %v5408_v63, %v5416_v36  ;;  %v14238_v30 = vcombine.low %v5415_v40, %v21774_v41 }
  0x62   :  { %v15233_v18 = vrot.slane %v15219_v51, %v21405_v31  ;;  %v5431_v21 = vrot.slane %v5417_v11, %v21405_v31  ;;  %v14229_v26 = vrot.slane %v14221_v3, %v21405_v31  ;;  %v8510_v48 = vcombine.high %v19459_v25, %v19459_v25  ;;  %v1068_v11 = vld [vmem:[%s28419_s0 + $0x39] sm:$0x3f] }
  0x63   :  { %19964 = vrot.lane.b32.xlu0 %v19963_v45, %s21277_s9  ;;  %v14236_v56 = vrot.slane %v14222_v19, %v21405_v31  ;;  %v14246_v28 = vrot.slane %v14238_v30, %v21405_v31  ;;  %v8517_v15 = vrot.slane %v19459_v25, %v21405_v31  ;;  %v8526_v8 = vcombine.high %v19460_v43, %v19460_v43 }
  0x64   :  { %v15234_v7 = vcombine.low %v15226_v22, %v15233_v18  ;;  %v14239_v55 = vcombine.low %v21785_v2, %v5431_v21  ;;  %v21937_v41 = vcombine.high %v5431_v21, %v5431_v21  ;;  %v8524_v50 = vrot.slane %v8510_v48, %v21405_v31  ;;  %v19404_v2 = vld [vmem:[%s28419_s0 + $0x51] sm:$0xff] }
  0x65   :  { %v14237_v27 = vcombine.low %v14229_v26, %v14236_v56  ;;  %v8525_v37 = vcombine.high %v8517_v15, %v8517_v15  ;;  %v21944_v39 = vrot.slane %v19460_v43, %v21405_v31  ;;  %v21947_v14 = vrot.slane %v8526_v8, %v21405_v31  ;;  %v19237_v8 = vld [vmem:[%s28419_s0 + $0x49] sm:$0x3f] }
  0x66   :  { %v19978_v20 = vpack.i.bf16 %v15234_v7, %v15217_v47  ;;  %v14253_v32 = vrot.slane %v14239_v55, %v21405_v31  ;;  %v17161_v0 = vcombine.low %v5431_v21, %v21937_v41  ;;  %v21956_v57 = vcombine.high %v21852_v5, %v21852_v5 }
  0x67   :  { %v21960_v29 = vcombine.high %v21944_v39, %v21944_v39  ;;  %v17162_v62 = vcombine.low %v8517_v15, %v8525_v37  ;;  %v17178_v17 = vcombine.low %v8524_v50, %v21944_v39  ;;  %v7474_v49 = vcombine.high %v19403_v46, %v19403_v46 }
  0x68   :  { %19979 = vrot.lane.b32.xlu1 %v19978_v20, %s21281_s13  ;;  %v14254_v4 = vcombine.low %v14246_v28, %v14253_v32  ;;  %v17169_v58 = vrot.slane %v17161_v0, %v21405_v31  ;;  %v7481_v34 = vrot.slane %v19403_v46, %v21405_v31  ;;  %v7490_v38 = vcombine.high %v19404_v2, %v19404_v2 }
  0x69   :  { %v17176_v10 = vrot.slane %v17162_v62, %v21405_v31  ;;  %v17179_v24 = vcombine.low %v21960_v29, %v21947_v14  ;;  %v17186_v33 = vrot.slane %v17178_v17, %v21405_v31  ;;  %v7488_v9 = vrot.slane %v7474_v49, %v21405_v31 }
  0x6a   :  { %v19973_v61 = vpack.i.bf16 %v14254_v4, %v14237_v27  ;;  %v7489_v63 = vcombine.high %v7481_v34, %v7481_v34  ;;  %v21975_v1 = vrot.slane %v19404_v2, %v21405_v31  ;;  %v7504_v12 = vrot.slane %v7490_v38, %v21405_v31 }
  0x6b   :  { %v17177_v40 = vcombine.low %v17169_v58, %v17176_v10  ;;  %v21979_v44 = vrot.slane %v17179_v24, %v21405_v31  ;;  %v16181_v6 = vcombine.low %v21852_v5, %v21956_v57  ;;  %v2325_v52 = vcombine.high %v2104_v42, %v2104_v42 }
  0x6c   :  { %19974 = vrot.lane.b32.xlu0 %v19973_v61, %s21282_s18  ;;  %v7505_v36 = vcombine.high %v21975_v1, %v21975_v1  ;;  %v16182_v25 = vcombine.low %v7481_v34, %v7489_v63  ;;  %v16198_v51 = vcombine.low %v7488_v9, %v21975_v1  ;;  %v2332_v22 = vrot.slane %v2104_v42, %v21405_v31  ;;  %v19181_v34 = vld [vmem:[%s28419_s0 + $0x48] sm:$0x3f] }
  0x6d   :  { %v17194_v3 = vcombine.low %v17186_v33, %v21979_v44  ;;  %v16189_v43 = vrot.slane %v16181_v6, %v21405_v31  ;;  %v2339_v5 = vrot.slane %v2325_v52, %v21405_v31  ;;  %v1289_v26 = vcombine.high %v1068_v11, %v1068_v11 }
  0x6e   :  { %v16196_v45 = vrot.slane %v16182_v25, %v21405_v31  ;;  %v16199_v47 = vcombine.low %v7505_v36, %v7504_v12  ;;  %v16206_v19 = vrot.slane %v16198_v51, %v21405_v31  ;;  %v2340_v30 = vcombine.high %v2332_v22, %v2332_v22 }
  0x6f   :  { %v19988_v18 = vpack.i.bf16 %v17194_v3, %v17177_v40  ;;  %v11315_v21 = vcombine.low %v21768_v59, %v2332_v22  ;;  %v1296_v15 = vrot.slane %v1068_v11, %v21405_v31  ;;  %v1303_v55 = vrot.slane %v1289_v26, %v21405_v31 }
  0x70   :  { %v16197_v48 = vcombine.low %v16189_v43, %v16196_v45  ;;  %v21998_v56 = vrot.slane %v16199_v47, %v21405_v31  ;;  %v11316_v28 = vcombine.low %v2340_v30, %v2339_v5  ;;  %v11348_v37 = vcombine.low %v21815_v13, %v17169_v58  ;;  %v19350_v5 = vld [vmem:[%s28419_s0 + $0x60] sm:$0xff] }
  0x71   :  { %19989 = vrot.lane.b32.xlu1 %v19988_v18, %s21283_s21  ;;  %v11323_v7 = vrot.slane %v11315_v21, %v21405_v31  ;;  %v1304_v46 = vcombine.high %v1296_v15, %v1296_v15  ;;  %v10335_v27 = vcombine.low %v21803_v23, %v1296_v15  ;;  %v4398_v2 = vcombine.high %v19237_v8, %v19237_v8 }
  0x72   :  { %v16214_v59 = vcombine.low %v16206_v19, %v21998_v56  ;;  %v11330_v50 = vrot.slane %v11316_v28, %v21405_v31  ;;  %v4405_v17 = vrot.slane %v19237_v8, %v21405_v31  ;;  %v22014_v4 = vcombine.high %v7504_v12, %v7504_v12 }
  0x73   :  { %v10336_v0 = vcombine.low %v1304_v46, %v1303_v55  ;;  %v10343_v62 = vrot.slane %v10335_v27, %v21405_v31  ;;  %v4412_v49 = vrot.slane %v4398_v2, %v21405_v31  ;;  %v13292_v58 = vcombine.low %v21975_v1, %v7505_v36 }
  0x74   :  { %v19983_v20 = vpack.i.bf16 %v16214_v59, %v16197_v48  ;;  %v11331_v32 = vcombine.low %v11323_v7, %v11330_v50  ;;  %v10368_v38 = vcombine.low %v21839_v60, %v16189_v43  ;;  %v4413_v42 = vcombine.high %v4405_v17, %v4405_v17  ;;  %v19293_v48 = vld [vmem:[%s28419_s0 + $0x4a] sm:$0x3f] }
  0x75   :  { %v10350_v13 = vrot.slane %v10336_v0, %v21405_v31  ;;  %v13275_v10 = vcombine.low %v21956_v57, %v4405_v17  ;;  %v13293_v24 = vcombine.low %v7504_v12, %v22014_v4  ;;  %v13300_v9 = vrot.slane %v13292_v58, %v21405_v31  ;;  %v19349_v57 = vld [vmem:[%s28419_s0 + $0x58] sm:$0x3f] }
  0x76   :  { %19984 = vrot.lane.b32.xlu0 %v19983_v20, %s21284_s24  ;;  %v19998_v23 = vpack.i.bf16 %v11348_v37, %v11331_v32  ;;  %v3362_v61 = vcombine.high %v19181_v34, %v19181_v34  ;;  %v3369_v63 = vrot.slane %v19181_v34, %v21405_v31  ;;  %v13276_v40 = vcombine.low %v4413_v42, %v4412_v49 }
  0x77   :  { %v10351_v33 = vcombine.low %v10343_v62, %v10350_v13  ;;  %v13283_v6 = vrot.slane %v13275_v10, %v21405_v31  ;;  %v13307_v52 = vrot.slane %v13293_v24, %v21405_v31  ;;  %v3394_v60 = vcombine.high %v21902_v16, %v21902_v16  ;;  %v19461_v13 = vld [vmem:[%s28419_s0 + $0x5a] sm:$0x3f] }
  0x78   :  { %19999 = vrot.lane.b32.xlu1 %v19998_v23, %s21280_s12  ;;  %v3376_v36 = vrot.slane %v3362_v61, %v21405_v31  ;;  %v3377_v25 = vcombine.high %v3369_v63, %v3369_v63  ;;  %v12295_v51 = vcombine.low %v21894_v35, %v3369_v63  ;;  %v13290_v22 = vrot.slane %v13276_v40, %v21405_v31 }
  0x79   :  { %v19993_v12 = vpack.i.bf16 %v10368_v38, %v10351_v33  ;;  %v13308_v11 = vcombine.low %v13300_v9, %v13307_v52  ;;  %v12312_v3 = vcombine.low %v21899_v53, %v21909_v54  ;;  %v12313_v43 = vcombine.low %v21902_v16, %v3394_v60 }
  0x7a   :  { %v12296_v45 = vcombine.low %v3377_v25, %v3376_v36  ;;  %v12303_v47 = vrot.slane %v12295_v51, %v21405_v31  ;;  %v6471_v19 = vcombine.high %v19349_v57, %v19349_v57  ;;  %v13291_v30 = vcombine.low %v13283_v6, %v13290_v22 }
  0x7b   :  { %19994 = vrot.lane.b32.xlu0 %v19993_v12, %s21278_s10  ;;  %v12320_v35 = vrot.slane %v12312_v3, %v21405_v31  ;;  %v12327_v18 = vrot.slane %v12313_v43, %v21405_v31  ;;  %v6478_v21 = vrot.slane %v19349_v57, %v21405_v31  ;;  %v6487_v54 = vcombine.high %v19350_v5, %v19350_v5  ;;  %v19405_v57 = vld [vmem:[%s28419_s0 + $0x59] sm:$0x3f]  ;;  %v19406_v43 = vld [vmem:[%s28419_s0 + $0x61] sm:$0xff] }
  0x7c   :  { %v12310_v53 = vrot.slane %v12296_v45, %v21405_v31  ;;  %v6485_v16 = vrot.slane %v6471_v19, %v21405_v31  ;;  %v22052_v26 = vrot.slane %v19350_v5, %v21405_v31  ;;  %v20008_v28 = vpack.i.bf16 %v13308_v11, %v13291_v30 }
  0x7d   :  { %v12328_v15 = vcombine.low %v12320_v35, %v12327_v18  ;;  %v6486_v8 = vcombine.high %v6478_v21, %v6478_v21  ;;  %v15235_v7 = vcombine.low %v3394_v60, %v6478_v21  ;;  %v22058_v59 = vrot.slane %v6487_v54, %v21405_v31 }
  0x7e   :  { %v12311_v55 = vcombine.low %v12303_v47, %v12310_v53  ;;  %v22062_v50 = vcombine.high %v22052_v26, %v22052_v26  ;;  %20009 = vrot.lane.b32.xlu1 %v20008_v28, %s21279_s11  ;;  %v5434_v37 = vcombine.high %v19293_v48, %v19293_v48  ;;  %v5441_v2 = vrot.slane %v19293_v48, %v21405_v31  ;;  %v2106_v53 = vld [vmem:[%s28419_s0 + $0x4a] sm:$0x3f] }
  0x7f   :  { %v15236_v46 = vcombine.low %v6486_v8, %v6485_v16  ;;  %v15243_v27 = vrot.slane %v15235_v7, %v21405_v31  ;;  %v22069_v32 = vcombine.high %v22058_v59, %v22058_v59  ;;  %v22075_v62 = vcombine.high %v21947_v14, %v21947_v14 }
  0x80   :  { %v20003_v20 = vpack.i.bf16 %v12328_v15, %v12311_v55  ;;  %v15252_v0 = vcombine.low %v22052_v26, %v22062_v50  ;;  %v5448_v49 = vrot.slane %v5434_v37, %v21405_v31  ;;  %v5449_v34 = vcombine.high %v5441_v2, %v5441_v2 }
  0x81   :  { %v15250_v17 = vrot.slane %v15236_v46, %v21405_v31  ;;  %v14255_v23 = vcombine.low %v21937_v41, %v5441_v2  ;;  %v15253_v58 = vcombine.low %v22058_v59, %v22069_v32  ;;  %v14272_v42 = vcombine.low %v21944_v39, %v21960_v29  ;;  %v19462_v41 = vld [vmem:[%s28419_s0 + $0x62] sm:$0xff]  ;;  %v22148_v2 = vld [vmem:[%s28419_s0 + $0x5a] sm:$0x3f] }
  0x82   :  { %20004 = vrot.lane.b32.xlu0 %v20003_v20, %s21277_s9  ;;  %v15260_v38 = vrot.slane %v15252_v0, %v21405_v31  ;;  %v14273_v10 = vcombine.low %v21947_v14, %v22075_v62  ;;  %v14256_v33 = vcombine.low %v5449_v34, %v5448_v49  ;;  %v8543_v6 = vcombine.high %v19461_v13, %v19461_v13 }
  0x83   :  { %v15251_v24 = vcombine.low %v15243_v27, %v15250_v17  ;;  %v14263_v9 = vrot.slane %v14255_v23, %v21405_v31  ;;  %v15267_v61 = vrot.slane %v15253_v58, %v21405_v31  ;;  %v14280_v63 = vrot.slane %v14272_v42, %v21405_v31  ;;  %v1070_v23 = vld [vmem:[%s28419_s0 + $0x49] sm:$0x3f] }
  0x84   :  { %v14287_v40 = vrot.slane %v14273_v10, %v21405_v31  ;;  %v14270_v29 = vrot.slane %v14256_v33, %v21405_v31  ;;  %v8550_v52 = vrot.slane %v19461_v13, %v21405_v31  ;;  %v8559_v14 = vcombine.high %v19462_v41, %v19462_v41 }
  0x85   :  { %v22101_v60 = vrot.slane %v19462_v41, %v21405_v31  ;;  %v15268_v12 = vcombine.low %v15260_v38, %v15267_v61  ;;  %v8557_v25 = vrot.slane %v8543_v6, %v21405_v31  ;;  %v7507_v47 = vcombine.high %v19405_v57, %v19405_v57 }
  0x86   :  { %v14288_v36 = vcombine.low %v14280_v63, %v14287_v40  ;;  %v14271_v51 = vcombine.low %v14263_v9, %v14270_v29  ;;  %v8558_v22 = vcombine.high %v8550_v52, %v8550_v52  ;;  %v22108_v11 = vrot.slane %v8559_v14, %v21405_v31  ;;  %v22179_v40 = vld [vmem:[%s28419_s0 + $0x59] sm:$0x3f] }
  0x87   :  { %v22112_v3 = vcombine.high %v22101_v60, %v22101_v60  ;;  %v20018_v5 = vpack.i.bf16 %v15268_v12, %v15251_v24  ;;  %v17195_v45 = vcombine.low %v22075_v62, %v8550_v52  ;;  %v7514_v19 = vrot.slane %v19405_v57, %v21405_v31  ;;  %v19239_v29 = vld [vmem:[%s28419_s0 + $0x59] sm:$0x3f] }
  0x88   :  { %v20013_v30 = vpack.i.bf16 %v14288_v36, %v14271_v51  ;;  %v22121_v35 = vcombine.high %v22108_v11, %v22108_v11  ;;  %v17196_v18 = vcombine.low %v8558_v22, %v8557_v25  ;;  %v7521_v54 = vrot.slane %v7507_v47, %v21405_v31 }
  0x89   :  { %v17212_v21 = vcombine.low %v22101_v60, %v22112_v3  ;;  %20019 = vrot.lane.b32.xlu1 %v20018_v5, %s21281_s13  ;;  %v17203_v16 = vrot.slane %v17195_v45, %v21405_v31  ;;  %v7522_v48 = vcombine.high %v7514_v19, %v7514_v19  ;;  %v7523_v28 = vcombine.high %v19406_v43, %v19406_v43 }
  0x8a   :  { %20014 = vrot.lane.b32.xlu0 %v20013_v30, %s21282_s18  ;;  %v17210_v15 = vrot.slane %v17196_v18, %v21405_v31  ;;  %v17213_v8 = vcombine.low %v22108_v11, %v22121_v35  ;;  %v22139_v55 = vrot.slane %v19406_v43, %v21405_v31  ;;  %v16215_v27 = vcombine.low %v22014_v4, %v7514_v19  ;;  %v22208_v30 = vld [vmem:[%s28419_s0 + $0x69] sm:$0x3f] }
  0x8b   :  { %v22136_v7 = vrot.slane %v17212_v21, %v21405_v31  ;;  %v22142_v46 = vrot.slane %v7523_v28, %v21405_v31  ;;  %v16216_v37 = vcombine.low %v7522_v48, %v7521_v54  ;;  %v2358_v20 = vcombine.high %v2106_v53, %v2106_v53  ;;  %v19183_v48 = vld [vmem:[%s28419_s0 + $0x58] sm:$0x3f] }
  0x8c   :  { %v17211_v0 = vcombine.low %v17203_v16, %v17210_v15  ;;  %v22151_v17 = vrot.slane %v17213_v8, %v21405_v31  ;;  %v22155_v49 = vcombine.high %v22139_v55, %v22139_v55  ;;  %v2365_v34 = vrot.slane %v2106_v53, %v21405_v31 }
  0x8d   :  { %v7539_v13 = vcombine.high %v22142_v46, %v22142_v46  ;;  %v16223_v58 = vrot.slane %v16215_v27, %v21405_v31  ;;  %v16230_v38 = vrot.slane %v16216_v37, %v21405_v31  ;;  %v2372_v42 = vrot.slane %v2358_v20, %v21405_v31 }
  0x8e   :  { %v17228_v10 = vcombine.low %v22136_v7, %v22151_v17  ;;  %v16232_v41 = vcombine.low %v22139_v55, %v22155_v49  ;;  %v2373_v24 = vcombine.high %v2365_v34, %v2365_v34  ;;  %v22172_v33 = vrot.slane %v22148_v2, %v21405_v31 }
  0x8f   :  { %v16231_v9 = vcombine.low %v16223_v58, %v16230_v38  ;;  %v16233_v61 = vcombine.low %v22142_v46, %v7539_v13  ;;  %v11350_v63 = vcombine.low %v2372_v42, %v21944_v39  ;;  %v1322_v6 = vcombine.high %v1070_v23, %v1070_v23 }
  0x90   :  { %v20028_v52 = vpack.i.bf16 %v17228_v10, %v17211_v0  ;;  %v22185_v14 = vrot.slane %v16232_v41, %v21405_v31  ;;  %v11349_v57 = vcombine.low %v2365_v34, %v2373_v24  ;;  %v11367_v12 = vcombine.low %v22075_v62, %v22172_v33 }
  0x91   :  { %v22190_v39 = vrot.slane %v16233_v61, %v21405_v31  ;;  %v11364_v36 = vrot.slane %v11350_v63, %v21405_v31  ;;  %v1329_v25 = vrot.slane %v1070_v23, %v21405_v31  ;;  %v1336_v51 = vrot.slane %v1322_v6, %v21405_v31  ;;  %v22232_v23 = vld [vmem:[%s28419_s0 + $0x68] sm:$0x3f]  ;;  %v19352_v6 = vld [vmem:[%s28419_s0 + $0x70] sm:$0xff] }
  0x92   :  { %20029 = vrot.lane.b32.xlu1 %v20028_v52, %s21283_s21  ;;  %v11357_v22 = vrot.slane %v11349_v57, %v21405_v31  ;;  %v11381_v43 = vrot.slane %v11367_v12, %v21405_v31  ;;  %v22200_v5 = vrot.slane %v22179_v40, %v21405_v31  ;;  %v4431_v62 = vcombine.high %v19239_v29, %v19239_v29 }
  0x93   :  { %v16248_v45 = vcombine.low %v22185_v14, %v22190_v39  ;;  %v1337_v47 = vcombine.high %v1329_v25, %v1329_v25  ;;  %v10370_v19 = vcombine.low %v1336_v51, %v21975_v1  ;;  %v4438_v18 = vrot.slane %v19239_v29, %v21405_v31 }
  0x94   :  { %v11365_v21 = vcombine.low %v11357_v22, %v11364_v36  ;;  %v11382_v53 = vcombine.low %v21979_v44, %v11381_v43  ;;  %v10387_v16 = vcombine.low %v22014_v4, %v22200_v5  ;;  %v4445_v54 = vrot.slane %v4431_v62, %v21405_v31 }
  0x95   :  { %v20023_v1 = vpack.i.bf16 %v16248_v45, %v16231_v9  ;;  %v10369_v28 = vcombine.low %v1329_v25, %v1337_v47  ;;  %v10384_v15 = vrot.slane %v10370_v19, %v21405_v31  ;;  %v4446_v8 = vcombine.high %v4438_v18, %v4438_v18 }
  0x96   :  { %v20038_v27 = vpack.i.bf16 %v11382_v53, %v11365_v21  ;;  %v10401_v37 = vrot.slane %v10387_v16, %v21405_v31  ;;  %v22222_v44 = vrot.slane %v22208_v30, %v21405_v31  ;;  %v13310_v4 = vcombine.low %v4445_v54, %v22139_v55  ;;  %v22286_v54 = vld [vmem:[%s28419_s0 + $0x6a] sm:$0x3f] }
  0x97   :  { %20024 = vrot.lane.b32.xlu0 %v20023_v1, %s21284_s24  ;;  %v10377_v20 = vrot.slane %v10369_v28, %v21405_v31  ;;  %v13309_v0 = vcombine.low %v4438_v18, %v4446_v8  ;;  %v13326_v34 = vcombine.low %v22155_v49, %v22142_v46  ;;  %v3395_v58 = vcombine.high %v19183_v48, %v19183_v48  ;;  %v19351_v46 = vld [vmem:[%s28419_s0 + $0x68] sm:$0x3f] }
  0x98   :  { %20039 = vrot.lane.b32.xlu1 %v20038_v27, %s21280_s12  ;;  %v10402_v38 = vcombine.low %v21998_v56, %v10401_v37  ;;  %v13324_v55 = vrot.slane %v13310_v4, %v21405_v31  ;;  %v13327_v42 = vcombine.low %v7539_v13, %v22222_v44  ;;  %v3402_v10 = vrot.slane %v19183_v48, %v21405_v31 }
  0x99   :  { %v10385_v49 = vcombine.low %v10377_v20, %v10384_v15  ;;  %v13317_v41 = vrot.slane %v13309_v0, %v21405_v31  ;;  %v13334_v24 = vrot.slane %v13326_v34, %v21405_v31  ;;  %v3409_v9 = vrot.slane %v3395_v58, %v21405_v31  ;;  %v19463_v0 = vld [vmem:[%s28419_s0 + $0x6a] sm:$0x3f] }
  0x9a   :  { %v13341_v61 = vrot.slane %v13327_v42, %v21405_v31  ;;  %v3410_v56 = vcombine.high %v3402_v10, %v3402_v10  ;;  %v22248_v63 = vrot.slane %v22232_v23, %v21405_v31  ;;  %v12346_v13 = vcombine.low %v22062_v50, %v22058_v59  ;;  %v22262_v59 = vld [vmem:[%s28419_s0 + $0x78] sm:$0x3f] }
  0x9b   :  { %v20033_v29 = vpack.i.bf16 %v10402_v38, %v10385_v49  ;;  %v13325_v52 = vcombine.low %v13317_v41, %v13324_v55  ;;  %v12330_v57 = vcombine.low %v3409_v9, %v22052_v26  ;;  %v6504_v12 = vcombine.high %v19351_v46, %v19351_v46  ;;  %v19295_v50 = vld [vmem:[%s28419_s0 + $0x5a] sm:$0x3f] }
  0x9c   :  { %v13342_v36 = vcombine.low %v13334_v24, %v13341_v61  ;;  %v12329_v25 = vcombine.low %v3402_v10, %v3410_v56  ;;  %v12347_v51 = vcombine.low %v22069_v32, %v22248_v63  ;;  %v12354_v22 = vrot.slane %v12346_v13, %v21405_v31  ;;  %v19464_v61 = vld [vmem:[%s28419_s0 + $0x72] sm:$0xff] }
  0x9d   :  { %20034 = vrot.lane.b32.xlu0 %v20033_v29, %s21278_s10  ;;  %v12344_v26 = vrot.slane %v12330_v57, %v21405_v31  ;;  %v6511_v43 = vrot.slane %v19351_v46, %v21405_v31  ;;  %v6518_v62 = vrot.slane %v6504_v12, %v21405_v31  ;;  %v6520_v32 = vcombine.high %v19352_v6, %v19352_v6 }
  0x9e   :  { %v20048_v45 = vpack.i.bf16 %v13342_v36, %v13325_v52  ;;  %v12337_v47 = vrot.slane %v12329_v25, %v21405_v31  ;;  %v12361_v19 = vrot.slane %v12347_v51, %v21405_v31  ;;  %v22274_v18 = vrot.slane %v19352_v6, %v21405_v31  ;;  %v22328_v52 = vld [vmem:[%s28419_s0 + $0x7a] sm:$0x3f] }
  0x9f   :  { %v6519_v21 = vcombine.high %v6511_v43, %v6511_v43  ;;  %v22277_v53 = vrot.slane %v6520_v32, %v21405_v31  ;;  %v22281_v16 = vrot.slane %v22262_v59, %v21405_v31  ;;  %v5467_v48 = vcombine.high %v19295_v50, %v19295_v50 }
  0xa0   :  { %20049 = vrot.lane.b32.xlu1 %v20048_v45, %s21279_s11  ;;  %v12345_v1 = vcombine.low %v12337_v47, %v12344_v26  ;;  %v12362_v28 = vcombine.low %v12354_v22, %v12361_v19  ;;  %v22291_v15 = vcombine.high %v22274_v18, %v22274_v18  ;;  %v15270_v8 = vcombine.low %v6518_v62, %v22274_v18  ;;  %v19408_v62 = vld [vmem:[%s28419_s0 + $0x71] sm:$0xff] }
  0xa1   :  { %v22296_v27 = vcombine.high %v22277_v53, %v22277_v53  ;;  %v15269_v37 = vcombine.low %v6511_v43, %v6519_v21  ;;  %v5474_v4 = vrot.slane %v19295_v50, %v21405_v31  ;;  %v5481_v20 = vrot.slane %v5467_v48, %v21405_v31 }
  0xa2   :  { %v20043_v34 = vpack.i.bf16 %v12362_v28, %v12345_v1  ;;  %v15284_v58 = vrot.slane %v15270_v8, %v21405_v31  ;;  %v15286_v38 = vcombine.low %v22291_v15, %v22277_v53  ;;  %v22308_v55 = vrot.slane %v22286_v54, %v21405_v31  ;;  %v22359_v28 = vld [vmem:[%s28419_s0 + $0x79] sm:$0x3f] }
  0xa3   :  { %v15277_v42 = vrot.slane %v15269_v37, %v21405_v31  ;;  %v15287_v10 = vcombine.low %v22296_v27, %v22281_v16  ;;  %v5482_v46 = vcombine.high %v5474_v4, %v5474_v4  ;;  %v14290_v49 = vcombine.low %v5481_v20, %v22101_v60 }
  0xa4   :  { %20044 = vrot.lane.b32.xlu0 %v20043_v34, %s21277_s9  ;;  %v15294_v41 = vrot.slane %v15286_v38, %v21405_v31  ;;  %v14306_v24 = vcombine.low %v22112_v3, %v22108_v11  ;;  %v14307_v9 = vcombine.low %v22121_v35, %v22308_v55  ;;  %v8576_v56 = vcombine.high %v19463_v0, %v19463_v0  ;;  %v19407_v11 = vld [vmem:[%s28419_s0 + $0x69] sm:$0x3f] }
  0xa5   :  { %v15285_v13 = vcombine.low %v15277_v42, %v15284_v58  ;;  %v15301_v6 = vrot.slane %v15287_v10, %v21405_v31  ;;  %v14289_v29 = vcombine.low %v5474_v4, %v5482_v46  ;;  %v14304_v60 = vrot.slane %v14290_v49, %v21405_v31 }
  0xa6   :  { %v14314_v3 = vrot.slane %v14306_v24, %v21405_v31  ;;  %v14321_v35 = vrot.slane %v14307_v9, %v21405_v31  ;;  %v8583_v57 = vrot.slane %v19463_v0, %v21405_v31  ;;  %v8590_v12 = vrot.slane %v8576_v56, %v21405_v31  ;;  %v22389_v9 = vld [vmem:[%s28419_s0 + $0x6a] sm:$0x3f] }
  0xa7   :  { %v15302_v36 = vcombine.low %v15294_v41, %v15301_v6  ;;  %v14297_v25 = vrot.slane %v14289_v29, %v21405_v31  ;;  %v8592_v51 = vcombine.high %v19464_v61, %v19464_v61  ;;  %v22339_v22 = vrot.slane %v19464_v61, %v21405_v31 }
  0xa8   :  { %v14322_v50 = vcombine.low %v14314_v3, %v14321_v35  ;;  %v8591_v26 = vcombine.high %v8583_v57, %v8583_v57  ;;  %v22343_v43 = vrot.slane %v22328_v52, %v21405_v31  ;;  %v7540_v32 = vcombine.high %v19407_v11, %v19407_v11 }
  0xa9   :  { %v20058_v45 = vpack.i.bf16 %v15302_v36, %v15285_v13  ;;  %v14305_v47 = vcombine.low %v14297_v25, %v14304_v60  ;;  %v22349_v19 = vrot.slane %v8592_v51, %v21405_v31  ;;  %v22353_v21 = vcombine.high %v22339_v22, %v22339_v22 }
  0xaa   :  { %v17229_v48 = vcombine.low %v8583_v57, %v8591_v26  ;;  %v17230_v1 = vcombine.low %v8590_v12, %v22339_v22  ;;  %v7547_v8 = vrot.slane %v19407_v11, %v21405_v31  ;;  %v7554_v37 = vrot.slane %v7540_v32, %v21405_v31 }
  0xab   :  { %20059 = vrot.lane.b32.xlu1 %v20058_v45, %s21281_s13  ;;  %v20053_v4 = vpack.i.bf16 %v14322_v50, %v14305_v47  ;;  %v22366_v20 = vcombine.high %v22349_v19, %v22349_v19  ;;  %v17246_v0 = vcombine.low %v22353_v21, %v22349_v19  ;;  %v7556_v34 = vcombine.high %v19408_v62, %v19408_v62  ;;  %v22424_v47 = vld [vmem:[%s28419_s0 + $0x79] sm:$0x3f] }
  0xac   :  { %v17237_v58 = vrot.slane %v17229_v48, %v21405_v31  ;;  %v17244_v38 = vrot.slane %v17230_v1, %v21405_v31  ;;  %v7555_v42 = vcombine.high %v7547_v8, %v7547_v8  ;;  %v22373_v10 = vrot.slane %v19408_v62, %v21405_v31 }
  0xad   :  { %20054 = vrot.lane.b32.xlu0 %v20053_v4, %s21282_s18  ;;  %v17247_v46 = vcombine.low %v22366_v20, %v22343_v43  ;;  %v22379_v49 = vrot.slane %v17246_v0, %v21405_v31  ;;  %v7570_v41 = vrot.slane %v7556_v34, %v21405_v31  ;;  %v22384_v24 = vrot.slane %v22359_v28, %v21405_v31 }
  0xae   :  { %v17245_v61 = vcombine.low %v17237_v58, %v17244_v38  ;;  %v7571_v56 = vcombine.high %v22373_v10, %v22373_v10  ;;  %v16249_v13 = vcombine.low %v7547_v8, %v7555_v42  ;;  %v16250_v6 = vcombine.low %v7554_v37, %v22373_v10 }
  0xaf   :  { %v17261_v29 = vrot.slane %v17247_v46, %v21405_v31  ;;  %v22395_v60 = vcombine.high %v7570_v41, %v7570_v41  ;;  %v2391_v11 = vcombine.high %v22148_v2, %v22148_v2  ;;  %v2406_v3 = vcombine.high %v22172_v33, %v22172_v33  ;;  %v22412_v2 = vld [vmem:[%s28419_s0 + $0x69] sm:$0x3f] }
  0xb0   :  { %v16257_v35 = vrot.slane %v16249_v13, %v21405_v31  ;;  %v16264_v57 = vrot.slane %v16250_v6, %v21405_v31  ;;  %v16266_v12 = vcombine.low %v7571_v56, %v7570_v41  ;;  %v2431_v36 = vrot.slane %v22389_v9, %v21405_v31 }
  0xb1   :  { %v17262_v25 = vcombine.low %v22379_v49, %v17261_v29  ;;  %v16267_v51 = vcombine.low %v22395_v60, %v22384_v24  ;;  %v2405_v50 = vrot.slane %v2391_v11, %v21405_v31  ;;  %v1355_v33 = vcombine.high %v22179_v40, %v22179_v40 }
  0xb2   :  { %v16265_v26 = vcombine.low %v16257_v35, %v16264_v57  ;;  %v22417_v62 = vrot.slane %v16266_v12, %v21405_v31  ;;  %v2439_v32 = vcombine.high %v2431_v36, %v2431_v36  ;;  %v1370_v45 = vcombine.high %v22200_v5, %v22200_v5 }
  0xb3   :  { %v20068_v48 = vpack.i.bf16 %v17262_v25, %v17245_v61  ;;  %v16281_v1 = vrot.slane %v16267_v51, %v21405_v31  ;;  %v11383_v8 = vcombine.low %v2406_v3, %v2405_v50  ;;  %v1369_v37 = vrot.slane %v1355_v33, %v21405_v31 }
  0xb4   :  { %v11401_v40 = vcombine.low %v2431_v36, %v2439_v32  ;;  %v1395_v4 = vrot.slane %v22412_v2, %v21405_v31  ;;  %v4464_v0 = vcombine.high %v22208_v30, %v22208_v30  ;;  %v4479_v5 = vcombine.high %v22222_v44, %v22222_v44  ;;  %v22449_v36 = vld [vmem:[%s28419_s0 + $0x78] sm:$0x3f] }
  0xb5   :  { %20069 = vrot.lane.b32.xlu1 %v20068_v48, %s21283_s21  ;;  %v16282_v34 = vcombine.low %v22417_v62, %v16281_v1  ;;  %v11391_v58 = vrot.slane %v11383_v8, %v21405_v31  ;;  %v10403_v38 = vcombine.low %v1370_v45, %v1369_v37  ;;  %v4504_v42 = vrot.slane %v22424_v47, %v21405_v31 }
  0xb6   :  { %v11415_v46 = vrot.slane %v11401_v40, %v21405_v31  ;;  %v1403_v61 = vcombine.high %v1395_v4, %v1395_v4  ;;  %v4478_v13 = vrot.slane %v4464_v0, %v21405_v31  ;;  %v13344_v30 = vcombine.low %v22373_v10, %v7571_v56  ;;  %v22477_v0 = vld [vmem:[%s28419_s0 + $0x88] sm:$0x3f] }
  0xb7   :  { %v20063_v6 = vpack.i.bf16 %v16282_v34, %v16265_v26  ;;  %v11399_v44 = vcombine.low %v11391_v58, %v22136_v7  ;;  %v10411_v29 = vrot.slane %v10403_v38, %v21405_v31  ;;  %v4512_v11 = vcombine.high %v4504_v42, %v4504_v42 }
  0xb8   :  { %v11416_v3 = vcombine.low %v22151_v17, %v11415_v46  ;;  %v10421_v35 = vcombine.low %v1395_v4, %v1403_v61  ;;  %v13343_v57 = vcombine.low %v4479_v5, %v4478_v13  ;;  %v13358_v12 = vrot.slane %v13344_v30, %v21405_v31  ;;  %v19354_v4 = vld [vmem:[%s28419_s0 + $0x80] sm:$0xff]  ;;  %v22496_v61 = vld [vmem:[%s28419_s0 + $0x7a] sm:$0x3f] }
  0xb9   :  { %20064 = vrot.lane.b32.xlu0 %v20063_v6, %s21284_s24  ;;  %v10419_v56 = vcombine.low %v10411_v29, %v22185_v14  ;;  %v13360_v7 = vcombine.low %v7570_v41, %v22395_v60  ;;  %v13361_v25 = vcombine.low %v4504_v42, %v4512_v11  ;;  %v3428_v51 = vcombine.high %v22232_v23, %v22232_v23 }
  0xba   :  { %v20078_v17 = vpack.i.bf16 %v11416_v3, %v11399_v44  ;;  %v10435_v50 = vrot.slane %v10421_v35, %v21405_v31  ;;  %v13351_v33 = vrot.slane %v13343_v57, %v21405_v31  ;;  %v3443_v26 = vcombine.high %v22248_v63, %v22248_v63 }
  0xbb   :  { %v13368_v32 = vrot.slane %v13360_v7, %v21405_v31  ;;  %v13375_v45 = vrot.slane %v13361_v25, %v21405_v31  ;;  %v3442_v14 = vrot.slane %v3428_v51, %v21405_v31  ;;  %v3468_v41 = vrot.slane %v22449_v36, %v21405_v31 }
  0xbc   :  { %20079 = vrot.lane.b32.xlu1 %v20078_v17, %s21280_s12  ;;  %v10436_v23 = vcombine.low %v22190_v39, %v10435_v50  ;;  %v13359_v48 = vcombine.low %v13351_v33, %v13358_v12  ;;  %v12364_v1 = vcombine.low %v22274_v18, %v22291_v15  ;;  %v12380_v63 = vcombine.low %v22277_v53, %v22296_v27 }
  0xbd   :  { %v13376_v8 = vcombine.low %v13368_v32, %v13375_v45  ;;  %v3476_v37 = vcombine.high %v3468_v41, %v3468_v41  ;;  %v12363_v40 = vcombine.low %v3443_v26, %v3442_v14  ;;  %v6537_v39 = vcombine.high %v22262_v59, %v22262_v59 }
  0xbe   :  { %v20073_v5 = vpack.i.bf16 %v10436_v23, %v10419_v56  ;;  %v12378_v18 = vrot.slane %v12364_v1, %v21405_v31  ;;  %v12388_v53 = vrot.slane %v12380_v63, %v21405_v31  ;;  %v6552_v15 = vcombine.high %v22281_v16, %v22281_v16  ;;  %v22537_v23 = vld [vmem:[%s28419_s0 + $0x8a] sm:$0x3f] }
  0xbf   :  { %v20088_v27 = vpack.i.bf16 %v13376_v8, %v13359_v48  ;;  %v12371_v34 = vrot.slane %v12363_v40, %v21405_v31  ;;  %v12381_v58 = vcombine.low %v3468_v41, %v3476_v37  ;;  %v6551_v38 = vrot.slane %v6537_v39, %v21405_v31 }
  0xc0   :  { %20074 = vrot.lane.b32.xlu0 %v20073_v5, %s21278_s10  ;;  %v6553_v42 = vcombine.high %v19354_v4, %v19354_v4  ;;  %v22489_v46 = vrot.slane %v19354_v4, %v21405_v31  ;;  %v6577_v59 = vrot.slane %v22477_v0, %v21405_v31  ;;  %v5500_v16 = vcombine.high %v22286_v54, %v22286_v54 }
  0xc1   :  { %20089 = vrot.lane.b32.xlu1 %v20088_v27, %s21279_s11  ;;  %v12379_v13 = vcombine.low %v12371_v34, %v12378_v18  ;;  %v12395_v30 = vrot.slane %v12381_v58, %v21405_v31  ;;  %v15303_v6 = vcombine.low %v6552_v15, %v6551_v38  ;;  %v5515_v44 = vcombine.high %v22308_v55, %v22308_v55 }
  0xc2   :  { %v22505_v29 = vrot.slane %v6553_v42, %v21405_v31  ;;  %v22509_v11 = vcombine.high %v22489_v46, %v22489_v46  ;;  %v6585_v3 = vcombine.high %v6577_v59, %v6577_v59  ;;  %v5514_v35 = vrot.slane %v5500_v16, %v21405_v31  ;;  %v22570_v16 = vld [vmem:[%s28419_s0 + $0x89] sm:$0x3f] }
  0xc3   :  { %v12396_v54 = vcombine.low %v12388_v53, %v12395_v30  ;;  %v15311_v57 = vrot.slane %v15303_v6, %v21405_v31  ;;  %v5540_v12 = vrot.slane %v22496_v61, %v21405_v31  ;;  %v14324_v56 = vcombine.low %v22339_v22, %v22353_v21  ;;  %v19466_v21 = vld [vmem:[%s28419_s0 + $0x82] sm:$0xff] }
  0xc4   :  { %v22519_v55 = vcombine.high %v22505_v29, %v22505_v29  ;;  %v15304_v7 = vcombine.low %v22489_v46, %v22509_v11  ;;  %v15321_v25 = vcombine.low %v6577_v59, %v6585_v3  ;;  %v14323_v51 = vcombine.low %v5515_v44, %v5514_v35 }
  0xc5   :  { %v20083_v17 = vpack.i.bf16 %v12396_v54, %v12379_v13  ;;  %v5548_v50 = vcombine.high %v5540_v12, %v5540_v12  ;;  %v14338_v33 = vrot.slane %v14324_v56, %v21405_v31  ;;  %v14340_v26 = vcombine.low %v22349_v19, %v22366_v20 }
  0xc6   :  { %v15318_v32 = vrot.slane %v15304_v7, %v21405_v31  ;;  %v15320_v45 = vcombine.low %v22505_v29, %v22519_v55  ;;  %v15335_v14 = vrot.slane %v15321_v25, %v21405_v31  ;;  %v14331_v41 = vrot.slane %v14323_v51, %v21405_v31  ;;  %v2112_v7 = vld [vmem:[%s28419_s0 + $0x7a] sm:$0x3f] }
  0xc7   :  { %20084 = vrot.lane.b32.xlu0 %v20083_v17, %s21277_s9  ;;  %v14341_v19 = vcombine.low %v5540_v12, %v5548_v50  ;;  %v14348_v48 = vrot.slane %v14340_v26, %v21405_v31  ;;  %v8609_v1 = vcombine.high %v22328_v52, %v22328_v52  ;;  %v8624_v63 = vcombine.high %v22343_v43, %v22343_v43  ;;  %v19410_v52 = vld [vmem:[%s28419_s0 + $0x81] sm:$0xff] }
  0xc8   :  { %v15319_v8 = vcombine.low %v15311_v57, %v15318_v32  ;;  %v15328_v37 = vrot.slane %v15320_v45, %v21405_v31  ;;  %v14339_v40 = vcombine.low %v14331_v41, %v14338_v33  ;;  %v8625_v4 = vcombine.high %v19466_v21, %v19466_v21 }
  0xc9   :  { %v14355_v39 = vrot.slane %v14341_v19, %v21405_v31  ;;  %v8623_v5 = vrot.slane %v8609_v1, %v21405_v31  ;;  %v22549_v18 = vrot.slane %v19466_v21, %v21405_v31  ;;  %v8649_v53 = vrot.slane %v22537_v23, %v21405_v31 }
  0xca   :  { %v15336_v43 = vcombine.low %v15328_v37, %v15335_v14  ;;  %v22557_v15 = vrot.slane %v8625_v4, %v21405_v31  ;;  %v7573_v27 = vcombine.high %v22359_v28, %v22359_v28  ;;  %v7588_v34 = vcombine.high %v22384_v24, %v22384_v24  ;;  %v1076_v4 = vld [vmem:[%s28419_s0 + $0x79] sm:$0x3f] }
  0xcb   :  { %v14356_v58 = vcombine.low %v14348_v48, %v14355_v39  ;;  %v22565_v38 = vcombine.high %v22549_v18, %v22549_v18  ;;  %v8657_v42 = vcombine.high %v8649_v53, %v8649_v53  ;;  %v17263_v59 = vcombine.low %v8624_v63, %v8623_v5 }
  0xcc   :  { %v20098_v13 = vpack.i.bf16 %v15336_v43, %v15319_v8  ;;  %v22574_v30 = vcombine.high %v22557_v15, %v22557_v15  ;;  %v7587_v28 = vrot.slane %v7573_v27, %v21405_v31  ;;  %v7589_v24 = vcombine.high %v19410_v52, %v19410_v52 }
  0xcd   :  { %v20093_v6 = vpack.i.bf16 %v14356_v58, %v14339_v40  ;;  %v17264_v44 = vcombine.low %v22549_v18, %v22565_v38  ;;  %v17271_v3 = vrot.slane %v17263_v59, %v21405_v31  ;;  %v17281_v35 = vcombine.low %v8649_v53, %v8657_v42 }
  0xce   :  { %20099 = vrot.lane.b32.xlu1 %v20098_v13, %s21281_s13  ;;  %v17280_v54 = vcombine.low %v22557_v15, %v22574_v30  ;;  %v22584_v57 = vrot.slane %v19410_v52, %v21405_v31  ;;  %v22587_v12 = vrot.slane %v7589_v24, %v21405_v31  ;;  %v7613_v56 = vrot.slane %v22570_v16, %v21405_v31 }
  0xcf   :  { %20094 = vrot.lane.b32.xlu0 %v20093_v6, %s21282_s18  ;;  %v22596_v25 = vrot.slane %v17264_v44, %v21405_v31  ;;  %v17295_v51 = vrot.slane %v17281_v35, %v21405_v31  ;;  %v16283_v17 = vcombine.low %v7588_v34, %v7587_v28  ;;  %v2424_v50 = vcombine.high %v22389_v9, %v22389_v9  ;;  %v19245_v28 = vld [vmem:[%s28419_s0 + $0x89] sm:$0x3f] }
  0xd0   :  { %v22602_v33 = vrot.slane %v17280_v54, %v21405_v31  ;;  %v7604_v26 = vcombine.high %v22584_v57, %v22584_v57  ;;  %v7605_v21 = vcombine.high %v22587_v12, %v22587_v12  ;;  %v7621_v32 = vcombine.high %v7613_v56, %v7613_v56 }
  0xd1   :  { %v17279_v45 = vcombine.low %v17271_v3, %v22596_v25  ;;  %v16291_v14 = vrot.slane %v16283_v17, %v21405_v31  ;;  %v2438_v41 = vrot.slane %v2424_v50, %v21405_v31  ;;  %v2457_v19 = vcombine.high %v2112_v7, %v2112_v7 }
  0xd2   :  { %v17296_v48 = vcombine.low %v22602_v33, %v17295_v51  ;;  %v16284_v9 = vcombine.low %v22584_v57, %v7604_v26  ;;  %v16300_v1 = vcombine.low %v22587_v12, %v7605_v21  ;;  %v16301_v63 = vcombine.low %v7613_v56, %v7621_v32 }
  0xd3   :  { %v2464_v8 = vrot.slane %v2112_v7, %v21405_v31  ;;  %v2471_v37 = vrot.slane %v2457_v19, %v21405_v31  ;;  %v11417_v40 = vcombine.low %v2438_v41, %v22339_v22  ;;  %v1388_v39 = vcombine.high %v22412_v2, %v22412_v2 }
  0xd4   :  { %v20108_v5 = vpack.i.bf16 %v17296_v48, %v17279_v45  ;;  %v22623_v53 = vrot.slane %v16284_v9, %v21405_v31  ;;  %v22626_v52 = vrot.slane %v16300_v1, %v21405_v31  ;;  %v16315_v43 = vrot.slane %v16301_v63, %v21405_v31 }
  0xd5   :  { %v2472_v27 = vcombine.high %v2464_v8, %v2464_v8  ;;  %v11425_v34 = vrot.slane %v11417_v40, %v21405_v31  ;;  %v11434_v22 = vcombine.low %v22366_v20, %v2464_v8  ;;  %v1402_v58 = vrot.slane %v1388_v39, %v21405_v31 }
  0xd6   :  { %20109 = vrot.lane.b32.xlu1 %v20108_v5, %s21283_s21  ;;  %v16299_v2 = vcombine.low %v16291_v14, %v22623_v53  ;;  %v16316_v42 = vcombine.low %v22626_v52, %v16315_v43  ;;  %v1421_v59 = vcombine.high %v1076_v4, %v1076_v4  ;;  %v1428_v13 = vrot.slane %v1076_v4, %v21405_v31 }
  0xd7   :  { %v11433_v24 = vcombine.low %v11425_v34, %v22379_v49  ;;  %v11435_v6 = vcombine.low %v2472_v27, %v2471_v37  ;;  %v11442_v20 = vrot.slane %v11434_v22, %v21405_v31  ;;  %v10437_v44 = vcombine.low %v1402_v58, %v22373_v10 }
  0xd8   :  { %v20103_v3 = vpack.i.bf16 %v16316_v42, %v16299_v2  ;;  %v1435_v35 = vrot.slane %v1421_v59, %v21405_v31  ;;  %v1436_v54 = vcombine.high %v1428_v13, %v1428_v13  ;;  %v10454_v56 = vcombine.low %v22395_v60, %v1428_v13  ;;  %v19189_v60 = vld [vmem:[%s28419_s0 + $0x88] sm:$0x3f]  ;;  %v19357_v2 = vld [vmem:[%s28419_s0 + $0x98] sm:$0x3f] }
  0xd9   :  { %v11449_v7 = vrot.slane %v11435_v6, %v21405_v31  ;;  %v10445_v51 = vrot.slane %v10437_v44, %v21405_v31  ;;  %v4497_v17 = vcombine.high %v22424_v47, %v22424_v47  ;;  %v4530_v50 = vcombine.high %v19245_v28, %v19245_v28 }
  0xda   :  { %20104 = vrot.lane.b32.xlu0 %v20103_v3, %s21284_s24  ;;  %v10455_v49 = vcombine.low %v1436_v54, %v1435_v35  ;;  %v10462_v32 = vrot.slane %v10454_v56, %v21405_v31  ;;  %v4537_v10 = vrot.slane %v19245_v28, %v21405_v31  ;;  %v13378_v45 = vcombine.low %v7604_v26, %v22587_v12  ;;  %v19301_v56 = vld [vmem:[%s28419_s0 + $0x8a] sm:$0x3f] }
  0xdb   :  { %v11450_v14 = vcombine.low %v11442_v20, %v11449_v7  ;;  %v10453_v41 = vcombine.low %v10445_v51, %v22417_v62  ;;  %v4511_v19 = vrot.slane %v4497_v17, %v21405_v31  ;;  %v4544_v47 = vrot.slane %v4530_v50, %v21405_v31 }
  0xdc   :  { %v10469_v48 = vrot.slane %v10455_v49, %v21405_v31  ;;  %v4545_v9 = vcombine.high %v4537_v10, %v4537_v10  ;;  %v13392_v1 = vrot.slane %v13378_v45, %v21405_v31  ;;  %v13394_v63 = vcombine.low %v7605_v21, %v4537_v10 }
  0xdd   :  { %v20118_v8 = vpack.i.bf16 %v11450_v14, %v11433_v24  ;;  %v13377_v12 = vcombine.low %v4511_v19, %v22584_v57  ;;  %v3461_v26 = vcombine.high %v22449_v36, %v22449_v36  ;;  %v3494_v37 = vcombine.high %v19189_v60, %v19189_v60  ;;  %v19356_v36 = vld [vmem:[%s28419_s0 + $0x90] sm:$0xff] }
  0xde   :  { %v10470_v40 = vcombine.low %v10462_v32, %v10469_v48  ;;  %v13395_v4 = vcombine.low %v4545_v9, %v4544_v47  ;;  %v13402_v62 = vrot.slane %v13394_v63, %v21405_v31  ;;  %v3501_v39 = vrot.slane %v19189_v60, %v21405_v31 }
  0xdf   :  { %20119 = vrot.lane.b32.xlu1 %v20118_v8, %s21280_s12  ;;  %v13385_v5 = vrot.slane %v13377_v12, %v21405_v31  ;;  %v3475_v43 = vrot.slane %v3461_v26, %v21405_v31  ;;  %v3508_v21 = vrot.slane %v3494_v37, %v21405_v31  ;;  %v12398_v57 = vcombine.low %v22509_v11, %v22505_v29  ;;  %v19468_v26 = vld [vmem:[%s28419_s0 + $0x92] sm:$0xff] }
  0xe0   :  { %v20113_v27 = vpack.i.bf16 %v10470_v40, %v10453_v41  ;;  %v13409_v34 = vrot.slane %v13395_v4, %v21405_v31  ;;  %v3509_v22 = vcombine.high %v3501_v39, %v3501_v39  ;;  %v12414_v58 = vcombine.low %v22519_v55, %v3501_v39  ;;  %v19469_v39 = vld [vmem:[%s28419_s0 + $0x9a] sm:$0x3f] }
  0xe1   :  { %v13393_v42 = vcombine.low %v13385_v5, %v13392_v1  ;;  %v12397_v59 = vcombine.low %v3475_v43, %v22489_v46  ;;  %v12412_v13 = vrot.slane %v12398_v57, %v21405_v31  ;;  %v6570_v29 = vcombine.high %v22477_v0, %v22477_v0 }
  0xe2   :  { %20114 = vrot.lane.b32.xlu0 %v20113_v27, %s21278_s10  ;;  %v13410_v11 = vcombine.low %v13402_v62, %v13409_v34  ;;  %v12415_v28 = vcombine.low %v3509_v22, %v3508_v21  ;;  %v12422_v24 = vrot.slane %v12414_v58, %v21405_v31  ;;  %v6586_v6 = vcombine.high %v19356_v36, %v19356_v36  ;;  %v19412_v58 = vld [vmem:[%s28419_s0 + $0x91] sm:$0xff] }
  0xe3   :  { %v12405_v55 = vrot.slane %v12397_v59, %v21405_v31  ;;  %v6584_v20 = vrot.slane %v6570_v29, %v21405_v31  ;;  %v22688_v44 = vrot.slane %v19356_v36, %v21405_v31  ;;  %v6603_v46 = vcombine.high %v19357_v2, %v19357_v2 }
  0xe4   :  { %v20128_v3 = vpack.i.bf16 %v13410_v11, %v13393_v42  ;;  %v12429_v35 = vrot.slane %v12415_v28, %v21405_v31  ;;  %v22692_v0 = vrot.slane %v6586_v6, %v21405_v31  ;;  %v6610_v54 = vrot.slane %v19357_v2, %v21405_v31 }
  0xe5   :  { %v12413_v7 = vcombine.low %v12405_v55, %v12412_v13  ;;  %v22700_v51 = vcombine.high %v22688_v44, %v22688_v44  ;;  %v6617_v17 = vrot.slane %v6603_v46, %v21405_v31  ;;  %v15337_v50 = vcombine.low %v6584_v20, %v22688_v44  ;;  %v19413_v55 = vld [vmem:[%s28419_s0 + $0x99] sm:$0x3f] }
  0xe6   :  { %20129 = vrot.lane.b32.xlu1 %v20128_v3, %s21279_s11  ;;  %v12430_v49 = vcombine.low %v12422_v24, %v12429_v35  ;;  %v22707_v32 = vcombine.high %v22692_v0, %v22692_v0  ;;  %v6618_v10 = vcombine.high %v6610_v54, %v6610_v54  ;;  %v5533_v45 = vcombine.high %v22496_v61, %v22496_v61 }
  0xe7   :  { %v15338_v60 = vcombine.low %v22700_v51, %v22692_v0  ;;  %v15345_v14 = vrot.slane %v15337_v50, %v21405_v31  ;;  %v5566_v41 = vcombine.high %v19301_v56, %v19301_v56  ;;  %v5573_v19 = vrot.slane %v19301_v56, %v21405_v31 }
  0xe8   :  { %v20123_v47 = vpack.i.bf16 %v12430_v49, %v12413_v7  ;;  %v15354_v48 = vcombine.low %v22707_v32, %v6610_v54  ;;  %v15355_v9 = vcombine.low %v6618_v10, %v6617_v17  ;;  %v5547_v1 = vrot.slane %v5533_v45, %v21405_v31 }
  0xe9   :  { %v15352_v63 = vrot.slane %v15338_v60, %v21405_v31  ;;  %v5580_v8 = vrot.slane %v5566_v41, %v21405_v31  ;;  %v5581_v12 = vcombine.high %v5573_v19, %v5573_v19  ;;  %v14358_v61 = vcombine.low %v22565_v38, %v22557_v15 }
  0xea   :  { %20124 = vrot.lane.b32.xlu0 %v20123_v47, %s21277_s9  ;;  %v15362_v37 = vrot.slane %v15354_v48, %v21405_v31  ;;  %v15369_v40 = vrot.slane %v15355_v9, %v21405_v31  ;;  %v14357_v4 = vcombine.low %v5547_v1, %v22549_v18  ;;  %v14374_v62 = vcombine.low %v22574_v30, %v5573_v19 }
  0xeb   :  { %v15353_v5 = vcombine.low %v15345_v14, %v15352_v63  ;;  %v14372_v15 = vrot.slane %v14358_v61, %v21405_v31  ;;  %v14375_v38 = vcombine.low %v5581_v12, %v5580_v8  ;;  %v8642_v43 = vcombine.high %v22537_v23, %v22537_v23  ;;  %v2114_v14 = vld [vmem:[%s28419_s0 + $0x8a] sm:$0x3f] }
  0xec   :  { %v15370_v21 = vcombine.low %v15362_v37, %v15369_v40  ;;  %v14365_v57 = vrot.slane %v14357_v4, %v21405_v31  ;;  %v14382_v36 = vrot.slane %v14374_v62, %v21405_v31  ;;  %v8658_v27 = vcombine.high %v19468_v26, %v19468_v26  ;;  %v1078_v12 = vld [vmem:[%s28419_s0 + $0x89] sm:$0x3f] }
  0xed   :  { %v14389_v18 = vrot.slane %v14375_v38, %v21405_v31  ;;  %v8656_v30 = vrot.slane %v8642_v43, %v21405_v31  ;;  %v22740_v34 = vrot.slane %v19468_v26, %v21405_v31  ;;  %v8675_v22 = vcombine.high %v19469_v39, %v19469_v39 }
  0xee   :  { %v20138_v2 = vpack.i.bf16 %v15370_v21, %v15353_v5  ;;  %v14373_v23 = vcombine.low %v14365_v57, %v14372_v15  ;;  %v22746_v42 = vrot.slane %v8658_v27, %v21405_v31  ;;  %v8682_v59 = vrot.slane %v19469_v39, %v21405_v31  ;;  %v20928_v57 = vld [vmem:[%s28420_s1] sm:$0xff]  }
  0xef   :  { %v14390_v13 = vcombine.low %v14382_v36, %v14389_v18  ;;  %v22751_v29 = vcombine.high %v22740_v34, %v22740_v34  ;;  %v8689_v11 = vrot.slane %v8675_v22, %v21405_v31  ;;  %v17297_v28 = vcombine.low %v8656_v30, %v22740_v34  ;;  %v22818_v22 = vpop.permute.xlu1 %19884 }
  0xf0   :  { %20139 = vrot.lane.b32.xlu1 %v20138_v2, %s21281_s13  ;;  %v22758_v24 = vcombine.high %v22746_v42, %v22746_v42  ;;  %v8690_v6 = vcombine.high %v8682_v59, %v8682_v59  ;;  %v7606_v20 = vcombine.high %v22570_v16, %v22570_v16  ;;  %v7622_v46 = vcombine.high %v19412_v58, %v19412_v58  ;;  %v22825_v2 = vpop.permute.xlu0 %19874 }
  0xf1   :  { %v20133_v3 = vpack.i.bf16 %v14390_v13, %v14373_v23  ;;  %v17298_v35 = vcombine.low %v22751_v29, %v22746_v42  ;;  %v17305_v54 = vrot.slane %v17297_v28, %v21405_v31  ;;  %v22769_v56 = vrot.slane %v19412_v58, %v21405_v31  ;;  %v25_v28 = vld [vmem:[%s28419_s0] sm:$0xff] }
  0xf2   :  { %v17314_v7 = vcombine.low %v22758_v24, %v8682_v59  ;;  %v17315_v17 = vcombine.low %v8690_v6, %v8689_v11  ;;  %v7620_v50 = vrot.slane %v7606_v20, %v21405_v31  ;;  %v22774_v49 = vrot.slane %v7622_v46, %v21405_v31  ;;  %v26_v20 = vld [vmem:[%s28419_s0 + $0x8] sm:$0x3f] }
  0xf3   :  { %20134 = vrot.lane.b32.xlu0 %v20133_v3, %s21282_s18  ;;  %v22778_v16 = vrot.slane %v17298_v35, %v21405_v31  ;;  %v22782_v10 = vcombine.high %v22769_v56, %v22769_v56  ;;  %v7639_v45 = vcombine.high %v19413_v55, %v19413_v55  ;;  %v7646_v60 = vrot.slane %v19413_v55, %v21405_v31  ;;  %v20933_v46 = vld [vmem:[%s28420_s1 + $0x8] sm:$0xff]  }
  0xf4   :  { %v17322_v41 = vrot.slane %v17314_v7, %v21405_v31  ;;  %v17329_v19 = vrot.slane %v17315_v17, %v21405_v31  ;;  %v22792_v47 = vcombine.high %v22774_v49, %v22774_v49  ;;  %v16317_v48 = vcombine.low %v7620_v50, %v22769_v56  ;;  %v22847_v17 = vld [vmem:[%s28419_s0 + $0x10] sm:$0xff]  ;;  %v19247_v50 = vld [vmem:[%s28419_s0 + $0x99] sm:$0x3f] }
  0xf5   :  { %v17313_v9 = vcombine.low %v17305_v54, %v22778_v16  ;;  %v7653_v1 = vrot.slane %v7639_v45, %v21405_v31  ;;  %v7654_v63 = vcombine.high %v7646_v60, %v7646_v60  ;;  %v16318_v8 = vcombine.low %v22782_v10, %v22774_v49 }
  0xf6   :  { %v17330_v61 = vcombine.low %v17322_v41, %v17329_v19  ;;  %v16325_v26 = vrot.slane %v16317_v48, %v21405_v31  ;;  %v16334_v37 = vcombine.low %v22792_v47, %v7646_v60  ;;  %v2490_v40 = vcombine.high %v2114_v14, %v2114_v14 }
  0xf7   :  { %v22805_v4 = vrot.slane %v16318_v8, %v21405_v31  ;;  %v16335_v62 = vcombine.low %v7654_v63, %v7653_v1  ;;  %v2497_v39 = vrot.slane %v2114_v14, %v21405_v31  ;;  %v11467_v5 = vcombine.low %v22596_v25, %v22602_v33 }
  0xf8   :  { %v20148_v15 = vpack.i.bf16 %v17330_v61, %v17313_v9  ;;  %v16342_v38 = vrot.slane %v16334_v37, %v21405_v31  ;;  %v2504_v43 = vrot.slane %v2490_v40, %v21405_v31  ;;  %v1454_v21 = vcombine.high %v1078_v12, %v1078_v12  ;;  %v22868_v61 = vld [vmem:[%s28419_s0 + $0xa1] sm:$0xff]  ;;  %v20937_v37 = vld [vmem:[%s28420_s1 + $0x10] sm:$0xff]  }
  0xf9   :  { %v16333_v36 = vcombine.low %v16325_v26, %v22805_v4  ;;  %v16349_v27 = vrot.slane %v16335_v62, %v21405_v31  ;;  %v2505_v18 = vcombine.high %v2497_v39, %v2497_v39  ;;  %v1461_v30 = vrot.slane %v1078_v12, %v21405_v31 }
  0xfa   :  { %20149 = vrot.lane.b32.xlu1 %v20148_v15, %s21283_s21  ;;  %v11469_v25 = vcombine.low %v2504_v43, %v22740_v34  ;;  %v1468_v33 = vrot.slane %v1454_v21, %v21405_v31  ;;  %v10487_v58 = vcombine.low %v22623_v53, %v22626_v52  ;;  %v28426_v11 = vmov 0.0  }
  0xfb   :  { %v16350_v23 = vcombine.low %v16342_v38, %v16349_v27  ;;  %v11468_v59 = vcombine.low %v2497_v39, %v2505_v18  ;;  %v1469_v13 = vcombine.high %v1461_v30, %v1461_v30  ;;  %19625 = vmatprep.subr.bf16.mxu0 %v28426_v11  ;;  %19850 = vmatprep.subr.bf16.mxu1 %v28426_v11  ;;  %v19887_v53 = vunpack.i.h.bf16 %v22818_v22 }
  0xfc   :  { %v11483_v6 = vrot.slane %v11469_v25, %v21405_v31  ;;  %v10489_v55 = vcombine.low %v1468_v33, %v22769_v56  ;;  %19626 = vmatpush3.bf16.msra.mxu0 %v20928_v57  ;;  %v19886_v52 = vunpack.i.l.bf16 %v22818_v22  ;;  %19855 = vmatpush3.bf16.msra.mxu1 %v20928_v57  ;;  %v19877_v7 = vunpack.i.h.bf16 %v22825_v2 }
  0xfd   :  { %v20143_v3 = vpack.i.bf16 %v16350_v23, %v16333_v36  ;;  %v11476_v35 = vrot.slane %v11468_v59, %v21405_v31  ;;  %v10488_v54 = vcombine.low %v1461_v30, %v1469_v13  ;;  %19627 = vmatprep.subr.bf16.mxu0 %v28426_v11  ;;  %19851 = vmatprep.subr.bf16.mxu1 %v28426_v11  ;;  %vm18073_vm0 = vcmask 64512   ;;  %v19191_v30 = vld [vmem:[%s28419_s0 + $0x98] sm:$0x3f] }
  0xfe   :  { %v10503_v45 = vrot.slane %v10489_v55, %v21405_v31  ;;  %v19876_v60 = vunpack.i.l.bf16 %v22825_v2  ;;  %v137_v14 = vcombine.high %v25_v28, %v25_v28  ;;  %v144_v41 = vrot.slane %v25_v28, %v21405_v31 }
  0xff   :  { %20144 = vrot.lane.b32.xlu0 %v20143_v3, %s21284_s24  ;;  %v11484_v19 = vcombine.low %v11476_v35, %v11483_v6  ;;  %v10496_v48 = vrot.slane %v10488_v54, %v21405_v31  ;;  %v154_v9 = vcombine.high %v26_v20, %v26_v20  ;;  %v161_v1 = vrot.slane %v26_v20, %v21405_v31 }
 0x100   :  { %v151_v63 = vrot.slane %v137_v14, %v21405_v31  ;;  %v152_v8 = vcombine.high %v144_v41, %v144_v41  ;;  %v22863_v12 = vrot.slane %v22847_v17, %v21405_v31  ;;  %v4563_v26 = vcombine.high %v19247_v50, %v19247_v50  ;;  %19628 = vmatpush3.bf16.msra.mxu0 %v20933_v46 }
 0x101   :  { %v20158_v40 = vpack.i.bf16 %v11484_v19, %v11467_v5  ;;  %v10504_v62 = vcombine.low %v10496_v48, %v10503_v45  ;;  %v168_v39 = vrot.slane %v154_v9, %v21405_v31  ;;  %v169_v15 = vcombine.high %v161_v1, %v161_v1  ;;  %19629 = vmatprep.subr.bf16.mxu0 %v28426_v11  ;;  %v22911_v48 = vpop.permute.xlu1 %19889 }
 0x102   :  { %v153_v38 = vcombine.high %v151_v63, %v151_v63  ;;  %v9351_v43 = vcombine.low %v144_v41, %v152_v8  ;;  %v4570_v21 = vrot.slane %v19247_v50, %v21405_v31  ;;  %v4577_v57 = vrot.slane %v4563_v26, %v21405_v31  ;;  %19856 = vmatpush3.bf16.msra.mxu1 %v20933_v46 }
 0x103   :  { %20159 = vrot.lane.b32.xlu1 %v20158_v40, %s21280_s12  ;;  %v20153_v36 = vpack.i.bf16 %v10504_v62, %v10487_v58  ;;  %v9368_v27 = vcombine.low %v161_v1, %v169_v15  ;;  %v9369_v18 = vcombine.low %v168_v39, %v22863_v12  ;;  %v22881_v5 = vrot.slane %v22868_v61, %v21405_v31  ;;  %v20942_v58 = vld [vmem:[%s28420_s1 + $0x18] sm:$0xff]   ;;  %v19880_v15 = vpop.permute.xlu0 %19879 }
 0x104   :  { %v9352_v25 = vcombine.low %v151_v63, %v153_v38  ;;  %v9359_v33 = vrot.slane %v9351_v43, %v21405_v31  ;;  %v4578_v23 = vcombine.high %v4570_v21, %v4570_v21  ;;  %v13411_v59 = vcombine.low %v22769_v56, %v22782_v10  ;;  %19630 = vmatpush3.bf16.msra.mxu0 %v20937_v37  ;;  %v19192_v56 = vld [vmem:[%s28419_s0 + $0xa0] sm:$0xff] }
 0x105   :  { %20154 = vrot.lane.b32.xlu0 %v20153_v36, %s21278_s10  ;;  %v9376_v13 = vrot.slane %v9368_v27, %v21405_v31  ;;  %v9383_v28 = vrot.slane %v9369_v18, %v21405_v31  ;;  %v13412_v6 = vcombine.low %v22774_v49, %v22792_v47  ;;  %v13429_v55 = vcombine.low %v4577_v57, %v22881_v5  ;;  %v22938_v36 = vld [vmem:[%s28419_s0 + $0xb0] sm:$0xff] }
 0x106   :  { %v9366_v10 = vrot.slane %v9352_v25, %v21405_v31  ;;  %v13419_v20 = vrot.slane %v13411_v59, %v21405_v31  ;;  %v13428_v46 = vcombine.low %v4570_v21, %v4578_v23  ;;  %v3527_v3 = vcombine.high %v19191_v30, %v19191_v30  ;;  %19631 = vmatprep.subr.bf16.mxu0 %v28426_v11 }
 0x107   :  { %v9384_v35 = vcombine.low %v9376_v13, %v9383_v28  ;;  %v13426_v54 = vrot.slane %v13412_v6, %v21405_v31  ;;  %v13443_v50 = vrot.slane %v13429_v55, %v21405_v31  ;;  %v3534_v49 = vrot.slane %v19191_v30, %v21405_v31  ;;  %19852 = vmatprep.subr.bf16.mxu1 %v28426_v11  ;;  %v19303_v13 = vld [vmem:[%s28419_s0 + $0x9a] sm:$0x3f]  ;;  %v19304_v28 = vld [vmem:[%s28419_s0 + $0xa2] sm:$0xff] }
 0x108   :  { %v9367_v45 = vcombine.low %v9359_v33, %v9366_v10  ;;  %v13436_v14 = vrot.slane %v13428_v46, %v21405_v31  ;;  %v3541_v41 = vrot.slane %v3527_v3, %v21405_v31  ;;  %v3550_v19 = vrot.slane %v19192_v56, %v21405_v31  ;;  %19632 = vmatpush3.bf16.msra.mxu0 %v20942_v58 }
 0x109   :  { %v18075_v9 = vsel %vm18073_vm0, %v9384_v35, %v19877_v7  ;;  %v13427_v1 = vcombine.low %v13419_v20, %v13426_v54  ;;  %v3542_v63 = vcombine.high %v3534_v49, %v3534_v49  ;;  %v12431_v8 = vcombine.low %v22688_v44, %v22700_v51  ;;  %19633 = vmatprep.subr.bf16.mxu0 %v28426_v11  ;;  %v19359_v51 = vld [vmem:[%s28419_s0 + $0xa8] sm:$0x3f]  ;;  %v22973_v54 = vpop.permute.xlu1 %19899 }
 0x10a   :  { %v18074_v26 = vsel %vm18073_vm0, %v9367_v45, %v19876_v60  ;;  %v13444_v40 = vcombine.low %v13436_v14, %v13443_v50  ;;  %v12432_v62 = vcombine.low %v22692_v0, %v22707_v32  ;;  %v12449_v39 = vcombine.low %v3541_v41, %v3550_v19  ;;  %19857 = vmatpush3.bf16.msra.mxu1 %v20937_v37 }
 0x10b   :  { %v12439_v7 = vrot.slane %v12431_v8, %v21405_v31  ;;  %v12448_v38 = vcombine.low %v3534_v49, %v3542_v63  ;;  %v19892_v43 = vunpack.i.h.bf16 %v22911_v48  ;;  %v19891_v44 = vunpack.i.l.bf16 %v22911_v48  ;;  %19853 = vmatprep.subr.bf16.mxu1 %v28426_v11  ;;  %v19415_v48 = vld [vmem:[%s28419_s0 + $0xa9] sm:$0x3f] }
 0x10c   :  { %v20168_v2 = vpack.i.bf16 %v13444_v40, %v13427_v1  ;;  %v12446_v60 = vrot.slane %v12432_v62, %v21405_v31  ;;  %v12463_v0 = vrot.slane %v12449_v39, %v21405_v31  ;;  %vm18123_vm1 = vcmask 130048  }
 0x10d   :  { %v12456_v32 = vrot.slane %v12448_v38, %v21405_v31  ;;  %vm18173_vm2 = vcmask 195584   ;;  %v19882_v37 = vunpack.i.h.bf16 %v19880_v15  ;;  %v19881_v21 = vunpack.i.l.bf16 %v19880_v15  ;;  %v19895_v15 = vpop.permute.xlu0 %19894 }
 0x10e   :  { %20169 = vrot.lane.b32.xlu1 %v20168_v2, %s21279_s11  ;;  %v12447_v57 = vcombine.low %v12439_v7, %v12446_v60  ;;  %v6619_v27 = vcombine.high %v19192_v56, %v19192_v56  ;;  %v22940_v18 = vcombine.high %v3550_v19, %v3550_v19  ;;  %v6636_v30 = vcombine.high %v19359_v51, %v19359_v51 }
 0x10f   :  { %v12464_v25 = vcombine.low %v12456_v32, %v12463_v0  ;;  %v18124_v33 = vsel %vm18123_vm1, %v18074_v26, %v19881_v21  ;;  %v18125_v23 = vsel %vm18123_vm1, %v18075_v9, %v19882_v37  ;;  %v6643_v59 = vrot.slane %v19359_v51, %v21405_v31  ;;  %19858 = vmatpush3.bf16.msra.mxu1 %v20942_v58  ;;  %v19471_v0 = vld [vmem:[%s28419_s0 + $0xaa] sm:$0x3f] }
 0x110   :  { %v18174_v6 = vsel %vm18173_vm2, %v18124_v33, %v19886_v52  ;;  %v18175_v55 = vsel %vm18173_vm2, %v18125_v23, %v19887_v53  ;;  %v22958_v56 = vrot.slane %v6619_v27, %v21405_v31  ;;  %v6650_v10 = vrot.slane %v6636_v30, %v21405_v31  ;;  %19854 = vmatprep.subr.bf16.mxu1 %v28426_v11  ;;  %v23006_v27 = vld [vmem:[%s28419_s0 + $0xb2] sm:$0xff] }
 0x111   :  { %v20163_v20 = vpack.i.bf16 %v12464_v25, %v12447_v57  ;;  %v6651_v46 = vcombine.high %v6643_v59, %v6643_v59  ;;  %v22964_v58 = vrot.slane %v22938_v36, %v21405_v31  ;;  %v15371_v3 = vcombine.low %v3550_v19, %v22940_v18 }
 0x112   :  { %v22969_v22 = vcombine.high %v22958_v56, %v22958_v56  ;;  %v5599_v53 = vcombine.high %v19303_v13, %v19303_v13  ;;  %v5606_v52 = vrot.slane %v19303_v13, %v21405_v31  ;;  %v5622_v35 = vrot.slane %v19304_v28, %v21405_v31 }
 0x113   :  { %20164 = vrot.lane.b32.xlu0 %v20163_v20, %s21277_s9  ;;  %v15379_v50 = vrot.slane %v15371_v3, %v21405_v31  ;;  %v15388_v49 = vcombine.low %v6643_v59, %v6651_v46  ;;  %v15389_v45 = vcombine.low %v6650_v10, %v22964_v58  ;;  %v14391_v14 = vcombine.low %v22740_v34, %v22751_v29  ;;  %v23028_v20 = vld [vmem:[%s28419_s0 + $0xb1] sm:$0xff] }
 0x114   :  { %v15372_v41 = vcombine.low %v22958_v56, %v22969_v22  ;;  %v5613_v19 = vrot.slane %v5599_v53, %v21405_v31  ;;  %v5614_v9 = vcombine.high %v5606_v52, %v5606_v52  ;;  %v14392_v1 = vcombine.low %v22746_v42, %v22758_v24 }
 0x115   :  { %v15396_v63 = vrot.slane %v15388_v49, %v21405_v31  ;;  %v15403_v8 = vrot.slane %v15389_v45, %v21405_v31  ;;  %v14399_v26 = vrot.slane %v14391_v14, %v21405_v31  ;;  %v19902_v40 = vunpack.i.h.bf16 %v22973_v54  ;;  %v23046_v14 = vpop.permute.xlu1 %19909 }
 0x116   :  { %v15386_v62 = vrot.slane %v15372_v41, %v21405_v31  ;;  %v14406_v34 = vrot.slane %v14392_v1, %v21405_v31  ;;  %v14408_v29 = vcombine.low %v5606_v52, %v5614_v9  ;;  %v14409_v39 = vcombine.low %v5613_v19, %v5622_v35 }
 0x117   :  { %v15404_v7 = vcombine.low %v15396_v63, %v15403_v8  ;;  %v19901_v38 = vunpack.i.l.bf16 %v22973_v54  ;;  %vm18223_vm3 = vcmask 261120   ;;  %vm18273_vm4 = vcmask 326656  }
 0x118   :  { %v15387_v42 = vcombine.low %v15379_v50, %v15386_v62  ;;  %v14407_v51 = vcombine.low %v14399_v26, %v14406_v34  ;;  %v14416_v2 = vrot.slane %v14408_v29, %v21405_v31  ;;  %v14423_v60 = vrot.slane %v14409_v39, %v21405_v31 }
 0x119   :  { %v19897_v32 = vunpack.i.h.bf16 %v19895_v15  ;;  %v19896_v37 = vunpack.i.l.bf16 %v19895_v15  ;;  %v18224_v21 = vsel %vm18223_vm3, %v18174_v6, %v19891_v44  ;;  %v18225_v57 = vsel %vm18223_vm3, %v18175_v55, %v19892_v43 }
 0x11a   :  { %v20178_v30 = vpack.i.bf16 %v15404_v7, %v15387_v42  ;;  %v14424_v25 = vcombine.low %v14416_v2, %v14423_v60  ;;  %v8691_v33 = vcombine.high %v19304_v28, %v19304_v28  ;;  %v23008_v23 = vcombine.high %v5622_v35, %v5622_v35  ;;  %v19905_v2 = vpop.permute.xlu0 %19904 }
 0x11b   :  { %v18274_v59 = vsel %vm18273_vm4, %v18224_v21, %v19896_v37  ;;  %v18275_v13 = vsel %vm18273_vm4, %v18225_v57, %v19897_v32  ;;  %v8708_v10 = vcombine.high %v19471_v0, %v19471_v0  ;;  %v8715_v44 = vrot.slane %v19471_v0, %v21405_v31  ;;  %v2116_v32 = vld [vmem:[%s28419_s0 + $0x9a] sm:$0x3f] }
 0x11c   :  { %20179 = vrot.lane.b32.xlu1 %v20178_v30, %s21281_s13  ;;  %v20173_v43 = vpack.i.bf16 %v14424_v25, %v14407_v51  ;;  %v23018_v6 = vrot.slane %v8691_v33, %v21405_v31  ;;  %v23022_v28 = vrot.slane %v23006_v27, %v21405_v31  ;;  %v17331_v55 = vcombine.low %v5622_v35, %v23008_v23 }
 0x11d   :  { %v8722_v46 = vrot.slane %v8708_v10, %v21405_v31  ;;  %v8723_v3 = vcombine.high %v8715_v44, %v8715_v44  ;;  %v7655_v53 = vcombine.high %v22868_v61, %v22868_v61  ;;  %v23035_v52 = vcombine.high %v22881_v5, %v22881_v5 }
 0x11e   :  { %20174 = vrot.lane.b32.xlu0 %v20173_v43, %s21282_s18  ;;  %v23040_v35 = vcombine.high %v23018_v6, %v23018_v6  ;;  %v23043_v50 = vrot.slane %v17331_v55, %v21405_v31  ;;  %v7672_v49 = vcombine.high %v19415_v48, %v19415_v48  ;;  %v7679_v45 = vrot.slane %v19415_v48, %v21405_v31 }
 0x11f   :  { %v17348_v41 = vcombine.low %v8715_v44, %v8723_v3  ;;  %v17349_v61 = vcombine.low %v8722_v46, %v23022_v28  ;;  %v23050_v19 = vrot.slane %v7655_v53, %v21405_v31  ;;  %v23054_v9 = vrot.slane %v23028_v20, %v21405_v31  ;;  %v1080_v44 = vld [vmem:[%s28419_s0 + $0x99] sm:$0x3f] }
 0x120   :  { %v17332_v1 = vcombine.low %v23018_v6, %v23040_v35  ;;  %v7686_v63 = vrot.slane %v7672_v49, %v21405_v31  ;;  %v7687_v8 = vcombine.high %v7679_v45, %v7679_v45  ;;  %v16351_v26 = vcombine.low %v22881_v5, %v23035_v52 }
 0x121   :  { %v17356_v62 = vrot.slane %v17348_v41, %v21405_v31  ;;  %v17363_v34 = vrot.slane %v17349_v61, %v21405_v31  ;;  %v23065_v29 = vcombine.high %v23050_v19, %v23050_v19  ;;  %v19912_v39 = vunpack.i.h.bf16 %v23046_v14 }
 0x122   :  { %v23069_v15 = vrot.slane %v17332_v1, %v21405_v31  ;;  %v16359_v7 = vrot.slane %v16351_v26, %v21405_v31  ;;  %v16368_v42 = vcombine.low %v7679_v45, %v7687_v8  ;;  %v16369_v51 = vcombine.low %v7686_v63, %v23054_v9  ;;  %v23112_v26 = vpop.permute.xlu1 %19919 }
 0x123   :  { %v17364_v5 = vcombine.low %v17356_v62, %v17363_v34  ;;  %v16352_v60 = vcombine.low %v23050_v19, %v23065_v29  ;;  %v19911_v0 = vunpack.i.l.bf16 %v23046_v14  ;;  %vm18323_vm5 = vcmask 392192   ;;  %v23212_v14 = vld [vmem:[%s28419_s0 + $0xc0] sm:$0xff] }
 0x124   :  { %v17347_v37 = vcombine.low %v23043_v50, %v23069_v15  ;;  %v16376_v21 = vrot.slane %v16368_v42, %v21405_v31  ;;  %v16383_v57 = vrot.slane %v16369_v51, %v21405_v31  ;;  %vm18373_vm6 = vcmask 457728   ;;  %v23116_v42 = vpop.permute.xlu0 %19914 }
 0x125   :  { %v23084_v30 = vrot.slane %v16352_v60, %v21405_v31  ;;  %v19907_v25 = vunpack.i.h.bf16 %v19905_v2  ;;  %v19906_v33 = vunpack.i.l.bf16 %v19905_v2  ;;  %v18324_v10 = vsel %vm18323_vm5, %v18274_v59, %v19901_v38 }
 0x126   :  { %v20188_v48 = vpack.i.bf16 %v17364_v5, %v17347_v37  ;;  %v16384_v43 = vcombine.low %v16376_v21, %v16383_v57  ;;  %v18325_v55 = vsel %vm18323_vm5, %v18275_v13, %v19902_v40  ;;  %v2523_v46 = vcombine.high %v2116_v32, %v2116_v32  ;;  %v20945_v40 = vld [vmem:[%s28420_s1 + $0x20] ss:$0 sps:$4 sm:$0xff]  }
 0x127   :  { %v16367_v3 = vcombine.low %v16359_v7, %v23084_v30  ;;  %v23097_v53 = vsel %vm18373_vm6, %v18324_v10, %v19906_v33  ;;  %v23100_v49 = vsel %vm18373_vm6, %v18325_v55, %v19907_v25  ;;  %v2530_v38 = vrot.slane %v2116_v32, %v21405_v31  ;;  %v28_v32 = vld [vmem:[%s28419_s0 + $0x18] sm:$0x3f]  ;;  %v23128_v37 = vld [vmem:[%s28419_s0 + $0x20] sm:$0xff] }
 0x128   :  { %20189 = vrot.lane.b32.xlu1 %v20188_v48, %s21283_s21  ;;  %v2537_v59 = vrot.slane %v2523_v46, %v21405_v31  ;;  %v1487_v45 = vcombine.high %v1080_v44, %v1080_v44  ;;  %v1494_v54 = vrot.slane %v1080_v44, %v21405_v31  ;;  %vm18617_vm7 = vcmask 1043456  }
 0x129   :  { %v20183_v13 = vpack.i.bf16 %v16384_v43, %v16367_v3  ;;  %v2538_v41 = vcombine.high %v2530_v38, %v2530_v38  ;;  %v11486_v61 = vcombine.low %v22758_v24, %v2530_v38  ;;  %v18619_v5 = vsel %vm18617_vm7, %v20945_v40, 0  ;;  %v19249_v3 = vld [vmem:[%s28419_s0 + $0xa9] sm:$0x3f] }
 0x12a   :  { %v1501_v1 = vrot.slane %v1487_v45, %v21405_v31  ;;  %v1502_v63 = vcombine.high %v1494_v54, %v1494_v54  ;;  %v10506_v8 = vcombine.low %v22792_v47, %v1494_v54  ;;  %19634 = vmatpush3.bf16.msra.mxu0 %v18619_v5  ;;  %v19922_v47 = vunpack.i.h.bf16 %v23112_v26  ;;  %19859 = vmatpush3.bf16.msra.mxu1 %v18619_v5 }
 0x12b   :  { %20184 = vrot.lane.b32.xlu0 %v20183_v13, %s21284_s24  ;;  %v11500_v62 = vrot.slane %v11486_v61, %v21405_v31  ;;  %v11502_v34 = vcombine.low %v2538_v41, %v2537_v59  ;;  %v19917_v25 = vunpack.i.h.bf16 %v23116_v42  ;;  %v19916_v10 = vunpack.i.l.bf16 %v23116_v42 }
 0x12c   :  { %v10520_v51 = vrot.slane %v10506_v8, %v21405_v31  ;;  %v10522_v2 = vcombine.low %v1502_v63, %v1501_v1  ;;  %v170_v44 = vcombine.high %v22847_v17, %v22847_v17  ;;  %v185_v48 = vcombine.high %v22863_v12, %v22863_v12 }
 0x12d   :  { %v11501_v24 = vcombine.low %v22778_v16, %v11500_v62  ;;  %v11510_v60 = vrot.slane %v11502_v34, %v21405_v31  ;;  %v19921_v16 = vunpack.i.l.bf16 %v23112_v26  ;;  %v187_v55 = vcombine.high %v28_v32, %v28_v32 }
 0x12e   :  { %v10521_v21 = vcombine.low %v22805_v4, %v10520_v51  ;;  %v10530_v57 = vrot.slane %v10522_v2, %v21405_v31  ;;  %v194_v4 = vrot.slane %v28_v32, %v21405_v31  ;;  %v210_v46 = vrot.slane %v23128_v37, %v21405_v31  ;;  %v19193_v51 = vld [vmem:[%s28419_s0 + $0xa8] sm:$0x3f] }
 0x12f   :  { %v11518_v33 = vcombine.low %v11510_v60, %v23043_v50  ;;  %v184_v38 = vrot.slane %v170_v44, %v21405_v31  ;;  %v201_v17 = vrot.slane %v187_v55, %v21405_v31  ;;  %vm21286_vm8 = vmmov 0  }
 0x130   :  { %v10538_v43 = vcombine.low %v10530_v57, %v16359_v7  ;;  %v202_v45 = vcombine.high %v194_v4, %v194_v4  ;;  %v218_v54 = vcombine.high %v210_v46, %v210_v46  ;;  %19635 = vmatprep.mubr.msk.bf16.mxu0 %vm21286_vm8, %v28426_v11  ;;  %v4596_v40 = vcombine.high %v19249_v3, %v19249_v3 }
 0x131   :  { %v20198_v50 = vpack.i.bf16 %v11518_v33, %v11501_v24  ;;  %v186_v12 = vcombine.high %v184_v38, %v184_v38  ;;  %v9385_v7 = vcombine.low %v185_v48, %v184_v38  ;;  %v4603_v13 = vrot.slane %v19249_v3, %v21405_v31  ;;  %19703 = vmatprep.mubr.msk.bf16.mxu1 %vm21286_vm8, %v28426_v11 }
 0x132   :  { %v20193_v59 = vpack.i.bf16 %v10538_v43, %v10521_v21  ;;  %v9402_v41 = vcombine.low %v202_v45, %v201_v17  ;;  %v9403_v61 = vcombine.low %v210_v46, %v218_v54  ;;  %v23155_v1 = vcombine.high %v23054_v9, %v23054_v9  ;;  %v23187_v54 = vpop.permute.xlu1 %19929 }
 0x133   :  { %20199 = vrot.lane.b32.xlu1 %v20198_v50, %s21280_s12  ;;  %v13445_v63 = vcombine.low %v23035_v52, %v23050_v19  ;;  %v9386_v8 = vcombine.low %v186_v12, %v194_v4  ;;  %v9393_v62 = vrot.slane %v9385_v7, %v21405_v31  ;;  %v4610_v34 = vrot.slane %v4596_v40, %v21405_v31 }
 0x134   :  { %20194 = vrot.lane.b32.xlu0 %v20193_v59, %s21278_s10  ;;  %v4611_v42 = vcombine.high %v4603_v13, %v4603_v13  ;;  %v9410_v2 = vrot.slane %v9402_v41, %v21405_v31  ;;  %v9417_v5 = vrot.slane %v9403_v61, %v21405_v31  ;;  %v13446_v24 = vcombine.low %v23065_v29, %v4603_v13  ;;  %v19361_v61 = vld [vmem:[%s28419_s0 + $0xb8] sm:$0x3f] }
 0x135   :  { %v13453_v52 = vrot.slane %v13445_v63, %v21405_v31  ;;  %v9400_v19 = vrot.slane %v9386_v8, %v21405_v31  ;;  %v13463_v32 = vcombine.low %v23054_v9, %v23155_v1  ;;  %v3560_v33 = vcombine.high %v19193_v51, %v19193_v51 }
 0x136   :  { %v13462_v60 = vcombine.low %v4611_v42, %v4610_v34  ;;  %v9418_v21 = vcombine.low %v9410_v2, %v9417_v5  ;;  %v13460_v57 = vrot.slane %v13446_v24, %v21405_v31  ;;  %v3567_v44 = vrot.slane %v19193_v51, %v21405_v31  ;;  %v19305_v42 = vld [vmem:[%s28419_s0 + $0xaa] sm:$0x3f] }
 0x137   :  { %v9401_v48 = vcombine.low %v9393_v62, %v9400_v19  ;;  %v13477_v55 = vrot.slane %v13463_v32, %v21405_v31  ;;  %v23179_v29 = vcombine.high %v22964_v58, %v22964_v58  ;;  %v3574_v3 = vrot.slane %v3560_v33, %v21405_v31 }
 0x138   :  { %v13470_v43 = vrot.slane %v13462_v60, %v21405_v31  ;;  %v18077_v4 = vsel %vm18073_vm0, %v9418_v21, %v19917_v25  ;;  %v13461_v46 = vcombine.low %v13453_v52, %v13460_v57  ;;  %v3575_v50 = vcombine.high %v3567_v44, %v3567_v44  ;;  %v19925_v25 = vpop.permute.xlu0 %19924 }
 0x139   :  { %v18076_v38 = vsel %vm18073_vm0, %v9401_v48, %v19916_v10  ;;  %v12465_v17 = vcombine.low %v22940_v18, %v22958_v56  ;;  %v12466_v45 = vcombine.low %v22969_v22, %v3567_v44  ;;  %v12483_v7 = vcombine.low %v22964_v58, %v23179_v29 }
 0x13a   :  { %v13478_v59 = vcombine.low %v13470_v43, %v13477_v55  ;;  %v12482_v12 = vcombine.low %v3575_v50, %v3574_v3  ;;  %vm18423_vm9 = vcmask 523264   ;;  %vm18541_vm10 = vcmask 588800   ;;  %v23259_v50 = vpop.permute.xlu1 %19939 }
 0x13b   :  { %v12473_v13 = vrot.slane %v12465_v17, %v21405_v31  ;;  %v12480_v10 = vrot.slane %v12466_v45, %v21405_v31  ;;  %v18424_v18 = vsel %vm18423_vm9, %v23097_v53, %v19911_v0  ;;  %v12497_v22 = vrot.slane %v12483_v7, %v21405_v31 }
 0x13c   :  { %v20208_v40 = vpack.i.bf16 %v13478_v59, %v13461_v46  ;;  %v12490_v56 = vrot.slane %v12482_v12, %v21405_v31  ;;  %v18425_v58 = vsel %vm18423_vm9, %v23100_v49, %v19912_v39  ;;  %v19932_v41 = vunpack.i.h.bf16 %v23187_v54  ;;  %v19935_v45 = vpop.permute.xlu0 %19934 }
 0x13d   :  { %v12481_v63 = vcombine.low %v12473_v13, %v12480_v10  ;;  %v18473_v8 = vpack.c.bf16 %v18425_v58, %v18424_v18  ;;  %v19931_v0 = vunpack.i.l.bf16 %v23187_v54  ;;  %v19927_v53 = vunpack.i.h.bf16 %v19925_v25 }
 0x13e   :  { %20209 = vrot.lane.b32.xlu1 %v20208_v40, %s21279_s11  ;;  %v12498_v62 = vcombine.low %v12490_v56, %v12497_v22  ;;  %v19926_v39 = vunpack.i.l.bf16 %v19925_v25  ;;  %v18126_v49 = vsel %vm18123_vm1, %v18076_v38, %v19921_v16  ;;  %v18127_v34 = vsel %vm18123_vm1, %v18077_v4, %v19922_v47  ;;  %v19473_v22 = vld [vmem:[%s28419_s0 + $0xba] sm:$0x3f] }
 0x13f   :  { %19636 = vmatmul.mubr.msk.bf16.vlgmr.msra.gmra.mrb[0].mxu0 %vm18541_vm10, %v18473_v8  ;;  %v18177_v51 = vsel %vm18173_vm2, %v18127_v34, %v19927_v53  ;;  %v6652_v2 = vcombine.high %v22938_v36, %v22938_v36  ;;  %v6669_v5 = vcombine.high %v19361_v61, %v19361_v61  ;;  %v6676_v16 = vrot.slane %v19361_v61, %v21405_v31  ;;  %v23281_v53 = vld [vmem:[%s28419_s0 + $0xc2] sm:$0xff]  ;;  %v19417_v34 = vld [vmem:[%s28419_s0 + $0xb9] sm:$0x3f] }
 0x140   :  { %v20203_v24 = vpack.i.bf16 %v12498_v62, %v12481_v63  ;;  %v18176_v52 = vsel %vm18173_vm2, %v18126_v49, %v19926_v39  ;;  %v23231_v26 = vrot.slane %v23212_v14, %v21405_v31  ;;  %19639 = vmatprep.mubr.msk.bf16.mxu0 %vm21286_vm8, %v28426_v11  ;;  %v5632_v60 = vcombine.high %v19305_v42, %v19305_v42 }
 0x141   :  { %v23236_v47 = vrot.slane %v6652_v2, %v21405_v31  ;;  %v6683_v19 = vrot.slane %v6669_v5, %v21405_v31  ;;  %v6684_v36 = vcombine.high %v6676_v16, %v6676_v16  ;;  %v5639_v21 = vrot.slane %v19305_v42, %v21405_v31 }
 0x142   :  { %20204 = vrot.lane.b32.xlu0 %v20203_v24, %s21277_s9  ;;  %v23242_v32 = vcombine.high %v23231_v26, %v23231_v26  ;;  %v5663_v57 = vcombine.high %v23022_v28, %v23022_v28  ;;  %v5646_v48 = vrot.slane %v5632_v60, %v21405_v31  ;;  %v14425_v43 = vcombine.low %v23008_v23, %v23018_v6 }
 0x143   :  { %v23249_v33 = vcombine.high %v23236_v47, %v23236_v47  ;;  %v15405_v44 = vcombine.low %v23179_v29, %v23236_v47  ;;  %v15422_v55 = vcombine.low %v6684_v36, %v6683_v19  ;;  %v5647_v46 = vcombine.high %v5639_v21, %v5639_v21 }
 0x144   :  { %v15423_v4 = vcombine.low %v23231_v26, %v23242_v32  ;;  %v14426_v3 = vcombine.low %v23040_v35, %v5639_v21  ;;  %v14433_v29 = vrot.slane %v14425_v43, %v21405_v31  ;;  %v14443_v17 = vcombine.low %v23022_v28, %v5663_v57 }
 0x145   :  { %v15406_v38 = vcombine.low %v23249_v33, %v6676_v16  ;;  %v15413_v59 = vrot.slane %v15405_v44, %v21405_v31  ;;  %v15430_v23 = vrot.slane %v15422_v55, %v21405_v31  ;;  %v14442_v12 = vcombine.low %v5647_v46, %v5646_v48  ;;  %v23326_v46 = vpop.permute.xlu1 %19949 }
 0x146   :  { %v15437_v6 = vrot.slane %v15423_v4, %v21405_v31  ;;  %v14440_v54 = vrot.slane %v14426_v3, %v21405_v31  ;;  %v14457_v7 = vrot.slane %v14443_v17, %v21405_v31  ;;  %v19942_v25 = vunpack.i.h.bf16 %v23259_v50 }
 0x147   :  { %v15420_v35 = vrot.slane %v15406_v38, %v21405_v31  ;;  %v19941_v40 = vunpack.i.l.bf16 %v23259_v50  ;;  %v14450_v18 = vrot.slane %v14442_v12, %v21405_v31  ;;  %v19937_v56 = vunpack.i.h.bf16 %v19935_v45 }
 0x148   :  { %v15438_v13 = vcombine.low %v15430_v23, %v15437_v6  ;;  %v14441_v10 = vcombine.low %v14433_v29, %v14440_v54  ;;  %v19936_v61 = vunpack.i.l.bf16 %v19935_v45  ;;  %v18226_v63 = vsel %vm18223_vm3, %v18176_v52, %v19931_v0  ;;  %v19945_v29 = vpop.permute.xlu0 %19944 }
 0x149   :  { %v15421_v58 = vcombine.low %v15413_v59, %v15420_v35  ;;  %v18227_v8 = vsel %vm18223_vm3, %v18177_v51, %v19932_v41  ;;  %v14458_v62 = vcombine.low %v14450_v18, %v14457_v7  ;;  %v8724_v49 = vcombine.high %v23006_v27, %v23006_v27  ;;  %v23301_v27 = vld [vmem:[%s28419_s0 + $0xc1] sm:$0xff] }
 0x14a   :  { %v18277_v39 = vsel %vm18273_vm4, %v18227_v8, %v19937_v56  ;;  %v18276_v0 = vsel %vm18273_vm4, %v18226_v63, %v19936_v61  ;;  %v8741_v2 = vcombine.high %v19473_v22, %v19473_v22  ;;  %v8748_v41 = vrot.slane %v19473_v22, %v21405_v31 }
 0x14b   :  { %v20218_v42 = vpack.i.bf16 %v15438_v13, %v15421_v58  ;;  %v20213_v51 = vpack.i.bf16 %v14458_v62, %v14441_v10  ;;  %v23292_v5 = vrot.slane %v8724_v49, %v21405_v31  ;;  %v23296_v24 = vrot.slane %v23281_v53, %v21405_v31 }
 0x14c   :  { %v7688_v52 = vcombine.high %v23028_v20, %v23028_v20  ;;  %v8755_v16 = vrot.slane %v8741_v2, %v21405_v31  ;;  %v8756_v19 = vcombine.high %v8748_v41, %v8748_v41  ;;  %v7705_v60 = vcombine.high %v19417_v34, %v19417_v34  ;;  %v23373_v2 = vpop.permute.xlu1 %19959 }
 0x14d   :  { %20219 = vrot.lane.b32.xlu1 %v20218_v42, %s21281_s13  ;;  %20214 = vrot.lane.b32.xlu0 %v20213_v51, %s21282_s18  ;;  %v23310_v36 = vcombine.high %v23292_v5, %v23292_v5  ;;  %v23314_v21 = vcombine.high %v23296_v24, %v23296_v24  ;;  %v17365_v44 = vcombine.low %v5663_v57, %v23292_v5  ;;  %v19952_v7 = vunpack.i.h.bf16 %v23326_v46  ;;  %v1082_v42 = vld [vmem:[%s28419_s0 + $0xa9] sm:$0x3f] }
 0x14e   :  { %v23318_v20 = vrot.slane %v7688_v52, %v21405_v31  ;;  %v17382_v48 = vcombine.low %v8756_v19, %v8755_v16  ;;  %v7712_v43 = vrot.slane %v19417_v34, %v21405_v31  ;;  %v7719_v55 = vrot.slane %v7705_v60, %v21405_v31  ;;  %v23379_v19 = vpop.permute.xlu0 %19954 }
 0x14f   :  { %v23324_v4 = vrot.slane %v23301_v27, %v21405_v31  ;;  %v17366_v3 = vcombine.low %v23310_v36, %v8748_v41  ;;  %v23330_v38 = vrot.slane %v17365_v44, %v21405_v31  ;;  %v17383_v57 = vcombine.low %v23296_v24, %v23314_v21 }
 0x150   :  { %v23336_v59 = vcombine.high %v23318_v20, %v23318_v20  ;;  %v17390_v17 = vrot.slane %v17382_v48, %v21405_v31  ;;  %v7720_v45 = vcombine.high %v7712_v43, %v7712_v43  ;;  %v16385_v6 = vcombine.low %v23155_v1, %v23318_v20  ;;  %v2118_v1 = vld [vmem:[%s28419_s0 + $0xaa] sm:$0x3f] }
 0x151   :  { %v23341_v23 = vcombine.high %v23324_v4, %v23324_v4  ;;  %v17380_v54 = vrot.slane %v17366_v3, %v21405_v31  ;;  %v23347_v12 = vrot.slane %v17383_v57, %v21405_v31  ;;  %v19951_v56 = vunpack.i.l.bf16 %v23326_v46  ;;  %v19364_v46 = vld [vmem:[%s28419_s0 + $0xd0] sm:$0xff] }
 0x152   :  { %v16386_v35 = vcombine.low %v23336_v59, %v7712_v43  ;;  %v23352_v13 = vrot.slane %v16385_v6, %v21405_v31  ;;  %v16402_v10 = vcombine.low %v7720_v45, %v7719_v55  ;;  %v19947_v63 = vunpack.i.h.bf16 %v19945_v29  ;;  %v30_v43 = vld [vmem:[%s28419_s0 + $0x28] sm:$0x3f] }
 0x153   :  { %v16403_v18 = vcombine.low %v23324_v4, %v23341_v23  ;;  %v17381_v22 = vcombine.low %v23330_v38, %v17380_v54  ;;  %v17398_v58 = vcombine.low %v17390_v17, %v23347_v12  ;;  %v19946_v49 = vunpack.i.l.bf16 %v19945_v29  ;;  %v31_v17 = vld [vmem:[%s28419_s0 + $0x30] sm:$0xff] }
 0x154   :  { %v16400_v61 = vrot.slane %v16386_v35, %v21405_v31  ;;  %v16410_v8 = vrot.slane %v16402_v10, %v21405_v31  ;;  %v18326_v34 = vsel %vm18323_vm5, %v18276_v0, %v19941_v40  ;;  %v18327_v52 = vsel %vm18323_vm5, %v18277_v39, %v19942_v25 }
 0x155   :  { %v23365_v62 = vrot.slane %v16403_v18, %v21405_v31  ;;  %v20228_v41 = vpack.i.bf16 %v17398_v58, %v17381_v22  ;;  %v2556_v16 = vcombine.high %v2118_v1, %v2118_v1  ;;  %v23383_v40 = vsel %vm18373_vm6, %v18326_v34, %v19946_v49 }
 0x156   :  { %v16401_v51 = vcombine.low %v23352_v13, %v16400_v61  ;;  %v23386_v0 = vsel %vm18373_vm6, %v18327_v52, %v19947_v63  ;;  %v2563_v44 = vrot.slane %v2118_v1, %v21405_v31  ;;  %v1520_v50 = vcombine.high %v1082_v42, %v1082_v42 }
 0x157   :  { %v16418_v60 = vcombine.low %v16410_v8, %v23365_v62  ;;  %20229 = vrot.lane.b32.xlu1 %v20228_v41, %s21283_s21  ;;  %v2570_v48 = vrot.slane %v2556_v16, %v21405_v31  ;;  %v1527_v25 = vrot.slane %v1082_v42, %v21405_v31  ;;  %v19962_v39 = vunpack.i.h.bf16 %v23373_v2 }
 0x158   :  { %v2571_v3 = vcombine.high %v2563_v44, %v2563_v44  ;;  %v19961_v57 = vunpack.i.l.bf16 %v23373_v2  ;;  %v19957_v29 = vunpack.i.h.bf16 %v23379_v19  ;;  %v1534_v6 = vrot.slane %v1520_v50, %v21405_v31 }
 0x159   :  { %v20223_v55 = vpack.i.bf16 %v16418_v60, %v16401_v51  ;;  %v11536_v45 = vcombine.low %v2570_v48, %v23022_v28  ;;  %v1535_v54 = vcombine.high %v1527_v25, %v1527_v25  ;;  %v19956_v35 = vunpack.i.l.bf16 %v23379_v19  ;;  %v23468_v19 = vpop.permute.xlu1 %19969 }
 0x15a   :  { %v11520_v10 = vcombine.low %v2563_v44, %v2571_v3  ;;  %v203_v18 = vcombine.high %v23128_v37, %v23128_v37  ;;  %v220_v1 = vcombine.high %v30_v43, %v30_v43  ;;  %v227_v22 = vrot.slane %v30_v43, %v21405_v31 }
 0x15b   :  { %20224 = vrot.lane.b32.xlu0 %v20223_v55, %s21284_s24  ;;  %v11544_v58 = vrot.slane %v11536_v45, %v21405_v31  ;;  %v10540_v61 = vcombine.low %v1527_v25, %v1535_v54  ;;  %v10556_v63 = vcombine.low %v1534_v6, %v23054_v9  ;;  %v236_v28 = vcombine.high %v31_v17, %v31_v17  ;;  %v19251_v9 = vld [vmem:[%s28419_s0 + $0xb9] sm:$0x3f] }
 0x15c   :  { %v11534_v8 = vrot.slane %v11520_v10, %v21405_v31  ;;  %v217_v49 = vrot.slane %v203_v18, %v21405_v31  ;;  %v234_v34 = vrot.slane %v220_v1, %v21405_v31  ;;  %v235_v42 = vcombine.high %v227_v22, %v227_v22 }
 0x15d   :  { %v11552_v41 = vcombine.low %v11544_v58, %v23330_v38  ;;  %v10554_v37 = vrot.slane %v10540_v61, %v21405_v31  ;;  %v10564_v51 = vrot.slane %v10556_v63, %v21405_v31  ;;  %v243_v52 = vrot.slane %v31_v17, %v21405_v31 }
 0x15e   :  { %v11535_v16 = vcombine.low %v23069_v15, %v11534_v8  ;;  %v219_v60 = vcombine.high %v217_v49, %v217_v49  ;;  %v23422_v44 = vrot.slane %v236_v28, %v21405_v31  ;;  %v9420_v48 = vcombine.low %v227_v22, %v235_v42  ;;  %v19195_v15 = vld [vmem:[%s28419_s0 + $0xb8] sm:$0x3f] }
 0x15f   :  { %v10555_v50 = vcombine.low %v23084_v30, %v10554_v37  ;;  %v10572_v38 = vcombine.low %v10564_v51, %v23352_v13  ;;  %v251_v25 = vcombine.high %v243_v52, %v243_v52  ;;  %v9436_v43 = vcombine.low %v234_v34, %v243_v52 }
 0x160   :  { %v20238_v55 = vpack.i.bf16 %v11552_v41, %v11535_v16  ;;  %v9419_v3 = vcombine.low %v217_v49, %v219_v60  ;;  %v9434_v17 = vrot.slane %v9420_v48, %v21405_v31  ;;  %v4629_v45 = vcombine.high %v19251_v9, %v19251_v9 }
 0x161   :  { %v20233_v6 = vpack.i.bf16 %v10572_v38, %v10555_v50  ;;  %v9437_v54 = vcombine.low %v251_v25, %v23422_v44  ;;  %v9444_v10 = vrot.slane %v9436_v43, %v21405_v31  ;;  %v4636_v30 = vrot.slane %v19251_v9, %v21405_v31 }
 0x162   :  { %20239 = vrot.lane.b32.xlu1 %v20238_v55, %s21280_s12  ;;  %v9427_v13 = vrot.slane %v9419_v3, %v21405_v31  ;;  %v4643_v18 = vrot.slane %v4629_v45, %v21405_v31  ;;  %v4645_v1 = vcombine.high %v23301_v27, %v23301_v27  ;;  %v13479_v22 = vcombine.low %v23318_v20, %v23336_v59 }
 0x163   :  { %20234 = vrot.lane.b32.xlu0 %v20233_v6, %s21278_s10  ;;  %v9451_v58 = vrot.slane %v9437_v54, %v21405_v31  ;;  %v4644_v61 = vcombine.high %v4636_v30, %v4636_v30  ;;  %v3593_v63 = vcombine.high %v19195_v15, %v19195_v15  ;;  %v3600_v28 = vrot.slane %v19195_v15, %v21405_v31 }
 0x164   :  { %v9435_v8 = vcombine.low %v9427_v13, %v9434_v17  ;;  %v23444_v49 = vrot.slane %v4645_v1, %v21405_v31  ;;  %v13487_v34 = vrot.slane %v13479_v22, %v21405_v31  ;;  %v13496_v42 = vcombine.low %v4643_v18, %v23324_v4  ;;  %v19307_v1 = vld [vmem:[%s28419_s0 + $0xba] sm:$0x3f] }
 0x165   :  { %v9452_v27 = vcombine.low %v9444_v10, %v9451_v58  ;;  %v13480_v41 = vcombine.low %v4636_v30, %v4644_v61  ;;  %v3607_v20 = vrot.slane %v3593_v63, %v21405_v31  ;;  %v3608_v37 = vcombine.high %v3600_v28, %v3600_v28 }
 0x166   :  { %v18078_v51 = vsel %vm18073_vm0, %v9435_v8, %v19956_v35  ;;  %v13497_v52 = vcombine.low %v23341_v23, %v23444_v49  ;;  %v13504_v9 = vrot.slane %v13496_v42, %v21405_v31  ;;  %v3609_v16 = vcombine.high %v23212_v14, %v23212_v14 }
 0x167   :  { %v18079_v60 = vsel %vm18073_vm0, %v9452_v27, %v19957_v29  ;;  %v13494_v4 = vrot.slane %v13480_v41, %v21405_v31  ;;  %v12499_v48 = vcombine.low %v23236_v47, %v23249_v33  ;;  %v12500_v50 = vcombine.low %v3600_v28, %v3608_v37  ;;  %v19965_v29 = vpop.permute.xlu0 %19964  ;;  %v23514_v41 = vpop.permute.xlu1 %19979 }
 0x168   :  { %v13511_v35 = vrot.slane %v13497_v52, %v21405_v31  ;;  %v3623_v38 = vrot.slane %v3609_v16, %v21405_v31  ;;  %v12516_v23 = vcombine.low %v3607_v20, %v23231_v26  ;;  %v18426_v14 = vsel %vm18423_vm9, %v23383_v40, %v19951_v56  ;;  %v19363_v56 = vld [vmem:[%s28419_s0 + $0xc8] sm:$0x3f] }
 0x169   :  { %v13495_v25 = vcombine.low %v13487_v34, %v13494_v4  ;;  %v12507_v43 = vrot.slane %v12499_v48, %v21405_v31  ;;  %v12514_v47 = vrot.slane %v12500_v50, %v21405_v31  ;;  %v18427_v33 = vsel %vm18423_vm9, %v23386_v0, %v19952_v7 }
 0x16a   :  { %v13512_v55 = vcombine.low %v13504_v9, %v13511_v35  ;;  %v12517_v26 = vcombine.low %v23242_v32, %v3623_v38  ;;  %v12524_v3 = vrot.slane %v12516_v23, %v21405_v31  ;;  %v18474_v17 = vpack.c.bf16 %v18427_v33, %v18426_v14 }
 0x16b   :  { %v12515_v40 = vcombine.low %v12507_v43, %v12514_v47  ;;  %v19972_v45 = vunpack.i.h.bf16 %v23468_v19  ;;  %v19971_v15 = vunpack.i.l.bf16 %v23468_v19  ;;  %v19967_v6 = vunpack.i.h.bf16 %v19965_v29  ;;  %v19975_v48 = vpop.permute.xlu0 %19974 }
 0x16c   :  { %v20248_v7 = vpack.i.bf16 %v13512_v55, %v13495_v25  ;;  %v12531_v32 = vrot.slane %v12517_v26, %v21405_v31  ;;  %19640 = vmatmul.mubr.msk.bf16.gmra.mrb[4].mxu0 %vm18541_vm10, %v18474_v17  ;;  %v19966_v0 = vunpack.i.l.bf16 %v19965_v29  ;;  %v18128_v54 = vsel %vm18123_vm1, %v18078_v51, %v19961_v57  ;;  %v19475_v17 = vld [vmem:[%s28419_s0 + $0xca] sm:$0x3f] }
 0x16d   :  { %v18129_v10 = vsel %vm18123_vm1, %v18079_v60, %v19962_v39  ;;  %v23494_v30 = vcombine.high %v3623_v38, %v3623_v38  ;;  %v6702_v13 = vcombine.high %v19363_v56, %v19363_v56  ;;  %v6709_v18 = vrot.slane %v19363_v56, %v21405_v31  ;;  %19643 = vmatprep.mubr.msk.bf16.mxu0 %vm21286_vm8, %v28426_v11 }
 0x16e   :  { %20249 = vrot.lane.b32.xlu1 %v20248_v7, %s21279_s11  ;;  %v12532_v22 = vcombine.low %v12524_v3, %v12531_v32  ;;  %v18178_v57 = vsel %vm18173_vm2, %v18128_v54, %v19966_v0  ;;  %v18179_v2 = vsel %vm18173_vm2, %v18129_v10, %v19967_v6  ;;  %v6718_v39 = vcombine.high %v19364_v46, %v19364_v46  ;;  %v19419_v54 = vld [vmem:[%s28419_s0 + $0xc9] sm:$0x3f] }
 0x16f   :  { %v6716_v58 = vrot.slane %v6702_v13, %v21405_v31  ;;  %v6717_v61 = vcombine.high %v6709_v18, %v6709_v18  ;;  %v23507_v63 = vrot.slane %v19364_v46, %v21405_v31  ;;  %v15439_v28 = vcombine.low %v3623_v38, %v23494_v30 }
 0x170   :  { %v20243_v8 = vpack.i.bf16 %v12532_v22, %v12515_v40  ;;  %v23511_v34 = vrot.slane %v6718_v39, %v21405_v31  ;;  %v5665_v42 = vcombine.high %v19307_v1, %v19307_v1  ;;  %v5672_v27 = vrot.slane %v19307_v1, %v21405_v31 }
 0x171   :  { %v23518_v20 = vcombine.high %v23507_v63, %v23507_v63  ;;  %v15440_v37 = vcombine.low %v6709_v18, %v6717_v61  ;;  %v15447_v51 = vrot.slane %v15439_v28, %v21405_v31  ;;  %v15456_v52 = vcombine.low %v6716_v58, %v23507_v63 }
 0x172   :  { %20244 = vrot.lane.b32.xlu0 %v20243_v8, %s21277_s9  ;;  %v5679_v9 = vrot.slane %v5665_v42, %v21405_v31  ;;  %v5680_v16 = vcombine.high %v5672_v27, %v5672_v27  ;;  %v5681_v60 = vcombine.high %v23281_v53, %v23281_v53  ;;  %v14459_v4 = vcombine.low %v23292_v5, %v23310_v36 }
 0x173   :  { %v15454_v50 = vrot.slane %v15440_v37, %v21405_v31  ;;  %v15457_v35 = vcombine.low %v23518_v20, %v23511_v34  ;;  %v15464_v38 = vrot.slane %v15456_v52, %v21405_v31  ;;  %v19982_v23 = vunpack.i.h.bf16 %v23514_v41 }
 0x174   :  { %v5695_v14 = vrot.slane %v5681_v60, %v21405_v31  ;;  %v14460_v19 = vcombine.low %v5672_v27, %v5680_v16  ;;  %v14467_v29 = vrot.slane %v14459_v4, %v21405_v31  ;;  %v14476_v53 = vcombine.low %v5679_v9, %v23296_v24  ;;  %v19476_v24 = vld [vmem:[%s28419_s0 + $0xd2] sm:$0xff] }
 0x175   :  { %v15455_v25 = vcombine.low %v15447_v51, %v15454_v50  ;;  %v15471_v5 = vrot.slane %v15457_v35, %v21405_v31  ;;  %v19981_v43 = vunpack.i.l.bf16 %v23514_v41  ;;  %v19977_v47 = vunpack.i.h.bf16 %v19975_v48  ;;  %v23582_v51 = vpop.permute.xlu1 %19989 }
 0x176   :  { %v14474_v33 = vrot.slane %v14460_v19, %v21405_v31  ;;  %v14477_v55 = vcombine.low %v23314_v21, %v5695_v14  ;;  %v14484_v26 = vrot.slane %v14476_v53, %v21405_v31  ;;  %v19976_v3 = vunpack.i.l.bf16 %v19975_v48 }
 0x177   :  { %v15472_v56 = vcombine.low %v15464_v38, %v15471_v5  ;;  %v18228_v40 = vsel %vm18223_vm3, %v18178_v57, %v19971_v15  ;;  %v18229_v6 = vsel %vm18223_vm3, %v18179_v2, %v19972_v45  ;;  %v23549_v46 = vcombine.high %v5695_v14, %v5695_v14  ;;  %v19420_v57 = vld [vmem:[%s28419_s0 + $0xd1] sm:$0xff]  ;;  %v19985_v38 = vpop.permute.xlu0 %19984 }
 0x178   :  { %v14475_v7 = vcombine.low %v14467_v29, %v14474_v33  ;;  %v14491_v21 = vrot.slane %v14477_v55, %v21405_v31  ;;  %v18278_v32 = vsel %vm18273_vm4, %v18228_v40, %v19976_v3  ;;  %v18279_v0 = vsel %vm18273_vm4, %v18229_v6, %v19977_v47  ;;  %v2120_v33 = vld [vmem:[%s28419_s0 + $0xba] sm:$0x3f] }
 0x179   :  { %v20258_v10 = vpack.i.bf16 %v15472_v56, %v15455_v25  ;;  %v8774_v13 = vcombine.high %v19475_v17, %v19475_v17  ;;  %v8781_v18 = vrot.slane %v19475_v17, %v21405_v31  ;;  %v8790_v15 = vcombine.high %v19476_v24, %v19476_v24 }
 0x17a   :  { %v14492_v1 = vcombine.low %v14484_v26, %v14491_v21  ;;  %v23559_v45 = vrot.slane %v19476_v24, %v21405_v31  ;;  %v17399_v22 = vcombine.low %v5695_v14, %v23549_v46  ;;  %v23567_v2 = vcombine.high %v23444_v49, %v23444_v49 }
 0x17b   :  { %20259 = vrot.lane.b32.xlu1 %v20258_v10, %s21281_s13  ;;  %v8788_v39 = vrot.slane %v8774_v13, %v21405_v31  ;;  %v8789_v58 = vcombine.high %v8781_v18, %v8781_v18  ;;  %v23572_v61 = vrot.slane %v8790_v15, %v21405_v31  ;;  %v7738_v28 = vcombine.high %v19419_v54, %v19419_v54  ;;  %v1084_v13 = vld [vmem:[%s28419_s0 + $0xb9] sm:$0x3f] }
 0x17c   :  { %v20253_v8 = vpack.i.bf16 %v14492_v1, %v14475_v7  ;;  %v23576_v42 = vcombine.high %v23559_v45, %v23559_v45  ;;  %v23579_v27 = vrot.slane %v17399_v22, %v21405_v31  ;;  %v7745_v37 = vrot.slane %v19419_v54, %v21405_v31 }
 0x17d   :  { %v17400_v52 = vcombine.low %v8781_v18, %v8789_v58  ;;  %v17416_v9 = vcombine.low %v8788_v39, %v23559_v45  ;;  %v7752_v16 = vrot.slane %v7738_v28, %v21405_v31  ;;  %v7754_v60 = vcombine.high %v19420_v57, %v19420_v57 }
 0x17e   :  { %20254 = vrot.lane.b32.xlu0 %v20253_v8, %s21282_s18  ;;  %v17417_v4 = vcombine.low %v23576_v42, %v23572_v61  ;;  %v7753_v48 = vcombine.high %v7745_v37, %v7745_v37  ;;  %v23590_v50 = vrot.slane %v19420_v57, %v21405_v31  ;;  %v16419_v35 = vcombine.low %v23444_v49, %v23567_v2  ;;  %v23637_v57 = vpop.permute.xlu1 %19999 }
 0x17f   :  { %v17414_v14 = vrot.slane %v17400_v52, %v21405_v31  ;;  %v17424_v19 = vrot.slane %v17416_v9, %v21405_v31  ;;  %v23597_v29 = vrot.slane %v7754_v60, %v21405_v31  ;;  %v19992_v53 = vunpack.i.h.bf16 %v23582_v51 }
 0x180   :  { %v23601_v25 = vrot.slane %v17417_v4, %v21405_v31  ;;  %v23605_v5 = vcombine.high %v23590_v50, %v23590_v50  ;;  %v16420_v47 = vcombine.low %v7745_v37, %v7753_v48  ;;  %v23608_v49 = vrot.slane %v16419_v35, %v21405_v31  ;;  %v23649_v37 = vpop.permute.xlu0 %19994  ;;  %v32_v35 = vld [vmem:[%s28419_s0 + $0x38] sm:$0x3f] }
 0x181   :  { %v17415_v55 = vcombine.low %v23579_v27, %v17414_v14  ;;  %v16436_v26 = vcombine.low %v7752_v16, %v23590_v50  ;;  %v19991_v3 = vunpack.i.l.bf16 %v23582_v51  ;;  %v19987_v17 = vunpack.i.h.bf16 %v19985_v38 }
 0x182   :  { %v17432_v24 = vcombine.low %v17424_v19, %v23601_v25  ;;  %v16434_v56 = vrot.slane %v16420_v47, %v21405_v31  ;;  %v16437_v40 = vcombine.low %v23605_v5, %v23597_v29  ;;  %v19986_v6 = vunpack.i.l.bf16 %v19985_v38 }
 0x183   :  { %v16444_v7 = vrot.slane %v16436_v26, %v21405_v31  ;;  %v18328_v21 = vsel %vm18323_vm5, %v18278_v32, %v19981_v43  ;;  %v18329_v54 = vsel %vm18323_vm5, %v18279_v0, %v19982_v23  ;;  %v2589_v10 = vcombine.high %v2120_v33, %v2120_v33 }
 0x184   :  { %v20268_v18 = vpack.i.bf16 %v17432_v24, %v17415_v55  ;;  %v16435_v15 = vcombine.low %v23608_v49, %v16434_v56  ;;  %v23632_v1 = vrot.slane %v16437_v40, %v21405_v31  ;;  %v23635_v22 = vsel %vm18373_vm6, %v18328_v21, %v19986_v6 }
 0x185   :  { %v23640_v41 = vsel %vm18373_vm6, %v18329_v54, %v19987_v17  ;;  %v2596_v23 = vrot.slane %v2120_v33, %v21405_v31  ;;  %v2603_v43 = vrot.slane %v2589_v10, %v21405_v31  ;;  %v1553_v0 = vcombine.high %v1084_v13, %v1084_v13 }
 0x186   :  { %20269 = vrot.lane.b32.xlu1 %v20268_v18, %s21283_s21  ;;  %v16452_v32 = vcombine.low %v16444_v7, %v23632_v1  ;;  %v1560_v39 = vrot.slane %v1084_v13, %v21405_v31  ;;  %v20002_v8 = vunpack.i.h.bf16 %v23637_v57  ;;  %v20001_v14 = vunpack.i.l.bf16 %v23637_v57 }
 0x187   :  { %v2604_v58 = vcombine.high %v2596_v23, %v2596_v23  ;;  %v11553_v28 = vcombine.low %v23310_v36, %v2596_v23  ;;  %v1567_v9 = vrot.slane %v1553_v0, %v21405_v31  ;;  %v19997_v19 = vunpack.i.h.bf16 %v23649_v37 }
 0x188   :  { %v20263_v52 = vpack.i.bf16 %v16452_v32, %v16435_v15  ;;  %v1568_v16 = vcombine.high %v1560_v39, %v1560_v39  ;;  %v10573_v60 = vcombine.low %v23336_v59, %v1560_v39  ;;  %v33_v59 = vld [vmem:[%s28419_s0 + $0x40] sm:$0xff]  ;;  %v11586_v33 = vcombine.low %v23347_v12, %v23579_v27  ;;  %v19253_v12 = vld [vmem:[%s28419_s0 + $0xc9] sm:$0x3f] }
 0x189   :  { %v11554_v4 = vcombine.low %v2604_v58, %v2603_v43  ;;  %v11561_v48 = vrot.slane %v11553_v28, %v21405_v31  ;;  %v19996_v55 = vunpack.i.l.bf16 %v23649_v37  ;;  %v252_v17 = vcombine.high %v23422_v44, %v23422_v44  ;;  %v19197_v28 = vld [vmem:[%s28419_s0 + $0xc8] sm:$0x3f] }
 0x18a   :  { %20264 = vrot.lane.b32.xlu0 %v20263_v52, %s21284_s24  ;;  %v10574_v36 = vcombine.low %v1568_v16, %v1567_v9  ;;  %v10581_v38 = vrot.slane %v10573_v60, %v21405_v31  ;;  %v253_v24 = vcombine.high %v32_v35, %v32_v35  ;;  %v260_v56 = vrot.slane %v32_v35, %v21405_v31 }
 0x18b   :  { %v11568_v47 = vrot.slane %v11554_v4, %v21405_v31  ;;  %v10606_v6 = vcombine.low %v23365_v62, %v23608_v49  ;;  %v269_v7 = vcombine.high %v33_v59, %v33_v59  ;;  %v276_v21 = vrot.slane %v33_v59, %v21405_v31 }
 0x18c   :  { %v10588_v26 = vrot.slane %v10574_v36, %v21405_v31  ;;  %v267_v54 = vrot.slane %v253_v24, %v21405_v31  ;;  %v268_v10 = vcombine.high %v260_v56, %v260_v56  ;;  %v9453_v13 = vcombine.low %v252_v17, %v260_v56 }
 0x18d   :  { %v11569_v40 = vcombine.low %v11561_v48, %v11568_v47  ;;  %v283_v18 = vrot.slane %v269_v7, %v21405_v31  ;;  %v284_v15 = vcombine.high %v276_v21, %v276_v21  ;;  %v4662_v49 = vcombine.high %v19253_v12, %v19253_v12  ;;  %v23700_v47 = vpop.permute.xlu1 %20009 }
 0x18e   :  { %v10589_v27 = vcombine.low %v10581_v38, %v10588_v26  ;;  %v9454_v43 = vcombine.low %v268_v10, %v267_v54  ;;  %v9461_v62 = vrot.slane %v9453_v13, %v21405_v31  ;;  %v4669_v39 = vrot.slane %v19253_v12, %v21405_v31 }
 0x18f   :  { %v20278_v44 = vpack.i.bf16 %v11586_v33, %v11569_v40  ;;  %v285_v32 = vcombine.high %v283_v18, %v283_v18  ;;  %v9470_v0 = vcombine.low %v276_v21, %v284_v15  ;;  %v23685_v58 = vcombine.high %v23597_v29, %v23597_v29  ;;  %v20005_v15 = vpop.permute.xlu0 %20004 }
 0x190   :  { %v20273_v23 = vpack.i.bf16 %v10606_v6, %v10589_v27  ;;  %v9468_v37 = vrot.slane %v9454_v43, %v21405_v31  ;;  %v4676_v52 = vrot.slane %v4662_v49, %v21405_v31  ;;  %v13530_v9 = vcombine.low %v23590_v50, %v23605_v5 }
 0x191   :  { %20279 = vrot.lane.b32.xlu1 %v20278_v44, %s21280_s12  ;;  %v9471_v16 = vcombine.low %v283_v18, %v285_v32  ;;  %v9478_v60 = vrot.slane %v9470_v0, %v21405_v31  ;;  %v4677_v4 = vcombine.high %v4669_v39, %v4669_v39  ;;  %v13513_v48 = vcombine.low %v23567_v2, %v4669_v39 }
 0x192   :  { %20274 = vrot.lane.b32.xlu0 %v20273_v23, %s21278_s10  ;;  %v9469_v35 = vcombine.low %v9461_v62, %v9468_v37  ;;  %v13531_v36 = vcombine.low %v23597_v29, %v23685_v58  ;;  %v13538_v38 = vrot.slane %v13530_v9, %v21405_v31  ;;  %v3626_v59 = vcombine.high %v19197_v28, %v19197_v28  ;;  %v19365_v62 = vld [vmem:[%s28419_s0 + $0xd8] sm:$0x3f] }
 0x193   :  { %v9485_v33 = vrot.slane %v9471_v16, %v21405_v31  ;;  %v13514_v26 = vcombine.low %v4677_v4, %v4676_v52  ;;  %v13521_v5 = vrot.slane %v13513_v48, %v21405_v31  ;;  %v3633_v17 = vrot.slane %v19197_v28, %v21405_v31  ;;  %v19309_v28 = vld [vmem:[%s28419_s0 + $0xca] sm:$0x3f] }
 0x194   :  { %v18080_v24 = vsel %vm18073_vm0, %v9469_v35, %v19996_v55  ;;  %v13545_v2 = vrot.slane %v13531_v36, %v21405_v31  ;;  %v3640_v56 = vrot.slane %v3626_v59, %v21405_v31  ;;  %v3658_v29 = vcombine.high %v23511_v34, %v23511_v34 }
 0x195   :  { %v9486_v40 = vcombine.low %v9478_v60, %v9485_v33  ;;  %v13528_v6 = vrot.slane %v13514_v26, %v21405_v31  ;;  %v3641_v7 = vcombine.high %v3633_v17, %v3633_v17  ;;  %v12533_v21 = vcombine.low %v23494_v30, %v3633_v17 }
 0x196   :  { %v13546_v12 = vcombine.low %v13538_v38, %v13545_v2  ;;  %v12550_v27 = vcombine.low %v23507_v63, %v23518_v20  ;;  %v12551_v54 = vcombine.low %v23511_v34, %v3658_v29  ;;  %v18428_v55 = vsel %vm18423_vm9, %v23635_v22, %v19991_v3  ;;  %v23728_v20 = vpop.permute.xlu1 %20019 }
 0x197   :  { %v18081_v10 = vsel %vm18073_vm0, %v9486_v40, %v19997_v19  ;;  %v13529_v13 = vcombine.low %v13521_v5, %v13528_v6  ;;  %v12534_v44 = vcombine.low %v3641_v7, %v3640_v56  ;;  %v12541_v18 = vrot.slane %v12533_v21, %v21405_v31  ;;  %v20015_v6 = vpop.permute.xlu0 %20014 }
 0x198   :  { %v12558_v30 = vrot.slane %v12550_v27, %v21405_v31  ;;  %v12565_v23 = vrot.slane %v12551_v54, %v21405_v31  ;;  %v18429_v63 = vsel %vm18423_vm9, %v23640_v41, %v19992_v53  ;;  %v20012_v34 = vunpack.i.h.bf16 %v23700_v47  ;;  %v19366_v41 = vld [vmem:[%s28419_s0 + $0xe0] sm:$0xff] }
 0x199   :  { %v20288_v3 = vpack.i.bf16 %v13546_v12, %v13529_v13  ;;  %v12548_v22 = vrot.slane %v12534_v44, %v21405_v31  ;;  %v18475_v19 = vpack.c.bf16 %v18429_v63, %v18428_v55  ;;  %v20011_v43 = vunpack.i.l.bf16 %v23700_v47 }
 0x19a   :  { %v12566_v49 = vcombine.low %v12558_v30, %v12565_v23  ;;  %v20007_v32 = vunpack.i.h.bf16 %v20005_v15  ;;  %v20006_v51 = vunpack.i.l.bf16 %v20005_v15  ;;  %v18130_v53 = vsel %vm18123_vm1, %v18080_v24, %v20001_v14 }
 0x19b   :  { %20289 = vrot.lane.b32.xlu1 %v20288_v3, %s21279_s11  ;;  %v12549_v0 = vcombine.low %v12541_v18, %v12548_v22  ;;  %19644 = vmatmul.mubr.msk.bf16.gmra.mrb[8].mxu0 %vm18541_vm10, %v18475_v19  ;;  %v18131_v39 = vsel %vm18123_vm1, %v18081_v10, %v20002_v8  ;;  %v20022_v37 = vunpack.i.h.bf16 %v23728_v20  ;;  %v6735_v9 = vcombine.high %v19365_v62, %v19365_v62  ;;  %v19478_v3 = vld [vmem:[%s28419_s0 + $0xe2] sm:$0xff]  ;;  %v19421_v22 = vld [vmem:[%s28419_s0 + $0xd9] sm:$0x3f] }
 0x19c   :  { %v18180_v14 = vsel %vm18173_vm2, %v18130_v53, %v20006_v51  ;;  %v18181_v52 = vsel %vm18173_vm2, %v18131_v39, %v20007_v32  ;;  %v6742_v16 = vrot.slane %v19365_v62, %v21405_v31  ;;  %19647 = vmatprep.mubr.msk.bf16.mxu0 %vm21286_vm8, %v28426_v11  ;;  %v6751_v57 = vcombine.high %v19366_v41, %v19366_v41 }
 0x19d   :  { %v20283_v60 = vpack.i.bf16 %v12566_v49, %v12549_v0  ;;  %v23756_v8 = vrot.slane %v19366_v41, %v21405_v31  ;;  %v6749_v4 = vrot.slane %v6735_v9, %v21405_v31  ;;  %v5698_v36 = vcombine.high %v19309_v28, %v19309_v28  ;;  %v19422_v0 = vld [vmem:[%s28419_s0 + $0xe1] sm:$0xff] }
 0x19e   :  { %v6750_v48 = vcombine.high %v6742_v16, %v6742_v16  ;;  %v15473_v35 = vcombine.low %v3658_v29, %v6742_v16  ;;  %v23761_v38 = vrot.slane %v6751_v57, %v21405_v31  ;;  %v5705_v47 = vrot.slane %v19309_v28, %v21405_v31  ;;  %v23815_v28 = vpop.permute.xlu1 %20029 }
 0x19f   :  { %20284 = vrot.lane.b32.xlu0 %v20283_v60, %s21277_s9  ;;  %v23765_v59 = vcombine.high %v23756_v8, %v23756_v8  ;;  %v23770_v33 = vcombine.high %v23572_v61, %v23572_v61  ;;  %v5712_v17 = vrot.slane %v5698_v36, %v21405_v31  ;;  %v14510_v24 = vcombine.low %v23559_v45, %v23576_v42 }
 0x1a0   :  { %v15474_v26 = vcombine.low %v6750_v48, %v6749_v4  ;;  %v15481_v5 = vrot.slane %v15473_v35, %v21405_v31  ;;  %v23778_v2 = vcombine.high %v23761_v38, %v23761_v38  ;;  %v5713_v29 = vcombine.high %v5705_v47, %v5705_v47 }
 0x1a1   :  { %v15490_v56 = vcombine.low %v23756_v8, %v23765_v59  ;;  %v14493_v40 = vcombine.low %v23549_v46, %v5705_v47  ;;  %v14511_v21 = vcombine.low %v23572_v61, %v23770_v33  ;;  %v14518_v12 = vrot.slane %v14510_v24, %v21405_v31  ;;  %v19477_v61 = vld [vmem:[%s28419_s0 + $0xda] sm:$0x3f] }
 0x1a2   :  { %v15488_v7 = vrot.slane %v15474_v26, %v21405_v31  ;;  %v20021_v42 = vunpack.i.l.bf16 %v23728_v20  ;;  %v15491_v27 = vcombine.low %v23761_v38, %v23778_v2  ;;  %v14494_v55 = vcombine.low %v5713_v29, %v5712_v17  ;;  %v23891_v20 = vld [vmem:[%s28419_s0 + $0xd9] sm:$0x3f] }
 0x1a3   :  { %v15498_v54 = vrot.slane %v15490_v56, %v21405_v31  ;;  %v14501_v10 = vrot.slane %v14493_v40, %v21405_v31  ;;  %v14525_v46 = vrot.slane %v14511_v21, %v21405_v31  ;;  %v20017_v44 = vunpack.i.h.bf16 %v20015_v6  ;;  %v20025_v21 = vpop.permute.xlu0 %20024 }
 0x1a4   :  { %v15489_v13 = vcombine.low %v15481_v5, %v15488_v7  ;;  %v20016_v18 = vunpack.i.l.bf16 %v20015_v6  ;;  %v15505_v15 = vrot.slane %v15491_v27, %v21405_v31  ;;  %v14508_v30 = vrot.slane %v14494_v55, %v21405_v31 }
 0x1a5   :  { %v18230_v23 = vsel %vm18223_vm3, %v18180_v14, %v20011_v43  ;;  %v18231_v63 = vsel %vm18223_vm3, %v18181_v52, %v20012_v34  ;;  %v14526_v19 = vcombine.low %v14518_v12, %v14525_v46  ;;  %v8807_v53 = vcombine.high %v19477_v61, %v19477_v61 }
 0x1a6   :  { %v18280_v62 = vsel %vm18273_vm4, %v18230_v23, %v20016_v18  ;;  %v18281_v49 = vsel %vm18273_vm4, %v18231_v63, %v20017_v44  ;;  %v15506_v32 = vcombine.low %v15498_v54, %v15505_v15  ;;  %v14509_v51 = vcombine.low %v14501_v10, %v14508_v30  ;;  %v2122_v23 = vld [vmem:[%s28419_s0 + $0xca] sm:$0x3f] }
 0x1a7   :  { %v8814_v43 = vrot.slane %v19477_v61, %v21405_v31  ;;  %v8823_v41 = vcombine.high %v19478_v3, %v19478_v3  ;;  %v23810_v34 = vrot.slane %v19478_v3, %v21405_v31  ;;  %v7771_v39 = vcombine.high %v19421_v22, %v19421_v22 }
 0x1a8   :  { %v20298_v14 = vpack.i.bf16 %v15506_v32, %v15489_v13  ;;  %v20293_v52 = vpack.i.bf16 %v14526_v19, %v14509_v51  ;;  %v8821_v9 = vrot.slane %v8807_v53, %v21405_v31  ;;  %v7778_v48 = vrot.slane %v19421_v22, %v21405_v31  ;;  %v23877_v32 = vld [vmem:[%s28419_s0 + $0xda] sm:$0x3f]  ;;  %v1086_v51 = vld [vmem:[%s28419_s0 + $0xc9] sm:$0x3f] }
 0x1a9   :  { %v8822_v16 = vcombine.high %v8814_v43, %v8814_v43  ;;  %v23819_v60 = vrot.slane %v8823_v41, %v21405_v31  ;;  %v23823_v57 = vcombine.high %v23810_v34, %v23810_v34  ;;  %v17433_v4 = vcombine.low %v23770_v33, %v8814_v43 }
 0x1aa   :  { %20299 = vrot.lane.b32.xlu1 %v20298_v14, %s21281_s13  ;;  %20294 = vrot.lane.b32.xlu0 %v20293_v52, %s21282_s18  ;;  %v7785_v36 = vrot.slane %v7771_v39, %v21405_v31  ;;  %v7787_v47 = vcombine.high %v19422_v0, %v19422_v0  ;;  %v20032_v26 = vunpack.i.h.bf16 %v23815_v28  ;;  %v7786_v56 = vcombine.high %v7778_v48, %v7778_v48  ;;  %v23896_v39 = vpop.permute.xlu1 %20039 }
 0x1ab   :  { %v17434_v35 = vcombine.low %v8822_v16, %v8821_v9  ;;  %v23833_v5 = vcombine.high %v23819_v60, %v23819_v60  ;;  %v17441_v17 = vrot.slane %v17433_v4, %v21405_v31  ;;  %v17450_v24 = vcombine.low %v23810_v34, %v23823_v57 }
 0x1ac   :  { %v23840_v40 = vrot.slane %v19422_v0, %v21405_v31  ;;  %v23843_v6 = vrot.slane %v7787_v47, %v21405_v31  ;;  %v16453_v7 = vcombine.low %v23685_v58, %v7778_v48  ;;  %v16454_v54 = vcombine.low %v7786_v56, %v7785_v36 }
 0x1ad   :  { %v17448_v29 = vrot.slane %v17434_v35, %v21405_v31  ;;  %v17451_v12 = vcombine.low %v23819_v60, %v23833_v5  ;;  %v17458_v27 = vrot.slane %v17450_v24, %v21405_v31  ;;  %v20031_v55 = vunpack.i.l.bf16 %v23815_v28 }
 0x1ae   :  { %v23852_v13 = vcombine.high %v23840_v40, %v23840_v40  ;;  %v23856_v46 = vcombine.high %v23843_v6, %v23843_v6  ;;  %v16461_v44 = vrot.slane %v16453_v7, %v21405_v31  ;;  %v16468_v61 = vrot.slane %v16454_v54, %v21405_v31 }
 0x1af   :  { %v17449_v10 = vcombine.low %v17441_v17, %v17448_v29  ;;  %v17465_v18 = vrot.slane %v17451_v12, %v21405_v31  ;;  %v20027_v15 = vunpack.i.h.bf16 %v20025_v21  ;;  %v20026_v30 = vunpack.i.l.bf16 %v20025_v21  ;;  %v23913_v29 = vpop.permute.xlu0 %20034 }
 0x1b0   :  { %v16470_v63 = vcombine.low %v23840_v40, %v23852_v13  ;;  %v16471_v3 = vcombine.low %v23843_v6, %v23856_v46  ;;  %v18330_v22 = vsel %vm18323_vm5, %v18280_v62, %v20021_v42  ;;  %v18331_v19 = vsel %vm18323_vm5, %v18281_v49, %v20022_v37 }
 0x1b1   :  { %v17466_v53 = vcombine.low %v17458_v27, %v17465_v18  ;;  %v16469_v43 = vcombine.low %v16461_v44, %v16468_v61  ;;  %v23883_v41 = vsel %vm18373_vm6, %v18330_v22, %v20026_v30  ;;  %v23886_v42 = vsel %vm18373_vm6, %v18331_v19, %v20027_v15  ;;  %v34_v18 = vld [vmem:[%s28419_s0 + $0x48] sm:$0x3f]  ;;  %v23935_v30 = vld [vmem:[%s28419_s0 + $0x58] sm:$0x3f] }
 0x1b2   :  { %v16478_v37 = vrot.slane %v16470_v63, %v21405_v31  ;;  %v16485_v62 = vrot.slane %v16471_v3, %v21405_v31  ;;  %v2622_v49 = vcombine.high %v2122_v23, %v2122_v23  ;;  %v2629_v0 = vrot.slane %v2122_v23, %v21405_v31  ;;  %v19255_v19 = vld [vmem:[%s28419_s0 + $0xd9] sm:$0x3f] }
 0x1b3   :  { %v20308_v14 = vpack.i.bf16 %v17466_v53, %v17449_v10  ;;  %v23900_v52 = vrot.slane %v23877_v32, %v21405_v31  ;;  %v1586_v9 = vcombine.high %v1086_v51, %v1086_v51  ;;  %v1593_v16 = vrot.slane %v1086_v51, %v21405_v31 }
 0x1b4   :  { %v16486_v4 = vcombine.low %v16478_v37, %v16485_v62  ;;  %v2636_v48 = vrot.slane %v2622_v49, %v21405_v31  ;;  %v2637_v35 = vcombine.high %v2629_v0, %v2629_v0  ;;  %v23906_v36 = vrot.slane %v23891_v20, %v21405_v31 }
 0x1b5   :  { %20309 = vrot.lane.b32.xlu1 %v20308_v14, %s21283_s21  ;;  %v11605_v47 = vcombine.low %v23770_v33, %v23900_v52  ;;  %v1600_v17 = vrot.slane %v1586_v9, %v21405_v31  ;;  %v1601_v24 = vcombine.high %v1593_v16, %v1593_v16  ;;  %v20042_v56 = vunpack.i.h.bf16 %v23896_v39 }
 0x1b6   :  { %v20303_v7 = vpack.i.bf16 %v16486_v4, %v16469_v43  ;;  %v11587_v21 = vcombine.low %v2629_v0, %v2637_v35  ;;  %v11588_v12 = vcombine.low %v2636_v48, %v23559_v45  ;;  %v10625_v27 = vcombine.low %v23685_v58, %v23906_v36  ;;  %v23955_v4 = vld [vmem:[%s28419_s0 + $0xe9] sm:$0x3f] }
 0x1b7   :  { %v11619_v54 = vrot.slane %v11605_v47, %v21405_v31  ;;  %v10607_v10 = vcombine.low %v1593_v16, %v1601_v24  ;;  %v10608_v44 = vcombine.low %v1600_v17, %v23590_v50  ;;  %v20041_v33 = vunpack.i.l.bf16 %v23896_v39  ;;  %v35_v50 = vld [vmem:[%s28419_s0 + $0x50] sm:$0xff] }
 0x1b8   :  { %20304 = vrot.lane.b32.xlu0 %v20303_v7, %s21284_s24  ;;  %v11595_v61 = vrot.slane %v11587_v21, %v21405_v31  ;;  %v11602_v45 = vrot.slane %v11588_v12, %v21405_v31  ;;  %v10639_v15 = vrot.slane %v10625_v27, %v21405_v31  ;;  %v20037_v58 = vunpack.i.h.bf16 %v23913_v29 }
 0x1b9   :  { %v11620_v23 = vcombine.low %v23601_v25, %v11619_v54  ;;  %v10615_v63 = vrot.slane %v10607_v10, %v21405_v31  ;;  %v10622_v3 = vrot.slane %v10608_v44, %v21405_v31  ;;  %v20036_v22 = vunpack.i.l.bf16 %v23913_v29 }
 0x1ba   :  { %v11603_v51 = vcombine.low %v11595_v61, %v11602_v45  ;;  %v10640_v53 = vcombine.low %v23632_v1, %v10639_v15  ;;  %v286_v43 = vcombine.high %v34_v18, %v34_v18  ;;  %v293_v37 = vrot.slane %v34_v18, %v21405_v31 }
 0x1bb   :  { %v10623_v62 = vcombine.low %v10615_v63, %v10622_v3  ;;  %v302_v49 = vcombine.high %v35_v50, %v35_v50  ;;  %v309_v25 = vrot.slane %v35_v50, %v21405_v31  ;;  %v23949_v0 = vrot.slane %v23935_v30, %v21405_v31  ;;  %v19199_v50 = vld [vmem:[%s28419_s0 + $0xd8] sm:$0x3f] }
 0x1bc   :  { %v20318_v14 = vpack.i.bf16 %v11620_v23, %v11603_v51  ;;  %v300_v9 = vrot.slane %v286_v43, %v21405_v31  ;;  %v301_v16 = vcombine.high %v293_v37, %v293_v37  ;;  %v4695_v1 = vcombine.high %v19255_v19, %v19255_v19  ;;  %v23983_v51 = vld [vmem:[%s28419_s0 + $0xe8] sm:$0x3f] }
 0x1bd   :  { %v20313_v48 = vpack.i.bf16 %v10640_v53, %v10623_v62  ;;  %v316_v35 = vrot.slane %v302_v49, %v21405_v31  ;;  %v317_v47 = vcombine.high %v309_v25, %v309_v25  ;;  %v4702_v17 = vrot.slane %v19255_v19, %v21405_v31 }
 0x1be   :  { %20319 = vrot.lane.b32.xlu1 %v20318_v14, %s21280_s12  ;;  %v9487_v24 = vcombine.low %v293_v37, %v301_v16  ;;  %v9488_v7 = vcombine.low %v300_v9, %v309_v25  ;;  %v4709_v21 = vrot.slane %v4695_v1, %v21405_v31  ;;  %v4728_v12 = vcombine.high %v23955_v4, %v23955_v4 }
 0x1bf   :  { %20314 = vrot.lane.b32.xlu0 %v20313_v48, %s21278_s10  ;;  %v318_v27 = vcombine.high %v316_v35, %v316_v35  ;;  %v9504_v54 = vcombine.low %v317_v47, %v316_v35  ;;  %v4710_v10 = vcombine.high %v4702_v17, %v4702_v17  ;;  %v23966_v44 = vrot.slane %v23955_v4, %v21405_v31 }
 0x1c0   :  { %v9495_v18 = vrot.slane %v9487_v24, %v21405_v31  ;;  %v9502_v61 = vrot.slane %v9488_v7, %v21405_v31  ;;  %v13548_v45 = vcombine.low %v4709_v21, %v23840_v40  ;;  %v13564_v15 = vcombine.low %v23852_v13, %v23843_v6  ;;  %v24007_v7 = vpop.permute.xlu1 %20049 }
 0x1c1   :  { %v9505_v23 = vcombine.low %v318_v27, %v23949_v0  ;;  %v9512_v63 = vrot.slane %v9504_v54, %v21405_v31  ;;  %v4743_v3 = vcombine.high %v23966_v44, %v23966_v44  ;;  %v13547_v19 = vcombine.low %v4702_v17, %v4710_v10 }
 0x1c2   :  { %v9503_v40 = vcombine.low %v9495_v18, %v9502_v61  ;;  %v13562_v6 = vrot.slane %v13548_v45, %v21405_v31  ;;  %v13565_v13 = vcombine.low %v23856_v46, %v23966_v44  ;;  %v13572_v53 = vrot.slane %v13564_v15, %v21405_v31  ;;  %v20045_v18 = vpop.permute.xlu0 %20044  ;;  %v19368_v45 = vld [vmem:[%s28419_s0 + $0xf0] sm:$0xff] }
 0x1c3   :  { %v9519_v43 = vrot.slane %v9505_v23, %v21405_v31  ;;  %v13555_v37 = vrot.slane %v13547_v19, %v21405_v31  ;;  %v3659_v62 = vcombine.high %v19199_v50, %v19199_v50  ;;  %v3666_v49 = vrot.slane %v19199_v50, %v21405_v31  ;;  %v24044_v19 = vld [vmem:[%s28419_s0 + $0xf8] sm:$0x3f] }
 0x1c4   :  { %v18082_v25 = vsel %vm18073_vm0, %v9503_v40, %v20036_v22  ;;  %v13579_v14 = vrot.slane %v13565_v13, %v21405_v31  ;;  %v3692_v9 = vcombine.high %v23983_v51, %v23983_v51  ;;  %v23998_v16 = vrot.slane %v23983_v51, %v21405_v31 }
 0x1c5   :  { %v9520_v46 = vcombine.low %v9512_v63, %v9519_v43  ;;  %v13563_v1 = vcombine.low %v13555_v37, %v13562_v6  ;;  %v3673_v48 = vrot.slane %v3659_v62, %v21405_v31  ;;  %v3674_v35 = vcombine.high %v3666_v49, %v3666_v49  ;;  %v19311_v6 = vld [vmem:[%s28419_s0 + $0xda] sm:$0x3f] }
 0x1c6   :  { %v13580_v47 = vcombine.low %v13572_v53, %v13579_v14  ;;  %v3707_v17 = vcombine.high %v23998_v16, %v23998_v16  ;;  %v12584_v22 = vcombine.low %v23765_v59, %v23761_v38  ;;  %v12585_v24 = vcombine.low %v23778_v2, %v23998_v16 }
 0x1c7   :  { %v18083_v21 = vsel %vm18073_vm0, %v9520_v46, %v20037_v58  ;;  %v12567_v27 = vcombine.low %v3666_v49, %v3674_v35  ;;  %v12568_v54 = vcombine.low %v3673_v48, %v23756_v8  ;;  %v18430_v10 = vsel %vm18423_vm9, %v23883_v41, %v20031_v55  ;;  %v19367_v8 = vld [vmem:[%s28419_s0 + $0xe8] sm:$0x3f] }
 0x1c8   :  { %v20328_v61 = vpack.i.bf16 %v13580_v47, %v13563_v1  ;;  %v12592_v38 = vrot.slane %v12584_v22, %v21405_v31  ;;  %v12599_v59 = vrot.slane %v12585_v24, %v21405_v31  ;;  %v18431_v2 = vsel %vm18423_vm9, %v23886_v42, %v20032_v26  ;;  %v24066_v46 = vld [vmem:[%s28419_s0 + $0xea] sm:$0x3f] }
 0x1c9   :  { %v12575_v29 = vrot.slane %v12567_v27, %v21405_v31  ;;  %v12582_v58 = vrot.slane %v12568_v54, %v21405_v31  ;;  %v18476_v55 = vpack.c.bf16 %v18431_v2, %v18430_v10  ;;  %v20052_v41 = vunpack.i.h.bf16 %v24007_v7 }
 0x1ca   :  { %20329 = vrot.lane.b32.xlu1 %v20328_v61, %s21279_s11  ;;  %v12600_v28 = vcombine.low %v12592_v38, %v12599_v59  ;;  %v20051_v26 = vunpack.i.l.bf16 %v24007_v7  ;;  %v20047_v42 = vunpack.i.h.bf16 %v20045_v18  ;;  %v20046_v15 = vunpack.i.l.bf16 %v20045_v18 }
 0x1cb   :  { %v12583_v50 = vcombine.low %v12575_v29, %v12582_v58  ;;  %19648 = vmatmul.mubr.msk.bf16.gmra.mrb[12].mxu0 %vm18541_vm10, %v18476_v55  ;;  %v18132_v23 = vsel %vm18123_vm1, %v18082_v25, %v20041_v33  ;;  %v18133_v63 = vsel %vm18123_vm1, %v18083_v21, %v20042_v56  ;;  %v6768_v40 = vcombine.high %v19367_v8, %v19367_v8  ;;  %v24085_v58 = vpop.permute.xlu1 %20059 }
 0x1cc   :  { %v18182_v13 = vsel %vm18173_vm2, %v18132_v23, %v20046_v15  ;;  %v18183_v53 = vsel %vm18173_vm2, %v18133_v63, %v20047_v42  ;;  %v6775_v33 = vrot.slane %v19367_v8, %v21405_v31  ;;  %v6784_v43 = vcombine.high %v19368_v45, %v19368_v45  ;;  %19651 = vmatprep.mubr.msk.bf16.mxu0 %vm21286_vm8, %v28426_v11  ;;  %v20055_v15 = vpop.permute.xlu0 %20054 }
 0x1cd   :  { %v20323_v39 = vpack.i.bf16 %v12600_v28, %v12583_v50  ;;  %v6782_v56 = vrot.slane %v6768_v40, %v21405_v31  ;;  %v6791_v37 = vrot.slane %v19368_v45, %v21405_v31  ;;  %v6801_v62 = vcombine.high %v24044_v19, %v24044_v19 }
 0x1ce   :  { %v6783_v49 = vcombine.high %v6775_v33, %v6775_v33  ;;  %v6798_v25 = vrot.slane %v6784_v43, %v21405_v31  ;;  %v24061_v14 = vrot.slane %v24044_v19, %v21405_v31  ;;  %v5731_v1 = vcombine.high %v19311_v6, %v19311_v6 }
 0x1cf   :  { %20324 = vrot.lane.b32.xlu0 %v20323_v39, %s21277_s9  ;;  %v6799_v48 = vcombine.high %v6791_v37, %v6791_v37  ;;  %v15508_v35 = vcombine.low %v6782_v56, %v6791_v37  ;;  %v5738_v47 = vrot.slane %v19311_v6, %v21405_v31  ;;  %v5764_v22 = vcombine.high %v24066_v46, %v24066_v46  ;;  %v19480_v37 = vld [vmem:[%s28419_s0 + $0xf2] sm:$0xff] }
 0x1d0   :  { %v6800_v24 = vcombine.high %v6798_v25, %v6798_v25  ;;  %v6816_v21 = vcombine.high %v24061_v14, %v24061_v14  ;;  %v15507_v27 = vcombine.low %v6775_v33, %v6783_v49  ;;  %v5745_v54 = vrot.slane %v5731_v1, %v21405_v31 }
 0x1d1   :  { %v15522_v10 = vrot.slane %v15508_v35, %v21405_v31  ;;  %v15524_v18 = vcombine.low %v6799_v48, %v6798_v25  ;;  %v5746_v61 = vcombine.high %v5738_v47, %v5738_v47  ;;  %v24078_v38 = vrot.slane %v24066_v46, %v21405_v31  ;;  %v24112_v48 = vld [vmem:[%s28419_s0 + $0xfa] sm:$0x3f] }
 0x1d2   :  { %v15515_v59 = vrot.slane %v15507_v27, %v21405_v31  ;;  %v15525_v2 = vcombine.low %v6800_v24, %v24061_v14  ;;  %v14528_v8 = vcombine.low %v5745_v54, %v23810_v34  ;;  %v14544_v29 = vcombine.low %v23823_v57, %v23819_v60  ;;  %v19479_v60 = vld [vmem:[%s28419_s0 + $0xea] sm:$0x3f] }
 0x1d3   :  { %v15532_v55 = vrot.slane %v15524_v18, %v21405_v31  ;;  %v5779_v45 = vcombine.high %v24078_v38, %v24078_v38  ;;  %v14527_v28 = vcombine.low %v5738_v47, %v5746_v61  ;;  %v14545_v42 = vcombine.low %v23833_v5, %v24078_v38 }
 0x1d4   :  { %v15523_v50 = vcombine.low %v15515_v59, %v15522_v10  ;;  %v15539_v23 = vrot.slane %v15525_v2, %v21405_v31  ;;  %v14542_v34 = vrot.slane %v14528_v8, %v21405_v31  ;;  %v14552_v63 = vrot.slane %v14544_v29, %v21405_v31  ;;  %v19424_v10 = vld [vmem:[%s28419_s0 + $0xf1] sm:$0xff] }
 0x1d5   :  { %v14535_v57 = vrot.slane %v14527_v28, %v21405_v31  ;;  %v14559_v40 = vrot.slane %v14545_v42, %v21405_v31  ;;  %v20062_v6 = vunpack.i.h.bf16 %v24085_v58  ;;  %v20061_v5 = vunpack.i.l.bf16 %v24085_v58 }
 0x1d6   :  { %v15540_v33 = vcombine.low %v15532_v55, %v15539_v23  ;;  %v20057_v43 = vunpack.i.h.bf16 %v20055_v15  ;;  %v20056_v39 = vunpack.i.l.bf16 %v20055_v15  ;;  %v18232_v56 = vsel %vm18223_vm3, %v18182_v13, %v20051_v26  ;;  %v19423_v26 = vld [vmem:[%s28419_s0 + $0xe9] sm:$0x3f] }
 0x1d7   :  { %v14543_v49 = vcombine.low %v14535_v57, %v14542_v34  ;;  %v14560_v25 = vcombine.low %v14552_v63, %v14559_v40  ;;  %v18233_v1 = vsel %vm18223_vm3, %v18183_v53, %v20052_v41  ;;  %v8840_v35 = vcombine.high %v19479_v60, %v19479_v60 }
 0x1d8   :  { %v20338_v13 = vpack.i.bf16 %v15540_v33, %v15523_v50  ;;  %v18282_v47 = vsel %vm18273_vm4, %v18232_v56, %v20056_v39  ;;  %v18283_v24 = vsel %vm18273_vm4, %v18233_v1, %v20057_v43  ;;  %v8847_v27 = vrot.slane %v19479_v60, %v21405_v31  ;;  %v24140_v50 = vld [vmem:[%s28419_s0 + $0xf9] sm:$0x3f] }
 0x1d9   :  { %v20333_v7 = vpack.i.bf16 %v14560_v25, %v14543_v49  ;;  %v8854_v41 = vrot.slane %v8840_v35, %v21405_v31  ;;  %v8856_v53 = vcombine.high %v19480_v37, %v19480_v37  ;;  %v8863_v54 = vrot.slane %v19480_v37, %v21405_v31  ;;  %v24149_v37 = vpop.permute.xlu1 %20069 }
 0x1da   :  { %20339 = vrot.lane.b32.xlu1 %v20338_v13, %s21281_s13  ;;  %v8855_v18 = vcombine.high %v8847_v27, %v8847_v27  ;;  %v8873_v61 = vcombine.high %v24112_v48, %v24112_v48  ;;  %v24130_v59 = vrot.slane %v24112_v48, %v21405_v31  ;;  %v7804_v2 = vcombine.high %v19423_v26, %v19423_v26 }
 0x1db   :  { %20334 = vrot.lane.b32.xlu0 %v20333_v7, %s21282_s18  ;;  %v8870_v8 = vrot.slane %v8856_v53, %v21405_v31  ;;  %v8871_v29 = vcombine.high %v8863_v54, %v8863_v54  ;;  %v17468_v55 = vcombine.low %v8854_v41, %v8863_v54  ;;  %v7811_v28 = vrot.slane %v19423_v26, %v21405_v31  ;;  %v20065_v41 = vpop.permute.xlu0 %20064 }
 0x1dc   :  { %v8888_v42 = vcombine.high %v24130_v59, %v24130_v59  ;;  %v17467_v15 = vcombine.low %v8847_v27, %v8855_v18  ;;  %v7818_v23 = vrot.slane %v7804_v2, %v21405_v31  ;;  %v7820_v34 = vcombine.high %v19424_v10, %v19424_v10 }
 0x1dd   :  { %v8872_v63 = vcombine.high %v8870_v8, %v8870_v8  ;;  %v17482_v60 = vrot.slane %v17468_v55, %v21405_v31  ;;  %v17484_v57 = vcombine.low %v8871_v29, %v8870_v8  ;;  %v7819_v40 = vcombine.high %v7811_v28, %v7811_v28 }
 0x1de   :  { %v17475_v33 = vrot.slane %v17467_v15, %v21405_v31  ;;  %v7827_v43 = vrot.slane %v19424_v10, %v21405_v31  ;;  %v7834_v39 = vrot.slane %v7820_v34, %v21405_v31  ;;  %v7837_v56 = vcombine.high %v24140_v50, %v24140_v50 }
 0x1df   :  { %v17485_v49 = vcombine.low %v8872_v63, %v24130_v59  ;;  %v17492_v25 = vrot.slane %v17484_v57, %v21405_v31  ;;  %v24155_v1 = vrot.slane %v24140_v50, %v21405_v31  ;;  %v16487_v35 = vcombine.low %v7811_v28, %v7819_v40  ;;  %v2125_v63 = vld [vmem:[%s28419_s0 + $0x102] sm:$0xff] }
 0x1e0   :  { %v17483_v26 = vcombine.low %v17475_v33, %v17482_v60  ;;  %v7835_v13 = vcombine.high %v7827_v43, %v7827_v43  ;;  %v7836_v27 = vcombine.high %v7834_v39, %v7834_v39  ;;  %v16488_v7 = vcombine.low %v7818_v23, %v7827_v43  ;;  %v24179_v43 = vld [vmem:[%s28419_s0 + $0x10a] sm:$0x3f] }
 0x1e1   :  { %v17499_v53 = vrot.slane %v17485_v49, %v21405_v31  ;;  %v7852_v54 = vcombine.high %v24155_v1, %v24155_v1  ;;  %v16495_v10 = vrot.slane %v16487_v35, %v21405_v31  ;;  %v20072_v18 = vunpack.i.h.bf16 %v24149_v37  ;;  %v1089_v35 = vld [vmem:[%s28419_s0 + $0x101] sm:$0xff] }
 0x1e2   :  { %v16502_v2 = vrot.slane %v16488_v7, %v21405_v31  ;;  %v16504_v8 = vcombine.low %v7835_v13, %v7834_v39  ;;  %v16505_v29 = vcombine.low %v7836_v27, %v24155_v1  ;;  %v20071_v55 = vunpack.i.l.bf16 %v24149_v37 }
 0x1e3   :  { %v17500_v28 = vcombine.low %v17492_v25, %v17499_v53  ;;  %v20067_v15 = vunpack.i.h.bf16 %v20065_v41  ;;  %v20066_v23 = vunpack.i.l.bf16 %v20065_v41  ;;  %v18332_v34 = vsel %vm18323_vm5, %v18282_v47, %v20061_v5  ;;  %v24207_v53 = vld [vmem:[%s28419_s0 + $0x109] sm:$0x3f] }
 0x1e4   :  { %v16503_v60 = vcombine.low %v16495_v10, %v16502_v2  ;;  %v16512_v57 = vrot.slane %v16504_v8, %v21405_v31  ;;  %v16519_v40 = vrot.slane %v16505_v29, %v21405_v31  ;;  %v18333_v33 = vsel %vm18323_vm5, %v18283_v24, %v20062_v6 }
 0x1e5   :  { %v20348_v39 = vpack.i.bf16 %v17500_v28, %v17483_v26  ;;  %v24182_v5 = vsel %vm18373_vm6, %v18332_v34, %v20066_v23  ;;  %v24185_v47 = vsel %vm18373_vm6, %v18333_v33, %v20067_v15  ;;  %v2655_v49 = vcombine.high %v23877_v32, %v23877_v32 }
 0x1e6   :  { %v16520_v25 = vcombine.low %v16512_v57, %v16519_v40  ;;  %v2670_v58 = vcombine.high %v23900_v52, %v23900_v52  ;;  %v2671_v6 = vcombine.high %v2125_v63, %v2125_v63  ;;  %v2678_v24 = vrot.slane %v2125_v63, %v21405_v31  ;;  %v24216_v63 = vpop.permute.xlu1 %20079 }
 0x1e7   :  { %20349 = vrot.lane.b32.xlu1 %v20348_v39, %s21283_s21  ;;  %v2669_v26 = vrot.slane %v2655_v49, %v21405_v31  ;;  %v2688_v13 = vcombine.high %v24179_v43, %v24179_v43  ;;  %v2695_v32 = vrot.slane %v24179_v43, %v21405_v31  ;;  %v1619_v52 = vcombine.high %v23891_v20, %v23891_v20 }
 0x1e8   :  { %v20343_v27 = vpack.i.bf16 %v16520_v25, %v16503_v60  ;;  %v2685_v7 = vrot.slane %v2671_v6, %v21405_v31  ;;  %v2686_v41 = vcombine.high %v2678_v24, %v2678_v24  ;;  %v1634_v10 = vcombine.high %v23906_v36, %v23906_v36 }
 0x1e9   :  { %v2703_v2 = vcombine.high %v2695_v32, %v2695_v32  ;;  %v11621_v8 = vcombine.low %v2670_v58, %v2669_v26  ;;  %v1633_v29 = vrot.slane %v1619_v52, %v21405_v31  ;;  %v1635_v28 = vcombine.high %v1089_v35, %v1089_v35  ;;  %v24223_v58 = vpop.permute.xlu0 %20074 }
 0x1ea   :  { %20344 = vrot.lane.b32.xlu0 %v20343_v27, %s21284_s24  ;;  %v2687_v20 = vcombine.high %v2685_v7, %v2685_v7  ;;  %v11622_v15 = vcombine.low %v2678_v24, %v2686_v41  ;;  %v1642_v23 = vrot.slane %v1089_v35, %v21405_v31  ;;  %v1652_v34 = vcombine.high %v24207_v53, %v24207_v53 }
 0x1eb   :  { %v11629_v60 = vrot.slane %v11621_v8, %v21405_v31  ;;  %v11639_v57 = vcombine.low %v2695_v32, %v2703_v2  ;;  %v1649_v36 = vrot.slane %v1635_v28, %v21405_v31  ;;  %v1659_v40 = vrot.slane %v24207_v53, %v21405_v31 }
 0x1ec   :  { %v11636_v33 = vrot.slane %v11622_v15, %v21405_v31  ;;  %v11638_v39 = vcombine.low %v2685_v7, %v2687_v20  ;;  %v1650_v49 = vcombine.high %v1642_v23, %v1642_v23  ;;  %v10641_v25 = vcombine.low %v1634_v10, %v1633_v29  ;;  %v37_v7 = vld [vmem:[%s28419_s0 + $0x60] sm:$0xff] }
 0x1ed   :  { %v11653_v6 = vrot.slane %v11639_v57, %v21405_v31  ;;  %v1651_v24 = vcombine.high %v1649_v36, %v1649_v36  ;;  %v1667_v35 = vcombine.high %v1659_v40, %v1659_v40  ;;  %v20082_v26 = vunpack.i.h.bf16 %v24216_v63 }
 0x1ee   :  { %v11637_v52 = vcombine.low %v11629_v60, %v11636_v33  ;;  %v11646_v32 = vrot.slane %v11638_v39, %v21405_v31  ;;  %v10642_v27 = vcombine.low %v1642_v23, %v1650_v49  ;;  %v10649_v41 = vrot.slane %v10641_v25, %v21405_v31  ;;  %v24239_v23 = vld [vmem:[%s28419_s0 + $0x68] sm:$0x3f]  ;;  %v19258_v39 = vld [vmem:[%s28419_s0 + $0x111] sm:$0xff] }
 0x1ef   :  { %v10658_v2 = vcombine.low %v1649_v36, %v1651_v24  ;;  %v10659_v10 = vcombine.low %v1659_v40, %v1667_v35  ;;  %v20081_v8 = vunpack.i.l.bf16 %v24216_v63  ;;  %v20077_v29 = vunpack.i.h.bf16 %v24223_v58 }
 0x1f0   :  { %v11654_v28 = vcombine.low %v11646_v32, %v11653_v6  ;;  %v10656_v20 = vrot.slane %v10642_v27, %v21405_v31  ;;  %v20076_v15 = vunpack.i.l.bf16 %v24223_v58  ;;  %v319_v60 = vcombine.high %v23935_v30, %v23935_v30  ;;  %v24255_v30 = vld [vmem:[%s28419_s0 + $0x119] sm:$0x3f] }
 0x1f1   :  { %v10666_v57 = vrot.slane %v10658_v2, %v21405_v31  ;;  %v10673_v36 = vrot.slane %v10659_v10, %v21405_v31  ;;  %v334_v40 = vcombine.high %v23949_v0, %v23949_v0  ;;  %v335_v33 = vcombine.high %v37_v7, %v37_v7 }
 0x1f2   :  { %v20358_v49 = vpack.i.bf16 %v11654_v28, %v11637_v52  ;;  %v10657_v25 = vcombine.low %v10649_v41, %v10656_v20  ;;  %v333_v58 = vrot.slane %v319_v60, %v21405_v31  ;;  %v342_v6 = vrot.slane %v37_v7, %v21405_v31 }
 0x1f3   :  { %v10674_v24 = vcombine.low %v10666_v57, %v10673_v36  ;;  %v349_v35 = vrot.slane %v335_v33, %v21405_v31  ;;  %v359_v0 = vrot.slane %v24239_v23, %v21405_v31  ;;  %v4742_v52 = vrot.slane %v4728_v12, %v21405_v31 }
 0x1f4   :  { %20359 = vrot.lane.b32.xlu1 %v20358_v49, %s21280_s12  ;;  %v350_v32 = vcombine.high %v342_v6, %v342_v6  ;;  %v9521_v27 = vcombine.low %v334_v40, %v333_v58  ;;  %v4744_v41 = vcombine.high %v19258_v39, %v19258_v39  ;;  %v24266_v7 = vrot.slane %v19258_v39, %v21405_v31  ;;  %v19202_v49 = vld [vmem:[%s28419_s0 + $0x110] sm:$0xff] }
 0x1f5   :  { %v20353_v2 = vpack.i.bf16 %v10674_v24, %v10657_v25  ;;  %v351_v10 = vcombine.high %v349_v35, %v349_v35  ;;  %v367_v28 = vcombine.high %v359_v0, %v359_v0  ;;  %v4768_v20 = vrot.slane %v24255_v30, %v21405_v31  ;;  %v24295_v24 = vld [vmem:[%s28419_s0 + $0x118] sm:$0x3f] }
 0x1f6   :  { %v9522_v60 = vcombine.low %v342_v6, %v350_v32  ;;  %v9529_v57 = vrot.slane %v9521_v27, %v21405_v31  ;;  %v24272_v4 = vrot.slane %v4744_v41, %v21405_v31  ;;  %v24276_v12 = vcombine.high %v24266_v7, %v24266_v7 }
 0x1f7   :  { %20354 = vrot.lane.b32.xlu0 %v20353_v2, %s21278_s10  ;;  %v9538_v36 = vcombine.low %v349_v35, %v351_v10  ;;  %v9539_v40 = vcombine.low %v359_v0, %v367_v28  ;;  %v4776_v33 = vcombine.high %v4768_v20, %v4768_v20  ;;  %v13581_v39 = vcombine.low %v4743_v3, %v4742_v52 }
 0x1f8   :  { %v9536_v25 = vrot.slane %v9522_v60, %v21405_v31  ;;  %v24288_v58 = vcombine.high %v24272_v4, %v24272_v4  ;;  %v13582_v6 = vcombine.low %v24266_v7, %v24276_v12  ;;  %v3706_v44 = vrot.slane %v3692_v9, %v21405_v31 }
 0x1f9   :  { %v9546_v3 = vrot.slane %v9538_v36, %v21405_v31  ;;  %v9553_v35 = vrot.slane %v9539_v40, %v21405_v31  ;;  %v13589_v0 = vrot.slane %v13581_v39, %v21405_v31  ;;  %v13599_v52 = vcombine.low %v4768_v20, %v4776_v33 }
 0x1fa   :  { %v9537_v32 = vcombine.low %v9529_v57, %v9536_v25  ;;  %v13596_v27 = vrot.slane %v13582_v6, %v21405_v31  ;;  %v13598_v41 = vcombine.low %v24272_v4, %v24288_v58  ;;  %v3708_v2 = vcombine.high %v19202_v49, %v19202_v49  ;;  %v24318_v6 = vpop.permute.xlu1 %20089 }
 0x1fb   :  { %v9554_v10 = vcombine.low %v9546_v3, %v9553_v35  ;;  %v13613_v28 = vrot.slane %v13599_v52, %v21405_v31  ;;  %v3715_v51 = vrot.slane %v19202_v49, %v21405_v31  ;;  %v3732_v9 = vrot.slane %v24295_v24, %v21405_v31  ;;  %v20085_v35 = vpop.permute.xlu0 %20084 }
 0x1fc   :  { %v18084_v60 = vsel %vm18073_vm0, %v9537_v32, %v20076_v15  ;;  %v13597_v36 = vcombine.low %v13589_v0, %v13596_v27  ;;  %v13606_v20 = vrot.slane %v13598_v41, %v21405_v31  ;;  %v3722_v57 = vrot.slane %v3708_v2, %v21405_v31  ;;  %v24340_v2 = vld [vmem:[%s28419_s0 + $0x128] sm:$0x3f] }
 0x1fd   :  { %v18085_v40 = vsel %vm18073_vm0, %v9554_v10, %v20077_v29  ;;  %v3723_v33 = vcombine.high %v3715_v51, %v3715_v51  ;;  %v3740_v39 = vcombine.high %v3732_v9, %v3732_v9  ;;  %v12601_v25 = vcombine.low %v3707_v17, %v3706_v44 }
 0x1fe   :  { %v13614_v49 = vcombine.low %v13606_v20, %v13613_v28  ;;  %v3724_v3 = vcombine.high %v3722_v57, %v3722_v57  ;;  %v18432_v15 = vsel %vm18423_vm9, %v24182_v5, %v20071_v55  ;;  %v18433_v29 = vsel %vm18423_vm9, %v24185_v47, %v20072_v18  ;;  %v19370_v55 = vld [vmem:[%s28419_s0 + $0x120] sm:$0xff] }
 0x1ff   :  { %v12602_v0 = vcombine.low %v3715_v51, %v3723_v33  ;;  %v12609_v52 = vrot.slane %v12601_v25, %v21405_v31  ;;  %v12619_v16 = vcombine.low %v3732_v9, %v3740_v39  ;;  %v18477_v17 = vpack.c.bf16 %v18433_v29, %v18432_v15 }
 0x200   :  { %v20368_v44 = vpack.i.bf16 %v13614_v49, %v13597_v36  ;;  %v12618_v32 = vcombine.low %v3722_v57, %v3724_v3  ;;  %v20092_v27 = vunpack.i.h.bf16 %v24318_v6  ;;  %v20091_v41 = vunpack.i.l.bf16 %v24318_v6  ;;  %v19314_v36 = vld [vmem:[%s28419_s0 + $0x112] sm:$0xff]  ;;  %v24384_v3 = vpop.permute.xlu1 %20099 }
 0x201   :  { %v12616_v37 = vrot.slane %v12602_v0, %v21405_v31  ;;  %v12633_v18 = vrot.slane %v12619_v16, %v21405_v31  ;;  %19652 = vmatmul.mubr.msk.bf16.gmra.mrb[16].mxu0 %vm18541_vm10, %v18477_v17  ;;  %v20087_v5 = vunpack.i.h.bf16 %v20085_v35  ;;  %v20086_v47 = vunpack.i.l.bf16 %v20085_v35 }
 0x202   :  { %20369 = vrot.lane.b32.xlu1 %v20368_v44, %s21279_s11  ;;  %v12626_v10 = vrot.slane %v12618_v32, %v21405_v31  ;;  %v18134_v28 = vsel %vm18123_vm1, %v18084_v60, %v20081_v8  ;;  %v18135_v51 = vsel %vm18123_vm1, %v18085_v40, %v20082_v26  ;;  %v6815_v9 = vrot.slane %v6801_v62, %v21405_v31  ;;  %v24372_v8 = vld [vmem:[%s28419_s0 + $0x11a] sm:$0x3f] }
 0x203   :  { %v12617_v20 = vcombine.low %v12609_v52, %v12616_v37  ;;  %v18184_v57 = vsel %vm18173_vm2, %v18134_v28, %v20086_v47  ;;  %v18185_v33 = vsel %vm18173_vm2, %v18135_v51, %v20087_v5  ;;  %v6817_v39 = vcombine.high %v19370_v55, %v19370_v55  ;;  %19655 = vmatprep.mubr.msk.bf16.mxu0 %vm21286_vm8, %v28426_v11  ;;  %v20095_v5 = vpop.permute.xlu0 %20094 }
 0x204   :  { %v12634_v63 = vcombine.low %v12626_v10, %v12633_v18  ;;  %v24362_v26 = vrot.slane %v19370_v55, %v21405_v31  ;;  %v6841_v19 = vrot.slane %v24340_v2, %v21405_v31  ;;  %v15541_v62 = vcombine.low %v6816_v21, %v6815_v9 }
 0x205   :  { %v24375_v60 = vrot.slane %v6817_v39, %v21405_v31  ;;  %v5778_v40 = vrot.slane %v5764_v22, %v21405_v31  ;;  %v5780_v25 = vcombine.high %v19314_v36, %v19314_v36  ;;  %v24382_v49 = vrot.slane %v19314_v36, %v21405_v31 }
 0x206   :  { %v20363_v14 = vpack.i.bf16 %v12634_v63, %v12617_v20  ;;  %v24388_v21 = vcombine.high %v24362_v26, %v24362_v26  ;;  %v6849_v15 = vcombine.high %v6841_v19, %v6841_v19  ;;  %v15549_v29 = vrot.slane %v15541_v62, %v21405_v31  ;;  %v19482_v20 = vld [vmem:[%s28419_s0 + $0x122] sm:$0xff] }
 0x207   :  { %v24393_v35 = vcombine.high %v24375_v60, %v24375_v60  ;;  %v24396_v46 = vrot.slane %v5780_v25, %v21405_v31  ;;  %v24400_v22 = vcombine.high %v24382_v49, %v24382_v49  ;;  %v5804_v0 = vrot.slane %v24372_v8, %v21405_v31 }
 0x208   :  { %20364 = vrot.lane.b32.xlu0 %v20363_v14, %s21277_s9  ;;  %v15542_v52 = vcombine.low %v24362_v26, %v24388_v21  ;;  %v15559_v16 = vcombine.low %v6841_v19, %v6849_v15  ;;  %v14561_v17 = vcombine.low %v5779_v45, %v5778_v40  ;;  %v20102_v44 = vunpack.i.h.bf16 %v24384_v3 }
 0x209   :  { %v15558_v32 = vcombine.low %v24375_v60, %v24393_v35  ;;  %v24415_v55 = vcombine.high %v24396_v46, %v24396_v46  ;;  %v5812_v37 = vcombine.high %v5804_v0, %v5804_v0  ;;  %v14562_v18 = vcombine.low %v24382_v49, %v24400_v22 }
 0x20a   :  { %v15556_v47 = vrot.slane %v15542_v52, %v21405_v31  ;;  %v15573_v10 = vrot.slane %v15559_v16, %v21405_v31  ;;  %v14569_v38 = vrot.slane %v14561_v17, %v21405_v31  ;;  %v20101_v45 = vunpack.i.l.bf16 %v24384_v3  ;;  %v24436_v52 = vld [vmem:[%s28419_s0 + $0x12a] sm:$0x3f]  ;;  %v19426_v16 = vld [vmem:[%s28419_s0 + $0x121] sm:$0xff] }
 0x20b   :  { %v15566_v28 = vrot.slane %v15558_v32, %v21405_v31  ;;  %v14576_v51 = vrot.slane %v14562_v18, %v21405_v31  ;;  %v14578_v9 = vcombine.low %v24396_v46, %v24415_v55  ;;  %v14579_v36 = vcombine.low %v5804_v0, %v5812_v37 }
 0x20c   :  { %v15557_v39 = vcombine.low %v15549_v29, %v15556_v47  ;;  %v20097_v63 = vunpack.i.h.bf16 %v20095_v5  ;;  %v20096_v19 = vunpack.i.l.bf16 %v20095_v5  ;;  %v18234_v62 = vsel %vm18223_vm3, %v18184_v57, %v20091_v41 }
 0x20d   :  { %v15574_v40 = vcombine.low %v15566_v28, %v15573_v10  ;;  %v14577_v25 = vcombine.low %v14569_v38, %v14576_v51  ;;  %v14586_v14 = vrot.slane %v14578_v9, %v21405_v31  ;;  %v14593_v15 = vrot.slane %v14579_v36, %v21405_v31  ;;  %v24478_v28 = vpop.permute.xlu1 %20109 }
 0x20e   :  { %v18235_v0 = vsel %vm18223_vm3, %v18185_v33, %v20092_v27  ;;  %v18284_v29 = vsel %vm18273_vm4, %v18234_v62, %v20096_v19  ;;  %v8887_v41 = vrot.slane %v8873_v61, %v21405_v31  ;;  %v8889_v57 = vcombine.high %v19482_v20, %v19482_v20  ;;  %v24456_v27 = vld [vmem:[%s28419_s0 + $0x129] sm:$0x3f] }
 0x20f   :  { %v20378_v17 = vpack.i.bf16 %v15574_v40, %v15557_v39  ;;  %v14594_v32 = vcombine.low %v14586_v14, %v14593_v15  ;;  %v18285_v37 = vsel %vm18273_vm4, %v18235_v0, %v20097_v63  ;;  %v24451_v6 = vrot.slane %v19482_v20, %v21405_v31  ;;  %v20105_v40 = vpop.permute.xlu0 %20104 }
 0x210   :  { %v24459_v48 = vrot.slane %v8889_v57, %v21405_v31  ;;  %v8913_v61 = vrot.slane %v24436_v52, %v21405_v31  ;;  %v17501_v33 = vcombine.low %v8888_v42, %v8887_v41  ;;  %v7851_v18 = vrot.slane %v7837_v56, %v21405_v31 }
 0x211   :  { %20379 = vrot.lane.b32.xlu1 %v20378_v17, %s21281_s13  ;;  %v20373_v5 = vpack.i.bf16 %v14594_v32, %v14577_v25  ;;  %v24473_v47 = vcombine.high %v24451_v6, %v24451_v6  ;;  %v7853_v10 = vcombine.high %v19426_v16, %v19426_v16  ;;  %v24476_v38 = vrot.slane %v19426_v16, %v21405_v31 }
 0x212   :  { %v24482_v59 = vcombine.high %v24459_v48, %v24459_v48  ;;  %v8921_v42 = vcombine.high %v8913_v61, %v8913_v61  ;;  %v17509_v50 = vrot.slane %v17501_v33, %v21405_v31  ;;  %v7877_v56 = vrot.slane %v24456_v27, %v21405_v31  ;;  %v2128_v33 = vld [vmem:[%s28419_s0 + $0x11a] sm:$0x3f] }
 0x213   :  { %20374 = vrot.lane.b32.xlu0 %v20373_v5, %s21282_s18  ;;  %v17502_v51 = vcombine.low %v24451_v6, %v24473_v47  ;;  %v24491_v9 = vrot.slane %v7853_v10, %v21405_v31  ;;  %v24495_v36 = vcombine.high %v24476_v38, %v24476_v38  ;;  %v16521_v20 = vcombine.low %v7852_v54, %v7851_v18 }
 0x214   :  { %v17518_v39 = vcombine.low %v24459_v48, %v24482_v59  ;;  %v17519_v63 = vcombine.low %v8913_v61, %v8921_v42  ;;  %v7885_v19 = vcombine.high %v7877_v56, %v7877_v56  ;;  %v20112_v62 = vunpack.i.h.bf16 %v24478_v28 }
 0x215   :  { %v17516_v25 = vrot.slane %v17502_v51, %v21405_v31  ;;  %v24506_v14 = vcombine.high %v24491_v9, %v24491_v9  ;;  %v16522_v15 = vcombine.low %v24476_v38, %v24495_v36  ;;  %v16529_v1 = vrot.slane %v16521_v20, %v21405_v31 }
 0x216   :  { %v17526_v54 = vrot.slane %v17518_v39, %v21405_v31  ;;  %v17533_v0 = vrot.slane %v17519_v63, %v21405_v31  ;;  %v16539_v41 = vcombine.low %v7877_v56, %v7885_v19  ;;  %v20111_v57 = vunpack.i.l.bf16 %v24478_v28  ;;  %v1092_v39 = vld [vmem:[%s28419_s0 + $0x119] sm:$0x3f] }
 0x217   :  { %v17517_v16 = vcombine.low %v17509_v50, %v17516_v25  ;;  %v24515_v17 = vrot.slane %v16522_v15, %v21405_v31  ;;  %v16538_v32 = vcombine.low %v24491_v9, %v24506_v14  ;;  %v20107_v61 = vunpack.i.h.bf16 %v20105_v40 }
 0x218   :  { %v17534_v18 = vcombine.low %v17526_v54, %v17533_v0  ;;  %v16553_v5 = vrot.slane %v16539_v41, %v21405_v31  ;;  %v20106_v10 = vunpack.i.l.bf16 %v20105_v40  ;;  %v18334_v42 = vsel %vm18323_vm5, %v18284_v29, %v20101_v45  ;;  %v24560_v41 = vpop.permute.xlu1 %20119 }
 0x219   :  { %v16537_v50 = vcombine.low %v16529_v1, %v24515_v17  ;;  %v24528_v56 = vrot.slane %v16538_v32, %v21405_v31  ;;  %v18335_v51 = vsel %vm18323_vm5, %v18285_v37, %v20102_v44  ;;  %v2702_v20 = vrot.slane %v2688_v13, %v21405_v31 }
 0x21a   :  { %v20388_v63 = vpack.i.bf16 %v17534_v18, %v17517_v16  ;;  %v24541_v45 = vsel %vm18373_vm6, %v18334_v42, %v20106_v10  ;;  %v24544_v29 = vsel %vm18373_vm6, %v18335_v51, %v20107_v61  ;;  %v2721_v19 = vcombine.high %v2128_v33, %v2128_v33  ;;  %v24569_v18 = vpop.permute.xlu0 %20114 }
 0x21b   :  { %v16554_v3 = vcombine.low %v24528_v56, %v16553_v5  ;;  %v2728_v44 = vrot.slane %v2128_v33, %v21405_v31  ;;  %v11655_v37 = vcombine.low %v2702_v20, %v24382_v49  ;;  %v11656_v43 = vcombine.low %v24400_v22, %v24396_v46 }
 0x21c   :  { %20389 = vrot.lane.b32.xlu1 %v20388_v63, %s21283_s21  ;;  %v2735_v13 = vrot.slane %v2721_v19, %v21405_v31  ;;  %v1666_v40 = vrot.slane %v1652_v34, %v21405_v31  ;;  %v1685_v25 = vcombine.high %v1092_v39, %v1092_v39  ;;  %v1692_v15 = vrot.slane %v1092_v39, %v21405_v31 }
 0x21d   :  { %v20383_v1 = vpack.i.bf16 %v16554_v3, %v16537_v50  ;;  %v2736_v54 = vcombine.high %v2728_v44, %v2728_v44  ;;  %v11663_v0 = vrot.slane %v11655_v37, %v21405_v31  ;;  %v11670_v49 = vrot.slane %v11656_v43, %v21405_v31 }
 0x21e   :  { %v11672_v46 = vcombine.low %v24415_v55, %v2728_v44  ;;  %v1699_v22 = vrot.slane %v1685_v25, %v21405_v31  ;;  %v1700_v16 = vcombine.high %v1692_v15, %v1692_v15  ;;  %v10675_v32 = vcombine.low %v1666_v40, %v24266_v7  ;;  %v39_v7 = vld [vmem:[%s28419_s0 + $0x70] sm:$0xff] }
 0x21f   :  { %20384 = vrot.lane.b32.xlu0 %v20383_v1, %s21284_s24  ;;  %v11671_v53 = vcombine.low %v11663_v0, %v11670_v49  ;;  %v11673_v34 = vcombine.low %v2736_v54, %v2735_v13  ;;  %v10676_v61 = vcombine.low %v24276_v12, %v24272_v4  ;;  %v10692_v33 = vcombine.low %v24288_v58, %v1692_v15  ;;  %v40_v58 = vld [vmem:[%s28419_s0 + $0x78] sm:$0x3f]  ;;  %v19261_v1 = vld [vmem:[%s28419_s0 + $0x129] sm:$0x3f] }
 0x220   :  { %v11680_v5 = vrot.slane %v11672_v46, %v21405_v31  ;;  %v10683_v55 = vrot.slane %v10675_v32, %v21405_v31  ;;  %v10693_v10 = vcombine.low %v1700_v16, %v1699_v22  ;;  %v20122_v42 = vunpack.i.h.bf16 %v24560_v41 }
 0x221   :  { %v11687_v50 = vrot.slane %v11673_v34, %v21405_v31  ;;  %v10690_v51 = vrot.slane %v10676_v61, %v21405_v31  ;;  %v10700_v4 = vrot.slane %v10692_v33, %v21405_v31  ;;  %v20121_v12 = vunpack.i.l.bf16 %v24560_v41 }
 0x222   :  { %v10707_v20 = vrot.slane %v10693_v10, %v21405_v31  ;;  %v20117_v39 = vunpack.i.h.bf16 %v24569_v18  ;;  %v20116_v63 = vunpack.i.l.bf16 %v24569_v18  ;;  %v352_v19 = vcombine.high %v24239_v23, %v24239_v23 }
 0x223   :  { %v11688_v3 = vcombine.low %v11680_v5, %v11687_v50  ;;  %v10691_v44 = vcombine.low %v10683_v55, %v10690_v51  ;;  %v368_v37 = vcombine.high %v39_v7, %v39_v7  ;;  %v375_v43 = vrot.slane %v39_v7, %v21405_v31 }
 0x224   :  { %v10708_v13 = vcombine.low %v10700_v4, %v10707_v20  ;;  %v366_v40 = vrot.slane %v352_v19, %v21405_v31  ;;  %v385_v25 = vcombine.high %v40_v58, %v40_v58  ;;  %v392_v15 = vrot.slane %v40_v58, %v21405_v31  ;;  %v19205_v4 = vld [vmem:[%s28419_s0 + $0x128] sm:$0x3f] }
 0x225   :  { %v20398_v54 = vpack.i.bf16 %v11688_v3, %v11671_v53  ;;  %v382_v0 = vrot.slane %v368_v37, %v21405_v31  ;;  %v383_v49 = vcombine.high %v375_v43, %v375_v43  ;;  %v4761_v23 = vcombine.high %v24255_v30, %v24255_v30 }
 0x226   :  { %v20393_v46 = vpack.i.bf16 %v10708_v13, %v10691_v44  ;;  %v399_v22 = vrot.slane %v385_v25, %v21405_v31  ;;  %v400_v16 = vcombine.high %v392_v15, %v392_v15  ;;  %v9555_v32 = vcombine.low %v366_v40, %v375_v43 }
 0x227   :  { %20399 = vrot.lane.b32.xlu1 %v20398_v54, %s21280_s12  ;;  %v384_v34 = vcombine.high %v382_v0, %v382_v0  ;;  %v9556_v61 = vcombine.low %v383_v49, %v382_v0  ;;  %v4775_v33 = vrot.slane %v4761_v23, %v21405_v31  ;;  %v4794_v18 = vcombine.high %v19261_v1, %v19261_v1  ;;  %v24627_v23 = vpop.permute.xlu1 %20129 }
 0x228   :  { %20394 = vrot.lane.b32.xlu0 %v20393_v46, %s21278_s10  ;;  %v9563_v53 = vrot.slane %v9555_v32, %v21405_v31  ;;  %v9573_v5 = vcombine.low %v400_v16, %v399_v22  ;;  %v4801_v55 = vrot.slane %v19261_v1, %v21405_v31  ;;  %v13616_v30 = vcombine.low %v24495_v36, %v24491_v9  ;;  %v20125_v32 = vpop.permute.xlu0 %20124 }
 0x229   :  { %v9570_v10 = vrot.slane %v9556_v61, %v21405_v31  ;;  %v9572_v7 = vcombine.low %v384_v34, %v392_v15  ;;  %v4808_v50 = vrot.slane %v4794_v18, %v21405_v31  ;;  %v13615_v51 = vcombine.low %v4775_v33, %v24476_v38 }
 0x22a   :  { %v9587_v58 = vrot.slane %v9573_v5, %v21405_v31  ;;  %v4809_v20 = vcombine.high %v4801_v55, %v4801_v55  ;;  %v13630_v19 = vrot.slane %v13616_v30, %v21405_v31  ;;  %v13632_v3 = vcombine.low %v24506_v14, %v4801_v55 }
 0x22b   :  { %v9571_v44 = vcombine.low %v9563_v53, %v9570_v10  ;;  %v9580_v9 = vrot.slane %v9572_v7, %v21405_v31  ;;  %v13623_v36 = vrot.slane %v13615_v51, %v21405_v31  ;;  %v3725_v37 = vcombine.high %v24295_v24, %v24295_v24  ;;  %v1100_v10 = vld [vmem:[%s28419_s0 + $0x159] sm:$0x3f] }
 0x22c   :  { %v13633_v38 = vcombine.low %v4809_v20, %v4808_v50  ;;  %v13640_v43 = vrot.slane %v13632_v3, %v21405_v31  ;;  %v3758_v13 = vcombine.high %v19205_v4, %v19205_v4  ;;  %v3765_v40 = vrot.slane %v19205_v4, %v21405_v31 }
 0x22d   :  { %v9588_v25 = vcombine.low %v9580_v9, %v9587_v58  ;;  %v18086_v15 = vsel %vm18073_vm0, %v9571_v44, %v20116_v63  ;;  %v13631_v1 = vcombine.low %v13623_v36, %v13630_v19  ;;  %v3739_v14 = vrot.slane %v3725_v37, %v21405_v31 }
 0x22e   :  { %v13647_v54 = vrot.slane %v13633_v38, %v21405_v31  ;;  %v3772_v0 = vrot.slane %v3758_v13, %v21405_v31  ;;  %v3773_v49 = vcombine.high %v3765_v40, %v3765_v40  ;;  %v12636_v24 = vcombine.low %v24388_v21, %v24375_v60 }
 0x22f   :  { %v18087_v46 = vsel %vm18073_vm0, %v9588_v25, %v20117_v39  ;;  %v12635_v22 = vcombine.low %v3739_v14, %v24362_v26  ;;  %v12652_v16 = vcombine.low %v24393_v35, %v3765_v40  ;;  %v18434_v63 = vsel %vm18423_vm9, %v24541_v45, %v20111_v57  ;;  %v19317_v57 = vld [vmem:[%s28419_s0 + $0x12a] sm:$0x3f]  ;;  %v20135_v14 = vpop.permute.xlu0 %20134 }
 0x230   :  { %v13648_v34 = vcombine.low %v13640_v43, %v13647_v54  ;;  %v12650_v61 = vrot.slane %v12636_v24, %v21405_v31  ;;  %v12653_v33 = vcombine.low %v3773_v49, %v3772_v0  ;;  %v18435_v60 = vsel %vm18423_vm9, %v24544_v29, %v20112_v62  ;;  %v1099_v62 = vld [vmem:[%s28419_s0 + $0x151] sm:$0xff] }
 0x231   :  { %v12643_v21 = vrot.slane %v12635_v22, %v21405_v31  ;;  %v12660_v26 = vrot.slane %v12652_v16, %v21405_v31  ;;  %v18478_v35 = vpack.c.bf16 %v18435_v60, %v18434_v63  ;;  %v20132_v39 = vunpack.i.h.bf16 %v24627_v23 }
 0x232   :  { %v20408_v45 = vpack.i.bf16 %v13648_v34, %v13631_v1  ;;  %v12667_v18 = vrot.slane %v12653_v33, %v21405_v31  ;;  %v20131_v53 = vunpack.i.l.bf16 %v24627_v23  ;;  %v20127_v28 = vunpack.i.h.bf16 %v20125_v32  ;;  %v2136_v23 = vld [vmem:[%s28419_s0 + $0x15a] sm:$0x3f] }
 0x233   :  { %v12651_v29 = vcombine.low %v12643_v21, %v12650_v61  ;;  %19656 = vmatmul.mubr.msk.bf16.gmra.mrb[20].mxu0 %vm18541_vm10, %v18478_v35  ;;  %v20126_v5 = vunpack.i.l.bf16 %v20125_v32  ;;  %v18136_v55 = vsel %vm18123_vm1, %v18086_v15, %v20121_v12  ;;  %v18137_v30 = vsel %vm18123_vm1, %v18087_v46, %v20122_v42  ;;  %v1101_v42 = vld [vmem:[%s28419_s0 + $0x161] sm:$0xff]  ;;  %v19372_v35 = vld [vmem:[%s28419_s0 + $0x130] sm:$0xff] }
 0x234   :  { %20409 = vrot.lane.b32.xlu1 %v20408_v45, %s21279_s11  ;;  %v12668_v7 = vcombine.low %v12660_v26, %v12667_v18  ;;  %v18187_v50 = vsel %vm18173_vm2, %v18137_v30, %v20127_v28  ;;  %v5797_v51 = vcombine.high %v24372_v8, %v24372_v8  ;;  %v5830_v4 = vcombine.high %v19317_v57, %v19317_v57 }
 0x235   :  { %v18186_v58 = vsel %vm18173_vm2, %v18136_v55, %v20126_v5  ;;  %v5837_v12 = vrot.slane %v19317_v57, %v21405_v31  ;;  %v14596_v41 = vcombine.low %v24473_v47, %v24459_v48  ;;  %v1800_v20 = vcombine.high %v1099_v62, %v1099_v62  ;;  %19659 = vmatprep.mubr.msk.bf16.mxu0 %vm21286_vm8, %v28426_v11  ;;  %v24682_v47 = vpop.permute.xlu1 %20139  ;;  %v19373_v62 = vld [vmem:[%s28419_s0 + $0x138] sm:$0x3f] }
 0x236   :  { %v20403_v19 = vpack.i.bf16 %v12668_v7, %v12651_v29  ;;  %v5811_v3 = vrot.slane %v5797_v51, %v21405_v31  ;;  %v5844_v8 = vrot.slane %v5830_v4, %v21405_v31  ;;  %v1817_v44 = vcombine.high %v1100_v10, %v1100_v10  ;;  %v2135_v29 = vld [vmem:[%s28419_s0 + $0x152] sm:$0xff] }
 0x237   :  { %v5845_v9 = vcombine.high %v5837_v12, %v5837_v12  ;;  %v14610_v36 = vrot.slane %v14596_v41, %v21405_v31  ;;  %v14612_v37 = vcombine.low %v24482_v59, %v5837_v12  ;;  %v24680_v48 = vrot.slane %v1800_v20, %v21405_v31 }
 0x238   :  { %20404 = vrot.lane.b32.xlu0 %v20403_v19, %s21277_s9  ;;  %v14595_v38 = vcombine.low %v5811_v3, %v24451_v6  ;;  %v1824_v43 = vrot.slane %v1100_v10, %v21405_v31  ;;  %v1831_v13 = vrot.slane %v1817_v44, %v21405_v31  ;;  %v1833_v40 = vcombine.high %v1101_v42, %v1101_v42  ;;  %v2137_v44 = vld [vmem:[%s28419_s0 + $0x162] sm:$0xff] }
 0x239   :  { %v14613_v25 = vcombine.low %v5845_v9, %v5844_v8  ;;  %v14620_v15 = vrot.slane %v14612_v37, %v21405_v31  ;;  %v1816_v59 = vcombine.high %v24680_v48, %v24680_v48  ;;  %v1840_v1 = vrot.slane %v1101_v42, %v21405_v31 }
 0x23a   :  { %v14603_v54 = vrot.slane %v14595_v38, %v21405_v31  ;;  %v1832_v0 = vcombine.high %v1824_v43, %v1824_v43  ;;  %v24694_v49 = vrot.slane %v1833_v40, %v21405_v31  ;;  %v20142_v6 = vunpack.i.h.bf16 %v24682_v47 }
 0x23b   :  { %v14627_v24 = vrot.slane %v14613_v25, %v21405_v31  ;;  %v1848_v46 = vcombine.high %v1840_v1, %v1840_v1  ;;  %v10811_v22 = vcombine.low %v1816_v59, %v1824_v43  ;;  %v20141_v16 = vunpack.i.l.bf16 %v24682_v47  ;;  %v24760_v59 = vpop.permute.xlu1 %20149  ;;  %v19213_v47 = vld [vmem:[%s28419_s0 + $0x168] sm:$0x3f] }
 0x23c   :  { %28443 = vst [vmem:[#allocation5_spill] sm:$0xff] %v24694_v49  ;;  %v14611_v63 = vcombine.low %v14603_v54, %v14610_v36  ;;  %v24701_v32 = vcombine.high %v24694_v49, %v24694_v49  ;;  %v10812_v34 = vcombine.low %v1832_v0, %v1831_v13  ;;  %v20137_v61 = vunpack.i.h.bf16 %v20135_v14 }
 0x23d   :  { %v14628_v33 = vcombine.low %v14620_v15, %v14627_v24  ;;  %v10819_v60 = vrot.slane %v10811_v22, %v21405_v31  ;;  %v10828_v21 = vcombine.low %v1840_v1, %v1848_v46  ;;  %v20136_v26 = vunpack.i.l.bf16 %v20135_v14 }
 0x23e   :  { %v10826_v57 = vrot.slane %v10812_v34, %v21405_v31  ;;  %v10829_v45 = vcombine.low %v24694_v49, %v24701_v32  ;;  %v18236_v18 = vsel %vm18223_vm3, %v18186_v58, %v20131_v53  ;;  %v18237_v28 = vsel %vm18223_vm3, %v18187_v50, %v20132_v39  ;;  %v20145_v34 = vpop.permute.xlu0 %20144 }
 0x23f   :  { %v20418_v5 = vpack.i.bf16 %v14628_v33, %v14611_v63  ;;  %v10836_v55 = vrot.slane %v10828_v21, %v21405_v31  ;;  %v18286_v30 = vsel %vm18273_vm4, %v18236_v18, %v20136_v26  ;;  %v18287_v10 = vsel %vm18273_vm4, %v18237_v28, %v20137_v61 }
 0x240   :  { %v10827_v39 = vcombine.low %v10819_v60, %v10826_v57  ;;  %v10843_v53 = vrot.slane %v10829_v45, %v21405_v31  ;;  %v6834_v7 = vcombine.high %v24340_v2, %v24340_v2  ;;  %v6850_v50 = vcombine.high %v19372_v35, %v19372_v35 }
 0x241   :  { %20419 = vrot.lane.b32.xlu1 %v20418_v5, %s21282_s18  ;;  %v24731_v51 = vrot.slane %v19372_v35, %v21405_v31  ;;  %v6867_v4 = vcombine.high %v19373_v62, %v19373_v62  ;;  %v6874_v58 = vrot.slane %v19373_v62, %v21405_v31  ;;  %v2836_v12 = vcombine.high %v2135_v29, %v2135_v29  ;;  %v19428_v5 = vld [vmem:[%s28419_s0 + $0x131] sm:$0xff] }
 0x242   :  { %v10844_v41 = vcombine.low %v10836_v55, %v10843_v53  ;;  %v6848_v42 = vrot.slane %v6834_v7, %v21405_v31  ;;  %v24736_v20 = vrot.slane %v6850_v50, %v21405_v31  ;;  %v2853_v19 = vcombine.high %v2136_v23, %v2136_v23  ;;  %v19429_v7 = vld [vmem:[%s28419_s0 + $0x139] sm:$0x3f] }
 0x243   :  { %v24740_v2 = vcombine.high %v24731_v51, %v24731_v51  ;;  %v6881_v3 = vrot.slane %v6867_v4, %v21405_v31  ;;  %v6882_v8 = vcombine.high %v6874_v58, %v6874_v58  ;;  %v24747_v9 = vrot.slane %v2836_v12, %v21405_v31 }
 0x244   :  { %v20413_v36 = vpack.i.bf16 %v10844_v41, %v10827_v39  ;;  %v24751_v37 = vcombine.high %v24736_v20, %v24736_v20  ;;  %v15575_v38 = vcombine.low %v6848_v42, %v24731_v51  ;;  %v2860_v43 = vrot.slane %v2136_v23, %v21405_v31 }
 0x245   :  { %28444 = vst [vmem:[#allocation6_spill] sm:$0xff] %v24747_v9  ;;  %v15576_v13 = vcombine.low %v24740_v2, %v24736_v20  ;;  %v15593_v40 = vcombine.low %v6882_v8, %v6881_v3  ;;  %v2852_v25 = vcombine.high %v24747_v9, %v24747_v9  ;;  %v2867_v15 = vrot.slane %v2853_v19, %v21405_v31 }
 0x246   :  { %20414 = vrot.lane.b32.xlu0 %v20413_v36, %s21278_s10  ;;  %v15583_v1 = vrot.slane %v15575_v38, %v21405_v31  ;;  %v15592_v14 = vcombine.low %v24751_v37, %v6874_v58  ;;  %v2868_v54 = vcombine.high %v2860_v43, %v2860_v43  ;;  %v2869_v0 = vcombine.high %v2137_v44, %v2137_v44 }
 0x247   :  { %v15590_v24 = vrot.slane %v15576_v13, %v21405_v31  ;;  %v15607_v46 = vrot.slane %v15593_v40, %v21405_v31  ;;  %v2876_v22 = vrot.slane %v2137_v44, %v21405_v31  ;;  %v11791_v63 = vcombine.low %v2852_v25, %v2860_v43 }
 0x248   :  { %v15600_v61 = vrot.slane %v15592_v14, %v21405_v31  ;;  %v24770_v33 = vrot.slane %v2869_v0, %v21405_v31  ;;  %v11792_v60 = vcombine.low %v2868_v54, %v2867_v15  ;;  %v20152_v21 = vunpack.i.h.bf16 %v24760_v59  ;;  %v19214_v14 = vld [vmem:[%s28419_s0 + $0x170] sm:$0xff] }
 0x249   :  { %v15591_v26 = vcombine.low %v15583_v1, %v15590_v24  ;;  %v2884_v35 = vcombine.high %v2876_v22, %v2876_v22  ;;  %v11799_v57 = vrot.slane %v11791_v63, %v21405_v31  ;;  %v20151_v45 = vunpack.i.l.bf16 %v24760_v59 }
 0x24a   :  { %28445 = vst [vmem:[#allocation7_spill] sm:$0xff] %v24770_v33  ;;  %v15608_v18 = vcombine.low %v15600_v61, %v15607_v46  ;;  %v24777_v28 = vcombine.high %v24770_v33, %v24770_v33  ;;  %v11806_v62 = vrot.slane %v11792_v60, %v21405_v31  ;;  %v20147_v29 = vunpack.i.h.bf16 %v20145_v34 }
 0x24b   :  { %v11808_v55 = vcombine.low %v2876_v22, %v2884_v35  ;;  %v20146_v23 = vunpack.i.l.bf16 %v20145_v34  ;;  %v18336_v39 = vsel %vm18323_vm5, %v18286_v30, %v20141_v16  ;;  %v18337_v53 = vsel %vm18323_vm5, %v18287_v10, %v20142_v6  ;;  %v19212_v16 = vld [vmem:[%s28419_s0 + $0x160] sm:$0xff]  ;;  %v24839_v34 = vpop.permute.xlu1 %20159 }
 0x24c   :  { %v20428_v50 = vpack.i.bf16 %v15608_v18, %v15591_v26  ;;  %v11807_v4 = vcombine.low %v11799_v57, %v11806_v62  ;;  %v11809_v58 = vcombine.low %v24770_v33, %v24777_v28  ;;  %v24795_v12 = vsel %vm18373_vm6, %v18337_v53, %v20147_v29 }
 0x24d   :  { %v11816_v6 = vrot.slane %v11808_v55, %v21405_v31  ;;  %v24805_v30 = vsel %vm18373_vm6, %v18336_v39, %v20146_v23  ;;  %v7870_v10 = vcombine.high %v24456_v27, %v24456_v27  ;;  %v7886_v41 = vcombine.high %v19428_v5, %v19428_v5 }
 0x24e   :  { %20429 = vrot.lane.b32.xlu1 %v20428_v50, %s21281_s13  ;;  %v11823_v42 = vrot.slane %v11809_v58, %v21405_v31  ;;  %v24812_v19 = vrot.slane %v19428_v5, %v21405_v31  ;;  %v7903_v3 = vcombine.high %v19429_v7, %v19429_v7  ;;  %v7910_v8 = vrot.slane %v19429_v7, %v21405_v31  ;;  %v24849_v5 = vpop.permute.xlu0 %20154  ;;  %v41_v7 = vld [vmem:[%s28419_s0 + $0x80] sm:$0xff] }
 0x24f   :  { %v7884_v44 = vrot.slane %v7870_v10, %v21405_v31  ;;  %v24817_v36 = vrot.slane %v7886_v41, %v21405_v31  ;;  %v3873_v38 = vcombine.high %v19212_v16, %v19212_v16  ;;  %v3890_v43 = vcombine.high %v19213_v47, %v19213_v47 }
 0x250   :  { %v11824_v13 = vcombine.low %v11816_v6, %v11823_v42  ;;  %v24821_v27 = vcombine.high %v24812_v19, %v24812_v19  ;;  %v7917_v40 = vrot.slane %v7903_v3, %v21405_v31  ;;  %v7918_v25 = vcombine.high %v7910_v8, %v7910_v8 }
 0x251   :  { %v24826_v15 = vcombine.high %v24817_v36, %v24817_v36  ;;  %v16555_v1 = vcombine.low %v7884_v44, %v24812_v19  ;;  %v24833_v54 = vrot.slane %v3873_v38, %v21405_v31  ;;  %v3897_v0 = vrot.slane %v19213_v47, %v21405_v31  ;;  %v42_v47 = vld [vmem:[%s28419_s0 + $0x88] sm:$0x3f]  ;;  %v24874_v38 = vld [vmem:[%s28419_s0 + $0x90] sm:$0xff] }
 0x252   :  { %v20423_v24 = vpack.i.bf16 %v11824_v13, %v11807_v4  ;;  %v16556_v46 = vcombine.low %v24821_v27, %v24817_v36  ;;  %v16573_v22 = vcombine.low %v7918_v25, %v7917_v40  ;;  %v3904_v63 = vrot.slane %v3890_v43, %v21405_v31 }
 0x253   :  { %28446 = vst [vmem:[#allocation8_spill] sm:$0xff] %v24833_v54  ;;  %v16563_v61 = vrot.slane %v16555_v1, %v21405_v31  ;;  %v16572_v60 = vcombine.low %v24826_v15, %v7910_v8  ;;  %v3889_v26 = vcombine.high %v24833_v54, %v24833_v54  ;;  %v3905_v35 = vcombine.high %v3897_v0, %v3897_v0 }
 0x254   :  { %20424 = vrot.lane.b32.xlu0 %v20423_v24, %s21280_s12  ;;  %v16570_v57 = vrot.slane %v16556_v46, %v21405_v31  ;;  %v16587_v18 = vrot.slane %v16573_v22, %v21405_v31  ;;  %v3906_v62 = vcombine.high %v19214_v14, %v19214_v14  ;;  %v3913_v29 = vrot.slane %v19214_v14, %v21405_v31  ;;  %v19484_v14 = vld [vmem:[%s28419_s0 + $0x132] sm:$0xff] }
 0x255   :  { %v16580_v55 = vrot.slane %v16572_v60, %v21405_v31  ;;  %v12771_v23 = vcombine.low %v3889_v26, %v3897_v0  ;;  %v12772_v39 = vcombine.low %v3905_v35, %v3904_v63  ;;  %v20162_v53 = vunpack.i.h.bf16 %v24839_v34 }
 0x256   :  { %v16571_v50 = vcombine.low %v16563_v61, %v16570_v57  ;;  %v24857_v4 = vrot.slane %v3906_v62, %v21405_v31  ;;  %v3921_v58 = vcombine.high %v3913_v29, %v3913_v29  ;;  %v20161_v16 = vunpack.i.l.bf16 %v24839_v34  ;;  %v19485_v62 = vld [vmem:[%s28419_s0 + $0x13a] sm:$0x3f] }
 0x257   :  { %v16588_v6 = vcombine.low %v16580_v55, %v16587_v18  ;;  %v12779_v10 = vrot.slane %v12771_v23, %v21405_v31  ;;  %v12786_v41 = vrot.slane %v12772_v39, %v21405_v31  ;;  %v20157_v42 = vunpack.i.h.bf16 %v24849_v5 }
 0x258   :  { %28447 = vst [vmem:[#allocation9_spill] sm:$0xff] %v24857_v4  ;;  %v24868_v3 = vcombine.high %v24857_v4, %v24857_v4  ;;  %v12788_v8 = vcombine.low %v3913_v29, %v3921_v58  ;;  %v20156_v44 = vunpack.i.l.bf16 %v24849_v5  ;;  %v401_v43 = vcombine.high %v41_v7, %v41_v7 }
 0x259   :  { %v20438_v13 = vpack.i.bf16 %v16588_v6, %v16571_v50  ;;  %v12787_v40 = vcombine.low %v12779_v10, %v12786_v41  ;;  %v408_v25 = vrot.slane %v41_v7, %v21405_v31  ;;  %v418_v1 = vcombine.high %v42_v47, %v42_v47 }
 0x25a   :  { %v12789_v0 = vcombine.low %v24857_v4, %v24868_v3  ;;  %v12796_v24 = vrot.slane %v12788_v8, %v21405_v31  ;;  %v415_v46 = vrot.slane %v401_v43, %v21405_v31  ;;  %v425_v22 = vrot.slane %v42_v47, %v21405_v31  ;;  %v19269_v8 = vld [vmem:[%s28419_s0 + $0x169] sm:$0x3f] }
 0x25b   :  { %20439 = vrot.lane.b32.xlu1 %v20438_v13, %s21284_s24  ;;  %v416_v63 = vcombine.high %v408_v25, %v408_v25  ;;  %v432_v61 = vrot.slane %v418_v1, %v21405_v31  ;;  %v24889_v60 = vrot.slane %v24874_v38, %v21405_v31  ;;  %v8906_v26 = vcombine.high %v24436_v52, %v24436_v52 }
 0x25c   :  { %v12803_v35 = vrot.slane %v12789_v0, %v21405_v31  ;;  %v417_v57 = vcombine.high %v415_v46, %v415_v46  ;;  %v433_v18 = vcombine.high %v425_v22, %v425_v22  ;;  %v8922_v29 = vcombine.high %v19484_v14, %v19484_v14 }
 0x25d   :  { %v9589_v5 = vcombine.low %v408_v25, %v416_v63  ;;  %v9607_v55 = vcombine.low %v432_v61, %v24889_v60  ;;  %v8920_v23 = vrot.slane %v8906_v26, %v21405_v31  ;;  %v24900_v39 = vrot.slane %v19484_v14, %v21405_v31  ;;  %v19270_v63 = vld [vmem:[%s28419_s0 + $0x171] sm:$0xff] }
 0x25e   :  { %v12804_v7 = vcombine.low %v12796_v24, %v12803_v35  ;;  %v9590_v50 = vcombine.low %v415_v46, %v417_v57  ;;  %v9606_v52 = vcombine.low %v425_v22, %v433_v18  ;;  %v24903_v58 = vrot.slane %v8922_v29, %v21405_v31 }
 0x25f   :  { %v9597_v47 = vrot.slane %v9589_v5, %v21405_v31  ;;  %v9621_v6 = vrot.slane %v9607_v55, %v21405_v31  ;;  %v24909_v10 = vcombine.high %v24900_v39, %v24900_v39  ;;  %v8939_v41 = vcombine.high %v19485_v62, %v19485_v62 }
 0x260   :  { %v20433_v43 = vpack.i.bf16 %v12804_v7, %v12787_v40  ;;  %v9604_v13 = vrot.slane %v9590_v50, %v21405_v31  ;;  %v9614_v25 = vrot.slane %v9606_v52, %v21405_v31  ;;  %v24918_v1 = vcombine.high %v24903_v58, %v24903_v58  ;;  %v24936_v7 = vpop.permute.xlu1 %20169 }
 0x261   :  { %v8946_v14 = vrot.slane %v19485_v62, %v21405_v31  ;;  %v8953_v0 = vrot.slane %v8939_v41, %v21405_v31  ;;  %v17535_v24 = vcombine.low %v8920_v23, %v24900_v39  ;;  %v17536_v46 = vcombine.low %v24909_v10, %v24903_v58 }
 0x262   :  { %20434 = vrot.lane.b32.xlu0 %v20433_v43, %s21277_s9  ;;  %v9605_v40 = vcombine.low %v9597_v47, %v9604_v13  ;;  %v9622_v22 = vcombine.low %v9614_v25, %v9621_v6  ;;  %v4926_v61 = vcombine.high %v19269_v8, %v19269_v8  ;;  %v4933_v26 = vrot.slane %v19269_v8, %v21405_v31 }
 0x263   :  { %v8954_v35 = vcombine.high %v8946_v14, %v8946_v14  ;;  %v17543_v57 = vrot.slane %v17535_v24, %v21405_v31  ;;  %v17550_v18 = vrot.slane %v17536_v46, %v21405_v31  ;;  %v17552_v62 = vcombine.low %v24918_v1, %v8946_v14  ;;  %v19325_v46 = vld [vmem:[%s28419_s0 + $0x16a] sm:$0x3f] }
 0x264   :  { %v18088_v29 = vsel %vm18073_vm0, %v9605_v40, %v20156_v44  ;;  %v18089_v5 = vsel %vm18073_vm0, %v9622_v22, %v20157_v42  ;;  %v4940_v55 = vrot.slane %v4926_v61, %v21405_v31  ;;  %v4941_v23 = vcombine.high %v4933_v26, %v4933_v26  ;;  %v20165_v44 = vpop.permute.xlu0 %20164 }
 0x265   :  { %v17551_v50 = vcombine.low %v17543_v57, %v17550_v18  ;;  %v17553_v52 = vcombine.low %v8954_v35, %v8953_v0  ;;  %v17560_v47 = vrot.slane %v17552_v62, %v21405_v31  ;;  %v4942_v6 = vcombine.high %v19270_v63, %v19270_v63  ;;  %v19326_v35 = vld [vmem:[%s28419_s0 + $0x172] sm:$0xff] }
 0x266   :  { %v24940_v41 = vrot.slane %v19270_v63, %v21405_v31  ;;  %v13751_v8 = vcombine.low %v24701_v32, %v4933_v26  ;;  %v13752_v43 = vcombine.low %v4941_v23, %v4940_v55  ;;  %v18436_v42 = vsel %vm18423_vm9, %v24805_v30, %v20151_v45  ;;  %v1094_v23 = vld [vmem:[%s28419_s0 + $0x129] sm:$0x3f] }
 0x267   :  { %v17567_v13 = vrot.slane %v17553_v52, %v21405_v31  ;;  %v24949_v25 = vrot.slane %v4942_v6, %v21405_v31  ;;  %v18437_v14 = vsel %vm18423_vm9, %v24795_v12, %v20152_v21  ;;  %v20172_v0 = vunpack.i.h.bf16 %v24936_v7 }
 0x268   :  { %v24958_v32 = vcombine.high %v24940_v41, %v24940_v41  ;;  %v13759_v24 = vrot.slane %v13751_v8, %v21405_v31  ;;  %v13766_v45 = vrot.slane %v13752_v43, %v21405_v31  ;;  %v18479_v30 = vpack.c.bf16 %v18437_v14, %v18436_v42 }
 0x269   :  { %28448 = vst [vmem:[#allocation10_spill] sm:$0xff] %v24949_v25  ;;  %v17568_v40 = vcombine.low %v17560_v47, %v17567_v13  ;;  %v24967_v59 = vcombine.high %v24949_v25, %v24949_v25  ;;  %v20171_v21 = vunpack.i.l.bf16 %v24936_v7  ;;  %v20167_v12 = vunpack.i.h.bf16 %v20165_v44  ;;  %v2130_v7 = vld [vmem:[%s28419_s0 + $0x12a] sm:$0x3f] }
 0x26a   :  { %v13767_v22 = vcombine.low %v13759_v24, %v13766_v45  ;;  %v13768_v63 = vcombine.low %v24940_v41, %v24958_v32  ;;  %19660 = vmatmul.mubr.msk.bf16.gmra.mrb[24].mxu0 %vm18541_vm10, %v18479_v30  ;;  %v20166_v61 = vunpack.i.l.bf16 %v20165_v44  ;;  %v18138_v26 = vsel %vm18123_vm1, %v18088_v29, %v20161_v16  ;;  %v25001_v44 = vpop.permute.xlu1 %20179 }
 0x26b   :  { %v20448_v57 = vpack.i.bf16 %v17568_v40, %v17551_v50  ;;  %v13769_v18 = vcombine.low %v24949_v25, %v24967_v59  ;;  %v18139_v62 = vsel %vm18123_vm1, %v18089_v5, %v20162_v53  ;;  %v5962_v55 = vcombine.high %v19325_v46, %v19325_v46  ;;  %19663 = vmatprep.mubr.msk.bf16.mxu0 %vm21286_vm8, %v28426_v11 }
 0x26c   :  { %v13776_v16 = vrot.slane %v13768_v63, %v21405_v31  ;;  %v18188_v29 = vsel %vm18173_vm2, %v18138_v26, %v20166_v61  ;;  %v18189_v50 = vsel %vm18173_vm2, %v18139_v62, %v20167_v12  ;;  %v5969_v52 = vrot.slane %v19325_v46, %v21405_v31  ;;  %v20175_v12 = vpop.permute.xlu0 %20174 }
 0x26d   :  { %20449 = vrot.lane.b32.xlu1 %v20448_v57, %s21283_s21  ;;  %v13783_v34 = vrot.slane %v13769_v18, %v21405_v31  ;;  %v5976_v53 = vrot.slane %v5962_v55, %v21405_v31  ;;  %v5978_v5 = vcombine.high %v19326_v35, %v19326_v35  ;;  %v24997_v47 = vrot.slane %v19326_v35, %v21405_v31 }
 0x26e   :  { %v5977_v6 = vcombine.high %v5969_v52, %v5969_v52  ;;  %v14731_v8 = vcombine.low %v24777_v28, %v5969_v52  ;;  %v1718_v43 = vcombine.high %v1094_v23, %v1094_v23  ;;  %v1725_v42 = vrot.slane %v1094_v23, %v21405_v31  ;;  %v19382_v52 = vld [vmem:[%s28419_s0 + $0x180] sm:$0xff] }
 0x26f   :  { %v13784_v13 = vcombine.low %v13776_v16, %v13783_v34  ;;  %v25004_v14 = vrot.slane %v5978_v5, %v21405_v31  ;;  %v25008_v24 = vcombine.high %v24997_v47, %v24997_v47  ;;  %v10725_v45 = vcombine.low %v24515_v17, %v24528_v56 }
 0x270   :  { %v14732_v30 = vcombine.low %v5977_v6, %v5976_v53  ;;  %v14739_v46 = vrot.slane %v14731_v8, %v21405_v31  ;;  %v1732_v28 = vrot.slane %v1718_v43, %v21405_v31  ;;  %v1733_v40 = vcombine.high %v1725_v42, %v1725_v42  ;;  %v2129_v8 = vld [vmem:[%s28419_s0 + $0x122] sm:$0xff] }
 0x271   :  { %28449 = vst [vmem:[#allocation11_spill] sm:$0xff] %v25004_v14  ;;  %v20443_v63 = vpack.i.bf16 %v13784_v13, %v13767_v22  ;;  %v25016_v61 = vcombine.high %v25004_v14, %v25004_v14  ;;  %v14748_v26 = vcombine.low %v24997_v47, %v25008_v24  ;;  %v20182_v35 = vunpack.i.h.bf16 %v25001_v44  ;;  %v19381_v22 = vld [vmem:[%s28419_s0 + $0x178] sm:$0x3f] }
 0x272   :  { %v14746_v57 = vrot.slane %v14732_v30, %v21405_v31  ;;  %v10726_v17 = vcombine.low %v1725_v42, %v1733_v40  ;;  %v10727_v56 = vcombine.low %v1732_v28, %v24812_v19  ;;  %v20181_v18 = vunpack.i.l.bf16 %v25001_v44  ;;  %v25114_v44 = vld [vmem:[%s28419_s0 + $0x140] sm:$0xff] }
 0x273   :  { %20444 = vrot.lane.b32.xlu0 %v20443_v63, %s21279_s11  ;;  %v14749_v62 = vcombine.low %v25004_v14, %v25016_v61  ;;  %v14756_v55 = vrot.slane %v14748_v26, %v21405_v31  ;;  %v20177_v23 = vunpack.i.h.bf16 %v20175_v12  ;;  %v20176_v16 = vunpack.i.l.bf16 %v20175_v12 }
 0x274   :  { %v14747_v34 = vcombine.low %v14739_v46, %v14746_v57  ;;  %v10734_v53 = vrot.slane %v10726_v17, %v21405_v31  ;;  %v10741_v5 = vrot.slane %v10727_v56, %v21405_v31  ;;  %v18238_v6 = vsel %vm18223_vm3, %v18188_v29, %v20171_v21 }
 0x275   :  { %v14763_v43 = vrot.slane %v14749_v62, %v21405_v31  ;;  %v18239_v42 = vsel %vm18223_vm3, %v18189_v50, %v20172_v0  ;;  %v18288_v13 = vsel %vm18273_vm4, %v18238_v6, %v20176_v16  ;;  %v6999_v30 = vcombine.high %v19381_v22, %v19381_v22 }
 0x276   :  { %v10742_v46 = vcombine.low %v10734_v53, %v10741_v5  ;;  %v18289_v28 = vsel %vm18273_vm4, %v18239_v42, %v20177_v23  ;;  %v7006_v40 = vrot.slane %v19381_v22, %v21405_v31  ;;  %v7015_v12 = vcombine.high %v19382_v52, %v19382_v52  ;;  %v25064_v23 = vpop.permute.xlu1 %20189 }
 0x277   :  { %v14764_v21 = vcombine.low %v14756_v55, %v14763_v43  ;;  %v7013_v29 = vrot.slane %v6999_v30, %v21405_v31  ;;  %v25049_v63 = vrot.slane %v19382_v52, %v21405_v31  ;;  %v2737_v0 = vcombine.high %v2129_v8, %v2129_v8 }
 0x278   :  { %v20453_v50 = vpack.i.bf16 %v10742_v46, %v10725_v45  ;;  %v7014_v26 = vcombine.high %v7006_v40, %v7006_v40  ;;  %v25055_v57 = vrot.slane %v7015_v12, %v21405_v31  ;;  %v15711_v17 = vcombine.low %v24868_v3, %v7006_v40  ;;  %v20185_v46 = vpop.permute.xlu0 %20184 }
 0x279   :  { %v20458_v56 = vpack.i.bf16 %v14764_v21, %v14747_v34  ;;  %v25060_v22 = vcombine.high %v25049_v63, %v25049_v63  ;;  %v2744_v62 = vrot.slane %v2129_v8, %v21405_v31  ;;  %v2751_v55 = vrot.slane %v2737_v0, %v21405_v31 }
 0x27a   :  { %20454 = vrot.lane.b32.xlu0 %v20453_v50, %s21278_s10  ;;  %v25069_v45 = vcombine.high %v25055_v57, %v25055_v57  ;;  %v15712_v16 = vcombine.low %v7014_v26, %v7013_v29  ;;  %v15719_v3 = vrot.slane %v15711_v17, %v21405_v31  ;;  %v2754_v52 = vcombine.high %v2130_v7, %v2130_v7  ;;  %v19437_v17 = vld [vmem:[%s28419_s0 + $0x179] sm:$0x3f] }
 0x27b   :  { %20459 = vrot.lane.b32.xlu1 %v20458_v56, %s21282_s18  ;;  %v15728_v34 = vcombine.low %v25049_v63, %v25060_v22  ;;  %v2752_v53 = vcombine.high %v2744_v62, %v2744_v62  ;;  %v2753_v5 = vcombine.high %v2751_v55, %v2751_v55  ;;  %v2761_v6 = vrot.slane %v2130_v7, %v21405_v31 }
 0x27c   :  { %v15726_v8 = vrot.slane %v15712_v16, %v21405_v31  ;;  %v15729_v43 = vcombine.low %v25055_v57, %v25069_v45  ;;  %v2768_v42 = vrot.slane %v2754_v52, %v21405_v31 }
 0x27d   :  { %v15736_v40 = vrot.slane %v15728_v34, %v21405_v31  ;;  %v2769_v12 = vcombine.high %v2761_v6, %v2761_v6  ;;  %v11689_v21 = vcombine.low %v2744_v62, %v2752_v53  ;;  %v11690_v29 = vcombine.low %v2751_v55, %v2753_v5  ;;  %v19438_v53 = vld [vmem:[%s28419_s0 + $0x181] sm:$0xff] }
 0x27e   :  { %v15727_v0 = vcombine.low %v15719_v3, %v15726_v8  ;;  %v15743_v50 = vrot.slane %v15729_v43, %v21405_v31  ;;  %v11707_v7 = vcombine.low %v2768_v42, %v24900_v39  ;;  %v20187_v34 = vunpack.i.h.bf16 %v20185_v46  ;;  %v19207_v42 = vld [vmem:[%s28419_s0 + $0x138] sm:$0x3f] }
 0x27f   :  { %v11697_v56 = vrot.slane %v11689_v21, %v21405_v31  ;;  %v11704_v16 = vrot.slane %v11690_v29, %v21405_v31  ;;  %v11706_v52 = vcombine.low %v2761_v6, %v2769_v12  ;;  %v20186_v55 = vunpack.i.l.bf16 %v20185_v46 }
 0x280   :  { %v15744_v11 = vcombine.low %v15736_v40, %v15743_v50  ;;  %v11721_v62 = vrot.slane %v11707_v7, %v21405_v31  ;;  %v18338_v3 = vsel %vm18323_vm5, %v18288_v13, %v20181_v18  ;;  %v18339_v6 = vsel %vm18323_vm5, %v18289_v28, %v20182_v35 }
 0x281   :  { %v11705_v5 = vcombine.low %v11697_v56, %v11704_v16  ;;  %v11714_v8 = vrot.slane %v11706_v52, %v21405_v31  ;;  %v8035_v43 = vcombine.high %v19437_v17, %v19437_v17  ;;  %v25105_v40 = vsel %vm18373_vm6, %v18338_v3, %v20186_v55  ;;  %v25134_v52 = vpop.permute.xlu1 %20199 }
 0x282   :  { %v20468_v46 = vpack.i.bf16 %v15744_v11, %v15727_v0  ;;  %v25108_v18 = vsel %vm18373_vm6, %v18339_v6, %v20187_v34  ;;  %v8042_v13 = vrot.slane %v19437_v17, %v21405_v31  ;;  %v8051_v12 = vcombine.high %v19438_v53, %v19438_v53 }
 0x283   :  { %v11722_v35 = vcombine.low %v11714_v8, %v11721_v62  ;;  %v8049_v28 = vrot.slane %v8035_v43, %v21405_v31  ;;  %v25118_v21 = vrot.slane %v19438_v53, %v21405_v31  ;;  %v3791_v0 = vcombine.high %v19207_v42, %v19207_v42 }
 0x284   :  { %20469 = vrot.lane.b32.xlu1 %v20468_v46, %s21281_s13  ;;  %v8050_v11 = vcombine.high %v8042_v13, %v8042_v13  ;;  %v16691_v29 = vcombine.low %v24967_v59, %v8042_v13  ;;  %v3798_v50 = vrot.slane %v19207_v42, %v21405_v31  ;;  %v25124_v17 = vrot.slane %v8051_v12, %v21405_v31 }
 0x285   :  { %v20463_v7 = vpack.i.bf16 %v11722_v35, %v11705_v5  ;;  %v25128_v56 = vcombine.high %v25118_v21, %v25118_v21  ;;  %v25132_v16 = vrot.slane %v25114_v44, %v21405_v31  ;;  %v3805_v55 = vrot.slane %v3791_v0, %v21405_v31  ;;  %v25152_v35 = vpop.permute.xlu0 %20194 }
 0x286   :  { %v16692_v34 = vcombine.low %v8050_v11, %v8049_v28  ;;  %v16699_v62 = vrot.slane %v16691_v29, %v21405_v31  ;;  %v3806_v3 = vcombine.high %v3798_v50, %v3798_v50  ;;  %v25141_v53 = vcombine.high %v25124_v17, %v25124_v17 }
 0x287   :  { %20464 = vrot.lane.b32.xlu0 %v20463_v7, %s21280_s12  ;;  %v16708_v5 = vcombine.low %v25118_v21, %v25128_v56  ;;  %v12669_v8 = vcombine.low %v24731_v51, %v24740_v2  ;;  %v12670_v6 = vcombine.low %v24736_v20, %v24751_v37  ;;  %v12687_v46 = vcombine.low %v3805_v55, %v25132_v16  ;;  %v44_v20 = vld [vmem:[%s28419_s0 + $0x98] sm:$0x3f] }
 0x288   :  { %v16706_v43 = vrot.slane %v16692_v34, %v21405_v31  ;;  %v12686_v42 = vcombine.low %v3798_v50, %v3806_v3  ;;  %v16709_v28 = vcombine.low %v25124_v17, %v25141_v53  ;;  %v25168_v50 = vld [vmem:[%s28419_s0 + $0xa0] sm:$0xff]  ;;  %v19493_v7 = vld [vmem:[%s28419_s0 + $0x17a] sm:$0x3f]  ;;  %v20196_v3 = vunpack.i.l.bf16 %v25152_v35 }
 0x289   :  { %v16716_v12 = vrot.slane %v16708_v5, %v21405_v31  ;;  %v12677_v11 = vrot.slane %v12669_v8, %v21405_v31  ;;  %v12684_v51 = vrot.slane %v12670_v6, %v21405_v31  ;;  %v12701_v29 = vrot.slane %v12687_v46, %v21405_v31 }
 0x28a   :  { %v16707_v2 = vcombine.low %v16699_v62, %v16706_v43  ;;  %v12694_v37 = vrot.slane %v12686_v42, %v21405_v31  ;;  %v16723_v34 = vrot.slane %v16709_v28, %v21405_v31  ;;  %v20197_v62 = vunpack.i.h.bf16 %v25152_v35  ;;  %v19494_v28 = vld [vmem:[%s28419_s0 + $0x182] sm:$0xff] }
 0x28b   :  { %v12685_v55 = vcombine.low %v12677_v11, %v12684_v51  ;;  %v434_v8 = vcombine.high %v24874_v38, %v24874_v38  ;;  %v449_v6 = vcombine.high %v24889_v60, %v24889_v60  ;;  %v451_v43 = vcombine.high %v44_v20, %v44_v20 }
 0x28c   :  { %v12702_v5 = vcombine.low %v12694_v37, %v12701_v29  ;;  %v16724_v42 = vcombine.low %v16716_v12, %v16723_v34  ;;  %v458_v46 = vrot.slane %v44_v20, %v21405_v31  ;;  %v474_v13 = vrot.slane %v25168_v50, %v21405_v31 }
 0x28d   :  { %v9071_v11 = vcombine.high %v19493_v7, %v19493_v7  ;;  %v448_v51 = vrot.slane %v434_v8, %v21405_v31  ;;  %v465_v38 = vrot.slane %v451_v43, %v21405_v31  ;;  %v9078_v37 = vrot.slane %v19493_v7, %v21405_v31 }
 0x28e   :  { %v20473_v35 = vpack.i.bf16 %v12702_v5, %v12685_v55  ;;  %v20478_v60 = vpack.i.bf16 %v16724_v42, %v16707_v2  ;;  %v466_v29 = vcombine.high %v458_v46, %v458_v46  ;;  %v482_v12 = vcombine.high %v474_v13, %v474_v13  ;;  %v19263_v2 = vld [vmem:[%s28419_s0 + $0x139] sm:$0x3f] }
 0x28f   :  { %v9085_v20 = vrot.slane %v9071_v11, %v21405_v31  ;;  %v450_v34 = vcombine.high %v448_v51, %v448_v51  ;;  %v9623_v0 = vcombine.low %v449_v6, %v448_v51  ;;  %v9086_v30 = vcombine.high %v9078_v37, %v9078_v37 }
 0x290   :  { %20474 = vrot.lane.b32.xlu0 %v20473_v35, %s21277_s9  ;;  %v9087_v26 = vcombine.high %v19494_v28, %v19494_v28  ;;  %20479 = vrot.lane.b32.xlu1 %v20478_v60, %s21284_s24  ;;  %v9640_v55 = vcombine.low %v466_v29, %v465_v38  ;;  %v9641_v5 = vcombine.low %v474_v13, %v482_v12  ;;  %v25206_v13 = vld [vmem:[%s28419_s0 + $0x141] sm:$0xff] }
 0x291   :  { %v25193_v8 = vrot.slane %v19494_v28, %v21405_v31  ;;  %v17671_v7 = vcombine.low %v25016_v61, %v9078_v37  ;;  %v9624_v43 = vcombine.low %v450_v34, %v458_v46  ;;  %v9631_v42 = vrot.slane %v9623_v0, %v21405_v31 }
 0x292   :  { %v25201_v6 = vrot.slane %v9087_v26, %v21405_v31  ;;  %v17672_v11 = vcombine.low %v9086_v30, %v9085_v20  ;;  %v9648_v28 = vrot.slane %v9640_v55, %v21405_v31  ;;  %v9655_v35 = vrot.slane %v9641_v5, %v21405_v31 }
 0x293   :  { %v25212_v51 = vcombine.high %v25193_v8, %v25193_v8  ;;  %v17679_v46 = vrot.slane %v17671_v7, %v21405_v31  ;;  %v9638_v0 = vrot.slane %v9624_v43, %v21405_v31  ;;  %v4827_v38 = vcombine.high %v19263_v2, %v19263_v2 }
 0x294   :  { %v25218_v30 = vcombine.high %v25201_v6, %v25201_v6  ;;  %v17686_v26 = vrot.slane %v17672_v11, %v21405_v31  ;;  %v9656_v37 = vcombine.low %v9648_v28, %v9655_v35  ;;  %v4834_v29 = vrot.slane %v19263_v2, %v21405_v31 }
 0x295   :  { %v17688_v60 = vcombine.low %v25193_v8, %v25212_v51  ;;  %v25226_v12 = vrot.slane %v25206_v13, %v21405_v31  ;;  %v9639_v20 = vcombine.low %v9631_v42, %v9638_v0  ;;  %v4841_v5 = vrot.slane %v4827_v38, %v21405_v31  ;;  %v25240_v0 = vpop.permute.xlu1 %20209 }
 0x296   :  { %v17687_v34 = vcombine.low %v17679_v46, %v17686_v26  ;;  %v17689_v55 = vcombine.low %v25201_v6, %v25218_v30  ;;  %v18091_v7 = vsel %vm18073_vm0, %v9656_v37, %v20197_v62  ;;  %v4842_v11 = vcombine.high %v4834_v29, %v4834_v29  ;;  %v20205_v26 = vpop.permute.xlu0 %20204 }
 0x297   :  { %v17696_v43 = vrot.slane %v17688_v60, %v21405_v31  ;;  %v13649_v28 = vcombine.low %v24812_v19, %v24821_v27  ;;  %v18090_v2 = vsel %vm18073_vm0, %v9639_v20, %v20196_v3  ;;  %v13650_v42 = vcombine.low %v24817_v36, %v24826_v15 }
 0x298   :  { %v17703_v35 = vrot.slane %v17689_v55, %v21405_v31  ;;  %v13667_v46 = vcombine.low %v4841_v5, %v25226_v12  ;;  %v13666_v38 = vcombine.low %v4834_v29, %v4842_v11  ;;  %v28450_v37 = vunpack.i.l.bf16 %v25064_v23  ;;  %v19319_v29 = vld [vmem:[%s28419_s0 + $0x13a] sm:$0x3f] }
 0x299   :  { %v13657_v62 = vrot.slane %v13649_v28, %v21405_v31  ;;  %v28451_v3 = vunpack.i.h.bf16 %v25064_v23  ;;  %v13664_v36 = vrot.slane %v13650_v42, %v21405_v31  ;;  %v20212_v11 = vunpack.i.h.bf16 %v25240_v0 }
 0x29a   :  { %v18438_v19 = vsel %vm18423_vm9, %v25105_v40, %v28450_v37  ;;  %v17704_v20 = vcombine.low %v17696_v43, %v17703_v35  ;;  %v13681_v15 = vrot.slane %v13667_v46, %v21405_v31  ;;  %v13674_v5 = vrot.slane %v13666_v38, %v21405_v31 }
 0x29b   :  { %v18439_v60 = vsel %vm18423_vm9, %v25108_v18, %v28451_v3  ;;  %v20211_v40 = vunpack.i.l.bf16 %v25240_v0  ;;  %v20207_v23 = vunpack.i.h.bf16 %v20205_v26  ;;  %v25262_v18 = vld [vmem:[%s28419_s0 + $0x142] sm:$0xff]  ;;  %v13665_v28 = vcombine.low %v13657_v62, %v13664_v36 }
 0x29c   :  { %v18480_v55 = vpack.c.bf16 %v18439_v60, %v18438_v19  ;;  %v20488_v43 = vpack.i.bf16 %v17704_v20, %v17687_v34  ;;  %v20206_v35 = vunpack.i.l.bf16 %v20205_v26  ;;  %v28452_v42 = vunpack.i.l.bf16 %v25134_v52  ;;  %v1102_v34 = vld [vmem:[%s28419_s0 + $0x169] sm:$0x3f]  ;;  %v25278_v26 = vld [vmem:[%s28419_s0 + $0x179] sm:$0x3f] }
 0x29d   :  { %v13682_v38 = vcombine.low %v13674_v5, %v13681_v15  ;;  %v28453_v37 = vunpack.i.h.bf16 %v25134_v52  ;;  %v5863_v19 = vcombine.high %v19319_v29, %v19319_v29  ;;  %v5870_v3 = vrot.slane %v19319_v29, %v21405_v31  ;;  %v25294_v29 = vpop.permute.xlu1 %20219 }
 0x29e   :  { %19664 = vmatmul.mubr.msk.bf16.gmra.mrb[28].mxu0 %vm18541_vm10, %v18480_v55  ;;  %v18140_v46 = vsel %vm18123_vm1, %v18090_v2, %v28452_v42  ;;  %v28454_v62 = vmov 0.0   ;;  %20489 = vrot.lane.b32.xlu1 %v20488_v43, %s21283_s21  ;;  %v25287_v2 = vrot.slane %v25262_v18, %v21405_v31  ;;  %v14629_v60 = vcombine.low %v24900_v39, %v24909_v10 }
 0x29f   :  { %v18141_v0 = vsel %vm18123_vm1, %v18091_v7, %v28453_v37  ;;  %19667 = vmatprep.mubr.msk.bf16.mxu0 %vm21286_vm8, %v28454_v62  ;;  %v18190_v52 = vsel %vm18173_vm2, %v18140_v46, %v20206_v35  ;;  %v20483_v20 = vpack.i.bf16 %v13682_v38, %v13665_v28  ;;  %v5877_v36 = vrot.slane %v5863_v19, %v21405_v31 }
 0x2a0   :  { %v18191_v7 = vsel %vm18173_vm2, %v18141_v0, %v20207_v23  ;;  %v5878_v15 = vcombine.high %v5870_v3, %v5870_v3  ;;  %v14630_v55 = vcombine.low %v24903_v58, %v24918_v1  ;;  %v14637_v5 = vrot.slane %v14629_v60, %v21405_v31  ;;  %v20215_v0 = vpop.permute.xlu0 %20214 }
 0x2a1   :  { %v1850_v43 = vcombine.high %v1102_v34, %v1102_v34  ;;  %v1857_v23 = vrot.slane %v1102_v34, %v21405_v31  ;;  %v25300_v35 = vrot.slane %v25278_v26, %v21405_v31  ;;  %20484 = vrot.lane.b32.xlu0 %v20483_v20, %s21279_s11  ;;  %v14647_v42 = vcombine.low %v5877_v36, %v25287_v2 }
 0x2a2   :  { %v14644_v39 = vrot.slane %v14630_v55, %v21405_v31  ;;  %v14646_v28 = vcombine.low %v5870_v3, %v5878_v15  ;;  %v10862_v58 = vcombine.low %v24958_v32, %v24949_v25  ;;  %v20221_v15 = vunpack.i.l.bf16 %v25294_v29 }
 0x2a3   :  { %v1864_v1 = vrot.slane %v1850_v43, %v21405_v31  ;;  %v1865_v46 = vcombine.high %v1857_v23, %v1857_v23  ;;  %v10863_v38 = vcombine.low %v24967_v59, %v25300_v35  ;;  %v14661_v60 = vrot.slane %v14647_v42, %v21405_v31  ;;  %v25327_v42 = vld [vmem:[%s28419_s0 + $0x150] sm:$0xff] }
 0x2a4   :  { %v14645_v19 = vcombine.low %v14637_v5, %v14644_v39  ;;  %v14654_v34 = vrot.slane %v14646_v28, %v21405_v31  ;;  %v10870_v3 = vrot.slane %v10862_v58, %v21405_v31  ;;  %v20217_v43 = vunpack.i.h.bf16 %v20215_v0  ;;  %v19375_v5 = vld [vmem:[%s28419_s0 + $0x148] sm:$0x3f] }
 0x2a5   :  { %v10845_v20 = vcombine.low %v1857_v23, %v1865_v46  ;;  %v10846_v36 = vcombine.low %v1864_v1, %v24940_v41  ;;  %v10877_v32 = vrot.slane %v10863_v38, %v21405_v31  ;;  %v20216_v59 = vunpack.i.l.bf16 %v20215_v0 }
 0x2a6   :  { %v14662_v55 = vcombine.low %v14654_v34, %v14661_v60  ;;  %v18240_v37 = vsel %vm18223_vm3, %v18190_v52, %v20211_v40  ;;  %v18241_v41 = vsel %vm18223_vm3, %v18191_v7, %v20212_v11  ;;  %v2138_v40 = vld [vmem:[%s28419_s0 + $0x16a] sm:$0x3f]  ;;  %v6883_v46 = vcombine.high %v25114_v44, %v25114_v44  ;;  %v25344_v34 = vld [vmem:[%s28419_s0 + $0x17a] sm:$0x3f] }
 0x2a7   :  { %v10853_v39 = vrot.slane %v10845_v20, %v21405_v31  ;;  %v10860_v28 = vrot.slane %v10846_v36, %v21405_v31  ;;  %v10878_v23 = vcombine.low %v10870_v3, %v10877_v32  ;;  %v18290_v58 = vsel %vm18273_vm4, %v18240_v37, %v20216_v59 }
 0x2a8   :  { %v20498_v52 = vpack.i.bf16 %v14662_v55, %v14645_v19  ;;  %v18291_v1 = vsel %vm18273_vm4, %v18241_v41, %v20217_v43  ;;  %v25338_v11 = vcombine.high %v25132_v16, %v25132_v16  ;;  %v6900_v7 = vcombine.high %v19375_v5, %v19375_v5 }
 0x2a9   :  { %v10861_v38 = vcombine.low %v10853_v39, %v10860_v28  ;;  %v6907_v0 = vrot.slane %v19375_v5, %v21405_v31  ;;  %v25348_v37 = vrot.slane %v6883_v46, %v21405_v31  ;;  %v25352_v44 = vrot.slane %v25327_v42, %v21405_v31  ;;  %v25367_v39 = vpop.permute.xlu1 %20229 }
 0x2aa   :  { %20499 = vrot.lane.b32.xlu1 %v20498_v52, %s21282_s18  ;;  %v2886_v19 = vcombine.high %v2138_v40, %v2138_v40  ;;  %v2893_v60 = vrot.slane %v2138_v40, %v21405_v31  ;;  %v6914_v20 = vrot.slane %v6900_v7, %v21405_v31  ;;  %v15609_v32 = vcombine.low %v25132_v16, %v25338_v11  ;;  %v20225_v7 = vpop.permute.xlu0 %20224 }
 0x2ab   :  { %v20493_v3 = vpack.i.bf16 %v10878_v23, %v10861_v38  ;;  %v6915_v36 = vcombine.high %v6907_v0, %v6907_v0  ;;  %v25360_v55 = vcombine.high %v25348_v37, %v25348_v37  ;;  %v25365_v5 = vrot.slane %v25344_v34, %v21405_v31 }
 0x2ac   :  { %v2900_v43 = vrot.slane %v2886_v19, %v21405_v31  ;;  %v2901_v59 = vcombine.high %v2893_v60, %v2893_v60  ;;  %v15617_v28 = vrot.slane %v15609_v32, %v21405_v31  ;;  %v15627_v16 = vcombine.low %v6914_v20, %v25352_v44 }
 0x2ad   :  { %20494 = vrot.lane.b32.xlu0 %v20493_v3, %s21278_s10  ;;  %v15626_v23 = vcombine.low %v6907_v0, %v6915_v36  ;;  %v11842_v41 = vcombine.low %v25008_v24, %v25004_v14  ;;  %v15610_v40 = vcombine.low %v25348_v37, %v25360_v55  ;;  %v11843_v38 = vcombine.low %v25016_v61, %v25365_v5 }
 0x2ae   :  { %v11825_v52 = vcombine.low %v2893_v60, %v2901_v59  ;;  %v11826_v46 = vcombine.low %v2900_v43, %v24997_v47  ;;  %v15641_v3 = vrot.slane %v15627_v16, %v21405_v31  ;;  %v20227_v43 = vunpack.i.h.bf16 %v20225_v7 }
 0x2af   :  { %v15634_v19 = vrot.slane %v15626_v23, %v21405_v31  ;;  %v11850_v0 = vrot.slane %v11842_v41, %v21405_v31  ;;  %v15624_v24 = vrot.slane %v15610_v40, %v21405_v31  ;;  %v11857_v47 = vrot.slane %v11843_v38, %v21405_v31  ;;  %v19431_v23 = vld [vmem:[%s28419_s0 + $0x149] sm:$0x3f] }
 0x2b0   :  { %v11833_v36 = vrot.slane %v11825_v52, %v21405_v31  ;;  %v11840_v60 = vrot.slane %v11826_v46, %v21405_v31  ;;  %v20226_v59 = vunpack.i.l.bf16 %v20225_v7  ;;  %v18340_v40 = vsel %vm18323_vm5, %v18290_v58, %v20221_v15  ;;  %v25395_v52 = vld [vmem:[%s28419_s0 + $0x151] sm:$0xff]  ;;  %v25412_v58 = vpop.permute.xlu1 %20239 }
 0x2b1   :  { %v15642_v32 = vcombine.low %v15634_v19, %v15641_v3  ;;  %v15625_v16 = vcombine.low %v15617_v28, %v15624_v24  ;;  %v11858_v20 = vcombine.low %v11850_v0, %v11857_v47  ;;  %v28455_v46 = vunpack.i.h.bf16 %v25294_v29  ;;  %v19215_v15 = vld [vmem:[%s28419_s0 + $0x178] sm:$0x3f] }
 0x2b2   :  { %v11841_v41 = vcombine.low %v11833_v36, %v11840_v60  ;;  %v25401_v7 = vsel %vm18373_vm6, %v18340_v40, %v20226_v59  ;;  %v7919_v19 = vcombine.high %v25206_v13, %v25206_v13  ;;  %v25407_v28 = vcombine.high %v25226_v12, %v25226_v12  ;;  %v25420_v13 = vld [vmem:[%s28419_s0 + $0x188] sm:$0x3f] }
 0x2b3   :  { %v18341_v38 = vsel %vm18323_vm5, %v18291_v1, %v28455_v46  ;;  %v20508_v3 = vpack.i.bf16 %v15642_v32, %v15625_v16  ;;  %v7936_v0 = vcombine.high %v19431_v23, %v19431_v23  ;;  %v7943_v36 = vrot.slane %v19431_v23, %v21405_v31 }
 0x2b4   :  { %v20503_v29 = vpack.i.bf16 %v11858_v20, %v11841_v41  ;;  %v25415_v1 = vsel %vm18373_vm6, %v18341_v38, %v20227_v43  ;;  %v25423_v24 = vrot.slane %v7919_v19, %v21405_v31  ;;  %v25428_v60 = vrot.slane %v25395_v52, %v21405_v31 }
 0x2b5   :  { %v16589_v20 = vcombine.low %v25226_v12, %v25407_v28  ;;  %20509 = vrot.lane.b32.xlu1 %v20508_v3, %s21281_s13  ;;  %v7950_v47 = vrot.slane %v7936_v0, %v21405_v31  ;;  %v3923_v32 = vcombine.high %v19215_v15, %v19215_v15  ;;  %v3930_v43 = vrot.slane %v19215_v15, %v21405_v31  ;;  %v25452_v15 = vpop.permute.xlu0 %20234 }
 0x2b6   :  { %20504 = vrot.lane.b32.xlu0 %v20503_v29, %s21280_s12  ;;  %v25439_v23 = vcombine.high %v25423_v24, %v25423_v24  ;;  %v7951_v16 = vcombine.high %v7943_v36, %v7943_v36  ;;  %v25446_v12 = vrot.slane %v25420_v13, %v21405_v31  ;;  %v12822_v19 = vcombine.low %v25060_v22, %v25055_v57  ;;  %v46_v57 = vld [vmem:[%s28419_s0 + $0xa8] sm:$0x3f] }
 0x2b7   :  { %v25442_v41 = vrot.slane %v16589_v20, %v21405_v31  ;;  %v16607_v40 = vcombine.low %v7950_v47, %v25428_v60  ;;  %v3937_v46 = vrot.slane %v3923_v32, %v21405_v31  ;;  %v3938_v38 = vcombine.high %v3930_v43, %v3930_v43 }
 0x2b8   :  { %v16590_v3 = vcombine.low %v25423_v24, %v25439_v23  ;;  %v16606_v29 = vcombine.low %v7943_v36, %v7951_v16  ;;  %v12823_v0 = vcombine.low %v25069_v45, %v25446_v12  ;;  %v12830_v61 = vrot.slane %v12822_v19, %v21405_v31 }
 0x2b9   :  { %v16621_v59 = vrot.slane %v16607_v40, %v21405_v31  ;;  %v12805_v47 = vcombine.low %v3930_v43, %v3938_v38  ;;  %v12806_v32 = vcombine.low %v3937_v46, %v25049_v63  ;;  %v20237_v45 = vunpack.i.h.bf16 %v25452_v15  ;;  %v47_v43 = vld [vmem:[%s28419_s0 + $0xb0] sm:$0xff] }
 0x2ba   :  { %v16604_v22 = vrot.slane %v16590_v3, %v21405_v31  ;;  %v16614_v36 = vrot.slane %v16606_v29, %v21405_v31  ;;  %v12837_v16 = vrot.slane %v12823_v0, %v21405_v31  ;;  %v20236_v46 = vunpack.i.l.bf16 %v25452_v15 }
 0x2bb   :  { %v12813_v63 = vrot.slane %v12805_v47, %v21405_v31  ;;  %v12820_v40 = vrot.slane %v12806_v32, %v21405_v31  ;;  %v467_v38 = vcombine.high %v25168_v50, %v25168_v50  ;;  %v484_v0 = vcombine.high %v46_v57, %v46_v57  ;;  %v19487_v50 = vld [vmem:[%s28419_s0 + $0x14a] sm:$0x3f] }
 0x2bc   :  { %v16605_v19 = vcombine.low %v25442_v41, %v16604_v22  ;;  %v16622_v3 = vcombine.low %v16614_v36, %v16621_v59  ;;  %v12838_v29 = vcombine.low %v12830_v61, %v12837_v16  ;;  %v491_v25 = vrot.slane %v46_v57, %v21405_v31  ;;  %v25493_v57 = vld [vmem:[%s28419_s0 + $0x152] sm:$0xff] }
 0x2bd   :  { %v12821_v20 = vcombine.low %v12813_v63, %v12820_v40  ;;  %v481_v14 = vrot.slane %v467_v38, %v21405_v31  ;;  %v500_v4 = vcombine.high %v47_v43, %v47_v43  ;;  %v498_v47 = vrot.slane %v484_v0, %v21405_v31 }
 0x2be   :  { %v20518_v33 = vpack.i.bf16 %v16622_v3, %v16605_v19  ;;  %v507_v32 = vrot.slane %v47_v43, %v21405_v31  ;;  %v8955_v59 = vcombine.high %v25262_v18, %v25262_v18  ;;  %v499_v22 = vcombine.high %v491_v25, %v491_v25 }
 0x2bf   :  { %v20513_v61 = vpack.i.bf16 %v12838_v29, %v12821_v20  ;;  %v483_v15 = vcombine.high %v481_v14, %v481_v14  ;;  %v25488_v36 = vrot.slane %v500_v4, %v21405_v31  ;;  %v25501_v18 = vcombine.high %v25287_v2, %v25287_v2 }
 0x2c0   :  { %20519 = vrot.lane.b32.xlu1 %v20518_v33, %s21284_s24  ;;  %v515_v16 = vcombine.high %v507_v32, %v507_v32  ;;  %v9674_v43 = vcombine.low %v498_v47, %v507_v32  ;;  %v25497_v63 = vrot.slane %v8955_v59, %v21405_v31  ;;  %v9658_v20 = vcombine.low %v491_v25, %v499_v22  ;;  %v19271_v33 = vld [vmem:[%s28419_s0 + $0x179] sm:$0x3f]  ;;  %v25526_v22 = vpop.permute.xlu1 %20249 }
 0x2c1   :  { %20514 = vrot.lane.b32.xlu0 %v20513_v61, %s21277_s9  ;;  %v9657_v4 = vcombine.low %v481_v14, %v483_v15  ;;  %v8972_v40 = vcombine.high %v19487_v50, %v19487_v50  ;;  %v8979_v38 = vrot.slane %v19487_v50, %v21405_v31  ;;  %v25516_v0 = vrot.slane %v25493_v57, %v21405_v31 }
 0x2c2   :  { %v9675_v19 = vcombine.low %v515_v16, %v25488_v36  ;;  %v9682_v3 = vrot.slane %v9674_v43, %v21405_v31  ;;  %v25512_v29 = vcombine.high %v25497_v63, %v25497_v63  ;;  %v9672_v14 = vrot.slane %v9658_v20, %v21405_v31  ;;  %v25532_v20 = vld [vmem:[%s28419_s0 + $0x189] sm:$0x3f] }
 0x2c3   :  { %v9665_v25 = vrot.slane %v9657_v4, %v21405_v31  ;;  %v8986_v47 = vrot.slane %v8972_v40, %v21405_v31  ;;  %v8987_v32 = vcombine.high %v8979_v38, %v8979_v38  ;;  %v17569_v59 = vcombine.low %v25287_v2, %v25501_v18 }
 0x2c4   :  { %v9689_v50 = vrot.slane %v9675_v19, %v21405_v31  ;;  %v17570_v61 = vcombine.low %v25497_v63, %v25512_v29  ;;  %v4959_v15 = vcombine.high %v19271_v33, %v19271_v33  ;;  %v4966_v40 = vrot.slane %v19271_v33, %v21405_v31 }
 0x2c5   :  { %v9673_v16 = vcombine.low %v9665_v25, %v9672_v14  ;;  %v17586_v43 = vcombine.low %v8979_v38, %v8987_v32  ;;  %v17587_v4 = vcombine.low %v8986_v47, %v25516_v0  ;;  %v25536_v2 = vrot.slane %v17569_v59, %v21405_v31 }
 0x2c6   :  { %v9690_v19 = vcombine.low %v9682_v3, %v9689_v50  ;;  %v17584_v49 = vrot.slane %v17570_v61, %v21405_v31  ;;  %v4973_v54 = vrot.slane %v4959_v15, %v21405_v31  ;;  %v4974_v47 = vcombine.high %v4966_v40, %v4966_v40 }
 0x2c7   :  { %v18092_v25 = vsel %vm18073_vm0, %v9673_v16, %v20236_v46  ;;  %v17594_v38 = vrot.slane %v17586_v43, %v21405_v31  ;;  %v17601_v14 = vrot.slane %v17587_v4, %v21405_v31  ;;  %v25547_v33 = vrot.slane %v25532_v20, %v21405_v31  ;;  %v20245_v16 = vpop.permute.xlu0 %20244  ;;  %v25564_v4 = vpop.permute.xlu1 %20259 }
 0x2c8   :  { %v18093_v32 = vsel %vm18073_vm0, %v9690_v19, %v20237_v45  ;;  %v17585_v9 = vcombine.low %v25536_v2, %v17584_v49  ;;  %v13786_v3 = vcombine.low %v4973_v54, %v25118_v21  ;;  %v13785_v59 = vcombine.low %v4966_v40, %v4974_v47  ;;  %v19327_v19 = vld [vmem:[%s28419_s0 + $0x17a] sm:$0x3f] }
 0x2c9   :  { %v17602_v50 = vcombine.low %v17594_v38, %v17601_v14  ;;  %v13802_v46 = vcombine.low %v25128_v56, %v25124_v17  ;;  %v28456_v61 = vunpack.i.l.bf16 %v25367_v39  ;;  %v13803_v49 = vcombine.low %v25141_v53, %v25547_v33  ;;  %v25576_v14 = vld [vmem:[%s28419_s0 + $0x18a] sm:$0x3f] }
 0x2ca   :  { %v13800_v45 = vrot.slane %v13786_v3, %v21405_v31  ;;  %v28457_v43 = vunpack.i.h.bf16 %v25367_v39  ;;  %v20252_v21 = vunpack.i.h.bf16 %v25526_v22  ;;  %v13793_v56 = vrot.slane %v13785_v59, %v21405_v31  ;;  %v1096_v59 = vld [vmem:[%s28419_s0 + $0x139] sm:$0x3f] }
 0x2cb   :  { %v18440_v15 = vsel %vm18423_vm9, %v25401_v7, %v28456_v61  ;;  %v20528_v17 = vpack.i.bf16 %v17602_v50, %v17585_v9  ;;  %v13810_v7 = vrot.slane %v13802_v46, %v21405_v31  ;;  %v13817_v53 = vrot.slane %v13803_v49, %v21405_v31  ;;  %v21228_v49 = vld [vmem:[%s28419_s0 + $0x131] sm:$0xff] }
 0x2cc   :  { %v18441_v54 = vsel %vm18423_vm9, %v25415_v1, %v28457_v43  ;;  %v20251_v39 = vunpack.i.l.bf16 %v25526_v22  ;;  %v20247_v38 = vunpack.i.h.bf16 %v20245_v16  ;;  %v20246_v1 = vunpack.i.l.bf16 %v20245_v16 }
 0x2cd   :  { %v18481_v40 = vpack.c.bf16 %v18441_v54, %v18440_v15  ;;  %20529 = vrot.lane.b32.xlu1 %v20528_v17, %s21283_s21  ;;  %v13801_v9 = vcombine.low %v13793_v56, %v13800_v45  ;;  %v28458_v47 = vunpack.i.l.bf16 %v25412_v58  ;;  %v28459_v50 = vunpack.i.h.bf16 %v25412_v58 }
 0x2ce   :  { %v13818_v61 = vcombine.low %v13810_v7, %v13817_v53  ;;  %v5995_v45 = vcombine.high %v19327_v19, %v19327_v19  ;;  %v25597_v58 = vrot.slane %v25576_v14, %v21405_v31  ;;  %v1734_v43 = vcombine.high %v21228_v49, %v21228_v49 }
 0x2cf   :  { %19668 = vmatmul.mubr.msk.bf16.gmra.mrb[32].mxu0 %vm18541_vm10, %v18481_v40  ;;  %v18142_v3 = vsel %vm18123_vm1, %v18092_v25, %v28458_v47  ;;  %v18143_v22 = vsel %vm18123_vm1, %v18093_v32, %v28459_v50  ;;  %v6002_v25 = vrot.slane %v19327_v19, %v21405_v31  ;;  %v14782_v32 = vcombine.low %v25212_v51, %v25201_v6  ;;  %v20255_v50 = vpop.permute.xlu0 %20254 }
 0x2d0   :  { %v18192_v15 = vsel %vm18173_vm2, %v18142_v3, %v20246_v1  ;;  %v18193_v16 = vsel %vm18173_vm2, %v18143_v22, %v20247_v38  ;;  %19671 = vmatprep.mubr.msk.bf16.mxu0 %vm21286_vm8, %v28454_v62  ;;  %v20523_v54 = vpack.i.bf16 %v13818_v61, %v13801_v9  ;;  %v6009_v17 = vrot.slane %v5995_v45, %v21405_v31 }
 0x2d1   :  { %v1751_v56 = vcombine.high %v1096_v59, %v1096_v59  ;;  %v6010_v7 = vcombine.high %v6002_v25, %v6002_v25  ;;  %v14783_v40 = vcombine.low %v25218_v30, %v25597_v58  ;;  %v14790_v19 = vrot.slane %v14782_v32, %v21405_v31 }
 0x2d2   :  { %v1748_v53 = vrot.slane %v1734_v43, %v21405_v31  ;;  %20524 = vrot.lane.b32.xlu0 %v20523_v54, %s21279_s11  ;;  %v14766_v6 = vcombine.low %v6009_v17, %v25193_v8  ;;  %v1758_v51 = vrot.slane %v1096_v59, %v21405_v31  ;;  %v20261_v61 = vunpack.i.l.bf16 %v25564_v4 }
 0x2d3   :  { %v1765_v38 = vrot.slane %v1751_v56, %v21405_v31  ;;  %v14765_v1 = vcombine.low %v6002_v25, %v6010_v7  ;;  %v14797_v9 = vrot.slane %v14783_v40, %v21405_v31  ;;  %v19383_v25 = vld [vmem:[%s28419_s0 + $0x188] sm:$0x3f]  ;;  %v20257_v43 = vunpack.i.h.bf16 %v20255_v50 }
 0x2d4   :  { %v1750_v47 = vcombine.high %v1748_v53, %v1748_v53  ;;  %v10743_v3 = vcombine.low %v24821_v27, %v1748_v53  ;;  %v14780_v30 = vrot.slane %v14766_v6, %v21405_v31  ;;  %v1766_v22 = vcombine.high %v1758_v51, %v1758_v51  ;;  %v19384_v27 = vld [vmem:[%s28419_s0 + $0x190] sm:$0xff] }
 0x2d5   :  { %v14773_v45 = vrot.slane %v14765_v1, %v21405_v31  ;;  %v14798_v32 = vcombine.low %v14790_v19, %v14797_v9  ;;  %v20256_v54 = vunpack.i.l.bf16 %v20255_v50  ;;  %v18242_v7 = vsel %vm18223_vm3, %v18192_v15, %v20251_v39  ;;  %v25631_v19 = vld [vmem:[%s28419_s0 + $0x198] sm:$0x3f] }
 0x2d6   :  { %v10744_v8 = vcombine.low %v1750_v47, %v1758_v51  ;;  %v10751_v59 = vrot.slane %v10743_v3, %v21405_v31  ;;  %v10760_v49 = vcombine.low %v1766_v22, %v1765_v38  ;;  %v18243_v40 = vsel %vm18223_vm3, %v18193_v16, %v20252_v21  ;;  %v2132_v21 = vld [vmem:[%s28419_s0 + $0x13a] sm:$0x3f] }
 0x2d7   :  { %v14781_v17 = vcombine.low %v14773_v45, %v14780_v30  ;;  %v18292_v6 = vsel %vm18273_vm4, %v18242_v7, %v20256_v54  ;;  %v18293_v51 = vsel %vm18273_vm4, %v18243_v40, %v20257_v43  ;;  %v7032_v38 = vcombine.high %v19383_v25, %v19383_v25  ;;  %v21229_v45 = vld [vmem:[%s28419_s0 + $0x132] sm:$0xff] }
 0x2d8   :  { %v10758_v56 = vrot.slane %v10744_v8, %v21405_v31  ;;  %v10768_v53 = vrot.slane %v10760_v49, %v21405_v31  ;;  %v7039_v47 = vrot.slane %v19383_v25, %v21405_v31  ;;  %v7048_v3 = vcombine.high %v19384_v27, %v19384_v27 }
 0x2d9   :  { %v20538_v1 = vpack.i.bf16 %v14798_v32, %v14781_v17  ;;  %v7046_v15 = vrot.slane %v7032_v38, %v21405_v31  ;;  %v25643_v16 = vrot.slane %v19384_v27, %v21405_v31  ;;  %v25647_v50 = vrot.slane %v25631_v19, %v21405_v31  ;;  %v25667_v17 = vpop.permute.xlu1 %20269 }
 0x2da   :  { %v10759_v9 = vcombine.low %v10751_v59, %v10758_v56  ;;  %v10776_v39 = vcombine.low %v10768_v53, %v25442_v41  ;;  %v7047_v30 = vcombine.high %v7039_v47, %v7039_v47  ;;  %v25651_v22 = vrot.slane %v7048_v3, %v21405_v31 }
 0x2db   :  { %28460 = vst [vmem:[#allocation12_spill] sm:$0xff] %v25647_v50  ;;  %20539 = vrot.lane.b32.xlu1 %v20538_v1, %s21282_s18  ;;  %v2770_v41 = vcombine.high %v21229_v45, %v21229_v45  ;;  %v25658_v8 = vcombine.high %v25643_v16, %v25643_v16  ;;  %v15746_v59 = vcombine.low %v7046_v15, %v25643_v16 }
 0x2dc   :  { %v20533_v32 = vpack.i.bf16 %v10776_v39, %v10759_v9  ;;  %v2787_v25 = vcombine.high %v2132_v21, %v2132_v21  ;;  %v25663_v49 = vcombine.high %v25651_v22, %v25651_v22  ;;  %v15745_v43 = vcombine.low %v7039_v47, %v7047_v30  ;;  %v20265_v47 = vpop.permute.xlu0 %20264 }
 0x2dd   :  { %v2784_v54 = vrot.slane %v2770_v41, %v21405_v31  ;;  %v2794_v27 = vrot.slane %v2132_v21, %v21405_v31  ;;  %v15760_v56 = vrot.slane %v15746_v59, %v21405_v31  ;;  %v15762_v7 = vcombine.low %v25658_v8, %v25651_v22 }
 0x2de   :  { %20534 = vrot.lane.b32.xlu0 %v20533_v32, %s21278_s10  ;;  %v2801_v40 = vrot.slane %v2787_v25, %v21405_v31  ;;  %v15753_v53 = vrot.slane %v15745_v43, %v21405_v31  ;;  %v15763_v38 = vcombine.low %v25663_v49, %v25647_v50  ;;  %v19439_v32 = vld [vmem:[%s28419_s0 + $0x189] sm:$0x3f]  ;;  %v20267_v43 = vunpack.i.h.bf16 %v20265_v47 }
 0x2df   :  { %v2786_v1 = vcombine.high %v2784_v54, %v2784_v54  ;;  %v2802_v9 = vcombine.high %v2794_v27, %v2794_v27  ;;  %v15770_v3 = vrot.slane %v15762_v7, %v21405_v31  ;;  %v11723_v21 = vcombine.low %v24909_v10, %v2784_v54 }
 0x2e0   :  { %v15761_v15 = vcombine.low %v15753_v53, %v15760_v56  ;;  %v15777_v30 = vrot.slane %v15763_v38, %v21405_v31  ;;  %v20266_v54 = vunpack.i.l.bf16 %v20265_v47  ;;  %v18342_v56 = vsel %vm18323_vm5, %v18292_v6, %v20261_v61  ;;  %v25700_v38 = vld [vmem:[%s28419_s0 + $0x199] sm:$0x3f] }
 0x2e1   :  { %v11724_v45 = vcombine.low %v2786_v1, %v2794_v27  ;;  %v11740_v41 = vcombine.low %v2802_v9, %v2801_v40  ;;  %v11731_v59 = vrot.slane %v11723_v21, %v21405_v31  ;;  %v19440_v27 = vld [vmem:[%s28419_s0 + $0x191] sm:$0xff]  ;;  %v28461_v40 = vunpack.i.h.bf16 %v25564_v4  ;;  %28462 = vst [vmem:[#allocation13_spill] sm:$0xff] %v25700_v38  ;;  %v19209_v4 = vld [vmem:[%s28419_s0 + $0x148] sm:$0x3f] }
 0x2e2   :  { %v15778_v46 = vcombine.low %v15770_v3, %v15777_v30  ;;  %v8068_v1 = vcombine.high %v19439_v32, %v19439_v32  ;;  %v8075_v9 = vrot.slane %v19439_v32, %v21405_v31  ;;  %v25705_v30 = vsel %vm18373_vm6, %v18342_v56, %v20266_v54  ;;  %v25738_v56 = vpop.permute.xlu1 %20279 }
 0x2e3   :  { %v11738_v7 = vrot.slane %v11724_v45, %v21405_v31  ;;  %v11748_v10 = vrot.slane %v11740_v41, %v21405_v31  ;;  %v18343_v53 = vsel %vm18323_vm5, %v18293_v51, %v28461_v40  ;;  %v8084_v45 = vcombine.high %v19440_v27, %v19440_v27 }
 0x2e4   :  { %v20548_v47 = vpack.i.bf16 %v15778_v46, %v15761_v15  ;;  %v25711_v61 = vsel %vm18373_vm6, %v18343_v53, %v20267_v43  ;;  %v8082_v6 = vrot.slane %v8068_v1, %v21405_v31  ;;  %v8083_v51 = vcombine.high %v8075_v9, %v8075_v9 }
 0x2e5   :  { %v11739_v3 = vcombine.low %v11731_v59, %v11738_v7  ;;  %v11756_v21 = vcombine.low %v11748_v10, %v25536_v2  ;;  %v25716_v15 = vrot.slane %v19440_v27, %v21405_v31  ;;  %v25720_v2 = vrot.slane %v25700_v38, %v21405_v31 }
 0x2e6   :  { %20549 = vrot.lane.b32.xlu1 %v20548_v47, %s21281_s13  ;;  %v25723_v41 = vrot.slane %v8084_v45, %v21405_v31  ;;  %v16725_v32 = vcombine.low %v8075_v9, %v8083_v51  ;;  %v3824_v59 = vcombine.high %v19209_v4, %v19209_v4  ;;  %v3831_v43 = vrot.slane %v19209_v4, %v21405_v31 }
 0x2e7   :  { %v20543_v46 = vpack.i.bf16 %v11756_v21, %v11739_v3  ;;  %28463 = vst [vmem:[#allocation14_spill] sm:$0xff] %v25720_v2  ;;  %v25729_v7 = vcombine.high %v25716_v15, %v25716_v15  ;;  %v16726_v10 = vcombine.low %v8082_v6, %v25716_v15  ;;  %v25734_v54 = vcombine.high %v25352_v44, %v25352_v44 }
 0x2e8   :  { %v12703_v27 = vcombine.low %v25338_v11, %v25348_v37  ;;  %v25742_v40 = vcombine.high %v25723_v41, %v25723_v41  ;;  %v16733_v53 = vrot.slane %v16725_v32, %v21405_v31  ;;  %v3838_v1 = vrot.slane %v3824_v59, %v21405_v31  ;;  %v25751_v37 = vpop.permute.xlu0 %20274 }
 0x2e9   :  { %20544 = vrot.lane.b32.xlu0 %v20543_v46, %s21280_s12  ;;  %v3839_v9 = vcombine.high %v3831_v43, %v3831_v43  ;;  %v16740_v47 = vrot.slane %v16726_v10, %v21405_v31  ;;  %v16742_v3 = vcombine.low %v25729_v7, %v25723_v41  ;;  %v12704_v21 = vcombine.low %v25360_v55, %v3831_v43  ;;  %v48_v46 = vld [vmem:[%s28419_s0 + $0xb8] sm:$0x3f]  ;;  %v49_v10 = vld [vmem:[%s28419_s0 + $0xc0] sm:$0xff] }
 0x2ea   :  { %v12711_v11 = vrot.slane %v12703_v27, %v21405_v31  ;;  %v16743_v4 = vcombine.low %v25742_v40, %v25720_v2  ;;  %v12721_v51 = vcombine.low %v25352_v44, %v25734_v54  ;;  %v517_v45 = vcombine.high %v48_v46, %v48_v46  ;;  %v19496_v2 = vld [vmem:[%s28419_s0 + $0x192] sm:$0xff] }
 0x2eb   :  { %v12720_v6 = vcombine.low %v3839_v9, %v3838_v1  ;;  %v16741_v32 = vcombine.low %v16733_v53, %v16740_v47  ;;  %v16750_v55 = vrot.slane %v16742_v3, %v21405_v31  ;;  %v12718_v59 = vrot.slane %v12704_v21, %v21405_v31  ;;  %v19495_v53 = vld [vmem:[%s28419_s0 + $0x18a] sm:$0x3f] }
 0x2ec   :  { %v16757_v27 = vrot.slane %v16743_v4, %v21405_v31  ;;  %v12735_v1 = vrot.slane %v12721_v51, %v21405_v31  ;;  %v20277_v9 = vunpack.i.h.bf16 %v25751_v37  ;;  %v20276_v3 = vunpack.i.l.bf16 %v25751_v37 }
 0x2ed   :  { %v12728_v44 = vrot.slane %v12720_v6, %v21405_v31  ;;  %v12719_v47 = vcombine.low %v12711_v11, %v12718_v59  ;;  %v516_v21 = vcombine.high %v25488_v36, %v25488_v36  ;;  %v524_v4 = vrot.slane %v48_v46, %v21405_v31  ;;  %v25784_v59 = vpop.permute.xlu1 %20289 }
 0x2ee   :  { %v16758_v43 = vcombine.low %v16750_v55, %v16757_v27  ;;  %v533_v6 = vcombine.high %v49_v10, %v49_v10  ;;  %v531_v51 = vrot.slane %v517_v45, %v21405_v31  ;;  %v540_v25 = vrot.slane %v49_v10, %v21405_v31  ;;  %v25790_v45 = vld [vmem:[%s28419_s0 + $0x19a] sm:$0x3f] }
 0x2ef   :  { %v12736_v39 = vcombine.low %v12728_v44, %v12735_v1  ;;  %v9104_v11 = vcombine.high %v19495_v53, %v19495_v53  ;;  %v9111_v37 = vrot.slane %v19495_v53, %v21405_v31  ;;  %v532_v55 = vcombine.high %v524_v4, %v524_v4  ;;  %28464 = vst [vmem:[#allocation15_spill] sm:$0xff] %v25790_v45 }
 0x2f0   :  { %v20558_v36 = vpack.i.bf16 %v16758_v43, %v16741_v32  ;;  %v547_v27 = vrot.slane %v533_v6, %v21405_v31  ;;  %v548_v46 = vcombine.high %v540_v25, %v540_v25  ;;  %v9691_v10 = vcombine.low %v516_v21, %v524_v4 }
 0x2f1   :  { %v20553_v38 = vpack.i.bf16 %v12736_v39, %v12719_v47  ;;  %v9118_v44 = vrot.slane %v9104_v11, %v21405_v31  ;;  %v9119_v1 = vcombine.high %v9111_v37, %v9111_v37  ;;  %v9692_v32 = vcombine.low %v532_v55, %v531_v51 }
 0x2f2   :  { %20559 = vrot.lane.b32.xlu1 %v20558_v36, %s21284_s24  ;;  %v549_v53 = vcombine.high %v547_v27, %v547_v27  ;;  %v9120_v39 = vcombine.high %v19496_v2, %v19496_v2  ;;  %v9699_v47 = vrot.slane %v9691_v10, %v21405_v31  ;;  %v9708_v6 = vcombine.low %v540_v25, %v548_v46  ;;  %v19265_v36 = vld [vmem:[%s28419_s0 + $0x149] sm:$0x3f] }
 0x2f3   :  { %20554 = vrot.lane.b32.xlu0 %v20553_v38, %s21277_s9  ;;  %v25798_v50 = vrot.slane %v19496_v2, %v21405_v31  ;;  %v25802_v21 = vrot.slane %v25790_v45, %v21405_v31  ;;  %v9706_v4 = vrot.slane %v9692_v32, %v21405_v31  ;;  %v17705_v51 = vcombine.low %v9111_v37, %v9119_v1 }
 0x2f4   :  { %v9709_v11 = vcombine.low %v547_v27, %v549_v53  ;;  %v25806_v38 = vrot.slane %v9120_v39, %v21405_v31  ;;  %v9716_v25 = vrot.slane %v9708_v6, %v21405_v31  ;;  %v4860_v32 = vcombine.high %v19265_v36, %v19265_v36 }
 0x2f5   :  { %28465 = vst [vmem:[#allocation16_spill] sm:$0xff] %v25802_v21  ;;  %v25814_v2 = vcombine.high %v25798_v50, %v25798_v50  ;;  %v17706_v55 = vcombine.low %v9118_v44, %v25798_v50  ;;  %v9707_v46 = vcombine.low %v9699_v47, %v9706_v4  ;;  %v17713_v37 = vrot.slane %v17705_v51, %v21405_v31 }
 0x2f6   :  { %v9723_v10 = vrot.slane %v9709_v11, %v21405_v31  ;;  %v25820_v27 = vcombine.high %v25806_v38, %v25806_v38  ;;  %v4867_v39 = vrot.slane %v19265_v36, %v21405_v31  ;;  %v25832_v4 = vcombine.high %v25428_v60, %v25428_v60 }
 0x2f7   :  { %v17720_v1 = vrot.slane %v17706_v55, %v21405_v31  ;;  %v17722_v53 = vcombine.low %v25814_v2, %v25806_v38  ;;  %v18094_v44 = vsel %vm18073_vm0, %v9707_v46, %v20276_v3  ;;  %v4874_v55 = vrot.slane %v4860_v32, %v21405_v31  ;;  %v20285_v46 = vpop.permute.xlu0 %20284 }
 0x2f8   :  { %v9724_v6 = vcombine.low %v9716_v25, %v9723_v10  ;;  %v17723_v47 = vcombine.low %v25820_v27, %v25802_v21  ;;  %v4875_v43 = vcombine.high %v4867_v39, %v4867_v39  ;;  %v13683_v3 = vcombine.low %v25407_v28, %v25423_v24 }
 0x2f9   :  { %v17721_v11 = vcombine.low %v17713_v37, %v17720_v1  ;;  %v17730_v51 = vrot.slane %v17722_v53, %v21405_v31  ;;  %v13684_v25 = vcombine.low %v25439_v23, %v4867_v39  ;;  %v13701_v21 = vcombine.low %v25428_v60, %v25832_v4  ;;  %v19321_v60 = vld [vmem:[%s28419_s0 + $0x14a] sm:$0x3f] }
 0x2fa   :  { %v18095_v45 = vsel %vm18073_vm0, %v9724_v6, %v20277_v9  ;;  %v17737_v36 = vrot.slane %v17723_v47, %v21405_v31  ;;  %v13700_v10 = vcombine.low %v4875_v43, %v4874_v55  ;;  %v28466_v37 = vunpack.i.l.bf16 %v25667_v17 }
 0x2fb   :  { %v28467_v53 = vunpack.i.h.bf16 %v25667_v17  ;;  %v13691_v28 = vrot.slane %v13683_v3, %v21405_v31  ;;  %v13698_v24 = vrot.slane %v13684_v25, %v21405_v31  ;;  %v13715_v39 = vrot.slane %v13701_v21, %v21405_v31 }
 0x2fc   :  { %v18442_v1 = vsel %vm18423_vm9, %v25705_v30, %v28466_v37  ;;  %v17738_v32 = vcombine.low %v17730_v51, %v17737_v36  ;;  %v13708_v43 = vrot.slane %v13700_v10, %v21405_v31  ;;  %v20291_v30 = vunpack.i.l.bf16 %v25784_v59 }
 0x2fd   :  { %v18443_v9 = vsel %vm18423_vm9, %v25711_v61, %v28467_v53  ;;  %v20287_v17 = vunpack.i.h.bf16 %v20285_v46  ;;  %v13699_v47 = vcombine.low %v13691_v28, %v13698_v24  ;;  %v20286_v61 = vunpack.i.l.bf16 %v20285_v46  ;;  %v25885_v53 = vld [vmem:[%s28419_s0 + $0x189] sm:$0x3f] }
 0x2fe   :  { %v18482_v23 = vpack.c.bf16 %v18443_v9, %v18442_v1  ;;  %v20568_v6 = vpack.i.bf16 %v17738_v32, %v17721_v11  ;;  %v28468_v51 = vunpack.i.l.bf16 %v25738_v56  ;;  %v13716_v36 = vcombine.low %v13708_v43, %v13715_v39 }
 0x2ff   :  { %v28469_v3 = vunpack.i.h.bf16 %v25738_v56  ;;  %v5896_v10 = vcombine.high %v19321_v60, %v19321_v60  ;;  %v5903_v46 = vrot.slane %v19321_v60, %v21405_v31  ;;  %v1105_v56 = vld [vmem:[%s28419_s0 + $0x181] sm:$0xff]  ;;  %v14663_v1 = vcombine.low %v25501_v18, %v25497_v63  ;;  %v25894_v60 = vpop.permute.xlu1 %20299 }
 0x300   :  { %19672 = vmatmul.mubr.msk.bf16.gmra.mrb[36].mxu0 %vm18541_vm10, %v18482_v23  ;;  %v18144_v55 = vsel %vm18123_vm1, %v18094_v44, %v28468_v51  ;;  %20569 = vrot.lane.b32.xlu1 %v20568_v6, %s21283_s21  ;;  %v25874_v44 = vcombine.high %v25516_v0, %v25516_v0  ;;  %v1883_v9 = vcombine.high %v25278_v26, %v25278_v26  ;;  %v20302_v51 = vunpack.i.h.bf16 %v25894_v60 }
 0x301   :  { %v18145_v25 = vsel %vm18123_vm1, %v18095_v45, %v28469_v3  ;;  %19675 = vmatprep.mubr.msk.bf16.mxu0 %vm21286_vm8, %v28454_v62  ;;  %v18194_v21 = vsel %vm18173_vm2, %v18144_v55, %v20286_v61  ;;  %v20563_v45 = vpack.i.bf16 %v13716_v36, %v13699_v47  ;;  %v5910_v37 = vrot.slane %v5896_v10, %v21405_v31 }
 0x302   :  { %v18195_v11 = vsel %vm18173_vm2, %v18145_v25, %v20287_v17  ;;  %v5911_v32 = vcombine.high %v5903_v46, %v5903_v46  ;;  %v14664_v28 = vcombine.low %v25512_v29, %v5903_v46  ;;  %v14681_v24 = vcombine.low %v25516_v0, %v25874_v44 }
 0x303   :  { %v1898_v23 = vcombine.high %v25300_v35, %v25300_v35  ;;  %20564 = vrot.lane.b32.xlu0 %v20563_v45, %s21279_s11  ;;  %v14671_v63 = vrot.slane %v14663_v1, %v21405_v31  ;;  %v1897_v18 = vrot.slane %v1883_v9, %v21405_v31  ;;  %v1899_v43 = vcombine.high %v1105_v56, %v1105_v56  ;;  %v20295_v35 = vpop.permute.xlu0 %20294 }
 0x304   :  { %v1906_v26 = vrot.slane %v1105_v56, %v21405_v31  ;;  %v14678_v39 = vrot.slane %v14664_v28, %v21405_v31  ;;  %v14680_v29 = vcombine.low %v5911_v32, %v5910_v37  ;;  %v14695_v17 = vrot.slane %v14681_v24, %v21405_v31 }
 0x305   :  { %v1923_v0 = vrot.slane %v25885_v53, %v21405_v31  ;;  %v1913_v6 = vrot.slane %v1899_v43, %v21405_v31  ;;  %v10879_v61 = vcombine.low %v1898_v23, %v1897_v18  ;;  %v20301_v25 = vunpack.i.l.bf16 %v25894_v60  ;;  %v19377_v18 = vld [vmem:[%s28419_s0 + $0x158] sm:$0x3f]  ;;  %v25920_v43 = vld [vmem:[%s28419_s0 + $0x160] sm:$0xff] }
 0x306   :  { %v1914_v47 = vcombine.high %v1906_v26, %v1906_v26  ;;  %v14679_v55 = vcombine.low %v14671_v63, %v14678_v39  ;;  %v14688_v36 = vrot.slane %v14680_v29, %v21405_v31  ;;  %v20297_v45 = vunpack.i.h.bf16 %v20295_v35 }
 0x307   :  { %v1931_v3 = vcombine.high %v1923_v0, %v1923_v0  ;;  %v1915_v10 = vcombine.high %v1913_v6, %v1913_v6  ;;  %v10887_v56 = vrot.slane %v10879_v61, %v21405_v31  ;;  %v20296_v9 = vunpack.i.l.bf16 %v20295_v35 }
 0x308   :  { %v10880_v46 = vcombine.low %v1906_v26, %v1914_v47  ;;  %v14696_v37 = vcombine.low %v14688_v36, %v14695_v17  ;;  %v18244_v32 = vsel %vm18223_vm3, %v18194_v21, %v20291_v30  ;;  %v28470_v23 = vunpack.i.h.bf16 %v25784_v59 }
 0x309   :  { %v10897_v1 = vcombine.low %v1923_v0, %v1931_v3  ;;  %v10896_v24 = vcombine.low %v1913_v6, %v1915_v10  ;;  %v6916_v26 = vcombine.high %v25327_v42, %v25327_v42  ;;  %v18294_v39 = vsel %vm18273_vm4, %v18244_v32, %v20296_v9  ;;  %v2141_v6 = vld [vmem:[%s28419_s0 + $0x182] sm:$0xff]  ;;  %v25949_v3 = vld [vmem:[%s28419_s0 + $0x18a] sm:$0x3f] }
 0x30a   :  { %v10894_v28 = vrot.slane %v10880_v46, %v21405_v31  ;;  %v18245_v63 = vsel %vm18223_vm3, %v18195_v11, %v28470_v23  ;;  %v20578_v30 = vpack.i.bf16 %v14696_v37, %v14679_v55  ;;  %v6933_v0 = vcombine.high %v19377_v18, %v19377_v18  ;;  %v25955_v37 = vpop.permute.xlu1 %20309 }
 0x30b   :  { %v10911_v21 = vrot.slane %v10897_v1, %v21405_v31  ;;  %v18295_v59 = vsel %vm18273_vm4, %v18245_v63, %v20297_v45  ;;  %v10904_v29 = vrot.slane %v10896_v24, %v21405_v31  ;;  %v25929_v17 = vrot.slane %v6916_v26, %v21405_v31 }
 0x30c   :  { %v10895_v11 = vcombine.low %v10887_v56, %v10894_v28  ;;  %20579 = vrot.lane.b32.xlu1 %v20578_v30, %s21282_s18  ;;  %v6940_v35 = vrot.slane %v19377_v18, %v21405_v31  ;;  %v6956_v42 = vrot.slane %v25920_v43, %v21405_v31  ;;  %v2919_v47 = vcombine.high %v25344_v34, %v25344_v34 }
 0x30d   :  { %v10912_v61 = vcombine.low %v10904_v29, %v10911_v21  ;;  %v25942_v55 = vcombine.high %v25929_v17, %v25929_v17  ;;  %v15643_v36 = vcombine.low %v25734_v54, %v25929_v17  ;;  %v2934_v10 = vcombine.high %v25365_v5, %v25365_v5  ;;  %v20305_v21 = vpop.permute.xlu0 %20304 }
 0x30e   :  { %v6947_v46 = vrot.slane %v6933_v0, %v21405_v31  ;;  %v6948_v56 = vcombine.high %v6940_v35, %v6940_v35  ;;  %v6964_v34 = vcombine.high %v6956_v42, %v6956_v42  ;;  %v2933_v45 = vrot.slane %v2919_v47, %v21405_v31 }
 0x30f   :  { %v20573_v1 = vpack.i.bf16 %v10912_v61, %v10895_v11  ;;  %v15644_v9 = vcombine.low %v25942_v55, %v6940_v35  ;;  %v15651_v54 = vrot.slane %v15643_v36, %v21405_v31  ;;  %v2935_v32 = vcombine.high %v2141_v6, %v2141_v6 }
 0x310   :  { %v15660_v28 = vcombine.low %v6948_v56, %v6947_v46  ;;  %v15661_v24 = vcombine.low %v6956_v42, %v6964_v34  ;;  %v2942_v23 = vrot.slane %v2141_v6, %v21405_v31  ;;  %v2959_v5 = vrot.slane %v25949_v3, %v21405_v31 }
 0x311   :  { %20574 = vrot.lane.b32.xlu0 %v20573_v1, %s21278_s10  ;;  %v15658_v63 = vrot.slane %v15644_v9, %v21405_v31  ;;  %v2949_v18 = vrot.slane %v2935_v32, %v21405_v31  ;;  %v11859_v26 = vcombine.low %v2934_v10, %v2933_v45  ;;  %v20312_v30 = vunpack.i.h.bf16 %v25955_v37  ;;  %v25982_v32 = vld [vmem:[%s28419_s0 + $0x161] sm:$0xff] }
 0x312   :  { %v15668_v11 = vrot.slane %v15660_v28, %v21405_v31  ;;  %v15675_v29 = vrot.slane %v15661_v24, %v21405_v31  ;;  %v2950_v0 = vcombine.high %v2942_v23, %v2942_v23  ;;  %v2967_v35 = vcombine.high %v2959_v5, %v2959_v5 }
 0x313   :  { %v15659_v42 = vcombine.low %v15651_v54, %v15658_v63  ;;  %v2951_v6 = vcombine.high %v2949_v18, %v2949_v18  ;;  %v11867_v47 = vrot.slane %v11859_v26, %v21405_v31  ;;  %v20311_v61 = vunpack.i.l.bf16 %v25955_v37  ;;  %v19433_v54 = vld [vmem:[%s28419_s0 + $0x159] sm:$0x3f] }
 0x314   :  { %v15676_v36 = vcombine.low %v15668_v11, %v15675_v29  ;;  %v11860_v46 = vcombine.low %v2942_v23, %v2950_v0  ;;  %v11877_v56 = vcombine.low %v2959_v5, %v2967_v35  ;;  %v20307_v34 = vunpack.i.h.bf16 %v20305_v21 }
 0x315   :  { %v11876_v10 = vcombine.low %v2949_v18, %v2951_v6  ;;  %v20306_v45 = vunpack.i.l.bf16 %v20305_v21  ;;  %v18344_v1 = vsel %vm18323_vm5, %v18294_v39, %v20301_v25  ;;  %v18345_v9 = vsel %vm18323_vm5, %v18295_v59, %v20302_v51  ;;  %v25998_v59 = vld [vmem:[%s28419_s0 + $0x198] sm:$0x3f] }
 0x316   :  { %v20588_v28 = vpack.i.bf16 %v15676_v36, %v15659_v42  ;;  %v11874_v24 = vrot.slane %v11860_v46, %v21405_v31  ;;  %v11891_v23 = vrot.slane %v11877_v56, %v21405_v31  ;;  %v25987_v25 = vsel %vm18373_vm6, %v18345_v9, %v20307_v34 }
 0x317   :  { %v11884_v60 = vrot.slane %v11876_v10, %v21405_v31  ;;  %v25991_v51 = vsel %vm18373_vm6, %v18344_v1, %v20306_v45  ;;  %v7952_v39 = vcombine.high %v25395_v52, %v25395_v52  ;;  %v7969_v63 = vcombine.high %v19433_v54, %v19433_v54  ;;  %v26023_v45 = vpop.permute.xlu1 %20319 }
 0x318   :  { %20589 = vrot.lane.b32.xlu1 %v20588_v28, %s21281_s13  ;;  %v11875_v5 = vcombine.low %v11867_v47, %v11874_v24  ;;  %v7976_v18 = vrot.slane %v19433_v54, %v21405_v31  ;;  %v7992_v26 = vrot.slane %v25982_v32, %v21405_v31  ;;  %v3956_v52 = vcombine.high %v25420_v13, %v25420_v13  ;;  %v26030_v28 = vpop.permute.xlu0 %20314 }
 0x319   :  { %v11892_v21 = vcombine.low %v11884_v60, %v11891_v23  ;;  %v26005_v11 = vrot.slane %v7952_v39, %v21405_v31  ;;  %v3971_v29 = vcombine.high %v25446_v12, %v25446_v12  ;;  %v7983_v0 = vrot.slane %v7969_v63, %v21405_v31  ;;  %v50_v60 = vld [vmem:[%s28419_s0 + $0xc8] sm:$0x3f] }
 0x31a   :  { %v7984_v35 = vcombine.high %v7976_v18, %v7976_v18  ;;  %v8000_v42 = vcombine.high %v7992_v26, %v7992_v26  ;;  %v3996_v6 = vrot.slane %v25998_v59, %v21405_v31  ;;  %v3970_v13 = vrot.slane %v3956_v52, %v21405_v31 }
 0x31b   :  { %v20583_v47 = vpack.i.bf16 %v11892_v21, %v11875_v5  ;;  %v26016_v36 = vcombine.high %v26005_v11, %v26005_v11  ;;  %v16623_v46 = vcombine.low %v25832_v4, %v26005_v11  ;;  %v12840_v10 = vcombine.low %v25643_v16, %v25658_v8 }
 0x31c   :  { %v16640_v56 = vcombine.low %v7984_v35, %v7983_v0  ;;  %v16641_v34 = vcombine.low %v7992_v26, %v8000_v42  ;;  %v4004_v12 = vcombine.high %v3996_v6, %v3996_v6  ;;  %v12839_v54 = vcombine.low %v3971_v29, %v3970_v13  ;;  %v26051_v29 = vld [vmem:[%s28419_s0 + $0xd8] sm:$0x3f] }
 0x31d   :  { %20584 = vrot.lane.b32.xlu0 %v20583_v47, %s21280_s12  ;;  %v16624_v1 = vcombine.low %v26016_v36, %v7976_v18  ;;  %v16631_v9 = vrot.slane %v16623_v46, %v21405_v31  ;;  %v12856_v4 = vcombine.low %v25651_v22, %v25663_v49  ;;  %v12854_v16 = vrot.slane %v12840_v10, %v21405_v31  ;;  %v51_v49 = vld [vmem:[%s28419_s0 + $0xd0] sm:$0xff] }
 0x31e   :  { %v16648_v24 = vrot.slane %v16640_v56, %v21405_v31  ;;  %v16655_v23 = vrot.slane %v16641_v34, %v21405_v31  ;;  %v12857_v8 = vcombine.low %v3996_v6, %v4004_v12  ;;  %v12847_v5 = vrot.slane %v12839_v54, %v21405_v31  ;;  %v19489_v34 = vld [vmem:[%s28419_s0 + $0x15a] sm:$0x3f] }
 0x31f   :  { %v16638_v39 = vrot.slane %v16624_v1, %v21405_v31  ;;  %v12864_v63 = vrot.slane %v12856_v4, %v21405_v31  ;;  %v20322_v22 = vunpack.i.h.bf16 %v26023_v45  ;;  %v20321_v21 = vunpack.i.l.bf16 %v26023_v45 }
 0x320   :  { %v16656_v18 = vcombine.low %v16648_v24, %v16655_v23  ;;  %v12871_v26 = vrot.slane %v12857_v8, %v21405_v31  ;;  %v20317_v52 = vunpack.i.h.bf16 %v26030_v28  ;;  %v12855_v35 = vcombine.low %v12847_v5, %v12854_v16  ;;  %v26070_v23 = vld [vmem:[%s28419_s0 + $0x162] sm:$0xff] }
 0x321   :  { %v16639_v0 = vcombine.low %v16631_v9, %v16638_v39  ;;  %v20316_v42 = vunpack.i.l.bf16 %v26030_v28  ;;  %v550_v6 = vcombine.high %v50_v60, %v50_v60  ;;  %v557_v46 = vrot.slane %v50_v60, %v21405_v31 }
 0x322   :  { %v12872_v47 = vcombine.low %v12864_v63, %v12871_v26  ;;  %v566_v13 = vcombine.high %v51_v49, %v51_v49  ;;  %v573_v56 = vrot.slane %v51_v49, %v21405_v31  ;;  %v26062_v1 = vrot.slane %v26051_v29, %v21405_v31 }
 0x323   :  { %v20598_v12 = vpack.i.bf16 %v16656_v18, %v16639_v0  ;;  %v564_v10 = vrot.slane %v550_v6, %v21405_v31  ;;  %v8988_v9 = vcombine.high %v25493_v57, %v25493_v57  ;;  %v565_v4 = vcombine.high %v557_v46, %v557_v46 }
 0x324   :  { %v20593_v54 = vpack.i.bf16 %v12872_v47, %v12855_v35  ;;  %v580_v28 = vrot.slane %v566_v13, %v21405_v31  ;;  %v581_v24 = vcombine.high %v573_v56, %v573_v56  ;;  %v9005_v60 = vcombine.high %v19489_v34, %v19489_v34 }
 0x325   :  { %20599 = vrot.lane.b32.xlu1 %v20598_v12, %s21284_s24  ;;  %v9726_v16 = vcombine.low %v564_v10, %v573_v56  ;;  %v26074_v8 = vrot.slane %v8988_v9, %v21405_v31  ;;  %v9725_v39 = vcombine.low %v557_v46, %v565_v4  ;;  %v9012_v63 = vrot.slane %v19489_v34, %v21405_v31  ;;  %v26095_v12 = vld [vmem:[%s28419_s0 + $0x199] sm:$0x3f] }
 0x326   :  { %20594 = vrot.lane.b32.xlu0 %v20593_v54, %s21277_s9  ;;  %v582_v57 = vcombine.high %v580_v28, %v580_v28  ;;  %v9742_v5 = vcombine.low %v581_v24, %v580_v28  ;;  %v9019_v26 = vrot.slane %v9005_v60, %v21405_v31  ;;  %v9028_v0 = vrot.slane %v26070_v23, %v21405_v31 }
 0x327   :  { %v9740_v49 = vrot.slane %v9726_v16, %v21405_v31  ;;  %v26081_v18 = vcombine.high %v26074_v8, %v26074_v8  ;;  %v9733_v35 = vrot.slane %v9725_v39, %v21405_v31  ;;  %v9020_v46 = vcombine.high %v9012_v63, %v9012_v63 }
 0x328   :  { %v9743_v6 = vcombine.low %v582_v57, %v26062_v1  ;;  %v9750_v47 = vrot.slane %v9742_v5, %v21405_v31  ;;  %v9036_v13 = vcombine.high %v9028_v0, %v9028_v0  ;;  %v17603_v56 = vcombine.low %v25874_v44, %v26074_v8 }
 0x329   :  { %v17604_v34 = vcombine.low %v26081_v18, %v9012_v63  ;;  %v4992_v10 = vcombine.high %v25532_v20, %v25532_v20  ;;  %v9741_v9 = vcombine.low %v9733_v35, %v9740_v49  ;;  %v17620_v4 = vcombine.low %v9020_v46, %v9019_v26  ;;  %v26112_v35 = vpop.permute.xlu1 %20329  ;;  %v20325_v46 = vpop.permute.xlu0 %20324 }
 0x32a   :  { %v9757_v54 = vrot.slane %v9743_v6, %v21405_v31  ;;  %v5007_v28 = vcombine.high %v25547_v33, %v25547_v33  ;;  %v17611_v24 = vrot.slane %v17603_v56, %v21405_v31  ;;  %v17621_v16 = vcombine.low %v9028_v0, %v9036_v13 }
 0x32b   :  { %v17618_v44 = vrot.slane %v17604_v34, %v21405_v31  ;;  %v5006_v60 = vrot.slane %v4992_v10, %v21405_v31  ;;  %v18096_v39 = vsel %vm18073_vm0, %v9741_v9, %v20316_v42  ;;  %v17628_v5 = vrot.slane %v17620_v4, %v21405_v31 }
 0x32c   :  { %v9758_v57 = vcombine.low %v9750_v47, %v9757_v54  ;;  %v5032_v20 = vrot.slane %v26095_v12, %v21405_v31  ;;  %v17635_v49 = vrot.slane %v17621_v16, %v21405_v31  ;;  %v13820_v33 = vcombine.low %v25716_v15, %v25729_v7 }
 0x32d   :  { %v17619_v63 = vcombine.low %v17611_v24, %v17618_v44  ;;  %v13819_v26 = vcombine.low %v5007_v28, %v5006_v60  ;;  %v13836_v42 = vcombine.low %v25723_v41, %v25742_v40  ;;  %v18444_v47 = vsel %vm18423_vm9, %v25991_v51, %v20311_v61  ;;  %v26132_v61 = vld [vmem:[%s28419_s0 + $0x19a] sm:$0x3f]  ;;  %v1098_v28 = vld [vmem:[%s28419_s0 + $0x149] sm:$0x3f] }
 0x32e   :  { %v18097_v0 = vsel %vm18073_vm0, %v9758_v57, %v20317_v52  ;;  %v5040_v6 = vcombine.high %v5032_v20, %v5032_v20  ;;  %v17636_v13 = vcombine.low %v17628_v5, %v17635_v49  ;;  %v13834_v34 = vrot.slane %v13820_v33, %v21405_v31 }
 0x32f   :  { %v13827_v56 = vrot.slane %v13819_v26, %v21405_v31  ;;  %v18445_v15 = vsel %vm18423_vm9, %v25987_v25, %v20312_v30  ;;  %v13844_v52 = vrot.slane %v13836_v42, %v21405_v31  ;;  %v20332_v40 = vunpack.i.h.bf16 %v26112_v35  ;;  %v21243_v42 = vld.sshfl [vmem:[%s28419_s0 + $0x151] sm:$0xff pattern:$0x76325410] }
 0x330   :  { %v13837_v7 = vcombine.low %v5032_v20, %v5040_v6  ;;  %v18483_v41 = vpack.c.bf16 %v18445_v15, %v18444_v47  ;;  %v20608_v51 = vpack.i.bf16 %v17636_v13, %v17619_v63  ;;  %v20331_v9 = vunpack.i.l.bf16 %v26112_v35  ;;  %v26165_v63 = vpop.permute.xlu1 %20339 }
 0x331   :  { %v13835_v10 = vcombine.low %v13827_v56, %v13834_v34  ;;  %v20327_v54 = vunpack.i.h.bf16 %v20325_v46  ;;  %v20326_v30 = vunpack.i.l.bf16 %v20325_v46  ;;  %v18146_v25 = vsel %vm18123_vm1, %v18096_v39, %v20321_v21 }
 0x332   :  { %v13851_v37 = vrot.slane %v13837_v7, %v21405_v31  ;;  %19676 = vmatmul.mubr.msk.bf16.gmra.mrb[40].mxu0 %vm18541_vm10, %v18483_v41  ;;  %v18147_v4 = vsel %vm18123_vm1, %v18097_v0, %v20322_v22  ;;  %20609 = vrot.lane.b32.xlu1 %v20608_v51, %s21283_s21  ;;  %v6028_v44 = vcombine.high %v25576_v14, %v25576_v14  ;;  %v20342_v47 = vunpack.i.h.bf16 %v26165_v63 }
 0x333   :  { %v18197_v24 = vsel %vm18173_vm2, %v18147_v4, %v20327_v54  ;;  %v6043_v16 = vcombine.high %v25597_v58, %v25597_v58  ;;  %v6068_v21 = vrot.slane %v26132_v61, %v21405_v31  ;;  %v18196_v22 = vsel %vm18173_vm2, %v18146_v25, %v20326_v30  ;;  %19679 = vmatprep.mubr.msk.bf16.mxu0 %vm21286_vm8, %v28454_v62  ;;  %v21230_v58 = vld [vmem:[%s28419_s0 + $0x141] sm:$0xff] }
 0x334   :  { %v13852_v45 = vcombine.low %v13844_v52, %v13851_v37  ;;  %v14800_v60 = vcombine.low %v25798_v50, %v25814_v2  ;;  %v14816_v57 = vcombine.low %v25806_v38, %v25820_v27  ;;  %v6042_v14 = vrot.slane %v6028_v44, %v21405_v31  ;;  %v20335_v27 = vpop.permute.xlu0 %20334  ;;  %v19386_v25 = vld [vmem:[%s28419_s0 + $0x1a0] sm:$0xff] }
 0x335   :  { %v6076_v39 = vcombine.high %v6068_v21, %v6068_v21  ;;  %v1767_v5 = vcombine.high %v21230_v58, %v21230_v58  ;;  %v1784_v20 = vcombine.high %v1098_v28, %v1098_v28  ;;  %v1791_v38 = vrot.slane %v1098_v28, %v21405_v31 }
 0x336   :  { %v20603_v49 = vpack.i.bf16 %v13852_v45, %v13835_v10  ;;  %v14814_v50 = vrot.slane %v14800_v60, %v21405_v31  ;;  %v14824_v2 = vrot.slane %v14816_v57, %v21405_v31  ;;  %v14799_v26 = vcombine.low %v6043_v16, %v6042_v14 }
 0x337   :  { %v14817_v33 = vcombine.low %v6068_v21, %v6076_v39  ;;  %v1781_v35 = vrot.slane %v1767_v5, %v21405_v31  ;;  %v1798_v0 = vrot.slane %v1784_v20, %v21405_v31  ;;  %v1799_v6 = vcombine.high %v1791_v38, %v1791_v38  ;;  %v26191_v21 = vld [vmem:[%s28419_s0 + $0x1a8] sm:$0x3f] }
 0x338   :  { %20604 = vrot.lane.b32.xlu0 %v20603_v49, %s21279_s11  ;;  %v20341_v46 = vunpack.i.l.bf16 %v26165_v63  ;;  %v14807_v13 = vrot.slane %v14799_v26, %v21405_v31  ;;  %v20337_v15 = vunpack.i.h.bf16 %v20335_v27  ;;  %v1815_v7 = vcombine.high %v21243_v42, %v21243_v42  ;;  %v21232_v49 = vld [vmem:[%s28419_s0 + $0x142] sm:$0xff] }
 0x339   :  { %v14831_v56 = vrot.slane %v14817_v33, %v21405_v31  ;;  %v1783_v34 = vcombine.high %v1781_v35, %v1781_v35  ;;  %v10778_v52 = vcombine.low %v1791_v38, %v1799_v6  ;;  %v10794_v41 = vcombine.low %v1798_v0, %v21243_v42  ;;  %v26223_v6 = vpop.permute.xlu1 %20349 }
 0x33a   :  { %v20336_v51 = vunpack.i.l.bf16 %v20335_v27  ;;  %v14815_v10 = vcombine.low %v14807_v13, %v14814_v50  ;;  %v18246_v30 = vsel %vm18223_vm3, %v18196_v22, %v20331_v9  ;;  %v10795_v28 = vcombine.low %v1815_v7, %v24680_v48  ;;  %v2134_v48 = vld [vmem:[%s28419_s0 + $0x14a] sm:$0x3f] }
 0x33b   :  { %v14832_v54 = vcombine.low %v14824_v2, %v14831_v56  ;;  %v10777_v37 = vcombine.low %v1781_v35, %v1783_v34  ;;  %v10792_v4 = vrot.slane %v10778_v52, %v21405_v31  ;;  %v10802_v44 = vrot.slane %v10794_v41, %v21405_v31 }
 0x33c   :  { %v18247_v16 = vsel %vm18223_vm3, %v18197_v24, %v20332_v40  ;;  %v18296_v22 = vsel %vm18273_vm4, %v18246_v30, %v20336_v51  ;;  %v10809_v57 = vrot.slane %v10795_v28, %v21405_v31  ;;  %v7065_v40 = vcombine.high %v25631_v19, %v25631_v19  ;;  %v28471_v24 = vld [vmem:[#allocation12_spill] sm:$0xff]  ;;  %v20345_v30 = vpop.permute.xlu0 %20344 }
 0x33d   :  { %v20618_v45 = vpack.i.bf16 %v14832_v54, %v14815_v10  ;;  %v10785_v9 = vrot.slane %v10777_v37, %v21405_v31  ;;  %v18297_v60 = vsel %vm18273_vm4, %v18247_v16, %v20337_v15  ;;  %v7080_v14 = vcombine.high %v28471_v24, %v28471_v24  ;;  %v21244_v54 = vld.sshfl [vmem:[%s28419_s0 + $0x152] sm:$0xff pattern:$0x76325410] }
 0x33e   :  { %v7081_v39 = vcombine.high %v19386_v25, %v19386_v25  ;;  %v26206_v5 = vrot.slane %v19386_v25, %v21405_v31  ;;  %v7105_v20 = vrot.slane %v26191_v21, %v21405_v31  ;;  %v2803_v50 = vcombine.high %v21232_v49, %v21232_v49 }
 0x33f   :  { %20619 = vrot.lane.b32.xlu1 %v20618_v45, %s21282_s18  ;;  %v10793_v58 = vcombine.low %v10785_v9, %v10792_v4  ;;  %v10810_v2 = vcombine.low %v10802_v44, %v10809_v57  ;;  %v7079_v19 = vrot.slane %v7065_v40, %v21405_v31  ;;  %v2820_v27 = vcombine.high %v2134_v48, %v2134_v48 }
 0x340   :  { %v26215_v38 = vrot.slane %v7081_v39, %v21405_v31  ;;  %v26219_v26 = vcombine.high %v26206_v5, %v26206_v5  ;;  %v7113_v33 = vcombine.high %v7105_v20, %v7105_v20  ;;  %v2817_v35 = vrot.slane %v2803_v50, %v21405_v31 }
 0x341   :  { %v2827_v0 = vrot.slane %v2134_v48, %v21405_v31  ;;  %v20613_v42 = vpack.i.bf16 %v10810_v2, %v10793_v58  ;;  %v15779_v56 = vcombine.low %v7080_v14, %v7079_v19  ;;  %v2834_v34 = vrot.slane %v2820_v27, %v21405_v31  ;;  %v28472_v58 = vld [vmem:[#allocation6_spill] sm:$0xff]  ;;  %v19442_v2 = vld [vmem:[%s28419_s0 + $0x1a1] sm:$0xff] }
 0x342   :  { %v26227_v13 = vcombine.high %v26215_v38, %v26215_v38  ;;  %v15780_v15 = vcombine.low %v26206_v5, %v26219_v26  ;;  %v15797_v7 = vcombine.low %v7105_v20, %v7113_v33  ;;  %v2819_v52 = vcombine.high %v2817_v35, %v2817_v35 }
 0x343   :  { %v2835_v41 = vcombine.high %v2827_v0, %v2827_v0  ;;  %20614 = vrot.lane.b32.xlu0 %v20613_v42, %s21278_s10  ;;  %v15787_v51 = vrot.slane %v15779_v56, %v21405_v31  ;;  %v20352_v37 = vunpack.i.h.bf16 %v26223_v6  ;;  %v2851_v45 = vcombine.high %v21244_v54, %v21244_v54  ;;  %v19211_v56 = vld [vmem:[%s28419_s0 + $0x158] sm:$0x3f] }
 0x344   :  { %v15796_v10 = vcombine.low %v26215_v38, %v26227_v13  ;;  %v15794_v25 = vrot.slane %v15780_v15, %v21405_v31  ;;  %v15811_v4 = vrot.slane %v15797_v7, %v21405_v31  ;;  %v11757_v28 = vcombine.low %v2817_v35, %v2819_v52  ;;  %v26260_v35 = vld [vmem:[%s28419_s0 + $0x1a9] sm:$0x3f] }
 0x345   :  { %v11758_v44 = vcombine.low %v2827_v0, %v2835_v41  ;;  %v11774_v9 = vcombine.low %v2834_v34, %v21244_v54  ;;  %v20351_v48 = vunpack.i.l.bf16 %v26223_v6  ;;  %v20347_v14 = vunpack.i.h.bf16 %v20345_v30  ;;  %v28473_v0 = vld [vmem:[#allocation13_spill] sm:$0xff] }
 0x346   :  { %v15804_v16 = vrot.slane %v15796_v10, %v21405_v31  ;;  %v15795_v57 = vcombine.low %v15787_v51, %v15794_v25  ;;  %v11765_v40 = vrot.slane %v11757_v28, %v21405_v31  ;;  %v11775_v20 = vcombine.low %v2851_v45, %v28472_v58  ;;  %v21245_v28 = vld.sshfl [vmem:[%s28419_s0 + $0x160] sm:$0xff pattern:$0x76325410] }
 0x347   :  { %v11772_v24 = vrot.slane %v11758_v44, %v21405_v31  ;;  %v11782_v49 = vrot.slane %v11774_v9, %v21405_v31  ;;  %v20346_v50 = vunpack.i.l.bf16 %v20345_v30  ;;  %v18346_v27 = vsel %vm18323_vm5, %v18296_v22, %v20341_v46  ;;  %v28474_v22 = vld [vmem:[#allocation14_spill] sm:$0xff] }
 0x348   :  { %v15812_v39 = vcombine.low %v15804_v16, %v15811_v4  ;;  %v18347_v33 = vsel %vm18323_vm5, %v18297_v60, %v20342_v47  ;;  %v8101_v42 = vcombine.high %v28473_v0, %v28473_v0  ;;  %v11789_v15 = vrot.slane %v11775_v20, %v21405_v31 }
 0x349   :  { %v11773_v19 = vcombine.low %v11765_v40, %v11772_v24  ;;  %v26269_v46 = vsel %vm18373_vm6, %v18346_v27, %v20346_v50  ;;  %v26272_v63 = vsel %vm18373_vm6, %v18347_v33, %v20347_v14  ;;  %v8116_v60 = vcombine.high %v28474_v22, %v28474_v22  ;;  %v28475_v27 = vld [vmem:[#allocation8_spill] sm:$0xff] }
 0x34a   :  { %v20628_v34 = vpack.i.bf16 %v15812_v39, %v15795_v57  ;;  %v8115_v47 = vrot.slane %v8101_v42, %v21405_v31  ;;  %v8117_v7 = vcombine.high %v19442_v2, %v19442_v2  ;;  %v26278_v52 = vrot.slane %v19442_v2, %v21405_v31  ;;  %v26295_v57 = vpop.permute.xlu1 %20359  ;;  %v26312_v42 = vpop.permute.xlu0 %20354 }
 0x34b   :  { %v11790_v41 = vcombine.low %v11782_v49, %v11789_v15  ;;  %v8141_v51 = vrot.slane %v26260_v35, %v21405_v31  ;;  %v3857_v10 = vcombine.high %v19211_v56, %v19211_v56  ;;  %v3864_v54 = vrot.slane %v19211_v56, %v21405_v31 }
 0x34c   :  { %20629 = vrot.lane.b32.xlu1 %v20628_v34, %s21281_s13  ;;  %v26285_v30 = vrot.slane %v8117_v7, %v21405_v31  ;;  %v26289_v25 = vcombine.high %v26278_v52, %v26278_v52  ;;  %v16759_v4 = vcombine.low %v8116_v60, %v8115_v47  ;;  %v3888_v39 = vcombine.high %v21245_v28, %v21245_v28 }
 0x34d   :  { %v20623_v44 = vpack.i.bf16 %v11790_v41, %v11773_v19  ;;  %v8149_v16 = vcombine.high %v8141_v51, %v8141_v51  ;;  %v3871_v45 = vrot.slane %v3857_v10, %v21405_v31  ;;  %v3872_v9 = vcombine.high %v3864_v54, %v3864_v54  ;;  %v26327_v41 = vld [vmem:[%s28419_s0 + $0x108] sm:$0x3f] }
 0x34e   :  { %v26299_v40 = vcombine.high %v26285_v30, %v26285_v30  ;;  %v16760_v24 = vcombine.low %v26278_v52, %v26289_v25  ;;  %v16767_v14 = vrot.slane %v16759_v4, %v21405_v31  ;;  %v12737_v20 = vcombine.low %v25929_v17, %v25942_v55  ;;  %v53_v55 = vld [vmem:[%s28419_s0 + $0x100] sm:$0xff] }
 0x34f   :  { %20624 = vrot.lane.b32.xlu0 %v20623_v44, %s21280_s12  ;;  %v16777_v58 = vcombine.low %v8141_v51, %v8149_v16  ;;  %v12738_v49 = vcombine.low %v3864_v54, %v3872_v9  ;;  %v12754_v50 = vcombine.low %v3871_v45, %v21245_v28  ;;  %v12755_v33 = vcombine.low %v3888_v39, %v28475_v27  ;;  %v19498_v39 = vld [vmem:[%s28419_s0 + $0x1a2] sm:$0xff] }
 0x350   :  { %v16774_v2 = vrot.slane %v16760_v24, %v21405_v31  ;;  %v16776_v19 = vcombine.low %v26285_v30, %v26299_v40  ;;  %v20362_v0 = vunpack.i.h.bf16 %v26295_v57  ;;  %v12745_v34 = vrot.slane %v12737_v20, %v21405_v31  ;;  %v26344_v20 = vpop.permute.xlu1 %20369 }
 0x351   :  { %v16791_v56 = vrot.slane %v16777_v58, %v21405_v31  ;;  %v12752_v15 = vrot.slane %v12738_v49, %v21405_v31  ;;  %v12762_v17 = vrot.slane %v12754_v50, %v21405_v31  ;;  %v12769_v60 = vrot.slane %v12755_v33, %v21405_v31  ;;  %v28476_v58 = vld [vmem:[#allocation15_spill] sm:$0xff] }
 0x352   :  { %v16775_v47 = vcombine.low %v16767_v14, %v16774_v2  ;;  %v16784_v22 = vrot.slane %v16776_v19, %v21405_v31  ;;  %v20361_v7 = vunpack.i.l.bf16 %v26295_v57  ;;  %v20357_v10 = vunpack.i.h.bf16 %v26312_v42  ;;  %v26350_v2 = vld [vmem:[%s28419_s0 + $0x1aa] sm:$0x3f]  ;;  %v28477_v19 = vld [vmem:[#allocation16_spill] sm:$0xff]  ;;  %v21247_v57 = vld.sshfl [vmem:[%s28419_s0 + $0x162] sm:$0xff pattern:$0x76325410] }
 0x353   :  { %v12753_v51 = vcombine.low %v12745_v34, %v12752_v15  ;;  %v20356_v54 = vunpack.i.l.bf16 %v26312_v42  ;;  %v583_v4 = vcombine.high %v26051_v29, %v26051_v29  ;;  %v12770_v44 = vcombine.low %v12762_v17, %v12769_v60 }
 0x354   :  { %v16792_v28 = vcombine.low %v16784_v22, %v16791_v56  ;;  %v598_v16 = vcombine.high %v26062_v1, %v26062_v1  ;;  %v599_v45 = vcombine.high %v53_v55, %v53_v55  ;;  %v606_v24 = vrot.slane %v53_v55, %v21405_v31 }
 0x355   :  { %v597_v9 = vrot.slane %v583_v4, %v21405_v31  ;;  %v623_v14 = vrot.slane %v26327_v41, %v21405_v31  ;;  %v9137_v29 = vcombine.high %v28476_v58, %v28476_v58  ;;  %v20633_v50 = vpack.i.bf16 %v12770_v44, %v12753_v51  ;;  %v26367_v44 = vpop.f32.mrb[0].mxu0 }
 0x356   :  { %v20638_v49 = vpack.i.bf16 %v16792_v28, %v16775_v47  ;;  %v613_v1 = vrot.slane %v599_v45, %v21405_v31  ;;  %v9152_v27 = vcombine.high %v28477_v19, %v28477_v19  ;;  %v614_v33 = vcombine.high %v606_v24, %v606_v24  ;;  %v19267_v47 = vld [vmem:[%s28419_s0 + $0x159] sm:$0x3f]  ;;  %v19637_v58 = vpop.f32.mrb[1].mxu0 }
 0x357   :  { %v631_v42 = vcombine.high %v623_v14, %v623_v14  ;;  %v9759_v56 = vcombine.low %v598_v16, %v597_v9  ;;  %v9151_v34 = vrot.slane %v9137_v29, %v21405_v31  ;;  %20634 = vrot.lane.b32.xlu0 %v20633_v50, %s21277_s9  ;;  %v9153_v17 = vcombine.high %v19498_v39, %v19498_v39 }
 0x358   :  { %20639 = vrot.lane.b32.xlu1 %v20638_v49, %s21284_s24  ;;  %v615_v15 = vcombine.high %v613_v1, %v613_v1  ;;  %v26358_v55 = vrot.slane %v19498_v39, %v21405_v31  ;;  %v20372_v22 = vunpack.i.h.bf16 %v26344_v20  ;;  %v9760_v60 = vcombine.low %v606_v24, %v614_v33 }
 0x359   :  { %v9767_v51 = vrot.slane %v9759_v56, %v21405_v31  ;;  %v9777_v4 = vcombine.low %v623_v14, %v631_v42  ;;  %v9177_v28 = vrot.slane %v26350_v2, %v21405_v31  ;;  %v26370_v45 = vrot.slane %v9153_v17, %v21405_v31 }
 0x35a   :  { %v9776_v16 = vcombine.low %v613_v1, %v615_v15  ;;  %v26374_v9 = vcombine.high %v26358_v55, %v26358_v55  ;;  %v17739_v39 = vcombine.low %v9152_v27, %v9151_v34  ;;  %v9774_v24 = vrot.slane %v9760_v60, %v21405_v31 }
 0x35b   :  { %v9791_v29 = vrot.slane %v9777_v4, %v21405_v31  ;;  %v9185_v14 = vcombine.high %v9177_v28, %v9177_v28  ;;  %v4893_v49 = vcombine.high %v19267_v47, %v19267_v47  ;;  %v26381_v1 = vcombine.high %v26370_v45, %v26370_v45  ;;  %v21246_v4 = vld.sshfl [vmem:[%s28419_s0 + $0x161] sm:$0xff pattern:$0x76325410] }
 0x35c   :  { %v9784_v50 = vrot.slane %v9776_v16, %v21405_v31  ;;  %v17740_v19 = vcombine.low %v26358_v55, %v26374_v9  ;;  %v17747_v33 = vrot.slane %v17739_v39, %v21405_v31  ;;  %v9775_v42 = vcombine.low %v9767_v51, %v9774_v24  ;;  %v26400_v39 = vpop.f32.mrb[2].mxu0 }
 0x35d   :  { %v17757_v27 = vcombine.low %v9177_v28, %v9185_v14  ;;  %v4900_v56 = vrot.slane %v19267_v47, %v21405_v31  ;;  %v4907_v34 = vrot.slane %v4893_v49, %v21405_v31  ;;  %v17756_v60 = vcombine.low %v26370_v45, %v26381_v1  ;;  %v20365_v49 = vpop.permute.xlu0 %20364 }
 0x35e   :  { %v9792_v15 = vcombine.low %v9784_v50, %v9791_v29  ;;  %v26389_v17 = vrot.slane %v17740_v19, %v21405_v31  ;;  %v18098_v16 = vsel %vm18073_vm0, %v9775_v42, %v20356_v54  ;;  %v13717_v47 = vcombine.low %v26005_v11, %v26016_v36  ;;  %v19638_v50 = vpop.f32.mrb[3].mxu0 }
 0x35f   :  { %v17771_v51 = vrot.slane %v17757_v27, %v21405_v31  ;;  %v4908_v28 = vcombine.high %v4900_v56, %v4900_v56  ;;  %v26405_v29 = vrot.slane %v17756_v60, %v21405_v31  ;;  %v4924_v14 = vcombine.high %v21246_v4, %v21246_v4 }
 0x360   :  { %v18099_v58 = vsel %vm18073_vm0, %v9792_v15, %v20357_v10  ;;  %v17755_v24 = vcombine.low %v17747_v33, %v26389_v17  ;;  %v13725_v54 = vrot.slane %v13717_v47, %v21405_v31  ;;  %v13734_v42 = vcombine.low %v4907_v34, %v21246_v4  ;;  %v28478_v10 = vld [vmem:[#allocation5_spill] sm:$0xff] }
 0x361   :  { %v13718_v19 = vcombine.low %v4900_v56, %v4908_v28  ;;  %v18446_v11 = vsel %vm18423_vm9, %v26269_v46, %v20351_v48  ;;  %v17772_v36 = vcombine.low %v26405_v29, %v17771_v51  ;;  %v13735_v27 = vcombine.low %v4924_v14, %v28478_v10  ;;  %v19323_v56 = vld [vmem:[%s28419_s0 + $0x15a] sm:$0x3f] }
 0x362   :  { %v18447_v33 = vsel %vm18423_vm9, %v26272_v63, %v20352_v37  ;;  %v20371_v15 = vunpack.i.l.bf16 %v26344_v20  ;;  %v13742_v60 = vrot.slane %v13734_v42, %v21405_v31  ;;  %v20367_v46 = vunpack.i.h.bf16 %v20365_v49 }
 0x363   :  { %v13732_v34 = vrot.slane %v13718_v19, %v21405_v31  ;;  %v18484_v48 = vpack.c.bf16 %v18447_v33, %v18446_v11  ;;  %v20648_v4 = vpack.i.bf16 %v17772_v36, %v17755_v24  ;;  %v13749_v51 = vrot.slane %v13735_v27, %v21405_v31  ;;  %v1107_v24 = vld [vmem:[%s28419_s0 + $0x191] sm:$0xff]  ;;  %v1108_v19 = vld [vmem:[%s28419_s0 + $0x199] sm:$0x3f] }
 0x364   :  { %v20366_v28 = vunpack.i.l.bf16 %v20365_v49  ;;  %v18148_v6 = vsel %vm18123_vm1, %v18098_v16, %v20361_v7  ;;  %v18149_v63 = vsel %vm18123_vm1, %v18099_v58, %v20362_v0  ;;  %v5929_v47 = vcombine.high %v19323_v56, %v19323_v56 }
 0x365   :  { %v13733_v37 = vcombine.low %v13725_v54, %v13732_v34  ;;  %19680 = vmatmul.mubr.msk.bf16.gmra.mrb[44].mxu0 %vm18541_vm10, %v18484_v48  ;;  %v5936_v14 = vrot.slane %v19323_v56, %v21405_v31  ;;  %20649 = vrot.lane.b32.xlu1 %v20648_v4, %s21283_s21  ;;  %v13750_v49 = vcombine.low %v13742_v60, %v13749_v51 }
 0x366   :  { %v18198_v50 = vsel %vm18173_vm2, %v18148_v6, %v20366_v28  ;;  %v18199_v7 = vsel %vm18173_vm2, %v18149_v63, %v20367_v46  ;;  %v5943_v0 = vrot.slane %v5929_v47, %v21405_v31  ;;  %v14697_v58 = vcombine.low %v26074_v8, %v26081_v18  ;;  %19683 = vmatprep.mubr.msk.bf16.mxu0 %vm21286_vm8, %v28454_v62  ;;  %v28479_v18 = vld [vmem:[#allocation7_spill] sm:$0xff]  ;;  %v26458_v46 = vpop.permute.xlu1 %20379 }
 0x367   :  { %v5944_v16 = vcombine.high %v5936_v14, %v5936_v14  ;;  %v1916_v54 = vcombine.high %v25885_v53, %v25885_v53  ;;  %v20643_v42 = vpack.i.bf16 %v13750_v49, %v13733_v37  ;;  %v5960_v11 = vcombine.high %v21247_v57, %v21247_v57 }
 0x368   :  { %v1932_v36 = vcombine.high %v1107_v24, %v1107_v24  ;;  %v1939_v10 = vrot.slane %v1107_v24, %v21405_v31  ;;  %v14705_v33 = vrot.slane %v14697_v58, %v21405_v31  ;;  %v14714_v56 = vcombine.low %v5943_v0, %v21247_v57  ;;  %v20375_v24 = vpop.permute.xlu0 %20374 }
 0x369   :  { %v14698_v27 = vcombine.low %v5936_v14, %v5944_v16  ;;  %v1930_v8 = vrot.slane %v1916_v54, %v21405_v31  ;;  %20644 = vrot.lane.b32.xlu0 %v20643_v42, %s21279_s11  ;;  %v14715_v34 = vcombine.low %v5960_v11, %v28479_v18  ;;  %v1949_v48 = vcombine.high %v1108_v19, %v1108_v19 }
 0x36a   :  { %v1946_v53 = vrot.slane %v1932_v36, %v21405_v31  ;;  %v1947_v60 = vcombine.high %v1939_v10, %v1939_v10  ;;  %v14722_v51 = vrot.slane %v14714_v56, %v21405_v31  ;;  %v1956_v28 = vrot.slane %v1108_v19, %v21405_v31 }
 0x36b   :  { %v14712_v4 = vrot.slane %v14698_v27, %v21405_v31  ;;  %v10913_v6 = vcombine.low %v1930_v8, %v1939_v10  ;;  %v14729_v37 = vrot.slane %v14715_v34, %v21405_v31  ;;  %v1963_v47 = vrot.slane %v1949_v48, %v21405_v31 }
 0x36c   :  { %v1948_v63 = vcombine.high %v1946_v53, %v1946_v53  ;;  %v10914_v14 = vcombine.low %v1947_v60, %v1946_v53  ;;  %v1964_v57 = vcombine.high %v1956_v28, %v1956_v28  ;;  %v20382_v16 = vunpack.i.h.bf16 %v26458_v46  ;;  %v2143_v53 = vld [vmem:[%s28419_s0 + $0x192] sm:$0xff] }
 0x36d   :  { %v14713_v49 = vcombine.low %v14705_v33, %v14712_v4  ;;  %v10921_v0 = vrot.slane %v10913_v6, %v21405_v31  ;;  %v14730_v58 = vcombine.low %v14722_v51, %v14729_v37  ;;  %v20381_v19 = vunpack.i.l.bf16 %v26458_v46  ;;  %v19379_v33 = vld [vmem:[%s28419_s0 + $0x168] sm:$0x3f]  ;;  %v2144_v6 = vld [vmem:[%s28419_s0 + $0x19a] sm:$0x3f] }
 0x36e   :  { %v10928_v54 = vrot.slane %v10914_v14, %v21405_v31  ;;  %v10930_v42 = vcombine.low %v1948_v63, %v1956_v28  ;;  %v10931_v11 = vcombine.low %v1964_v57, %v1963_v47  ;;  %v20377_v36 = vunpack.i.h.bf16 %v20375_v24 }
 0x36f   :  { %v20376_v10 = vunpack.i.l.bf16 %v20375_v24  ;;  %v18248_v27 = vsel %vm18223_vm3, %v18198_v50, %v20371_v15  ;;  %v20658_v56 = vpack.i.bf16 %v14730_v58, %v14713_v49  ;;  %v18249_v34 = vsel %vm18223_vm3, %v18199_v7, %v20372_v22  ;;  %v21248_v22 = vld.sshfl [vmem:[%s28419_s0 + $0x170] sm:$0xff pattern:$0x76325410] }
 0x370   :  { %v10929_v8 = vcombine.low %v10921_v0, %v10928_v54  ;;  %v10938_v18 = vrot.slane %v10930_v42, %v21405_v31  ;;  %v10945_v60 = vrot.slane %v10931_v11, %v21405_v31  ;;  %v18299_v50 = vsel %vm18273_vm4, %v18249_v34, %v20377_v36  ;;  %v28480_v42 = vld [vmem:[#allocation9_spill] sm:$0xff] }
 0x371   :  { %v18298_v15 = vsel %vm18273_vm4, %v18248_v27, %v20376_v10  ;;  %v6949_v48 = vcombine.high %v25920_v43, %v25920_v43  ;;  %20659 = vrot.lane.b32.xlu1 %v20658_v56, %s21282_s18  ;;  %v6966_v4 = vcombine.high %v19379_v33, %v19379_v33  ;;  %v6973_v20 = vrot.slane %v19379_v33, %v21405_v31 }
 0x372   :  { %v2952_v7 = vcombine.high %v25949_v3, %v25949_v3  ;;  %v10946_v51 = vcombine.low %v10938_v18, %v10945_v60  ;;  %v2968_v43 = vcombine.high %v2143_v53, %v2143_v53  ;;  %v2975_v37 = vrot.slane %v2143_v53, %v21405_v31  ;;  %v26503_v18 = vpop.permute.xlu1 %20389 }
 0x373   :  { %v6963_v28 = vrot.slane %v6949_v48, %v21405_v31  ;;  %v6980_v63 = vrot.slane %v6966_v4, %v21405_v31  ;;  %v6981_v47 = vcombine.high %v6973_v20, %v6973_v20  ;;  %v6997_v14 = vcombine.high %v21248_v22, %v21248_v22  ;;  %v20385_v48 = vpop.permute.xlu0 %20384 }
 0x374   :  { %v2966_v24 = vrot.slane %v2952_v7, %v21405_v31  ;;  %v20653_v49 = vpack.i.bf16 %v10946_v51, %v10929_v8  ;;  %v2982_v3 = vrot.slane %v2968_v43, %v21405_v31  ;;  %v2983_v0 = vcombine.high %v2975_v37, %v2975_v37 }
 0x375   :  { %v6965_v57 = vcombine.high %v6963_v28, %v6963_v28  ;;  %v15678_v58 = vcombine.low %v6973_v20, %v6981_v47  ;;  %v15694_v54 = vcombine.low %v6980_v63, %v21248_v22  ;;  %v15695_v11 = vcombine.low %v6997_v14, %v28480_v42 }
 0x376   :  { %v2985_v36 = vcombine.high %v2144_v6, %v2144_v6  ;;  %20654 = vrot.lane.b32.xlu0 %v20653_v49, %s21278_s10  ;;  %v2984_v27 = vcombine.high %v2982_v3, %v2982_v3  ;;  %v2992_v33 = vrot.slane %v2144_v6, %v21405_v31  ;;  %v11893_v56 = vcombine.low %v2966_v24, %v2975_v37  ;;  %v19435_v24 = vld [vmem:[%s28419_s0 + $0x169] sm:$0x3f] }
 0x377   :  { %v15677_v10 = vcombine.low %v6963_v28, %v6965_v57  ;;  %v15692_v8 = vrot.slane %v15678_v58, %v21405_v31  ;;  %v15702_v34 = vrot.slane %v15694_v54, %v21405_v31  ;;  %v15709_v53 = vrot.slane %v15695_v11, %v21405_v31  ;;  %v19221_v58 = vld [vmem:[%s28419_s0 + $0x1a8] sm:$0x3f] }
 0x378   :  { %v2999_v60 = vrot.slane %v2985_v36, %v21405_v31  ;;  %v3000_v20 = vcombine.high %v2992_v33, %v2992_v33  ;;  %v11894_v22 = vcombine.low %v2983_v0, %v2982_v3  ;;  %v11901_v7 = vrot.slane %v11893_v56, %v21405_v31 }
 0x379   :  { %v15685_v4 = vrot.slane %v15677_v10, %v21405_v31  ;;  %v15710_v51 = vcombine.low %v15702_v34, %v15709_v53  ;;  %v11910_v28 = vcombine.low %v2984_v27, %v2992_v33  ;;  %v20392_v6 = vunpack.i.h.bf16 %v26503_v18 }
 0x37a   :  { %v20391_v43 = vunpack.i.l.bf16 %v26503_v18  ;;  %v11908_v63 = vrot.slane %v11894_v22, %v21405_v31  ;;  %v11911_v47 = vcombine.low %v3000_v20, %v2999_v60  ;;  %v20387_v14 = vunpack.i.h.bf16 %v20385_v48 }
 0x37b   :  { %v15693_v37 = vcombine.low %v15685_v4, %v15692_v8  ;;  %v11918_v49 = vrot.slane %v11910_v28, %v21405_v31  ;;  %v20386_v57 = vunpack.i.l.bf16 %v20385_v48  ;;  %v18348_v3 = vsel %vm18323_vm5, %v18298_v15, %v20381_v19 }
 0x37c   :  { %v18349_v0 = vsel %vm18323_vm5, %v18299_v50, %v20382_v16  ;;  %v11909_v42 = vcombine.low %v11901_v7, %v11908_v63  ;;  %v11925_v11 = vrot.slane %v11911_v47, %v21405_v31  ;;  %v7985_v19 = vcombine.high %v25982_v32, %v25982_v32  ;;  %v21249_v50 = vld.sshfl [vmem:[%s28419_s0 + $0x171] sm:$0xff pattern:$0x76325410] }
 0x37d   :  { %v20668_v54 = vpack.i.bf16 %v15710_v51, %v15693_v37  ;;  %v26529_v36 = vsel %vm18373_vm6, %v18349_v0, %v20387_v14  ;;  %v26532_v10 = vsel %vm18373_vm6, %v18348_v3, %v20386_v57  ;;  %v8002_v46 = vcombine.high %v19435_v24, %v19435_v24  ;;  %v26554_v14 = vpop.permute.xlu1 %20399  ;;  %v26558_v0 = vpop.permute.xlu0 %20394 }
 0x37e   :  { %v8009_v16 = vrot.slane %v19435_v24, %v21405_v31  ;;  %v11926_v15 = vcombine.low %v11918_v49, %v11925_v11  ;;  %v3989_v27 = vcombine.high %v25998_v59, %v25998_v59  ;;  %v4022_v33 = vcombine.high %v19221_v58, %v19221_v58  ;;  %v28481_v59 = vld [vmem:[#allocation10_spill] sm:$0xff] }
 0x37f   :  { %20669 = vrot.lane.b32.xlu1 %v20668_v54, %s21281_s13  ;;  %v7999_v56 = vrot.slane %v7985_v19, %v21405_v31  ;;  %v8016_v8 = vrot.slane %v8002_v46, %v21405_v31  ;;  %v4029_v32 = vrot.slane %v19221_v58, %v21405_v31  ;;  %v8033_v60 = vcombine.high %v21249_v50, %v21249_v50  ;;  %v56_v46 = vld [vmem:[%s28419_s0 + $0x118] sm:$0x3f] }
 0x380   :  { %v8017_v34 = vcombine.high %v8009_v16, %v8009_v16  ;;  %v20663_v53 = vpack.i.bf16 %v11926_v15, %v11909_v42  ;;  %v4003_v48 = vrot.slane %v3989_v27, %v21405_v31  ;;  %v4036_v4 = vrot.slane %v4022_v33, %v21405_v31 }
 0x381   :  { %v8001_v20 = vcombine.high %v7999_v56, %v7999_v56  ;;  %v16674_v7 = vcombine.low %v8016_v8, %v21249_v50  ;;  %v4037_v51 = vcombine.high %v4029_v32, %v4029_v32  ;;  %v16675_v28 = vcombine.low %v8033_v60, %v28481_v59  ;;  %v26589_v59 = vpop.f32.mrb[4].mxu0 }
 0x382   :  { %v16658_v22 = vcombine.low %v8009_v16, %v8017_v34  ;;  %20664 = vrot.lane.b32.xlu0 %v20663_v53, %s21280_s12  ;;  %v12873_v37 = vcombine.low %v4003_v48, %v26206_v5  ;;  %v12874_v63 = vcombine.low %v26219_v26, %v26215_v38  ;;  %v12890_v47 = vcombine.low %v26227_v13, %v4029_v32  ;;  %v55_v26 = vld [vmem:[%s28419_s0 + $0x110] sm:$0xff]  ;;  %v19491_v48 = vld [vmem:[%s28419_s0 + $0x16a] sm:$0x3f] }
 0x383   :  { %v16657_v24 = vcombine.low %v7999_v56, %v8001_v20  ;;  %v16682_v57 = vrot.slane %v16674_v7, %v21405_v31  ;;  %v12891_v3 = vcombine.low %v4037_v51, %v4036_v4  ;;  %v16689_v58 = vrot.slane %v16675_v28, %v21405_v31  ;;  %v26585_v20 = vpop.permute.xlu1 %20409 }
 0x384   :  { %v16672_v49 = vrot.slane %v16658_v22, %v21405_v31  ;;  %v12881_v54 = vrot.slane %v12873_v37, %v21405_v31  ;;  %v12888_v5 = vrot.slane %v12874_v63, %v21405_v31  ;;  %v12898_v38 = vrot.slane %v12890_v47, %v21405_v31 }
 0x385   :  { %v16665_v13 = vrot.slane %v16657_v24, %v21405_v31  ;;  %v12905_v42 = vrot.slane %v12891_v3, %v21405_v31  ;;  %v20402_v11 = vunpack.i.h.bf16 %v26554_v14  ;;  %v20401_v19 = vunpack.i.l.bf16 %v26554_v14  ;;  %v19641_v24 = vpop.f32.mrb[5].mxu0 }
 0x386   :  { %v16690_v16 = vcombine.low %v16682_v57, %v16689_v58  ;;  %v12889_v15 = vcombine.low %v12881_v54, %v12888_v5  ;;  %v20397_v50 = vunpack.i.h.bf16 %v26558_v0  ;;  %v20396_v27 = vunpack.i.l.bf16 %v26558_v0 }
 0x387   :  { %v16673_v33 = vcombine.low %v16665_v13, %v16672_v49  ;;  %v12906_v56 = vcombine.low %v12898_v38, %v12905_v42  ;;  %v616_v8 = vcombine.high %v26327_v41, %v26327_v41  ;;  %v632_v34 = vcombine.high %v55_v26, %v55_v26  ;;  %v21250_v42 = vld.sshfl [vmem:[%s28419_s0 + $0x172] sm:$0xff pattern:$0x76325410] }
 0x388   :  { %v639_v32 = vrot.slane %v55_v26, %v21405_v31  ;;  %v649_v53 = vcombine.high %v56_v46, %v56_v46  ;;  %v656_v60 = vrot.slane %v56_v46, %v21405_v31  ;;  %v9021_v4 = vcombine.high %v26070_v23, %v26070_v23  ;;  %v19277_v46 = vld [vmem:[%s28419_s0 + $0x1a9] sm:$0x3f] }
 0x389   :  { %v20678_v22 = vpack.i.bf16 %v16690_v16, %v16673_v33  ;;  %v20673_v7 = vpack.i.bf16 %v12906_v56, %v12889_v15  ;;  %v630_v51 = vrot.slane %v616_v8, %v21405_v31  ;;  %v646_v41 = vrot.slane %v632_v34, %v21405_v31 }
 0x38a   :  { %v647_v28 = vcombine.high %v639_v32, %v639_v32  ;;  %v663_v37 = vrot.slane %v649_v53, %v21405_v31  ;;  %v664_v63 = vcombine.high %v656_v60, %v656_v60  ;;  %v9035_v47 = vrot.slane %v9021_v4, %v21405_v31 }
 0x38b   :  { %20679 = vrot.lane.b32.xlu1 %v20678_v22, %s21284_s24  ;;  %20674 = vrot.lane.b32.xlu0 %v20673_v7, %s21277_s9  ;;  %v648_v23 = vcombine.high %v646_v41, %v646_v41  ;;  %v9793_v49 = vcombine.low %v630_v51, %v639_v32  ;;  %v9038_v57 = vcombine.high %v19491_v48, %v19491_v48  ;;  %v20412_v3 = vunpack.i.h.bf16 %v26585_v20  ;;  %v28482_v51 = vld [vmem:[#allocation11_spill] sm:$0xff] }
 0x38c   :  { %v9794_v0 = vcombine.low %v647_v28, %v646_v41  ;;  %v9811_v58 = vcombine.low %v664_v63, %v663_v37  ;;  %v9037_v54 = vcombine.high %v9035_v47, %v9035_v47  ;;  %v9045_v5 = vrot.slane %v19491_v48, %v21405_v31 }
 0x38d   :  { %v9801_v38 = vrot.slane %v9793_v49, %v21405_v31  ;;  %v9810_v26 = vcombine.low %v648_v23, %v656_v60  ;;  %v9052_v13 = vrot.slane %v9038_v57, %v21405_v31  ;;  %v9069_v34 = vcombine.high %v21250_v42, %v21250_v42  ;;  %v26618_v23 = vpop.f32.mrb[6].mxu0 }
 0x38e   :  { %v9808_v16 = vrot.slane %v9794_v0, %v21405_v31  ;;  %v9825_v15 = vrot.slane %v9811_v58, %v21405_v31  ;;  %v9053_v33 = vcombine.high %v9045_v5, %v9045_v5  ;;  %v17637_v56 = vcombine.low %v9035_v47, %v9037_v54  ;;  %v19642_v54 = vpop.f32.mrb[7].mxu0 }
 0x38f   :  { %v9818_v8 = vrot.slane %v9810_v26, %v21405_v31  ;;  %v17654_v32 = vcombine.low %v9052_v13, %v21250_v42  ;;  %v5025_v53 = vcombine.high %v26095_v12, %v26095_v12  ;;  %v5058_v22 = vcombine.high %v19277_v46, %v19277_v46  ;;  %v20405_v13 = vpop.permute.xlu0 %20404 }
 0x390   :  { %v9809_v60 = vcombine.low %v9801_v38, %v9808_v16  ;;  %v17638_v48 = vcombine.low %v9045_v5, %v9053_v33  ;;  %v17645_v4 = vrot.slane %v17637_v56, %v21405_v31  ;;  %v17655_v41 = vcombine.low %v9069_v34, %v28482_v51  ;;  %v19388_v34 = vld [vmem:[%s28419_s0 + $0x1b0] sm:$0xff]  ;;  %v19389_v51 = vld [vmem:[%s28419_s0 + $0x1b8] sm:$0x3f] }
 0x391   :  { %v9826_v7 = vcombine.low %v9818_v8, %v9825_v15  ;;  %v17662_v28 = vrot.slane %v17654_v32, %v21405_v31  ;;  %v5039_v37 = vrot.slane %v5025_v53, %v21405_v31  ;;  %v5065_v24 = vrot.slane %v19277_v46, %v21405_v31 }
 0x392   :  { %v18100_v63 = vsel %vm18073_vm0, %v9809_v60, %v20396_v27  ;;  %v17652_v47 = vrot.slane %v17638_v48, %v21405_v31  ;;  %v5072_v12 = vrot.slane %v5058_v22, %v21405_v31  ;;  %v17669_v57 = vrot.slane %v17655_v41, %v21405_v31 }
 0x393   :  { %v18101_v49 = vsel %vm18073_vm0, %v9826_v7, %v20397_v50  ;;  %v13853_v0 = vcombine.low %v5039_v37, %v26278_v52  ;;  %v13854_v58 = vcombine.low %v26289_v25, %v26285_v30  ;;  %v5073_v27 = vcombine.high %v5065_v24, %v5065_v24 }
 0x394   :  { %v17653_v5 = vcombine.low %v17645_v4, %v17652_v47  ;;  %v13870_v38 = vcombine.low %v26299_v40, %v5065_v24  ;;  %v18448_v26 = vsel %vm18423_vm9, %v26532_v10, %v20391_v43  ;;  %v17670_v42 = vcombine.low %v17662_v28, %v17669_v57  ;;  %v19333_v43 = vld [vmem:[%s28419_s0 + $0x1aa] sm:$0x3f]  ;;  %v20420_v28 = vpop.permute.xlu1 %20419 }
 0x395   :  { %v13861_v50 = vrot.slane %v13853_v0, %v21405_v31  ;;  %v13868_v46 = vrot.slane %v13854_v58, %v21405_v31  ;;  %v18449_v52 = vsel %vm18423_vm9, %v26529_v36, %v20392_v6  ;;  %v13871_v30 = vcombine.low %v5073_v27, %v5072_v12  ;;  %v26693_v27 = vpop.permute.xlu0 %20414 }
 0x396   :  { %v13878_v25 = vrot.slane %v13870_v38, %v21405_v31  ;;  %v18485_v40 = vpack.c.bf16 %v18449_v52, %v18448_v26  ;;  %v20411_v16 = vunpack.i.l.bf16 %v26585_v20  ;;  %v20688_v10 = vpack.i.bf16 %v17670_v42, %v17653_v5 }
 0x397   :  { %v13869_v15 = vcombine.low %v13861_v50, %v13868_v46  ;;  %v20407_v33 = vunpack.i.h.bf16 %v20405_v13  ;;  %v20406_v56 = vunpack.i.l.bf16 %v20405_v13  ;;  %v13885_v8 = vrot.slane %v13871_v30, %v21405_v31 }
 0x398   :  { %19684 = vmatmul.mubr.msk.bf16.gmra.mrb[48].mxu0 %vm18541_vm10, %v18485_v40  ;;  %v18150_v18 = vsel %vm18123_vm1, %v18100_v63, %v20401_v19  ;;  %v18151_v6 = vsel %vm18123_vm1, %v18101_v49, %v20402_v11  ;;  %v6061_v36 = vcombine.high %v26132_v61, %v26132_v61  ;;  %20689 = vrot.lane.b32.xlu1 %v20688_v10, %s21283_s21  ;;  %v20422_v57 = vunpack.i.h.bf16 %v20420_v28 }
 0x399   :  { %v18200_v32 = vsel %vm18173_vm2, %v18150_v18, %v20406_v56  ;;  %v18201_v53 = vsel %vm18173_vm2, %v18151_v6, %v20407_v33  ;;  %v6094_v60 = vcombine.high %v19333_v43, %v19333_v43  ;;  %v6101_v19 = vrot.slane %v19333_v43, %v21405_v31  ;;  %19687 = vmatprep.mubr.msk.bf16.mxu0 %vm21286_vm8, %v28454_v62  ;;  %v64_v33 = vld [vmem:[%s28419_s0 + $0x158] sm:$0x3f]  ;;  %v65_v56 = vld [vmem:[%s28419_s0 + $0x160] sm:$0xff] }
 0x39a   :  { %v13886_v48 = vcombine.low %v13878_v25, %v13885_v8  ;;  %v6075_v14 = vrot.slane %v6061_v36, %v21405_v31  ;;  %v14834_v11 = vcombine.low %v26374_v9, %v26370_v45  ;;  %v7098_v61 = vcombine.high %v26191_v21, %v26191_v21  ;;  %v63_v25 = vld [vmem:[%s28419_s0 + $0x150] sm:$0xff] }
 0x39b   :  { %v6108_v4 = vrot.slane %v6094_v60, %v21405_v31  ;;  %v6109_v22 = vcombine.high %v6101_v19, %v6101_v19  ;;  %v14850_v7 = vcombine.low %v26381_v1, %v6101_v19  ;;  %v7114_v41 = vcombine.high %v19388_v34, %v19388_v34 }
 0x39c   :  { %v20683_v37 = vpack.i.bf16 %v13886_v48, %v13869_v15  ;;  %v14833_v45 = vcombine.low %v6075_v14, %v26358_v55  ;;  %v14848_v9 = vrot.slane %v14834_v11, %v21405_v31  ;;  %v7112_v21 = vrot.slane %v7098_v61, %v21405_v31 }
 0x39d   :  { %v14851_v63 = vcombine.low %v6109_v22, %v6108_v4  ;;  %v14858_v47 = vrot.slane %v14850_v7, %v21405_v31  ;;  %v26675_v24 = vrot.slane %v19388_v34, %v21405_v31  ;;  %v26678_v1 = vrot.slane %v7114_v41, %v21405_v31  ;;  %v19445_v41 = vld [vmem:[%s28419_s0 + $0x1b9] sm:$0x3f] }
 0x39e   :  { %20684 = vrot.lane.b32.xlu0 %v20683_v37, %s21279_s11  ;;  %v14841_v12 = vrot.slane %v14833_v45, %v21405_v31  ;;  %v7131_v49 = vcombine.high %v19389_v51, %v19389_v51  ;;  %v7138_v55 = vrot.slane %v19389_v51, %v21405_v31  ;;  %v20421_v42 = vunpack.i.l.bf16 %v20420_v28 }
 0x39f   :  { %v14865_v0 = vrot.slane %v14851_v63, %v21405_v31  ;;  %v26686_v58 = vcombine.high %v26675_v24, %v26675_v24  ;;  %v26690_v54 = vcombine.high %v26678_v1, %v26678_v1  ;;  %v15813_v5 = vcombine.low %v7112_v21, %v26675_v24 }
 0x3a0   :  { %v14849_v38 = vcombine.low %v14841_v12, %v14848_v9  ;;  %v7145_v26 = vrot.slane %v7131_v49, %v21405_v31  ;;  %v7146_v13 = vcombine.high %v7138_v55, %v7138_v55  ;;  %v18250_v43 = vsel %vm18223_vm3, %v18200_v32, %v20411_v16  ;;  %v19444_v32 = vld [vmem:[%s28419_s0 + $0x1b1] sm:$0xff] }
 0x3a1   :  { %v14866_v50 = vcombine.low %v14858_v47, %v14865_v0  ;;  %v15814_v46 = vcombine.low %v26686_v58, %v26678_v1  ;;  %v15821_v52 = vrot.slane %v15813_v5, %v21405_v31  ;;  %v15830_v30 = vcombine.low %v26690_v54, %v7138_v55 }
 0x3a2   :  { %v15831_v40 = vcombine.low %v7146_v13, %v7145_v26  ;;  %v18251_v10 = vsel %vm18223_vm3, %v18201_v53, %v20412_v3  ;;  %v20417_v15 = vunpack.i.h.bf16 %v26693_v27  ;;  %v26717_v16 = vsel %vm18273_vm4, %v18250_v43, %v20421_v42  ;;  %v19500_v42 = vld [vmem:[%s28419_s0 + $0x1b2] sm:$0xff] }
 0x3a3   :  { %v20693_v8 = vpack.i.bf16 %v14866_v50, %v14849_v38  ;;  %v15828_v18 = vrot.slane %v15814_v46, %v21405_v31  ;;  %v15838_v6 = vrot.slane %v15830_v30, %v21405_v31  ;;  %v26721_v3 = vsel %vm18273_vm4, %v18251_v10, %v20422_v57 }
 0x3a4   :  { %v15845_v20 = vrot.slane %v15831_v40, %v21405_v31  ;;  %v20416_v36 = vunpack.i.l.bf16 %v26693_v27  ;;  %v764_v34 = vcombine.high %v63_v25, %v63_v25  ;;  %v781_v60 = vcombine.high %v64_v33, %v64_v33 }
 0x3a5   :  { %20694 = vrot.lane.b32.xlu0 %v20693_v8, %s21282_s18  ;;  %v15829_v53 = vcombine.low %v15821_v52, %v15828_v18  ;;  %v788_v19 = vrot.slane %v64_v33, %v21405_v31  ;;  %v797_v48 = vcombine.high %v65_v56, %v65_v56  ;;  %v804_v61 = vrot.slane %v65_v56, %v21405_v31  ;;  %v19501_v8 = vld [vmem:[%s28419_s0 + $0x1ba] sm:$0x3f] }
 0x3a6   :  { %v15846_v14 = vcombine.low %v15838_v6, %v15845_v20  ;;  %v26730_v11 = vrot.slane %v764_v34, %v21405_v31  ;;  %v8134_v4 = vcombine.high %v26260_v35, %v26260_v35  ;;  %v795_v22 = vrot.slane %v781_v60, %v21405_v31 }
 0x3a7   :  { %v796_v7 = vcombine.high %v788_v19, %v788_v19  ;;  %v811_v51 = vrot.slane %v797_v48, %v21405_v31  ;;  %v8150_v28 = vcombine.high %v19444_v32, %v19444_v32  ;;  %v812_v9 = vcombine.high %v804_v61, %v804_v61 }
 0x3a8   :  { %28483 = vst [vmem:[#allocation12_spill] sm:$0xff] %v26730_v11  ;;  %v20698_v37 = vpack.i.bf16 %v15846_v14, %v15829_v53  ;;  %v780_v45 = vcombine.high %v26730_v11, %v26730_v11  ;;  %v8148_v21 = vrot.slane %v8134_v4, %v21405_v31  ;;  %v26744_v35 = vrot.slane %v19444_v32, %v21405_v31 }
 0x3a9   :  { %v813_v63 = vcombine.high %v811_v51, %v811_v51  ;;  %v9930_v47 = vcombine.low %v796_v7, %v795_v22  ;;  %v26747_v12 = vrot.slane %v8150_v28, %v21405_v31  ;;  %v9946_v55 = vcombine.low %v804_v61, %v812_v9  ;;  %v20430_v61 = vpop.permute.xlu1 %20429 }
 0x3aa   :  { %20699 = vrot.lane.b32.xlu1 %v20698_v37, %s21281_s13  ;;  %v9929_v49 = vcombine.low %v780_v45, %v788_v19  ;;  %v8167_v57 = vcombine.high %v19445_v41, %v19445_v41  ;;  %v8174_v0 = vrot.slane %v19445_v41, %v21405_v31  ;;  %v26754_v26 = vcombine.high %v26744_v35, %v26744_v35  ;;  %v20425_v37 = vpop.permute.xlu0 %20424 }
 0x3ab   :  { %v9944_v5 = vrot.slane %v9930_v47, %v21405_v31  ;;  %v9947_v38 = vcombine.low %v811_v51, %v813_v63  ;;  %v26758_v13 = vcombine.high %v26747_v12, %v26747_v12  ;;  %v9954_v46 = vrot.slane %v9946_v55, %v21405_v31 }
 0x3ac   :  { %v9937_v50 = vrot.slane %v9929_v49, %v21405_v31  ;;  %v8181_v52 = vrot.slane %v8167_v57, %v21405_v31  ;;  %v8182_v30 = vcombine.high %v8174_v0, %v8174_v0  ;;  %v16793_v40 = vcombine.low %v8148_v21, %v26744_v35  ;;  %v1109_v21 = vld [vmem:[%s28419_s0 + $0x1a1] sm:$0xff]  ;;  %v1110_v57 = vld [vmem:[%s28419_s0 + $0x1a9] sm:$0x3f] }
 0x3ad   :  { %v9961_v25 = vrot.slane %v9947_v38, %v21405_v31  ;;  %v16794_v43 = vcombine.low %v26754_v26, %v26747_v12  ;;  %v16810_v10 = vcombine.low %v26758_v13, %v8174_v0  ;;  %v9170_v18 = vcombine.high %v26350_v2, %v26350_v2 }
 0x3ae   :  { %v9945_v33 = vcombine.low %v9937_v50, %v9944_v5  ;;  %v16811_v56 = vcombine.low %v8182_v30, %v8181_v52  ;;  %v9186_v6 = vcombine.high %v19500_v42, %v19500_v42  ;;  %v16801_v34 = vrot.slane %v16793_v40, %v21405_v31 }
 0x3af   :  { %v9962_v20 = vcombine.low %v9954_v46, %v9961_v25  ;;  %v26778_v32 = vrot.slane %v16794_v43, %v21405_v31  ;;  %v16818_v53 = vrot.slane %v16810_v10, %v21405_v31  ;;  %v9184_v48 = vrot.slane %v9170_v18, %v21405_v31  ;;  %v2146_v25 = vld [vmem:[%s28419_s0 + $0x1aa] sm:$0x3f] }
 0x3b0   :  { %v18108_v60 = vsel %vm18073_vm0, %v9945_v33, %v20416_v36  ;;  %v16825_v19 = vrot.slane %v16811_v56, %v21405_v31  ;;  %v26785_v14 = vrot.slane %v19500_v42, %v21405_v31  ;;  %v26792_v22 = vrot.slane %v9186_v6, %v21405_v31 }
 0x3b1   :  { %v18109_v2 = vsel %vm18073_vm0, %v9962_v20, %v20417_v15  ;;  %v16809_v4 = vcombine.low %v16801_v34, %v26778_v32  ;;  %v9203_v7 = vcombine.high %v19501_v8, %v19501_v8  ;;  %v9210_v41 = vrot.slane %v19501_v8, %v21405_v31 }
 0x3b2   :  { %v16826_v51 = vcombine.low %v16818_v53, %v16825_v19  ;;  %v26796_v36 = vcombine.high %v26785_v14, %v26785_v14  ;;  %v17773_v28 = vcombine.low %v9184_v48, %v26785_v14  ;;  %v26802_v27 = vcombine.high %v26792_v22, %v26792_v22  ;;  %v20440_v53 = vpop.permute.xlu1 %20439  ;;  %v26835_v19 = vpop.f32.mrb[8].mxu0 }
 0x3b3   :  { %v9217_v15 = vrot.slane %v9203_v7, %v21405_v31  ;;  %v20432_v45 = vunpack.i.h.bf16 %v20430_v61  ;;  %v20431_v9 = vunpack.i.l.bf16 %v20430_v61  ;;  %v9218_v47 = vcombine.high %v9210_v41, %v9210_v41  ;;  %v19645_v7 = vpop.f32.mrb[9].mxu0 }
 0x3b4   :  { %v20703_v63 = vpack.i.bf16 %v16826_v51, %v16809_v4  ;;  %v17774_v49 = vcombine.low %v26796_v36, %v26792_v22  ;;  %v17781_v55 = vrot.slane %v17773_v28, %v21405_v31  ;;  %v17790_v0 = vcombine.low %v26802_v27, %v9210_v41 }
 0x3b5   :  { %v18350_v5 = vsel %vm18323_vm5, %v26717_v16, %v20431_v9  ;;  %v18351_v38 = vsel %vm18323_vm5, %v26721_v3, %v20432_v45  ;;  %v20427_v42 = vunpack.i.h.bf16 %v20425_v37  ;;  %v17791_v46 = vcombine.low %v9218_v47, %v9217_v15 }
 0x3b6   :  { %20704 = vrot.lane.b32.xlu0 %v20703_v63, %s21284_s24  ;;  %v26821_v50 = vrot.slane %v17774_v49, %v21405_v31  ;;  %v20426_v52 = vunpack.i.l.bf16 %v20425_v37  ;;  %v1965_v30 = vcombine.high %v1109_v21, %v1109_v21  ;;  %v17798_v40 = vrot.slane %v17790_v0, %v21405_v31 }
 0x3b7   :  { %v18159_v16 = vsel %vm18123_vm1, %v18109_v2, %v20427_v42  ;;  %v1972_v43 = vrot.slane %v1109_v21, %v21405_v31  ;;  %v1982_v3 = vcombine.high %v1110_v57, %v1110_v57  ;;  %v17805_v33 = vrot.slane %v17791_v46, %v21405_v31  ;;  %v20435_v21 = vpop.permute.xlu0 %20434 }
 0x3b8   :  { %v17789_v10 = vcombine.low %v17781_v55, %v26821_v50  ;;  %v18158_v56 = vsel %vm18123_vm1, %v18108_v60, %v20426_v52  ;;  %v1979_v8 = vrot.slane %v1965_v30, %v21405_v31  ;;  %v1989_v6 = vrot.slane %v1110_v57, %v21405_v31 }
 0x3b9   :  { %v1980_v18 = vcombine.high %v1972_v43, %v1972_v43  ;;  %v1996_v20 = vrot.slane %v1982_v3, %v21405_v31  ;;  %v3018_v34 = vcombine.high %v2146_v25, %v2146_v25  ;;  %v17806_v48 = vcombine.low %v17798_v40, %v17805_v33  ;;  %v26856_v40 = vld [vmem:[%s28419_s0 + $0x1c0] sm:$0xff] }
 0x3ba   :  { %v1981_v61 = vcombine.high %v1979_v8, %v1979_v8  ;;  %v3025_v2 = vrot.slane %v2146_v25, %v21405_v31  ;;  %v11943_v4 = vcombine.low %v26389_v17, %v26405_v29  ;;  %v1997_v60 = vcombine.high %v1989_v6, %v1989_v6  ;;  %v19223_v17 = vld [vmem:[%s28419_s0 + $0x1b8] sm:$0x3f] }
 0x3bb   :  { %v10947_v51 = vcombine.low %v1972_v43, %v1980_v18  ;;  %v10965_v41 = vcombine.low %v1996_v20, %v26744_v35  ;;  %v3032_v28 = vrot.slane %v3018_v34, %v21405_v31  ;;  %v20708_v37 = vpack.i.bf16 %v17806_v48, %v17789_v10  ;;  %v26866_v34 = vpop.f32.mrb[10].mxu0 }
 0x3bc   :  { %v10948_v15 = vcombine.low %v1979_v8, %v1981_v61  ;;  %v3033_v45 = vcombine.high %v3025_v2, %v3025_v2  ;;  %v20442_v9 = vunpack.i.h.bf16 %v20440_v53  ;;  %v10964_v47 = vcombine.low %v1989_v6, %v1997_v60 }
 0x3bd   :  { %v10955_v63 = vrot.slane %v10947_v51, %v21405_v31  ;;  %v10979_v49 = vrot.slane %v10965_v41, %v21405_v31  ;;  %v11945_v55 = vcombine.low %v3032_v28, %v26785_v14  ;;  %20709 = vrot.lane.b32.xlu1 %v20708_v37, %s21283_s21  ;;  %v20441_v0 = vunpack.i.l.bf16 %v20440_v53 }
 0x3be   :  { %v10962_v29 = vrot.slane %v10948_v15, %v21405_v31  ;;  %v11944_v57 = vcombine.low %v3025_v2, %v3033_v45  ;;  %v18401_v42 = vsel %vm18373_vm6, %v18351_v38, %v20442_v9  ;;  %v10972_v46 = vrot.slane %v10964_v47, %v21405_v31  ;;  %v19279_v38 = vld [vmem:[%s28419_s0 + $0x1b9] sm:$0x3f]  ;;  %v20445_v47 = vpop.permute.xlu0 %20444 }
 0x3bf   :  { %v11959_v52 = vrot.slane %v11945_v55, %v21405_v31  ;;  %v20437_v30 = vunpack.i.h.bf16 %v20435_v21  ;;  %v20436_v25 = vunpack.i.l.bf16 %v20435_v21  ;;  %v18400_v10 = vsel %vm18373_vm6, %v18350_v5, %v20441_v0 }
 0x3c0   :  { %v10963_v43 = vcombine.low %v10955_v63, %v10962_v29  ;;  %v11952_v3 = vrot.slane %v11944_v57, %v21405_v31  ;;  %v4055_v33 = vcombine.high %v19223_v17, %v19223_v17  ;;  %v10980_v8 = vcombine.low %v10972_v46, %v10979_v49 }
 0x3c1   :  { %v18208_v18 = vsel %vm18173_vm2, %v18158_v56, %v20436_v25  ;;  %v18209_v6 = vsel %vm18173_vm2, %v18159_v16, %v20437_v30  ;;  %v4062_v20 = vrot.slane %v19223_v17, %v21405_v31  ;;  %v26871_v5 = vrot.slane %v26856_v40, %v21405_v31  ;;  %v26878_v56 = vld [vmem:[%s28419_s0 + $0x1c1] sm:$0xff]  ;;  %v19646_v16 = vpop.f32.mrb[11].mxu0 }
 0x3c2   :  { %v11960_v53 = vcombine.low %v11952_v3, %v11959_v52  ;;  %v4069_v48 = vrot.slane %v4055_v33, %v21405_v31  ;;  %v12907_v61 = vcombine.low %v26675_v24, %v26686_v58  ;;  %v20713_v2 = vpack.i.bf16 %v10980_v8, %v10963_v43  ;;  %v20450_v24 = vpop.permute.xlu1 %20449  ;;  %v26910_v43 = vld [vmem:[%s28419_s0 + $0x1c2] sm:$0xff] }
 0x3c3   :  { %v4070_v7 = vcombine.high %v4062_v20, %v4062_v20  ;;  %v12908_v60 = vcombine.low %v26678_v1, %v26690_v54  ;;  %v5091_v51 = vcombine.high %v19279_v38, %v19279_v38  ;;  %v5098_v15 = vrot.slane %v19279_v38, %v21405_v31 }
 0x3c4   :  { %v20718_v41 = vpack.i.bf16 %v11960_v53, %v11943_v4  ;;  %v12915_v28 = vrot.slane %v12907_v61, %v21405_v31  ;;  %v12925_v37 = vcombine.low %v4069_v48, %v26871_v5  ;;  %20714 = vrot.lane.b32.xlu0 %v20713_v2, %s21278_s10  ;;  %v26890_v21 = vrot.slane %v26878_v56, %v21405_v31 }
 0x3c5   :  { %v12922_v58 = vrot.slane %v12908_v60, %v21405_v31  ;;  %v12924_v45 = vcombine.low %v4062_v20, %v4070_v7  ;;  %v5105_v9 = vrot.slane %v5091_v51, %v21405_v31  ;;  %v5106_v54 = vcombine.high %v5098_v15, %v5098_v15  ;;  %v26917_v20 = vld [vmem:[%s28421_s2] ss:$0 sm:$0xff] }
 0x3c6   :  { %20719 = vrot.lane.b32.xlu1 %v20718_v41, %s21280_s12  ;;  %v12939_v1 = vrot.slane %v12925_v37, %v21405_v31  ;;  %v13887_v4 = vcombine.low %v26744_v35, %v26754_v26  ;;  %v13888_v63 = vcombine.low %v26747_v12, %v26758_v13  ;;  %v20452_v29 = vunpack.i.h.bf16 %v20450_v24  ;;  %v19335_v35 = vld [vmem:[%s28419_s0 + $0x1ba] sm:$0x3f] }
 0x3c7   :  { %v12923_v49 = vcombine.low %v12915_v28, %v12922_v58  ;;  %v12932_v55 = vrot.slane %v12924_v45, %v21405_v31  ;;  %v13905_v17 = vcombine.low %v5105_v9, %v26890_v21  ;;  %v13904_v46 = vcombine.low %v5098_v15, %v5106_v54  ;;  %v26942_v15 = vld [vmem:[%s28419_s0 + $0x1d0] sm:$0xff]  ;;  %v20460_v54 = vpop.permute.xlu1 %20459 }
 0x3c8   :  { %v13895_v57 = vrot.slane %v13887_v4, %v21405_v31  ;;  %v13902_v0 = vrot.slane %v13888_v63, %v21405_v31  ;;  %v20451_v52 = vunpack.i.l.bf16 %v20450_v24  ;;  %v18451_v30 = vsel %vm18423_vm9, %v18401_v42, %v20452_v29  ;;  %v26962_v4 = vpop.permute.xlu0 %20454 }
 0x3c9   :  { %v12940_v26 = vcombine.low %v12932_v55, %v12939_v1  ;;  %v13919_v12 = vrot.slane %v13905_v17, %v21405_v31  ;;  %v20447_v25 = vunpack.i.h.bf16 %v20445_v47  ;;  %v13912_v33 = vrot.slane %v13904_v46, %v21405_v31  ;;  %v57_v46 = vld [vmem:[%s28419_s0 + $0x120] sm:$0xff] }
 0x3ca   :  { %v13903_v3 = vcombine.low %v13895_v57, %v13902_v0  ;;  %v18450_v38 = vsel %vm18423_vm9, %v18400_v10, %v20451_v52  ;;  %v20446_v8 = vunpack.i.l.bf16 %v20445_v47  ;;  %v6127_v61 = vcombine.high %v19335_v35, %v19335_v35 }
 0x3cb   :  { %v20723_v53 = vpack.i.bf16 %v12940_v26, %v12923_v49  ;;  %v18486_v48 = vpack.c.bf16 %v18451_v30, %v18450_v38  ;;  %v18259_v42 = vsel %vm18223_vm3, %v18209_v6, %v20447_v25  ;;  %v13920_v16 = vcombine.low %v13912_v33, %v13919_v12  ;;  %v58_v33 = vld [vmem:[%s28419_s0 + $0x128] sm:$0x3f] }
 0x3cc   :  { %v18258_v2 = vsel %vm18223_vm3, %v18208_v18, %v20446_v8  ;;  %v6134_v7 = vrot.slane %v19335_v35, %v21405_v31  ;;  %v26924_v60 = vrot.slane %v26910_v43, %v21405_v31  ;;  %v6141_v10 = vrot.slane %v6127_v61, %v21405_v31  ;;  %v19391_v18 = vld [vmem:[%s28419_s0 + $0x1c8] sm:$0x3f] }
 0x3cd   :  { %20724 = vrot.lane.b32.xlu0 %v20723_v53, %s21277_s9  ;;  %v14867_v51 = vcombine.low %v26785_v14, %v26796_v36  ;;  %v14868_v6 = vcombine.low %v26792_v22, %v26802_v27  ;;  %v26934_v41 = vadd.f32 %v26917_v20, %v26367_v44  ;;  %v20728_v28 = vpack.i.bf16 %v13920_v16, %v13903_v3 }
 0x3ce   :  { %v6142_v37 = vcombine.high %v6134_v7, %v6134_v7  ;;  %v7147_v14 = vcombine.high %v26856_v40, %v26856_v40  ;;  %v26948_v22 = vcombine.high %v26871_v5, %v26871_v5  ;;  %19688 = vmatmul.mubr.msk.bf16.gmra.mrb[52].mxu0 %vm18541_vm10, %v18486_v48  ;;  %v14885_v24 = vcombine.low %v6141_v10, %v26924_v60  ;;  %v26998_v48 = vld [vmem:[%s28419_s0 + $0x130] sm:$0xff] }
 0x3cf   :  { %v14875_v44 = vrot.slane %v14867_v51, %v21405_v31  ;;  %v14882_v36 = vrot.slane %v14868_v6, %v21405_v31  ;;  %v18853_v58 = vmax.f32 %v26934_v41, 0.0  ;;  %19691 = vmatprep.mubr.msk.bf16.mxu0 %vm21286_vm8, %v28454_v62  ;;  %20729 = vrot.lane.b32.xlu1 %v20728_v28, %s21279_s11  ;;  %v7164_v9 = vcombine.high %v19391_v18, %v19391_v18 }
 0x3d0   :  { %v14884_v40 = vcombine.low %v6134_v7, %v6142_v37  ;;  %v26959_v45 = vrot.slane %v7147_v14, %v21405_v31  ;;  %v7171_v1 = vrot.slane %v19391_v18, %v21405_v31  ;;  %v14899_v47 = vrot.slane %v14885_v24, %v21405_v31 }
 0x3d1   :  { %v14883_v63 = vcombine.low %v14875_v44, %v14882_v36  ;;  %v26967_v49 = vrot.slane %v26942_v15, %v21405_v31  ;;  %v15847_v55 = vcombine.low %v26871_v5, %v26948_v22  ;;  %v7178_v57 = vrot.slane %v7164_v9, %v21405_v31  ;;  %v19447_v9 = vld [vmem:[%s28419_s0 + $0x1c9] sm:$0x3f] }
 0x3d2   :  { %v14892_v17 = vrot.slane %v14884_v40, %v21405_v31  ;;  %v26974_v29 = vcombine.high %v26959_v45, %v26959_v45  ;;  %v7179_v0 = vcombine.high %v7171_v1, %v7171_v1  ;;  %v20462_v35 = vunpack.i.h.bf16 %v20460_v54 }
 0x3d3   :  { %v15855_v52 = vrot.slane %v15847_v55, %v21405_v31  ;;  %v20461_v26 = vunpack.i.l.bf16 %v20460_v54  ;;  %v20457_v12 = vunpack.i.h.bf16 %v26962_v4  ;;  %v15865_v3 = vcombine.low %v7178_v57, %v26967_v49 }
 0x3d4   :  { %v14900_v5 = vcombine.low %v14892_v17, %v14899_v47  ;;  %v15848_v30 = vcombine.low %v26959_v45, %v26974_v29  ;;  %v15864_v25 = vcombine.low %v7171_v1, %v7179_v0  ;;  %v26992_v8 = vsel %vm18273_vm4, %v18259_v42, %v20462_v35  ;;  %v27027_v0 = vld [vmem:[%s28419_s0 + $0x1d1] sm:$0xff] }
 0x3d5   :  { %v26989_v38 = vsel %vm18273_vm4, %v18258_v2, %v20461_v26  ;;  %v20456_v53 = vunpack.i.l.bf16 %v26962_v4  ;;  %v665_v61 = vcombine.high %v57_v46, %v57_v46  ;;  %v15879_v51 = vrot.slane %v15865_v3, %v21405_v31 }
 0x3d6   :  { %v20733_v16 = vpack.i.bf16 %v14900_v5, %v14883_v63  ;;  %v15862_v7 = vrot.slane %v15848_v30, %v21405_v31  ;;  %v15872_v10 = vrot.slane %v15864_v25, %v21405_v31  ;;  %v672_v2 = vrot.slane %v57_v46, %v21405_v31 }
 0x3d7   :  { %v679_v42 = vrot.slane %v665_v61, %v21405_v31  ;;  %v682_v6 = vcombine.high %v58_v33, %v58_v33  ;;  %v689_v41 = vrot.slane %v58_v33, %v21405_v31  ;;  %v27009_v37 = vrot.slane %v26998_v48, %v21405_v31 }
 0x3d8   :  { %20734 = vrot.lane.b32.xlu0 %v20733_v16, %s21282_s18  ;;  %v15863_v18 = vcombine.low %v15855_v52, %v15862_v7  ;;  %v15880_v28 = vcombine.low %v15872_v10, %v15879_v51  ;;  %v18659_v14 = vadd.f32 %v26917_v20, %v26400_v39  ;;  %v680_v44 = vcombine.high %v672_v2, %v672_v2  ;;  %v19503_v51 = vld [vmem:[%s28419_s0 + $0x1ca] sm:$0x3f] }
 0x3d9   :  { %v681_v36 = vcombine.high %v679_v42, %v679_v42  ;;  %v696_v24 = vrot.slane %v682_v6, %v21405_v31  ;;  %v697_v40 = vcombine.high %v689_v41, %v689_v41  ;;  %v8183_v63 = vcombine.high %v26878_v56, %v26878_v56 }
 0x3da   :  { %v20738_v1 = vpack.i.bf16 %v15880_v28, %v15863_v18  ;;  %v18854_v54 = vmax.f32 %v18659_v14, 0.0  ;;  %v27021_v47 = vcombine.high %v26890_v21, %v26890_v21  ;;  %v9827_v55 = vcombine.low %v672_v2, %v680_v44  ;;  %v27062_v18 = vld [vmem:[%s28419_s0 + $0x1d2] sm:$0xff] }
 0x3db   :  { %v9828_v39 = vcombine.low %v679_v42, %v681_v36  ;;  %v9844_v17 = vcombine.low %v689_v41, %v697_v40  ;;  %v9845_v57 = vcombine.low %v696_v24, %v27009_v37  ;;  %v27033_v56 = vrot.slane %v8183_v63, %v21405_v31  ;;  %v20470_v36 = vpop.permute.xlu1 %20469  ;;  %v20465_v63 = vpop.permute.xlu0 %20464 }
 0x3dc   :  { %20739 = vrot.lane.b32.xlu1 %v20738_v1, %s21281_s13  ;;  %v27030_v46 = vpack.c.bf16 %v18854_v54, %v18853_v58  ;;  %v8200_v52 = vcombine.high %v19447_v9, %v19447_v9  ;;  %v8207_v35 = vrot.slane %v19447_v9, %v21405_v31  ;;  %v9835_v26 = vrot.slane %v9827_v55, %v21405_v31  ;;  %v27094_v55 = vpop.f32.mrb[12].mxu0 }
 0x3dd   :  { %v9842_v5 = vrot.slane %v9828_v39, %v21405_v31  ;;  %v9852_v30 = vrot.slane %v9844_v17, %v21405_v31  ;;  %v9859_v25 = vrot.slane %v9845_v57, %v21405_v31  ;;  %v27042_v3 = vcombine.high %v27033_v56, %v27033_v56 }
 0x3de   :  { %28484 = vst [vmem:[#allocation6_spill] sm:$0xff] %v27030_v46  ;;  %v8214_v58 = vrot.slane %v8200_v52, %v21405_v31  ;;  %v8215_v33 = vcombine.high %v8207_v35, %v8207_v35  ;;  %v27047_v61 = vrot.slane %v27027_v0, %v21405_v31  ;;  %v16827_v10 = vcombine.low %v26890_v21, %v27021_v47 }
 0x3df   :  { %v9843_v16 = vcombine.low %v9835_v26, %v9842_v5  ;;  %v9860_v7 = vcombine.low %v9852_v30, %v9859_v25  ;;  %v9219_v2 = vcombine.high %v26910_v43, %v26910_v43  ;;  %v16828_v42 = vcombine.low %v27033_v56, %v27042_v3 }
 0x3e0   :  { %v16844_v6 = vcombine.low %v8207_v35, %v8215_v33  ;;  %v16845_v41 = vcombine.low %v8214_v58, %v27047_v61  ;;  %v27066_v21 = vcombine.high %v26924_v60, %v26924_v60  ;;  %v27073_v14 = vrot.slane %v16827_v10, %v21405_v31  ;;  %v19649_v35 = vpop.f32.mrb[13].mxu0 }
 0x3e1   :  { %v18102_v28 = vsel %vm18073_vm0, %v9843_v16, %v20456_v53  ;;  %v18103_v43 = vsel %vm18073_vm0, %v9860_v7, %v20457_v12  ;;  %v27076_v44 = vrot.slane %v9219_v2, %v21405_v31  ;;  %v27079_v24 = vrot.slane %v16828_v42, %v21405_v31 }
 0x3e2   :  { %v16852_v40 = vrot.slane %v16844_v6, %v21405_v31  ;;  %v16859_v9 = vrot.slane %v16845_v41, %v21405_v31  ;;  %v9236_v1 = vcombine.high %v19503_v51, %v19503_v51  ;;  %v9243_v12 = vrot.slane %v19503_v51, %v21405_v31  ;;  %v2148_v6 = vld [vmem:[%s28419_s0 + $0x1ba] sm:$0x3f] }
 0x3e3   :  { %v27085_v4 = vcombine.high %v27076_v44, %v27076_v44  ;;  %v27090_v53 = vrot.slane %v27062_v18, %v21405_v31  ;;  %v17807_v54 = vcombine.low %v26924_v60, %v27066_v21  ;;  %v16843_v39 = vcombine.low %v27073_v14, %v27079_v24  ;;  %v1112_v60 = vld [vmem:[%s28419_s0 + $0x1b9] sm:$0x3f] }
 0x3e4   :  { %v16860_v17 = vcombine.low %v16852_v40, %v16859_v9  ;;  %v9250_v57 = vrot.slane %v9236_v1, %v21405_v31  ;;  %v20472_v52 = vunpack.i.h.bf16 %v20470_v36  ;;  %v9251_v26 = vcombine.high %v9243_v12, %v9243_v12 }
 0x3e5   :  { %v17808_v5 = vcombine.low %v27076_v44, %v27085_v4  ;;  %v17815_v30 = vrot.slane %v17807_v54, %v21405_v31  ;;  %v20471_v25 = vunpack.i.l.bf16 %v20470_v36  ;;  %v20467_v7 = vunpack.i.h.bf16 %v20465_v63  ;;  %v27123_v54 = vpop.f32.mrb[14].mxu0 }
 0x3e6   :  { %v20743_v58 = vpack.i.bf16 %v16860_v17, %v16843_v39  ;;  %v17825_v33 = vcombine.low %v9250_v57, %v27090_v53  ;;  %v18359_v16 = vsel %vm18323_vm5, %v26992_v8, %v20472_v52  ;;  %v17824_v51 = vcombine.low %v9243_v12, %v9251_v26  ;;  %v20480_v12 = vpop.permute.xlu1 %20479  ;;  %28485 = vst [vmem:[#allocation13_spill] sm:$0xff] %v27123_v54  ;;  %v19650_v52 = vpop.f32.mrb[15].mxu0 }
 0x3e7   :  { %v27109_v10 = vrot.slane %v17808_v5, %v21405_v31  ;;  %v18358_v2 = vsel %vm18323_vm5, %v26989_v38, %v20471_v25  ;;  %v20466_v42 = vunpack.i.l.bf16 %v20465_v63  ;;  %v18153_v36 = vsel %vm18123_vm1, %v18103_v43, %v20467_v7  ;;  %v20475_v26 = vpop.permute.xlu0 %20474 }
 0x3e8   :  { %20744 = vrot.lane.b32.xlu0 %v20743_v58, %s21284_s24  ;;  %v17839_v41 = vrot.slane %v17825_v33, %v21405_v31  ;;  %v2015_v8 = vcombine.high %v1112_v60, %v1112_v60  ;;  %v2022_v40 = vrot.slane %v1112_v60, %v21405_v31  ;;  %v17832_v1 = vrot.slane %v17824_v51, %v21405_v31 }
 0x3e9   :  { %v17823_v9 = vcombine.low %v17815_v30, %v27109_v10  ;;  %v18152_v38 = vsel %vm18123_vm1, %v18102_v28, %v20466_v42  ;;  %v3051_v57 = vcombine.high %v2148_v6, %v2148_v6  ;;  %v3058_v35 = vrot.slane %v2148_v6, %v21405_v31 }
 0x3ea   :  { %v2029_v63 = vrot.slane %v2015_v8, %v21405_v31  ;;  %v2030_v39 = vcombine.high %v2022_v40, %v2022_v40  ;;  %v10982_v17 = vcombine.low %v26758_v13, %v2022_v40  ;;  %v17840_v43 = vcombine.low %v17832_v1, %v17839_v41 }
 0x3eb   :  { %v3065_v60 = vrot.slane %v3051_v57, %v21405_v31  ;;  %v20482_v28 = vunpack.i.h.bf16 %v20480_v12  ;;  %v3066_v33 = vcombine.high %v3058_v35, %v3058_v35  ;;  %v11962_v7 = vcombine.low %v26802_v27, %v3058_v35  ;;  %v20490_v35 = vpop.permute.xlu1 %20489 }
 0x3ec   :  { %v10996_v5 = vrot.slane %v10982_v17, %v21405_v31  ;;  %v10998_v25 = vcombine.low %v2030_v39, %v2029_v63  ;;  %v20748_v58 = vpack.i.bf16 %v17840_v43, %v17823_v9  ;;  %v20481_v42 = vunpack.i.l.bf16 %v20480_v12  ;;  %v19225_v9 = vld [vmem:[%s28419_s0 + $0x1c8] sm:$0x3f]  ;;  %v20485_v17 = vpop.permute.xlu0 %20484 }
 0x3ed   :  { %v11976_v6 = vrot.slane %v11962_v7, %v21405_v31  ;;  %v11978_v41 = vcombine.low %v3066_v33, %v3065_v60  ;;  %v18409_v8 = vsel %vm18373_vm6, %v18359_v16, %v20482_v28  ;;  %v20477_v40 = vunpack.i.h.bf16 %v20475_v26  ;;  %v19281_v16 = vld [vmem:[%s28419_s0 + $0x1c9] sm:$0x3f] }
 0x3ee   :  { %v10997_v51 = vcombine.low %v26778_v32, %v10996_v5  ;;  %v11006_v13 = vrot.slane %v10998_v25, %v21405_v31  ;;  %20749 = vrot.lane.b32.xlu1 %v20748_v58, %s21283_s21  ;;  %v18408_v27 = vsel %vm18373_vm6, %v18358_v2, %v20481_v42  ;;  %v20476_v32 = vunpack.i.l.bf16 %v20475_v26  ;;  %v27149_v2 = vpop.f32.mrb[16].mxu0 }
 0x3ef   :  { %v11977_v63 = vcombine.low %v26821_v50, %v11976_v6  ;;  %v11986_v12 = vrot.slane %v11978_v41, %v21405_v31  ;;  %v18203_v39 = vsel %vm18173_vm2, %v18153_v36, %v20477_v40  ;;  %v4088_v43 = vcombine.high %v19225_v9, %v19225_v9  ;;  %28486 = vst [vmem:[#allocation14_spill] sm:$0xff] %v27149_v2  ;;  %v19653_v5 = vpop.f32.mrb[17].mxu0 }
 0x3f0   :  { %v11014_v1 = vcombine.low %v11006_v13, %v27073_v14  ;;  %v18202_v52 = vsel %vm18173_vm2, %v18152_v38, %v20476_v32  ;;  %v4095_v14 = vrot.slane %v19225_v9, %v21405_v31  ;;  %v27153_v50 = vcombine.high %v26967_v49, %v26967_v49  ;;  %v27175_v41 = vpop.permute.xlu0 %20494 }
 0x3f1   :  { %v11994_v26 = vcombine.low %v11986_v12, %v17815_v30  ;;  %v12941_v36 = vcombine.low %v26948_v22, %v26959_v45  ;;  %v4102_v25 = vrot.slane %v4088_v43, %v21405_v31  ;;  %v5124_v28 = vcombine.high %v19281_v16, %v19281_v16 }
 0x3f2   :  { %v20753_v57 = vpack.i.bf16 %v11014_v1, %v10997_v51  ;;  %v4103_v38 = vcombine.high %v4095_v14, %v4095_v14  ;;  %v12942_v60 = vcombine.low %v26974_v29, %v4095_v14  ;;  %v12959_v30 = vcombine.low %v26967_v49, %v27153_v50 }
 0x3f3   :  { %v20758_v58 = vpack.i.bf16 %v11994_v26, %v11977_v63  ;;  %v12949_v33 = vrot.slane %v12941_v36, %v21405_v31  ;;  %v5131_v7 = vrot.slane %v19281_v16, %v21405_v31  ;;  %v5138_v45 = vrot.slane %v5124_v28, %v21405_v31  ;;  %v27180_v63 = vpop.permute.xlu1 %20499  ;;  %v19337_v26 = vld [vmem:[%s28419_s0 + $0x1ca] sm:$0x3f] }
 0x3f4   :  { %20754 = vrot.lane.b32.xlu0 %v20753_v57, %s21278_s10  ;;  %v12956_v51 = vrot.slane %v12942_v60, %v21405_v31  ;;  %v12958_v22 = vcombine.low %v4103_v38, %v4102_v25  ;;  %v27168_v13 = vcombine.high %v27047_v61, %v27047_v61  ;;  %v12973_v29 = vrot.slane %v12959_v30, %v21405_v31 }
 0x3f5   :  { %20759 = vrot.lane.b32.xlu1 %v20758_v58, %s21280_s12  ;;  %v5139_v42 = vcombine.high %v5131_v7, %v5131_v7  ;;  %v13921_v6 = vcombine.low %v27021_v47, %v27033_v56  ;;  %v13922_v49 = vcombine.low %v27042_v3, %v5131_v7  ;;  %v20492_v32 = vunpack.i.h.bf16 %v20490_v35  ;;  %v27194_v7 = vpop.permute.xlu0 %20504 }
 0x3f6   :  { %v12957_v40 = vcombine.low %v12949_v33, %v12956_v51  ;;  %v12966_v9 = vrot.slane %v12958_v22, %v21405_v31  ;;  %v13939_v1 = vcombine.low %v27047_v61, %v27168_v13  ;;  %v20491_v43 = vunpack.i.l.bf16 %v20490_v35 }
 0x3f7   :  { %v13929_v12 = vrot.slane %v13921_v6, %v21405_v31  ;;  %v13936_v16 = vrot.slane %v13922_v49, %v21405_v31  ;;  %v13938_v57 = vcombine.low %v5139_v42, %v5138_v45  ;;  %v18459_v3 = vsel %vm18423_vm9, %v18409_v8, %v20492_v32  ;;  %v27212_v22 = vpop.permute.xlu1 %20509  ;;  %v27214_v45 = vpop.f32.mrb[18].mxu0 }
 0x3f8   :  { %v12974_v47 = vcombine.low %v12966_v9, %v12973_v29  ;;  %v13953_v56 = vrot.slane %v13939_v1, %v21405_v31  ;;  %v20487_v14 = vunpack.i.h.bf16 %v20485_v17  ;;  %v18458_v25 = vsel %vm18423_vm9, %v18408_v27, %v20491_v43  ;;  %28487 = vst [vmem:[#allocation8_spill] sm:$0xff] %v27214_v45 }
 0x3f9   :  { %v13937_v36 = vcombine.low %v13929_v12, %v13936_v16  ;;  %v13946_v5 = vrot.slane %v13938_v57, %v21405_v31  ;;  %v20486_v38 = vunpack.i.l.bf16 %v20485_v17  ;;  %v18490_v28 = vpack.c.bf16 %v18459_v3, %v18458_v25  ;;  %v19393_v17 = vld [vmem:[%s28419_s0 + $0x1d8] sm:$0x3f] }
 0x3fa   :  { %v20763_v60 = vpack.i.bf16 %v12974_v47, %v12957_v40  ;;  %v18253_v35 = vsel %vm18223_vm3, %v18203_v39, %v20487_v14  ;;  %v6160_v30 = vcombine.high %v19337_v26, %v19337_v26  ;;  %v6167_v8 = vrot.slane %v19337_v26, %v21405_v31 }
 0x3fb   :  { %v13954_v58 = vcombine.low %v13946_v5, %v13953_v56  ;;  %v18252_v33 = vsel %vm18223_vm3, %v18202_v52, %v20486_v38  ;;  %v27199_v51 = vcombine.high %v27090_v53, %v27090_v53  ;;  %v14901_v27 = vcombine.low %v27066_v21, %v27076_v44  ;;  %19704 = vmatmul.mubr.msk.bf16.vlgmr.msra.gmra.mrb[0].mxu1 %vm18541_vm10, %v18490_v28  ;;  %v19654_v44 = vpop.f32.mrb[19].mxu0 }
 0x3fc   :  { %20764 = vrot.lane.b32.xlu0 %v20763_v60, %s21277_s9  ;;  %v27205_v39 = vadd.f32 %v26917_v20, %v26589_v59  ;;  %v7180_v52 = vcombine.high %v26942_v15, %v26942_v15  ;;  %v6174_v42 = vrot.slane %v6160_v30, %v21405_v31  ;;  %v6175_v6 = vcombine.high %v6167_v8, %v6167_v8  ;;  %v27221_v59 = vld [vmem:[%s28419_s0 + $0x1e0] sm:$0xff]  ;;  %v27245_v47 = vpop.f32.mrb[20].mxu0  ;;  %v27262_v30 = vpop.permute.xlu1 %20519  ;;  %v27279_v44 = vld [vmem:[%s28419_s0 + $0x178] sm:$0x3f] }
 0x3fd   :  { %v20768_v29 = vpack.i.bf16 %v13954_v58, %v13937_v36  ;;  %v14902_v21 = vcombine.low %v27085_v4, %v6167_v8  ;;  %v14909_v15 = vrot.slane %v14901_v27, %v21405_v31  ;;  %v14919_v49 = vcombine.low %v27090_v53, %v27199_v51  ;;  %19707 = vmatprep.mubr.msk.bf16.mxu1 %vm21286_vm8, %v28454_v62  ;;  %v27251_v36 = vpop.permute.xlu0 %20514  ;;  %v19657_v5 = vpop.f32.mrb[21].mxu0  ;;  %v66_v58 = vld [vmem:[%s28419_s0 + $0x168] sm:$0x3f] }
 0x3fe   :  { %v18855_v40 = vmax.f32 %v27205_v39, 0.0  ;;  %v27229_v9 = vrot.slane %v7180_v52, %v21405_v31  ;;  %v14918_v1 = vcombine.low %v6175_v6, %v6174_v42  ;;  %v7197_v32 = vcombine.high %v19393_v17, %v19393_v17  ;;  %28488 = vst [vmem:[#allocation15_spill] sm:$0xff] %v27245_v47  ;;  %28489 = vst [vmem:[#allocation16_spill] sm:$0xff] %v27279_v44 }
 0x3ff   :  { %20769 = vrot.lane.b32.xlu1 %v20768_v29, %s21279_s11  ;;  %v14916_v4 = vrot.slane %v14902_v21, %v21405_v31  ;;  %v14933_v12 = vrot.slane %v14919_v49, %v21405_v31  ;;  %v7204_v57 = vrot.slane %v19393_v17, %v21405_v31  ;;  %v27243_v43 = vrot.slane %v27221_v59, %v21405_v31  ;;  %v67_v21 = vld [vmem:[%s28419_s0 + $0x170] sm:$0xff] }
 0x400   :  { %v27238_v16 = vcombine.high %v27229_v9, %v27229_v9  ;;  %v14926_v3 = vrot.slane %v14918_v1, %v21405_v31  ;;  %v7211_v14 = vrot.slane %v7197_v32, %v21405_v31  ;;  %v15881_v26 = vcombine.low %v27153_v50, %v27229_v9 }
 0x401   :  { %v14917_v56 = vcombine.low %v14909_v15, %v14916_v4  ;;  %v7212_v25 = vcombine.high %v7204_v57, %v7204_v57  ;;  %v27255_v38 = vcombine.high %v27243_v43, %v27243_v43  ;;  %v20502_v28 = vunpack.i.h.bf16 %v27180_v63 }
 0x402   :  { %v15882_v60 = vcombine.low %v27238_v16, %v7204_v57  ;;  %v14934_v8 = vcombine.low %v14926_v3, %v14933_v12  ;;  %v15889_v50 = vrot.slane %v15881_v26, %v21405_v31  ;;  %v20501_v27 = vunpack.i.l.bf16 %v27180_v63 }
 0x403   :  { %v15898_v29 = vcombine.low %v7212_v25, %v7211_v14  ;;  %v15899_v42 = vcombine.low %v27243_v43, %v27255_v38  ;;  %v27271_v6 = vsel %vm18273_vm4, %v18253_v35, %v20502_v28  ;;  %v20496_v49 = vunpack.i.l.bf16 %v27175_v41  ;;  %v27295_v14 = vpop.permute.xlu0 %20524 }
 0x404   :  { %v15896_v52 = vrot.slane %v15882_v60, %v21405_v31  ;;  %v20773_v63 = vpack.i.bf16 %v14934_v8, %v14917_v56  ;;  %v27282_v15 = vsel %vm18273_vm4, %v18252_v33, %v20501_v27  ;;  %v814_v4 = vcombine.high %v66_v58, %v66_v58  ;;  %v19449_v60 = vld [vmem:[%s28419_s0 + $0x1d9] sm:$0x3f] }
 0x405   :  { %v15906_v35 = vrot.slane %v15898_v29, %v21405_v31  ;;  %v15913_v32 = vrot.slane %v15899_v42, %v21405_v31  ;;  %v821_v12 = vrot.slane %v66_v58, %v21405_v31  ;;  %v830_v3 = vcombine.high %v67_v21, %v67_v21  ;;  %v27304_v58 = vpop.permute.xlu1 %20529 }
 0x406   :  { %v15897_v1 = vcombine.low %v15889_v50, %v15896_v52  ;;  %20774 = vrot.lane.b32.xlu0 %v20773_v63, %s21282_s18  ;;  %v828_v57 = vrot.slane %v814_v4, %v21405_v31  ;;  %v837_v56 = vrot.slane %v67_v21, %v21405_v31  ;;  %v27293_v33 = vrot.slane %v27279_v44, %v21405_v31 }
 0x407   :  { %v15914_v26 = vcombine.low %v15906_v35, %v15913_v32  ;;  %v829_v5 = vcombine.high %v821_v12, %v821_v12  ;;  %v18667_v25 = vadd.f32 %v26917_v20, %v26618_v23  ;;  %v8216_v28 = vcombine.high %v27027_v0, %v27027_v0  ;;  %v27310_v23 = vld [vmem:[%s28419_s0 + $0x1e1] sm:$0xff]  ;;  %v27336_v39 = vpop.permute.xlu0 %20534 }
 0x408   :  { %28490 = vst [vmem:[#allocation5_spill] sm:$0xff] %v27293_v33  ;;  %v844_v8 = vrot.slane %v830_v3, %v21405_v31  ;;  %v845_v50 = vcombine.high %v837_v56, %v837_v56  ;;  %v9964_v27 = vcombine.low %v828_v57, %v837_v56  ;;  %v8233_v35 = vcombine.high %v19449_v60, %v19449_v60  ;;  %v27327_v3 = vpop.f32.mrb[22].mxu0 }
 0x409   :  { %v20778_v52 = vpack.i.bf16 %v15914_v26, %v15897_v1  ;;  %v9963_v29 = vcombine.low %v821_v12, %v829_v5  ;;  %v18856_v42 = vmax.f32 %v18667_v25, 0.0  ;;  %v27313_v21 = vrot.slane %v8216_v28, %v21405_v31  ;;  %28492 = vst [vmem:[#allocation9_spill] sm:$0xff] %v27327_v3 }
 0x40a   :  { %v846_v63 = vcombine.high %v844_v8, %v844_v8  ;;  %v9978_v0 = vrot.slane %v9964_v27, %v21405_v31  ;;  %v9980_v4 = vcombine.low %v845_v50, %v844_v8  ;;  %v8240_v57 = vrot.slane %v19449_v60, %v21405_v31  ;;  %v19505_v27 = vld [vmem:[%s28419_s0 + $0x1da] sm:$0x3f] }
 0x40b   :  { %20779 = vrot.lane.b32.xlu1 %v20778_v52, %s21281_s13  ;;  %v9971_v32 = vrot.slane %v9963_v29, %v21405_v31  ;;  %v27320_v1 = vpack.c.bf16 %v18856_v42, %v18855_v40  ;;  %v27324_v12 = vcombine.high %v27313_v21, %v27313_v21  ;;  %v8247_v5 = vrot.slane %v8233_v35, %v21405_v31  ;;  %v19658_v40 = vpop.f32.mrb[23].mxu0  ;;  %v27344_v52 = vpop.permute.xlu1 %20539 }
 0x40c   :  { %v9981_v56 = vcombine.low %v846_v63, %v27293_v33  ;;  %v9988_v26 = vrot.slane %v9980_v4, %v21405_v31  ;;  %v27334_v25 = vrot.slane %v27310_v23, %v21405_v31  ;;  %v8248_v8 = vcombine.high %v8240_v57, %v8240_v57  ;;  %v27346_v29 = vpop.f32.mrb[24].mxu0 }
 0x40d   :  { %28491 = vst [vmem:[#allocation7_spill] sm:$0xff] %v27320_v1  ;;  %v9979_v28 = vcombine.low %v9971_v32, %v9978_v0  ;;  %v16861_v60 = vcombine.low %v27168_v13, %v27313_v21  ;;  %v16862_v50 = vcombine.low %v27324_v12, %v8240_v57  ;;  %28493 = vst [vmem:[#allocation10_spill] sm:$0xff] %v27346_v29  ;;  %v27356_v13 = vld [vmem:[%s28419_s0 + $0x1e2] sm:$0xff] }
 0x40e   :  { %v9995_v42 = vrot.slane %v9981_v56, %v21405_v31  ;;  %v27351_v63 = vcombine.high %v27334_v25, %v27334_v25  ;;  %v9252_v0 = vcombine.high %v27062_v18, %v27062_v18  ;;  %v16878_v57 = vcombine.low %v8248_v8, %v8247_v5  ;;  %v19661_v56 = vpop.f32.mrb[25].mxu0 }
 0x40f   :  { %v18110_v4 = vsel %vm18073_vm0, %v9979_v28, %v20496_v49  ;;  %v27362_v35 = vrot.slane %v16861_v60, %v21405_v31  ;;  %v16876_v32 = vrot.slane %v16862_v50, %v21405_v31  ;;  %v9269_v46 = vcombine.high %v19505_v27, %v19505_v27  ;;  %v27370_v29 = vpop.f32.mrb[26].mxu0 }
 0x410   :  { %v9996_v40 = vcombine.low %v9988_v26, %v9995_v42  ;;  %v16879_v17 = vcombine.low %v27334_v25, %v27351_v63  ;;  %v27368_v1 = vrot.slane %v9252_v0, %v21405_v31  ;;  %28494 = vst [vmem:[#allocation11_spill] sm:$0xff] %v27370_v29  ;;  %v16886_v49 = vrot.slane %v16878_v57, %v21405_v31  ;;  %v19662_v26 = vpop.f32.mrb[27].mxu0  ;;  %v1114_v29 = vld [vmem:[%s28419_s0 + $0x1c9] sm:$0x3f] }
 0x411   :  { %v16877_v18 = vcombine.low %v27362_v35, %v16876_v32  ;;  %v9276_v28 = vrot.slane %v19505_v27, %v21405_v31  ;;  %v27377_v5 = vrot.slane %v27356_v13, %v21405_v31  ;;  %v28495_v8 = vunpack.i.h.bf16 %v27175_v41  ;;  %v27388_v32 = vpop.permute.xlu0 %20544 }
 0x412   :  { %v16893_v50 = vrot.slane %v16879_v17, %v21405_v31  ;;  %v27385_v42 = vcombine.high %v27368_v1, %v27368_v1  ;;  %v9283_v0 = vrot.slane %v9269_v46, %v21405_v31  ;;  %v17841_v41 = vcombine.low %v27199_v51, %v27368_v1 }
 0x413   :  { %v18111_v60 = vsel %vm18073_vm0, %v9996_v40, %v28495_v8  ;;  %v9284_v27 = vcombine.high %v9276_v28, %v9276_v28  ;;  %v27392_v57 = vcombine.high %v27377_v5, %v27377_v5  ;;  %v20512_v56 = vunpack.i.h.bf16 %v27212_v22  ;;  %v27397_v40 = vpop.permute.xlu1 %20549 }
 0x414   :  { %v16894_v17 = vcombine.low %v16886_v49, %v16893_v50  ;;  %v17842_v26 = vcombine.low %v27385_v42, %v9276_v28  ;;  %v20511_v8 = vunpack.i.l.bf16 %v27212_v22  ;;  %v20507_v46 = vunpack.i.h.bf16 %v27194_v7  ;;  %v2150_v22 = vld [vmem:[%s28419_s0 + $0x1ca] sm:$0x3f] }
 0x415   :  { %v27406_v3 = vrot.slane %v17841_v41, %v21405_v31  ;;  %v17858_v47 = vcombine.low %v9284_v27, %v9283_v0  ;;  %v17859_v51 = vcombine.low %v27377_v5, %v27392_v57  ;;  %v18353_v49 = vsel %vm18323_vm5, %v27271_v6, %v20512_v56 }
 0x416   :  { %v20783_v28 = vpack.i.bf16 %v16894_v17, %v16877_v18  ;;  %v17856_v50 = vrot.slane %v17842_v26, %v21405_v31  ;;  %v18352_v11 = vsel %vm18323_vm5, %v27282_v15, %v20511_v8  ;;  %v20506_v41 = vunpack.i.l.bf16 %v27194_v7  ;;  %v27426_v26 = vpop.permute.xlu0 %20554 }
 0x417   :  { %v17866_v0 = vrot.slane %v17858_v47, %v21405_v31  ;;  %v17873_v27 = vrot.slane %v17859_v51, %v21405_v31  ;;  %v18161_v45 = vsel %vm18123_vm1, %v18111_v60, %v20507_v46  ;;  %v2048_v2 = vcombine.high %v1114_v29, %v1114_v29  ;;  %v27431_v60 = vpop.permute.xlu1 %20559 }
 0x418   :  { %20784 = vrot.lane.b32.xlu0 %v20783_v28, %s21284_s24  ;;  %v17857_v6 = vcombine.low %v27406_v3, %v17856_v50  ;;  %v18160_v18 = vsel %vm18123_vm1, %v18110_v4, %v20506_v41  ;;  %v2055_v56 = vrot.slane %v1114_v29, %v21405_v31  ;;  %v3084_v17 = vcombine.high %v2150_v22, %v2150_v22  ;;  %v19227_v29 = vld [vmem:[%s28419_s0 + $0x1d8] sm:$0x3f] }
 0x419   :  { %v17874_v15 = vcombine.low %v17866_v0, %v17873_v27  ;;  %v2062_v7 = vrot.slane %v2048_v2, %v21405_v31  ;;  %v3091_v47 = vrot.slane %v2150_v22, %v21405_v31  ;;  %v20522_v8 = vunpack.i.h.bf16 %v27262_v30 }
 0x41a   :  { %v2063_v46 = vcombine.high %v2055_v56, %v2055_v56  ;;  %v3098_v51 = vrot.slane %v3084_v17, %v21405_v31  ;;  %v20521_v28 = vunpack.i.l.bf16 %v27262_v30  ;;  %v20517_v4 = vunpack.i.h.bf16 %v27251_v36 }
 0x41b   :  { %v20788_v50 = vpack.i.bf16 %v17874_v15, %v17857_v6  ;;  %v11032_v2 = vcombine.low %v2062_v7, %v27047_v61  ;;  %v3099_v41 = vcombine.high %v3091_v47, %v3091_v47  ;;  %v18403_v22 = vsel %vm18373_vm6, %v18353_v49, %v20522_v8  ;;  %v27465_v8 = vpop.permute.xlu1 %20569 }
 0x41c   :  { %v11016_v0 = vcombine.low %v2055_v56, %v2063_v46  ;;  %v12012_v27 = vcombine.low %v3098_v51, %v27090_v53  ;;  %v18402_v54 = vsel %vm18373_vm6, %v18352_v11, %v20521_v28  ;;  %v20516_v17 = vunpack.i.l.bf16 %v27251_v36  ;;  %v19283_v53 = vld [vmem:[%s28419_s0 + $0x1d9] sm:$0x3f]  ;;  %v27458_v36 = vpop.permute.xlu0 %20564 }
 0x41d   :  { %20789 = vrot.lane.b32.xlu1 %v20788_v50, %s21283_s21  ;;  %v11040_v30 = vrot.slane %v11032_v2, %v21405_v31  ;;  %v11996_v33 = vcombine.low %v3091_v47, %v3099_v41  ;;  %v27447_v44 = vsel %vm18173_vm2, %v18161_v45, %v20517_v4  ;;  %v4121_v6 = vcombine.high %v19227_v29, %v19227_v29  ;;  %v27471_v4 = vpop.f32.mrb[28].mxu0 }
 0x41e   :  { %v11030_v61 = vrot.slane %v11016_v0, %v21405_v31  ;;  %v12020_v49 = vrot.slane %v12012_v27, %v21405_v31  ;;  %v27452_v56 = vsel %vm18173_vm2, %v18160_v18, %v20516_v17  ;;  %v4128_v11 = vrot.slane %v19227_v29, %v21405_v31  ;;  %v19665_v50 = vpop.f32.mrb[29].mxu0 }
 0x41f   :  { %v11048_v15 = vcombine.low %v11040_v30, %v27362_v35  ;;  %v12010_v45 = vrot.slane %v11996_v33, %v21405_v31  ;;  %v4135_v7 = vrot.slane %v4121_v6, %v21405_v31  ;;  %v4137_v47 = vcombine.high %v27221_v59, %v27221_v59  ;;  %v27480_v0 = vpop.f32.mrb[30].mxu0 }
 0x420   :  { %v11031_v18 = vcombine.low %v27079_v24, %v11030_v61  ;;  %v12028_v46 = vcombine.low %v12020_v49, %v27406_v3  ;;  %v4136_v51 = vcombine.high %v4128_v11, %v4128_v11  ;;  %v12975_v28 = vcombine.low %v27229_v9, %v27238_v16  ;;  %v19666_v17 = vpop.f32.mrb[31].mxu0  ;;  %v27492_v49 = vpop.permute.xlu0 %20574 }
 0x421   :  { %v12011_v35 = vcombine.low %v27109_v10, %v12010_v45  ;;  %v27475_v33 = vrot.slane %v4137_v47, %v21405_v31  ;;  %v12992_v29 = vcombine.low %v4135_v7, %v27243_v43  ;;  %v5157_v59 = vcombine.high %v19283_v53, %v19283_v53  ;;  %v27499_v45 = vpop.permute.xlu1 %20579  ;;  %v27536_v17 = vpop.f32.mrb[32].mxu0 }
 0x422   :  { %v20793_v2 = vpack.i.bf16 %v11048_v15, %v11031_v18  ;;  %v12976_v41 = vcombine.low %v4128_v11, %v4136_v51  ;;  %v12983_v24 = vrot.slane %v12975_v28, %v21405_v31  ;;  %v5164_v3 = vrot.slane %v19283_v53, %v21405_v31  ;;  %v19339_v18 = vld [vmem:[%s28419_s0 + $0x1da] sm:$0x3f] }
 0x423   :  { %v20798_v9 = vpack.i.bf16 %v12028_v46, %v12011_v35  ;;  %v12993_v16 = vcombine.low %v27255_v38, %v27475_v33  ;;  %v13000_v10 = vrot.slane %v12992_v29, %v21405_v31  ;;  %v5171_v27 = vrot.slane %v5157_v59, %v21405_v31 }
 0x424   :  { %20794 = vrot.lane.b32.xlu0 %v20793_v2, %s21278_s10  ;;  %v12990_v43 = vrot.slane %v12976_v41, %v21405_v31  ;;  %v5172_v30 = vcombine.high %v5164_v3, %v5164_v3  ;;  %v5173_v6 = vcombine.high %v27310_v23, %v27310_v23  ;;  %v13955_v61 = vcombine.low %v27313_v21, %v27324_v12 }
 0x425   :  { %20799 = vrot.lane.b32.xlu1 %v20798_v9, %s21280_s12  ;;  %v13007_v38 = vrot.slane %v12993_v16, %v21405_v31  ;;  %v13972_v11 = vcombine.low %v5171_v27, %v27334_v25  ;;  %v20532_v53 = vunpack.i.h.bf16 %v27304_v58  ;;  %v20531_v15 = vunpack.i.l.bf16 %v27304_v58  ;;  %v27526_v16 = vpop.permute.xlu0 %20584 }
 0x426   :  { %v12991_v7 = vcombine.low %v12983_v24, %v12990_v43  ;;  %v27502_v23 = vrot.slane %v5173_v6, %v21405_v31  ;;  %v13956_v47 = vcombine.low %v5164_v3, %v5172_v30  ;;  %v13963_v21 = vrot.slane %v13955_v61, %v21405_v31 }
 0x427   :  { %v13008_v46 = vcombine.low %v13000_v10, %v13007_v38  ;;  %v13980_v25 = vrot.slane %v13972_v11, %v21405_v31  ;;  %v18452_v51 = vsel %vm18423_vm9, %v18402_v54, %v20531_v15  ;;  %v18453_v58 = vsel %vm18423_vm9, %v18403_v22, %v20532_v53 }
 0x428   :  { %v13970_v28 = vrot.slane %v13956_v47, %v21405_v31  ;;  %v13973_v35 = vcombine.low %v27351_v63, %v27502_v23  ;;  %v18487_v29 = vpack.c.bf16 %v18453_v58, %v18452_v51  ;;  %v20527_v59 = vunpack.i.h.bf16 %v27295_v14  ;;  %v19395_v63 = vld [vmem:[%s28419_s0 + $0x1e8] sm:$0x3f] }
 0x429   :  { %v20803_v50 = vpack.i.bf16 %v13008_v46, %v12991_v7  ;;  %v20526_v2 = vunpack.i.l.bf16 %v27295_v14  ;;  %v6193_v41 = vcombine.high %v19339_v18, %v19339_v18  ;;  %v6200_v24 = vrot.slane %v19339_v18, %v21405_v31 }
 0x42a   :  { %v13971_v3 = vcombine.low %v13963_v21, %v13970_v28  ;;  %v13987_v9 = vrot.slane %v13973_v35, %v21405_v31  ;;  %v18261_v54 = vsel %vm18223_vm3, %v27447_v44, %v20527_v59  ;;  %v6209_v22 = vcombine.high %v27356_v13, %v27356_v13  ;;  %19692 = vmatmul.mubr.msk.bf16.gmra.mrb[56].mxu0 %vm18541_vm10, %v18487_v29  ;;  %v27534_v13 = vpop.permute.xlu1 %20589  ;;  %v27570_v29 = vpop.permute.xlu0 %20594 }
 0x42b   :  { %20804 = vrot.lane.b32.xlu0 %v20803_v50, %s21277_s9  ;;  %v18260_v14 = vsel %vm18223_vm3, %v27452_v56, %v20526_v2  ;;  %v6207_v10 = vrot.slane %v6193_v41, %v21405_v31  ;;  %v6208_v27 = vcombine.high %v6200_v24, %v6200_v24  ;;  %v14935_v44 = vcombine.low %v27368_v1, %v27385_v42  ;;  %v19396_v56 = vld [vmem:[%s28419_s0 + $0x1f0] sm:$0xff]  ;;  %v19669_v1 = vpop.f32.mrb[33].mxu0 }
 0x42c   :  { %v13988_v43 = vcombine.low %v13980_v25, %v13987_v9  ;;  %v27539_v30 = vrot.slane %v6209_v22, %v21405_v31  ;;  %v27543_v6 = vadd.f32 %v26917_v20, %v26835_v19  ;;  %v27550_v61 = vcombine.high %v27475_v33, %v27475_v33  ;;  %19695 = vmatprep.mubr.msk.bf16.mxu0 %vm21286_vm8, %v28454_v62  ;;  %v27556_v19 = vpop.f32.mrb[34].mxu0 }
 0x42d   :  { %v14936_v38 = vcombine.low %v6200_v24, %v6208_v27  ;;  %v14943_v11 = vrot.slane %v14935_v44, %v21405_v31  ;;  %v14952_v53 = vcombine.low %v6207_v10, %v27377_v5  ;;  %v7230_v15 = vcombine.high %v19395_v63, %v19395_v63  ;;  %v19670_v18 = vpop.f32.mrb[35].mxu0 }
 0x42e   :  { %v20808_v20 = vpack.i.bf16 %v13988_v43, %v13971_v3  ;;  %v14953_v7 = vcombine.low %v27392_v57, %v27539_v30  ;;  %v18857_v47 = vmax.f32 %v27543_v6, 0.0  ;;  %v7237_v21 = vrot.slane %v19395_v63, %v21405_v31  ;;  %v27577_v24 = vpop.permute.xlu1 %20599  ;;  %v27593_v43 = vld [vmem:[%s28419_s0 + $0x140] sm:$0xff] }
 0x42f   :  { %v14950_v46 = vrot.slane %v14936_v38, %v21405_v31  ;;  %v14960_v25 = vrot.slane %v14952_v53, %v21405_v31  ;;  %v7244_v51 = vrot.slane %v7230_v15, %v21405_v31  ;;  %v7246_v58 = vcombine.high %v19396_v56, %v19396_v56 }
 0x430   :  { %20809 = vrot.lane.b32.xlu1 %v20808_v20, %s21279_s11  ;;  %v14967_v5 = vrot.slane %v14953_v7, %v21405_v31  ;;  %v7245_v28 = vcombine.high %v7237_v21, %v7237_v21  ;;  %v7253_v35 = vrot.slane %v19396_v56, %v21405_v31  ;;  %v15915_v57 = vcombine.low %v27475_v33, %v27550_v61  ;;  %v60_v33 = vld [vmem:[%s28419_s0 + $0x138] sm:$0x3f]  ;;  %v19451_v20 = vld [vmem:[%s28419_s0 + $0x1e9] sm:$0x3f] }
 0x431   :  { %v14951_v59 = vcombine.low %v14943_v11, %v14950_v46  ;;  %v27573_v50 = vrot.slane %v7246_v58, %v21405_v31  ;;  %v20542_v2 = vunpack.i.h.bf16 %v27344_v52  ;;  %v20541_v41 = vunpack.i.l.bf16 %v27344_v52 }
 0x432   :  { %v14968_v3 = vcombine.low %v14960_v25, %v14967_v5  ;;  %v7261_v9 = vcombine.high %v7253_v35, %v7253_v35  ;;  %v15916_v22 = vcombine.low %v7237_v21, %v7245_v28  ;;  %v15923_v63 = vrot.slane %v15915_v57, %v21405_v31  ;;  %v27611_v25 = vpop.permute.xlu0 %20604  ;;  %v27626_v28 = vpop.permute.xlu1 %20609 }
 0x433   :  { %v15932_v10 = vcombine.low %v7244_v51, %v7253_v35  ;;  %v27584_v27 = vsel %vm18273_vm4, %v18260_v14, %v20541_v41  ;;  %v27587_v44 = vsel %vm18273_vm4, %v18261_v54, %v20542_v2  ;;  %v20537_v52 = vunpack.i.h.bf16 %v27336_v39  ;;  %v27618_v51 = vld [vmem:[%s28421_s2] ss:$0 sm:$0xff] }
 0x434   :  { %v20813_v56 = vpack.i.bf16 %v14968_v3, %v14951_v59  ;;  %v15930_v1 = vrot.slane %v15916_v22, %v21405_v31  ;;  %v15933_v38 = vcombine.low %v7261_v9, %v27573_v50  ;;  %v20536_v11 = vunpack.i.l.bf16 %v27336_v39  ;;  %v19452_v22 = vld [vmem:[%s28419_s0 + $0x1f1] sm:$0xff] }
 0x435   :  { %v15940_v14 = vrot.slane %v15932_v10, %v21405_v31  ;;  %v698_v54 = vcombine.high %v26998_v48, %v26998_v48  ;;  %v713_v53 = vcombine.high %v27009_v37, %v27009_v37  ;;  %v715_v15 = vcombine.high %v60_v33, %v60_v33 }
 0x436   :  { %20814 = vrot.lane.b32.xlu0 %v20813_v56, %s21282_s18  ;;  %v15931_v7 = vcombine.low %v15923_v63, %v15930_v1  ;;  %v15947_v21 = vrot.slane %v15933_v38, %v21405_v31  ;;  %v722_v18 = vrot.slane %v60_v33, %v21405_v31  ;;  %v738_v46 = vrot.slane %v27593_v43, %v21405_v31 }
 0x437   :  { %v712_v48 = vrot.slane %v698_v54, %v21405_v31  ;;  %v729_v37 = vrot.slane %v715_v15, %v21405_v31  ;;  %v18675_v58 = vadd.f32 %v27618_v51, %v26866_v34  ;;  %v27624_v5 = vcombine.high %v27502_v23, %v27502_v23 }
 0x438   :  { %v15948_v35 = vcombine.low %v15940_v14, %v15947_v21  ;;  %v730_v57 = vcombine.high %v722_v18, %v722_v18  ;;  %v746_v59 = vcombine.high %v738_v46, %v738_v46  ;;  %v8266_v2 = vcombine.high %v19451_v20, %v19451_v20  ;;  %v19507_v21 = vld [vmem:[%s28419_s0 + $0x1ea] sm:$0x3f] }
 0x439   :  { %v714_v41 = vcombine.high %v712_v48, %v712_v48  ;;  %v9861_v3 = vcombine.low %v713_v53, %v712_v48  ;;  %v18858_v9 = vmax.f32 %v18675_v58, 0.0  ;;  %v8273_v63 = vrot.slane %v19451_v20, %v21405_v31  ;;  %v27656_v58 = vpop.permute.xlu1 %20619 }
 0x43a   :  { %v20818_v34 = vpack.i.bf16 %v15948_v35, %v15931_v7  ;;  %v9878_v33 = vcombine.low %v730_v57, %v729_v37  ;;  %v9879_v10 = vcombine.low %v738_v46, %v746_v59  ;;  %v8280_v56 = vrot.slane %v8266_v2, %v21405_v31  ;;  %v27647_v46 = vpop.f32.mrb[36].mxu0 }
 0x43b   :  { %v9862_v1 = vcombine.low %v714_v41, %v722_v18  ;;  %v9869_v38 = vrot.slane %v9861_v3, %v21405_v31  ;;  %v27636_v14 = vpack.c.bf16 %v18858_v9, %v18857_v47  ;;  %v8281_v54 = vcombine.high %v8273_v63, %v8273_v63  ;;  %v27645_v18 = vpop.permute.xlu0 %20614  ;;  %v19673_v35 = vpop.f32.mrb[37].mxu0  ;;  %v19508_v3 = vld [vmem:[%s28419_s0 + $0x1f2] sm:$0xff] }
 0x43c   :  { %20819 = vrot.lane.b32.xlu1 %v20818_v34, %s21281_s13  ;;  %v9886_v53 = vrot.slane %v9878_v33, %v21405_v31  ;;  %v9893_v15 = vrot.slane %v9879_v10, %v21405_v31  ;;  %v8282_v20 = vcombine.high %v19452_v22, %v19452_v22  ;;  %v8289_v7 = vrot.slane %v19452_v22, %v21405_v31  ;;  %v27664_v9 = vpop.f32.mrb[38].mxu0 }
 0x43d   :  { %v9876_v6 = vrot.slane %v9862_v1, %v21405_v31  ;;  %v16895_v47 = vcombine.low %v27502_v23, %v27624_v5  ;;  %v16896_v48 = vcombine.low %v8273_v63, %v8281_v54  ;;  %v27654_v37 = vcombine.high %v27539_v30, %v27539_v30  ;;  %v19674_v33 = vpop.f32.mrb[39].mxu0 }
 0x43e   :  { %v9894_v57 = vcombine.low %v9886_v53, %v9893_v15  ;;  %v27659_v59 = vrot.slane %v8282_v20, %v21405_v31  ;;  %v8297_v2 = vcombine.high %v8289_v7, %v8289_v7  ;;  %v16912_v41 = vcombine.low %v8280_v56, %v8289_v7  ;;  %v2152_v33 = vld [vmem:[%s28419_s0 + $0x1da] sm:$0x3f] }
 0x43f   :  { %v9877_v23 = vcombine.low %v9869_v38, %v9876_v6  ;;  %v16903_v22 = vrot.slane %v16895_v47, %v21405_v31  ;;  %v16910_v63 = vrot.slane %v16896_v48, %v21405_v31  ;;  %v9302_v34 = vcombine.high %v19507_v21, %v19507_v21  ;;  %v27682_v48 = vpop.permute.xlu0 %20624 }
 0x440   :  { %v18105_v10 = vsel %vm18073_vm0, %v9894_v57, %v20537_v52  ;;  %v16913_v1 = vcombine.low %v8297_v2, %v27659_v59  ;;  %v16920_v56 = vrot.slane %v16912_v41, %v21405_v31  ;;  %v9309_v54 = vrot.slane %v19507_v21, %v21405_v31  ;;  %v27690_v57 = vpop.permute.xlu1 %20629 }
 0x441   :  { %v18104_v38 = vsel %vm18073_vm0, %v9877_v23, %v20536_v11  ;;  %v16911_v53 = vcombine.low %v16903_v22, %v16910_v63  ;;  %v9316_v15 = vrot.slane %v9302_v34, %v21405_v31  ;;  %v9318_v20 = vcombine.high %v19508_v3, %v19508_v3 }
 0x442   :  { %v16927_v7 = vrot.slane %v16913_v1, %v21405_v31  ;;  %v9317_v6 = vcombine.high %v9309_v54, %v9309_v54  ;;  %v9325_v47 = vrot.slane %v19508_v3, %v21405_v31  ;;  %v17875_v52 = vcombine.low %v27539_v30, %v27654_v37  ;;  %v1116_v30 = vld [vmem:[%s28419_s0 + $0x1d9] sm:$0x3f] }
 0x443   :  { %v27685_v21 = vrot.slane %v9318_v20, %v21405_v31  ;;  %v20552_v39 = vunpack.i.h.bf16 %v27397_v40  ;;  %v20551_v11 = vunpack.i.l.bf16 %v27397_v40  ;;  %v20547_v35 = vunpack.i.h.bf16 %v27388_v32 }
 0x444   :  { %v16928_v2 = vcombine.low %v16920_v56, %v16927_v7  ;;  %v9333_v41 = vcombine.high %v9325_v47, %v9325_v47  ;;  %v17876_v23 = vcombine.low %v9309_v54, %v9317_v6  ;;  %v17883_v3 = vrot.slane %v17875_v52, %v21405_v31  ;;  %v27713_v52 = vpop.permute.xlu0 %20634 }
 0x445   :  { %v17892_v22 = vcombine.low %v9316_v15, %v9325_v47  ;;  %v18360_v63 = vsel %vm18323_vm5, %v27584_v27, %v20551_v11  ;;  %v18361_v40 = vsel %vm18323_vm5, %v27587_v44, %v20552_v39  ;;  %v20546_v34 = vunpack.i.l.bf16 %v27388_v32 }
 0x446   :  { %v20823_v1 = vpack.i.bf16 %v16928_v2, %v16911_v53  ;;  %v17890_v56 = vrot.slane %v17876_v23, %v21405_v31  ;;  %v17893_v54 = vcombine.low %v9333_v41, %v27685_v21  ;;  %v18155_v20 = vsel %vm18123_vm1, %v18105_v10, %v20547_v35  ;;  %v27718_v35 = vpop.permute.xlu1 %20639 }
 0x447   :  { %v17900_v15 = vrot.slane %v17892_v22, %v21405_v31  ;;  %v18154_v27 = vsel %vm18123_vm1, %v18104_v38, %v20546_v34  ;;  %v2081_v7 = vcombine.high %v1116_v30, %v1116_v30  ;;  %v2088_v44 = vrot.slane %v1116_v30, %v21405_v31 }
 0x448   :  { %20824 = vrot.lane.b32.xlu0 %v20823_v1, %s21284_s24  ;;  %v17891_v32 = vcombine.low %v17883_v3, %v17890_v56  ;;  %v17907_v6 = vrot.slane %v17893_v54, %v21405_v31  ;;  %v3117_v47 = vcombine.high %v2152_v33, %v2152_v33  ;;  %v3124_v53 = vrot.slane %v2152_v33, %v21405_v31 }
 0x449   :  { %v2095_v39 = vrot.slane %v2081_v7, %v21405_v31  ;;  %v2096_v10 = vcombine.high %v2088_v44, %v2088_v44  ;;  %v11049_v11 = vcombine.low %v27324_v12, %v2088_v44  ;;  %v20562_v38 = vunpack.i.h.bf16 %v27431_v60  ;;  %v19229_v12 = vld [vmem:[%s28419_s0 + $0x1e8] sm:$0x3f] }
 0x44a   :  { %v17908_v2 = vcombine.low %v17900_v15, %v17907_v6  ;;  %v3131_v41 = vrot.slane %v3117_v47, %v21405_v31  ;;  %v3132_v23 = vcombine.high %v3124_v53, %v3124_v53  ;;  %v12029_v3 = vcombine.low %v27385_v42, %v3124_v53  ;;  %v19285_v42 = vld [vmem:[%s28419_s0 + $0x1e9] sm:$0x3f]  ;;  %v27740_v53 = vpop.permute.xlu0 %20644 }
 0x44b   :  { %v11050_v30 = vcombine.low %v2096_v10, %v2095_v39  ;;  %v11057_v22 = vrot.slane %v11049_v11, %v21405_v31  ;;  %v20561_v34 = vunpack.i.l.bf16 %v27431_v60  ;;  %v18411_v33 = vsel %vm18373_vm6, %v18361_v40, %v20562_v38  ;;  %v27742_v39 = vpop.f32.mrb[40].mxu0 }
 0x44c   :  { %v20828_v1 = vpack.i.bf16 %v17908_v2, %v17891_v32  ;;  %v12030_v56 = vcombine.low %v3132_v23, %v3131_v41  ;;  %v12037_v54 = vrot.slane %v12029_v3, %v21405_v31  ;;  %v20557_v15 = vunpack.i.h.bf16 %v27426_v26 }
 0x44d   :  { %v11064_v7 = vrot.slane %v11050_v30, %v21405_v31  ;;  %v18410_v60 = vsel %vm18373_vm6, %v18360_v63, %v20561_v34  ;;  %v20556_v40 = vunpack.i.l.bf16 %v27426_v26  ;;  %v4154_v6 = vcombine.high %v19229_v12, %v19229_v12  ;;  %v27745_v63 = vpop.permute.xlu1 %20649  ;;  %v19677_v26 = vpop.f32.mrb[41].mxu0 }
 0x44e   :  { %20829 = vrot.lane.b32.xlu1 %v20828_v1, %s21283_s21  ;;  %v12044_v44 = vrot.slane %v12030_v56, %v21405_v31  ;;  %v18205_v32 = vsel %vm18173_vm2, %v18155_v20, %v20557_v15  ;;  %v4161_v47 = vrot.slane %v19229_v12, %v21405_v31  ;;  %v5190_v38 = vcombine.high %v19285_v42, %v19285_v42 }
 0x44f   :  { %v11065_v10 = vcombine.low %v11057_v22, %v11064_v7  ;;  %v18204_v11 = vsel %vm18173_vm2, %v18154_v27, %v20556_v40  ;;  %v4168_v41 = vrot.slane %v4154_v6, %v21405_v31  ;;  %v5197_v3 = vrot.slane %v19285_v42, %v21405_v31  ;;  %v27764_v7 = vpop.f32.mrb[42].mxu0 }
 0x450   :  { %v12045_v2 = vcombine.low %v12037_v54, %v12044_v44  ;;  %v4169_v23 = vcombine.high %v4161_v47, %v4161_v47  ;;  %v13009_v20 = vcombine.low %v27550_v61, %v4161_v47  ;;  %v5204_v30 = vrot.slane %v5190_v38, %v21405_v31  ;;  %v19341_v61 = vld [vmem:[%s28419_s0 + $0x1ea] sm:$0x3f]  ;;  %v19397_v47 = vld [vmem:[%s28419_s0 + $0x1f8] sm:$0x3f] }
 0x451   :  { %11162 = vrot.lane.b32.xlu0 %v11065_v10, %s21278_s10  ;;  %v20572_v22 = vunpack.i.h.bf16 %v27465_v8  ;;  %v20571_v27 = vunpack.i.l.bf16 %v27465_v8  ;;  %v20567_v1 = vunpack.i.h.bf16 %v27458_v36  ;;  %v20566_v56 = vunpack.i.l.bf16 %v27458_v36  ;;  %v27772_v10 = vpop.permute.xlu0 %20654  ;;  %v27775_v26 = vpop.permute.xlu1 %20659 }
 0x452   :  { %12142 = vrot.lane.b32.xlu1 %v12045_v2, %s21280_s12  ;;  %v13010_v34 = vcombine.low %v4169_v23, %v4168_v41  ;;  %v13017_v12 = vrot.slane %v13009_v20, %v21405_v31  ;;  %v5205_v54 = vcombine.high %v5197_v3, %v5197_v3  ;;  %v13989_v15 = vcombine.low %v27624_v5, %v5197_v3  ;;  %v19678_v5 = vpop.f32.mrb[43].mxu0 }
 0x453   :  { %v18460_v42 = vsel %vm18423_vm9, %v18410_v60, %v20571_v27  ;;  %v18461_v8 = vsel %vm18423_vm9, %v18411_v33, %v20572_v22  ;;  %v18254_v6 = vsel %vm18223_vm3, %v18204_v11, %v20566_v56  ;;  %v18255_v36 = vsel %vm18223_vm3, %v18205_v32, %v20567_v1 }
 0x454   :  { %v13024_v40 = vrot.slane %v13010_v34, %v21405_v31  ;;  %v18491_v44 = vpack.c.bf16 %v18461_v8, %v18460_v42  ;;  %v13990_v38 = vcombine.low %v5205_v54, %v5204_v30  ;;  %v13997_v60 = vrot.slane %v13989_v15, %v21405_v31  ;;  %v27803_v8 = vld [vmem:[%s28419_s0 + $0x188] sm:$0x3f] }
 0x455   :  { %v6226_v33 = vcombine.high %v19341_v61, %v19341_v61  ;;  %v6233_v41 = vrot.slane %v19341_v61, %v21405_v31  ;;  %v18680_v11 = vadd.f32 %v27618_v51, %v27094_v55  ;;  %v7262_v32 = vcombine.high %v27573_v50, %v27573_v50  ;;  %v27811_v5 = vpop.permute.xlu1 %20669 }
 0x456   :  { %v13025_v2 = vcombine.low %v13017_v12, %v13024_v40  ;;  %19708 = vmatmul.mubr.msk.bf16.gmra.mrb[4].mxu1 %vm18541_vm10, %v18491_v44  ;;  %v14004_v23 = vrot.slane %v13990_v38, %v21405_v31  ;;  %v7263_v3 = vcombine.high %v19397_v47, %v19397_v47  ;;  %v7270_v30 = vrot.slane %v19397_v47, %v21405_v31  ;;  %v27805_v40 = vpop.permute.xlu0 %20664 }
 0x457   :  { %v6240_v20 = vrot.slane %v6226_v33, %v21405_v31  ;;  %19711 = vmatprep.mubr.msk.bf16.mxu1 %vm21286_vm8, %v28454_v62  ;;  %v6241_v22 = vcombine.high %v6233_v41, %v6233_v41  ;;  %v14969_v55 = vcombine.low %v27654_v37, %v6233_v41  ;;  %v18859_v27 = vmax.f32 %v18680_v11, 0.0  ;;  %v69_v37 = vld [vmem:[%s28419_s0 + $0x180] sm:$0xff] }
 0x458   :  { %13122 = vrot.lane.b32.xlu0 %v13025_v2, %s21277_s9  ;;  %v20582_v50 = vunpack.i.h.bf16 %v27499_v45  ;;  %v14005_v34 = vcombine.low %v13997_v60, %v14004_v23  ;;  %v7277_v12 = vrot.slane %v7263_v3, %v21405_v31  ;;  %v7278_v1 = vcombine.high %v7270_v30, %v7270_v30  ;;  %v28496_v33 = vld [vmem:[#allocation16_spill] sm:$0xff]  ;;  %v28497_v41 = vld [vmem:[#allocation5_spill] sm:$0xff] }
 0x459   :  { %v15949_v56 = vcombine.low %v7262_v32, %v7270_v30  ;;  %v14970_v61 = vcombine.low %v6241_v22, %v6240_v20  ;;  %v14977_v54 = vrot.slane %v14969_v55, %v21405_v31  ;;  %v20581_v15 = vunpack.i.l.bf16 %v27499_v45  ;;  %v19453_v30 = vld [vmem:[%s28419_s0 + $0x1f9] sm:$0x3f]  ;;  %v28498_v55 = vld [vmem:[#allocation13_spill] sm:$0xff] }
 0x45a   :  { %v27795_v42 = vsel %vm18273_vm4, %v18255_v36, %v20582_v50  ;;  %14102 = vrot.lane.b32.xlu1 %v14005_v34, %s21279_s11  ;;  %v15950_v44 = vcombine.low %v7278_v1, %v7277_v12  ;;  %v20577_v45 = vunpack.i.h.bf16 %v27492_v49  ;;  %v20576_v36 = vunpack.i.l.bf16 %v27492_v49 }
 0x45b   :  { %v15957_v47 = vrot.slane %v15949_v56, %v21405_v31  ;;  %v14984_v38 = vrot.slane %v14970_v61, %v21405_v31  ;;  %v18304_v60 = vsel %vm18273_vm4, %v18254_v6, %v20581_v15  ;;  %v847_v2 = vcombine.high %v28496_v33, %v28496_v33 }
 0x45c   :  { %v862_v11 = vcombine.high %v28497_v41, %v28497_v41  ;;  %v15964_v32 = vrot.slane %v15950_v44, %v21405_v31  ;;  %v863_v23 = vcombine.high %v69_v37, %v69_v37  ;;  %v870_v20 = vrot.slane %v69_v37, %v21405_v31 }
 0x45d   :  { %v887_v3 = vrot.slane %v27803_v8, %v21405_v31  ;;  %v14985_v22 = vcombine.low %v14977_v54, %v14984_v38  ;;  %v861_v6 = vrot.slane %v847_v2, %v21405_v31  ;;  %v18683_v50 = vadd.f32 %v27618_v51, %v28498_v55  ;;  %v27834_v38 = vpop.permute.xlu0 %20674 }
 0x45e   :  { %v8298_v34 = vcombine.high %v27659_v59, %v27659_v59  ;;  %v15965_v12 = vcombine.low %v15957_v47, %v15964_v32  ;;  %v877_v1 = vrot.slane %v863_v23, %v21405_v31  ;;  %v878_v56 = vcombine.high %v870_v20, %v870_v20  ;;  %v19509_v59 = vld [vmem:[%s28419_s0 + $0x1fa] sm:$0x3f]  ;;  %v27842_v32 = vpop.permute.xlu1 %20679 }
 0x45f   :  { %v895_v61 = vcombine.high %v887_v3, %v887_v3  ;;  %15082 = vrot.lane.b32.xlu0 %v14985_v22, %s21282_s18  ;;  %v9997_v15 = vcombine.low %v862_v11, %v861_v6  ;;  %v18860_v37 = vmax.f32 %v18683_v50, 0.0  ;;  %v8299_v44 = vcombine.high %v19453_v30, %v19453_v30 }
 0x460   :  { %v8306_v54 = vrot.slane %v19453_v30, %v21405_v31  ;;  %16062 = vrot.lane.b32.xlu1 %v15965_v12, %s21281_s13  ;;  %v879_v33 = vcombine.high %v877_v1, %v877_v1  ;;  %v9998_v2 = vcombine.low %v870_v20, %v878_v56  ;;  %v9334_v47 = vcombine.high %v27685_v21, %v27685_v21 }
 0x461   :  { %v10015_v41 = vcombine.low %v887_v3, %v895_v61  ;;  %v10005_v11 = vrot.slane %v9997_v15, %v21405_v31  ;;  %v27845_v23 = vpack.c.bf16 %v18860_v37, %v18859_v27  ;;  %v8313_v30 = vrot.slane %v8299_v44, %v21405_v31  ;;  %v27852_v61 = vpop.f32.mrb[44].mxu0 }
 0x462   :  { %v8314_v22 = vcombine.high %v8306_v54, %v8306_v54  ;;  %v10012_v6 = vrot.slane %v9998_v2, %v21405_v31  ;;  %v10014_v20 = vcombine.low %v877_v1, %v879_v33  ;;  %v16929_v55 = vcombine.low %v8298_v34, %v8306_v54  ;;  %v19681_v2 = vpop.f32.mrb[45].mxu0 }
 0x463   :  { %v10029_v3 = vrot.slane %v10015_v41, %v21405_v31  ;;  %v9335_v12 = vcombine.high %v19509_v59, %v19509_v59  ;;  %v9342_v56 = vrot.slane %v19509_v59, %v21405_v31  ;;  %v20592_v21 = vunpack.i.h.bf16 %v27534_v13  ;;  %v27859_v41 = vpop.permute.xlu0 %20684  ;;  %v27861_v59 = vpop.f32.mrb[46].mxu0 }
 0x464   :  { %v16930_v50 = vcombine.low %v8314_v22, %v8313_v30  ;;  %v10013_v15 = vcombine.low %v10005_v11, %v10012_v6  ;;  %v10022_v27 = vrot.slane %v10014_v20, %v21405_v31  ;;  %v16937_v37 = vrot.slane %v16929_v55, %v21405_v31  ;;  %v19682_v20 = vpop.f32.mrb[47].mxu0 }
 0x465   :  { %v20591_v44 = vunpack.i.l.bf16 %v27534_v13  ;;  %v9349_v34 = vrot.slane %v9335_v12, %v21405_v31  ;;  %v9350_v54 = vcombine.high %v9342_v56, %v9342_v56  ;;  %v17909_v33 = vcombine.low %v9334_v47, %v9342_v56  ;;  %v27867_v13 = vpop.permute.xlu1 %20689 }
 0x466   :  { %v16944_v1 = vrot.slane %v16930_v50, %v21405_v31  ;;  %v10030_v30 = vcombine.low %v10022_v27, %v10029_v3  ;;  %v18112_v11 = vsel %vm18073_vm0, %v10013_v15, %v20576_v36  ;;  %v18355_v6 = vsel %vm18323_vm5, %v27795_v42, %v20592_v21 }
 0x467   :  { %v18354_v22 = vsel %vm18323_vm5, %v18304_v60, %v20591_v44  ;;  %v17910_v50 = vcombine.low %v9350_v54, %v9349_v34  ;;  %v17917_v12 = vrot.slane %v17909_v33, %v21405_v31  ;;  %v20587_v47 = vunpack.i.h.bf16 %v27526_v16  ;;  %v27893_v20 = vpop.permute.xlu0 %20694 }
 0x468   :  { %v16945_v55 = vcombine.low %v16937_v37, %v16944_v1  ;;  %v18113_v36 = vsel %vm18073_vm0, %v10030_v30, %v20577_v45  ;;  %v20586_v60 = vunpack.i.l.bf16 %v27526_v16  ;;  %v20602_v3 = vunpack.i.h.bf16 %v27577_v24 }
 0x469   :  { %v20601_v42 = vunpack.i.l.bf16 %v27577_v24  ;;  %v17924_v15 = vrot.slane %v17910_v50, %v21405_v31  ;;  %v18163_v27 = vsel %vm18123_vm1, %v18113_v36, %v20587_v47  ;;  %v20597_v37 = vunpack.i.h.bf16 %v27570_v29  ;;  %v27900_v50 = vpop.permute.xlu1 %20699 }
 0x46a   :  { %17042 = vrot.lane.b32.xlu0 %v16945_v55, %s21284_s24  ;;  %v20596_v44 = vunpack.i.l.bf16 %v27570_v29  ;;  %v18162_v45 = vsel %vm18123_vm1, %v18112_v11, %v20586_v60  ;;  %v18405_v2 = vsel %vm18373_vm6, %v18355_v6, %v20602_v3  ;;  %v20612_v24 = vunpack.i.h.bf16 %v27626_v28  ;;  %v28499_v55 = vld [vmem:[#allocation14_spill] sm:$0xff] }
 0x46b   :  { %v27871_v56 = vpop.f32.mrb[48].mxu0  ;;  %v18404_v16 = vsel %vm18373_vm6, %v18354_v22, %v20601_v42  ;;  %v17925_v34 = vcombine.low %v17917_v12, %v17924_v15  ;;  %v18213_v33 = vsel %vm18173_vm2, %v18163_v27, %v20597_v37  ;;  %v20611_v30 = vunpack.i.l.bf16 %v27626_v28  ;;  %v62_v60 = vld [vmem:[%s28419_s0 + $0x148] sm:$0x3f] }
 0x46c   :  { %v19685_v21 = vpop.f32.mrb[49].mxu0  ;;  %v18212_v54 = vsel %vm18173_vm2, %v18162_v45, %v20596_v44  ;;  %v18455_v29 = vsel %vm18423_vm9, %v18405_v2, %v20612_v24  ;;  %v20607_v11 = vunpack.i.h.bf16 %v27611_v25  ;;  %v20606_v22 = vunpack.i.l.bf16 %v27611_v25  ;;  %v28500_v2 = vld [vmem:[#allocation8_spill] sm:$0xff] }
 0x46d   :  { %v27884_v49 = vpop.f32.mrb[50].mxu0  ;;  %v18688_v6 = vadd.f32 %v27618_v51, %v28499_v55  ;;  %18022 = vrot.lane.b32.xlu1 %v17925_v34, %s21283_s21  ;;  %v18454_v12 = vsel %vm18423_vm9, %v18404_v16, %v20611_v30  ;;  %v20622_v47 = vunpack.i.h.bf16 %v27656_v58  ;;  %v20621_v28 = vunpack.i.l.bf16 %v27656_v58  ;;  %v21251_v16 = vld.sshfl [vmem:[%s28419_s0 + $0x150] sm:$0xff pattern:$0x76325410] }
 0x46e   :  { %v19686_v1 = vpop.f32.mrb[51].mxu0  ;;  %v20617_v36 = vunpack.i.h.bf16 %v27645_v18  ;;  %v18488_v25 = vpack.c.bf16 %v18455_v29, %v18454_v12  ;;  %v18262_v3 = vsel %vm18223_vm3, %v18212_v54, %v20606_v22  ;;  %v18263_v42 = vsel %vm18223_vm3, %v18213_v33, %v20607_v11  ;;  %v27930_v54 = vpop.permute.xlu0 %20704 }
 0x46f   :  { %v18861_v21 = vmax.f32 %v18688_v6, 0.0  ;;  %v18312_v15 = vsel %vm18273_vm4, %v18262_v3, %v20621_v28  ;;  %v18313_v27 = vsel %vm18273_vm4, %v18263_v42, %v20622_v47  ;;  %v20616_v37 = vunpack.i.l.bf16 %v27645_v18  ;;  %v27933_v22 = vpop.permute.xlu1 %20709 }
 0x470   :  { %v731_v58 = vcombine.high %v27593_v43, %v27593_v43  ;;  %v748_v44 = vcombine.high %v62_v60, %v62_v60  ;;  %v755_v45 = vrot.slane %v62_v60, %v21405_v31  ;;  %v18691_v24 = vadd.f32 %v27618_v51, %v28500_v2  ;;  %19696 = vmatmul.mubr.msk.bf16.gmra.mrb[60].mxu0 %vm18541_vm10, %v18488_v25  ;;  %v28501_v60 = vld [vmem:[#allocation12_spill] sm:$0xff] }
 0x471   :  { %v20632_v34 = vunpack.i.h.bf16 %v27690_v57  ;;  %v20631_v18 = vunpack.i.l.bf16 %v27690_v57  ;;  %v20627_v43 = vunpack.i.h.bf16 %v27682_v48  ;;  %19699 = vmatprep.mubr.msk.bf16.mxu0 %vm21286_vm8, %v28454_v62  ;;  %v779_v29 = vcombine.high %v21251_v16, %v21251_v16 }
 0x472   :  { %v745_v1 = vrot.slane %v731_v58, %v21405_v31  ;;  %v762_v33 = vrot.slane %v748_v44, %v21405_v31  ;;  %v763_v30 = vcombine.high %v755_v45, %v755_v45  ;;  %v18862_v11 = vmax.f32 %v18691_v24, 0.0 }
 0x473   :  { %v18362_v6 = vsel %vm18323_vm5, %v18312_v15, %v20631_v18  ;;  %v18363_v12 = vsel %vm18323_vm5, %v18313_v27, %v20632_v34  ;;  %v20626_v57 = vunpack.i.l.bf16 %v27682_v48  ;;  %v9913_v25 = vcombine.low %v779_v29, %v28501_v60  ;;  %v27952_v34 = vpop.permute.xlu0 %20714  ;;  %v27957_v29 = vpop.permute.xlu1 %20719 }
 0x474   :  { %v747_v55 = vcombine.high %v745_v1, %v745_v1  ;;  %v9896_v47 = vcombine.low %v755_v45, %v763_v30  ;;  %v9912_v28 = vcombine.low %v762_v33, %v21251_v16  ;;  %v27939_v3 = vpack.c.bf16 %v18862_v11, %v18861_v21 }
 0x475   :  { %v20642_v58 = vunpack.i.h.bf16 %v27718_v35  ;;  %v20641_v44 = vunpack.i.l.bf16 %v27718_v35  ;;  %v20637_v2 = vunpack.i.h.bf16 %v27713_v52  ;;  %v9927_v27 = vrot.slane %v9913_v25, %v21405_v31 }
 0x476   :  { %v9895_v42 = vcombine.low %v745_v1, %v747_v55  ;;  %v9910_v24 = vrot.slane %v9896_v47, %v21405_v31  ;;  %v9920_v15 = vrot.slane %v9912_v28, %v21405_v31  ;;  %v20636_v48 = vunpack.i.l.bf16 %v27713_v52  ;;  %v28502_v55 = vld [vmem:[#allocation15_spill] sm:$0xff] }
 0x477   :  { %v18412_v21 = vsel %vm18373_vm6, %v18362_v6, %v20641_v44  ;;  %v18413_v16 = vsel %vm18373_vm6, %v18363_v12, %v20642_v58  ;;  %v20652_v1 = vunpack.i.h.bf16 %v27745_v63  ;;  %v20651_v18 = vunpack.i.l.bf16 %v27745_v63 }
 0x478   :  { %v9903_v45 = vrot.slane %v9895_v42, %v21405_v31  ;;  %v9928_v35 = vcombine.low %v9920_v15, %v9927_v27  ;;  %v20647_v33 = vunpack.i.h.bf16 %v27740_v53  ;;  %v20646_v30 = vunpack.i.l.bf16 %v27740_v53  ;;  %v71_v53 = vld [vmem:[%s28419_s0 + $0x190] sm:$0xff] }
 0x479   :  { %v18463_v11 = vsel %vm18423_vm9, %v18413_v16, %v20652_v1  ;;  %v18696_v6 = vadd.f32 %v27618_v51, %v28502_v55  ;;  %v20662_v12 = vunpack.i.h.bf16 %v27775_v26  ;;  %v18462_v28 = vsel %vm18423_vm9, %v18412_v21, %v20651_v18  ;;  %v27984_v16 = vpop.permute.xlu0 %20724  ;;  %v28503_v55 = vld [vmem:[#allocation9_spill] sm:$0xff] }
 0x47a   :  { %v9911_v52 = vcombine.low %v9903_v45, %v9910_v24  ;;  %v18107_v47 = vsel %vm18073_vm0, %v9928_v35, %v20617_v36  ;;  %v20661_v63 = vunpack.i.l.bf16 %v27775_v26  ;;  %v20657_v60 = vunpack.i.h.bf16 %v27772_v10  ;;  %v72_v36 = vld [vmem:[%s28419_s0 + $0x198] sm:$0x3f] }
 0x47b   :  { %v18157_v42 = vsel %vm18123_vm1, %v18107_v47, %v20627_v43  ;;  %v18492_v58 = vpack.c.bf16 %v18463_v11, %v18462_v28  ;;  %v18863_v44 = vmax.f32 %v18696_v6, 0.0  ;;  %v20656_v15 = vunpack.i.l.bf16 %v27772_v10 }
 0x47c   :  { %v18106_v25 = vsel %vm18073_vm0, %v9911_v52, %v20616_v37  ;;  %v18207_v26 = vsel %vm18173_vm2, %v18157_v42, %v20637_v2  ;;  %v880_v27 = vcombine.high %v27803_v8, %v27803_v8  ;;  %v896_v43 = vcombine.high %v71_v53, %v71_v53  ;;  %v27991_v8 = vpop.permute.xlu1 %20729 }
 0x47d   :  { %v18156_v24 = vsel %vm18123_vm1, %v18106_v25, %v20626_v57  ;;  %v18257_v37 = vsel %vm18223_vm3, %v18207_v26, %v20647_v33  ;;  %v903_v21 = vrot.slane %v71_v53, %v21405_v31  ;;  %19712 = vmatmul.mubr.msk.bf16.gmra.mrb[8].mxu1 %vm18541_vm10, %v18492_v58  ;;  %v913_v35 = vcombine.high %v72_v36, %v72_v36 }
 0x47e   :  { %v18206_v45 = vsel %vm18173_vm2, %v18156_v24, %v20636_v48  ;;  %v18307_v2 = vsel %vm18273_vm4, %v18257_v37, %v20662_v12  ;;  %v894_v1 = vrot.slane %v880_v27, %v21405_v31  ;;  %19715 = vmatprep.mubr.msk.bf16.mxu1 %vm21286_vm8, %v28454_v62  ;;  %v910_v18 = vrot.slane %v896_v43, %v21405_v31  ;;  %v28006_v37 = vpop.permute.xlu0 %20734 }
 0x47f   :  { %v18256_v57 = vsel %vm18223_vm3, %v18206_v45, %v20646_v30  ;;  %v911_v33 = vcombine.high %v903_v21, %v903_v21  ;;  %v920_v52 = vrot.slane %v72_v36, %v21405_v31  ;;  %v927_v11 = vrot.slane %v913_v35, %v21405_v31 }
 0x480   :  { %v18306_v48 = vsel %vm18273_vm4, %v18256_v57, %v20661_v63  ;;  %v10031_v30 = vcombine.low %v894_v1, %v903_v21  ;;  %v18699_v6 = vadd.f32 %v27618_v51, %v28503_v55  ;;  %v20672_v12 = vunpack.i.h.bf16 %v27811_v5  ;;  %v28013_v1 = vpop.permute.xlu1 %20739 }
 0x481   :  { %v912_v47 = vcombine.high %v910_v18, %v910_v18  ;;  %v928_v28 = vcombine.high %v920_v52, %v920_v52  ;;  %v10032_v53 = vcombine.low %v911_v33, %v910_v18  ;;  %v20671_v25 = vunpack.i.l.bf16 %v27811_v5 }
 0x482   :  { %v10039_v63 = vrot.slane %v10031_v30, %v21405_v31  ;;  %v18864_v42 = vmax.f32 %v18699_v6, 0.0  ;;  %v18357_v58 = vsel %vm18323_vm5, %v18307_v2, %v20672_v12  ;;  %v20667_v36 = vunpack.i.h.bf16 %v27805_v40 }
 0x483   :  { %v10046_v24 = vrot.slane %v10032_v53, %v21405_v31  ;;  %v10048_v26 = vcombine.low %v912_v47, %v920_v52  ;;  %v10049_v27 = vcombine.low %v928_v28, %v927_v11  ;;  %v18356_v45 = vsel %vm18323_vm5, %v18306_v48, %v20671_v25  ;;  %v28504_v28 = vld [vmem:[#allocation10_spill] sm:$0xff] }
 0x484   :  { %v28008_v43 = vpack.c.bf16 %v18864_v42, %v18863_v44  ;;  %v20666_v21 = vunpack.i.l.bf16 %v27805_v40  ;;  %v20682_v5 = vunpack.i.h.bf16 %v27842_v32  ;;  %v20681_v57 = vunpack.i.l.bf16 %v27842_v32 }
 0x485   :  { %v10047_v2 = vcombine.low %v10039_v63, %v10046_v24  ;;  %v10056_v35 = vrot.slane %v10048_v26, %v21405_v31  ;;  %v10063_v18 = vrot.slane %v10049_v27, %v21405_v31  ;;  %v20677_v33 = vunpack.i.h.bf16 %v27834_v38  ;;  %v28036_v63 = vpop.permute.xlu0 %20744  ;;  %v28040_v26 = vpop.permute.xlu1 %20749  ;;  %v28505_v27 = vld [vmem:[#allocation11_spill] sm:$0xff] }
 0x486   :  { %v18406_v48 = vsel %vm18373_vm6, %v18356_v45, %v20681_v57  ;;  %v18407_v44 = vsel %vm18373_vm6, %v18357_v58, %v20682_v5  ;;  %v20676_v52 = vunpack.i.l.bf16 %v27834_v38  ;;  %v20692_v40 = vunpack.i.h.bf16 %v27867_v13 }
 0x487   :  { %v10064_v11 = vcombine.low %v10056_v35, %v10063_v18  ;;  %v18114_v32 = vsel %vm18073_vm0, %v10047_v2, %v20656_v15  ;;  %v20691_v30 = vunpack.i.l.bf16 %v27867_v13  ;;  %v20687_v55 = vunpack.i.h.bf16 %v27859_v41 }
 0x488   :  { %v18164_v6 = vsel %vm18123_vm1, %v18114_v32, %v20666_v21  ;;  %v18457_v12 = vsel %vm18423_vm9, %v18407_v44, %v20692_v40  ;;  %v20686_v47 = vunpack.i.l.bf16 %v27859_v41  ;;  %v18704_v53 = vadd.f32 %v27618_v51, %v28504_v28 }
 0x489   :  { %v18115_v38 = vsel %vm18073_vm0, %v10064_v11, %v20657_v60  ;;  %v18214_v25 = vsel %vm18173_vm2, %v18164_v6, %v20676_v52  ;;  %v18456_v15 = vsel %vm18423_vm9, %v18406_v48, %v20691_v30  ;;  %v20697_v13 = vunpack.i.h.bf16 %v27893_v20  ;;  %v73_v48 = vld [vmem:[%s28419_s0 + $0x1a0] sm:$0xff]  ;;  %v28068_v11 = vld [vmem:[%s28419_s0 + $0x1b0] sm:$0xff] }
 0x48a   :  { %v18165_v42 = vsel %vm18123_vm1, %v18115_v38, %v20667_v36  ;;  %v18489_v58 = vpack.c.bf16 %v18457_v12, %v18456_v15  ;;  %v18264_v41 = vsel %vm18223_vm3, %v18214_v25, %v20686_v47  ;;  %v18865_v24 = vmax.f32 %v18704_v53, 0.0  ;;  %v28080_v38 = vpop.permute.xlu1 %20759 }
 0x48b   :  { %v18215_v10 = vsel %vm18173_vm2, %v18165_v42, %v20677_v33  ;;  %v20696_v60 = vunpack.i.l.bf16 %v27893_v20  ;;  %v18707_v45 = vadd.f32 %v27618_v51, %v28505_v27  ;;  %v20702_v21 = vunpack.i.h.bf16 %v27900_v50 }
 0x48c   :  { %v18265_v5 = vsel %vm18223_vm3, %v18215_v10, %v20687_v55  ;;  %v20701_v57 = vunpack.i.l.bf16 %v27900_v50  ;;  %19700 = vmatmul.mubr.msk.bf16.gmra.mrb[64].mxu0 %vm18541_vm10, %v18489_v58  ;;  %v20707_v36 = vunpack.i.h.bf16 %v27930_v54  ;;  %v20706_v2 = vunpack.i.l.bf16 %v27930_v54  ;;  %v74_v54 = vld [vmem:[%s28419_s0 + $0x1a8] sm:$0x3f] }
 0x48d   :  { %v18314_v35 = vsel %vm18273_vm4, %v18264_v41, %v20696_v60  ;;  %v18315_v18 = vsel %vm18273_vm4, %v18265_v5, %v20697_v13  ;;  %v18866_v20 = vmax.f32 %v18707_v45, 0.0  ;;  %v20712_v33 = vunpack.i.h.bf16 %v27933_v22 }
 0x48e   :  { %v18364_v44 = vsel %vm18323_vm5, %v18314_v35, %v20701_v57  ;;  %v18365_v50 = vsel %vm18323_vm5, %v18315_v18, %v20702_v21  ;;  %v20711_v52 = vunpack.i.l.bf16 %v27933_v22  ;;  %v20717_v40 = vunpack.i.h.bf16 %v27952_v34  ;;  %v28075_v22 = vpop.permute.xlu0 %20754 }
 0x48f   :  { %v28070_v32 = vpack.c.bf16 %v18866_v20, %v18865_v24  ;;  %v18414_v30 = vsel %vm18373_vm6, %v18364_v44, %v20706_v2  ;;  %v18415_v55 = vsel %vm18373_vm6, %v18365_v50, %v20707_v36  ;;  %v20716_v6 = vunpack.i.l.bf16 %v27952_v34  ;;  %v28108_v44 = vpop.permute.xlu1 %20769 }
 0x490   :  { %v18464_v12 = vsel %vm18423_vm9, %v18414_v30, %v20711_v52  ;;  %v18465_v47 = vsel %vm18423_vm9, %v18415_v55, %v20712_v33  ;;  %v929_v28 = vcombine.high %v73_v48, %v73_v48  ;;  %v936_v53 = vrot.slane %v73_v48, %v21405_v31 }
 0x491   :  { %v18493_v25 = vpack.c.bf16 %v18465_v47, %v18464_v12  ;;  %v946_v15 = vcombine.high %v74_v54, %v74_v54  ;;  %v953_v13 = vrot.slane %v74_v54, %v21405_v31  ;;  %v28085_v42 = vrot.slane %v28068_v11, %v21405_v31 }
 0x492   :  { %v943_v34 = vrot.slane %v929_v28, %v21405_v31  ;;  %v944_v58 = vcombine.high %v936_v53, %v936_v53  ;;  %v20722_v41 = vunpack.i.h.bf16 %v27957_v29  ;;  %v20721_v24 = vunpack.i.l.bf16 %v27957_v29  ;;  %v28102_v20 = vpop.permute.xlu0 %20764 }
 0x493   :  { %v960_v10 = vrot.slane %v946_v15, %v21405_v31  ;;  %v961_v60 = vcombine.high %v953_v13, %v953_v13  ;;  %19716 = vmatmul.mubr.msk.bf16.gmra.mrb[12].mxu1 %vm18541_vm10, %v18493_v25  ;;  %v20727_v27 = vunpack.i.h.bf16 %v27984_v16  ;;  %v20726_v45 = vunpack.i.l.bf16 %v27984_v16  ;;  %v28125_v25 = vld [vmem:[%s28419_s0 + $0x1c0] sm:$0xff] }
 0x494   :  { %v945_v21 = vcombine.high %v943_v34, %v943_v34  ;;  %v10065_v5 = vcombine.low %v936_v53, %v944_v58  ;;  %v20732_v57 = vunpack.i.h.bf16 %v27991_v8  ;;  %v20731_v36 = vunpack.i.l.bf16 %v27991_v8  ;;  %19719 = vmatprep.mubr.msk.bf16.mxu1 %vm21286_vm8, %v28454_v62 }
 0x495   :  { %v10082_v2 = vcombine.low %v953_v13, %v961_v60  ;;  %v10083_v29 = vcombine.low %v960_v10, %v28085_v42  ;;  %v18712_v35 = vadd.f32 %v27618_v51, %v27471_v4  ;;  %v20737_v18 = vunpack.i.h.bf16 %v28006_v37 }
 0x496   :  { %v10066_v16 = vcombine.low %v943_v34, %v945_v21  ;;  %v10073_v33 = vrot.slane %v10065_v5, %v21405_v31  ;;  %v20736_v48 = vunpack.i.l.bf16 %v28006_v37  ;;  %v18715_v8 = vadd.f32 %v27618_v51, %v27480_v0  ;;  %v76_v0 = vld [vmem:[%s28419_s0 + $0x1b8] sm:$0x3f]  ;;  %v28136_v60 = vpop.permute.xlu0 %20774 }
 0x497   :  { %v10090_v50 = vrot.slane %v10082_v2, %v21405_v31  ;;  %v10097_v52 = vrot.slane %v10083_v29, %v21405_v31  ;;  %v18867_v54 = vmax.f32 %v18712_v35, 0.0  ;;  %v20742_v4 = vunpack.i.h.bf16 %v28013_v1  ;;  %v28143_v29 = vpop.permute.xlu1 %20779 }
 0x498   :  { %v10080_v30 = vrot.slane %v10066_v16, %v21405_v31  ;;  %v18868_v55 = vmax.f32 %v18715_v8, 0.0  ;;  %v20741_v12 = vunpack.i.l.bf16 %v28013_v1  ;;  %v20747_v47 = vunpack.i.h.bf16 %v28036_v63 }
 0x499   :  { %v10098_v51 = vcombine.low %v10090_v50, %v10097_v52  ;;  %v20746_v37 = vunpack.i.l.bf16 %v28036_v63  ;;  %v20752_v28 = vunpack.i.h.bf16 %v28040_v26  ;;  %v20751_v53 = vunpack.i.l.bf16 %v28040_v26 }
 0x49a   :  { %v10081_v15 = vcombine.low %v10073_v33, %v10080_v30  ;;  %v28127_v1 = vpack.c.bf16 %v18868_v55, %v18867_v54  ;;  %v20757_v13 = vunpack.i.h.bf16 %v28075_v22  ;;  %v20756_v34 = vunpack.i.l.bf16 %v28075_v22 }
 0x49b   :  { %v18117_v58 = vsel %vm18073_vm0, %v10098_v51, %v20717_v40  ;;  %v962_v63 = vcombine.high %v28068_v11, %v28068_v11  ;;  %v977_v26 = vcombine.high %v28085_v42, %v28085_v42  ;;  %v979_v10 = vcombine.high %v76_v0, %v76_v0 }
 0x49c   :  { %v18116_v21 = vsel %vm18073_vm0, %v10081_v15, %v20716_v6  ;;  %v18167_v5 = vsel %vm18123_vm1, %v18117_v58, %v20722_v41  ;;  %v986_v2 = vrot.slane %v76_v0, %v21405_v31  ;;  %v1002_v22 = vrot.slane %v28125_v25, %v21405_v31 }
 0x49d   :  { %v18166_v40 = vsel %vm18123_vm1, %v18116_v21, %v20721_v24  ;;  %v18217_v11 = vsel %vm18173_vm2, %v18167_v5, %v20727_v27  ;;  %v976_v42 = vrot.slane %v962_v63, %v21405_v31  ;;  %v993_v35 = vrot.slane %v979_v10, %v21405_v31  ;;  %v20785_v10 = vpop.permute.xlu0 %20784 }
 0x49e   :  { %v18216_v6 = vsel %vm18173_vm2, %v18166_v40, %v20726_v45  ;;  %v18267_v41 = vsel %vm18223_vm3, %v18217_v11, %v20732_v57  ;;  %v994_v33 = vcombine.high %v986_v2, %v986_v2  ;;  %v1010_v8 = vcombine.high %v1002_v22, %v1002_v22 }
 0x49f   :  { %v18266_v52 = vsel %vm18223_vm3, %v18216_v6, %v20731_v36  ;;  %v18317_v54 = vsel %vm18273_vm4, %v18267_v41, %v20737_v18  ;;  %v978_v24 = vcombine.high %v976_v42, %v976_v42  ;;  %v10099_v30 = vcombine.low %v977_v26, %v976_v42 }
 0x4a0   :  { %v18316_v55 = vsel %vm18273_vm4, %v18266_v52, %v20736_v48  ;;  %v18367_v0 = vsel %vm18323_vm5, %v18317_v54, %v20742_v4  ;;  %v10116_v51 = vcombine.low %v994_v33, %v993_v35  ;;  %v10117_v15 = vcombine.low %v1002_v22, %v1010_v8  ;;  %v20790_v4 = vpop.permute.xlu1 %20789 }
 0x4a1   :  { %v28149_v16 = vpop.f32.mrb[52].mxu0  ;;  %v18366_v57 = vsel %vm18323_vm5, %v18316_v55, %v20741_v12  ;;  %v18417_v58 = vsel %vm18373_vm6, %v18367_v0, %v20747_v47  ;;  %v10100_v63 = vcombine.low %v978_v24, %v986_v2  ;;  %v10107_v36 = vrot.slane %v10099_v30, %v21405_v31  ;;  %v28190_v54 = vpop.permute.xlu0 %20794 }
 0x4a2   :  { %v19689_v50 = vpop.f32.mrb[53].mxu0  ;;  %v18416_v18 = vsel %vm18373_vm6, %v18366_v57, %v20746_v37  ;;  %v18467_v26 = vsel %vm18423_vm9, %v18417_v58, %v20752_v28  ;;  %v10124_v21 = vrot.slane %v10116_v51, %v21405_v31  ;;  %v10131_v48 = vrot.slane %v10117_v15, %v21405_v31  ;;  %v78_v58 = vld [vmem:[%s28419_s0 + $0x1c8] sm:$0x3f] }
 0x4a3   :  { %v28155_v27 = vpop.f32.mrb[54].mxu0  ;;  %v18466_v5 = vsel %vm18423_vm9, %v18416_v18, %v20751_v53  ;;  %v10114_v22 = vrot.slane %v10100_v63, %v21405_v31  ;;  %v20762_v12 = vunpack.i.h.bf16 %v28080_v38  ;;  %v20761_v47 = vunpack.i.l.bf16 %v28080_v38  ;;  %v28177_v53 = vld [vmem:[%s28421_s2] ss:$0 sm:$0xff]  ;;  %v79_v18 = vld [vmem:[%s28419_s0 + $0x1d0] sm:$0xff] }
 0x4a4   :  { %v19690_v45 = vpop.f32.mrb[55].mxu0  ;;  %v18494_v2 = vpack.c.bf16 %v18467_v26, %v18466_v5  ;;  %v10132_v40 = vcombine.low %v10124_v21, %v10131_v48  ;;  %v20767_v11 = vunpack.i.h.bf16 %v28102_v20  ;;  %v20766_v37 = vunpack.i.l.bf16 %v28102_v20 }
 0x4a5   :  { %v10115_v28 = vcombine.low %v10107_v36, %v10114_v22  ;;  %v20772_v42 = vunpack.i.h.bf16 %v28108_v44  ;;  %v20771_v35 = vunpack.i.l.bf16 %v28108_v44  ;;  %v18720_v6 = vadd.f32 %v28177_v53, %v27536_v17 }
 0x4a6   :  { %v18119_v38 = vsel %vm18073_vm0, %v10132_v40, %v20757_v13  ;;  %19720 = vmatmul.mubr.msk.bf16.gmra.mrb[16].mxu1 %vm18541_vm10, %v18494_v2  ;;  %v20777_v41 = vunpack.i.h.bf16 %v28136_v60  ;;  %v20776_v20 = vunpack.i.l.bf16 %v28136_v60  ;;  %v18723_v33 = vadd.f32 %v28177_v53, %v27556_v19  ;;  %v28197_v19 = vpop.permute.xlu1 %20799 }
 0x4a7   :  { %v18118_v44 = vsel %vm18073_vm0, %v10115_v28, %v20756_v34  ;;  %v18169_v8 = vsel %vm18123_vm1, %v18119_v38, %v20762_v12  ;;  %v18869_v50 = vmax.f32 %v18720_v6, 0.0  ;;  %v20782_v52 = vunpack.i.h.bf16 %v28143_v29  ;;  %19723 = vmatprep.mubr.msk.bf16.mxu1 %vm21286_vm8, %v28454_v62 }
 0x4a8   :  { %v18168_v17 = vsel %vm18123_vm1, %v18118_v44, %v20761_v47  ;;  %v18219_v13 = vsel %vm18173_vm2, %v18169_v8, %v20767_v11  ;;  %v18870_v60 = vmax.f32 %v18723_v33, 0.0  ;;  %v20781_v24 = vunpack.i.l.bf16 %v28143_v29  ;;  %v20805_v47 = vpop.permute.xlu0 %20804 }
 0x4a9   :  { %v18218_v34 = vsel %vm18173_vm2, %v18168_v17, %v20766_v37  ;;  %v18269_v30 = vsel %vm18223_vm3, %v18219_v13, %v20772_v42  ;;  %v20787_v55 = vunpack.i.h.bf16 %v20785_v10  ;;  %v20786_v0 = vunpack.i.l.bf16 %v20785_v10 }
 0x4aa   :  { %v18268_v51 = vsel %vm18223_vm3, %v18218_v34, %v20771_v35  ;;  %v18319_v15 = vsel %vm18273_vm4, %v18269_v30, %v20777_v41  ;;  %v19770_v45 = vpack.c.bf16 %v18870_v60, %v18869_v50  ;;  %v20792_v57 = vunpack.i.h.bf16 %v20790_v4  ;;  %v20810_v28 = vpop.permute.xlu1 %20809 }
 0x4ab   :  { %v18318_v29 = vsel %vm18273_vm4, %v18268_v51, %v20776_v20  ;;  %v18369_v63 = vsel %vm18323_vm5, %v18319_v15, %v20782_v52  ;;  %v20791_v36 = vunpack.i.l.bf16 %v20790_v4  ;;  %v995_v21 = vcombine.high %v28125_v25, %v28125_v25  ;;  %v28506_v4 = vld [vmem:[#allocation6_spill] sm:$0xff] }
 0x4ac   :  { %v18368_v10 = vsel %vm18323_vm5, %v18318_v29, %v20781_v24  ;;  %v18419_v26 = vsel %vm18373_vm6, %v18369_v63, %v20787_v55  ;;  %19771 = vmatprep.subr.bf16.mxu1 %v19770_v45  ;;  %v1012_v22 = vcombine.high %v78_v58, %v78_v58  ;;  %v1019_v12 = vrot.slane %v78_v58, %v21405_v31  ;;  %v20815_v34 = vpop.permute.xlu0 %20814 }
 0x4ad   :  { %v18418_v48 = vsel %vm18373_vm6, %v18368_v10, %v20786_v0  ;;  %v18469_v5 = vsel %vm18423_vm9, %v18419_v26, %v20792_v57  ;;  %19773 = vmatpush3.bf16.msra.mxu1 %v28506_v4  ;;  %v1009_v40 = vrot.slane %v995_v21, %v21405_v31  ;;  %v1028_v11 = vcombine.high %v79_v18, %v79_v18 }
 0x4ae   :  { %v18468_v2 = vsel %vm18423_vm9, %v18418_v48, %v20791_v36  ;;  %v1035_v37 = vrot.slane %v79_v18, %v21405_v31  ;;  %v1026_v25 = vrot.slane %v1012_v22, %v21405_v31  ;;  %v1027_v35 = vcombine.high %v1019_v12, %v1019_v12  ;;  %v20820_v51 = vpop.permute.xlu1 %20819 }
 0x4af   :  { %v18495_v42 = vpack.c.bf16 %v18469_v5, %v18468_v2  ;;  %v1011_v6 = vcombine.high %v1009_v40, %v1009_v40  ;;  %v28224_v38 = vrot.slane %v1028_v11, %v21405_v31  ;;  %v20797_v44 = vunpack.i.h.bf16 %v28190_v54 }
 0x4b0   :  { %v1043_v41 = vcombine.high %v1035_v37, %v1035_v37  ;;  %v10134_v20 = vcombine.low %v1019_v12, %v1027_v35  ;;  %v10150_v33 = vcombine.low %v1026_v25, %v1035_v37  ;;  %v20796_v8 = vunpack.i.l.bf16 %v28190_v54 }
 0x4b1   :  { %19724 = vmatmul.mubr.msk.bf16.gmra.mrb[20].mxu1 %vm18541_vm10, %v18495_v42  ;;  %v10133_v50 = vcombine.low %v1009_v40, %v1011_v6  ;;  %v20802_v60 = vunpack.i.h.bf16 %v28197_v19  ;;  %v18728_v24 = vadd.f32 %v28177_v53, %v27647_v46  ;;  %v20801_v55 = vunpack.i.l.bf16 %v28197_v19  ;;  %v80_v46 = vld [vmem:[%s28419_s0 + $0x1d8] sm:$0x3f] }
 0x4b2   :  { %v10151_v52 = vcombine.low %v1043_v41, %v28224_v38  ;;  %19727 = vmatprep.mubr.msk.bf16.mxu1 %vm21286_vm8, %v28454_v62  ;;  %v10148_v17 = vrot.slane %v10134_v20, %v21405_v31  ;;  %v10158_v13 = vrot.slane %v10150_v33, %v21405_v31  ;;  %v18731_v0 = vadd.f32 %v28177_v53, %v27664_v9  ;;  %v28507_v6 = vld [vmem:[#allocation7_spill] sm:$0xff] }
 0x4b3   :  { %v10141_v30 = vrot.slane %v10133_v50, %v21405_v31  ;;  %v20807_v15 = vunpack.i.h.bf16 %v20805_v47  ;;  %v20806_v45 = vunpack.i.l.bf16 %v20805_v47  ;;  %v20812_v57 = vunpack.i.h.bf16 %v20810_v28 }
 0x4b4   :  { %v10165_v54 = vrot.slane %v10151_v52, %v21405_v31  ;;  %v20811_v58 = vunpack.i.l.bf16 %v20810_v28  ;;  %v18871_v36 = vmax.f32 %v18728_v24, 0.0  ;;  %v18872_v18 = vmax.f32 %v18731_v0, 0.0 }
 0x4b5   :  { %v10149_v29 = vcombine.low %v10141_v30, %v10148_v17  ;;  %v20817_v10 = vunpack.i.h.bf16 %v20815_v34  ;;  %v20816_v26 = vunpack.i.l.bf16 %v20815_v34  ;;  %v20822_v21 = vunpack.i.h.bf16 %v20820_v51 }
 0x4b6   :  { %v10166_v63 = vcombine.low %v10158_v13, %v10165_v54  ;;  %v18736_v19 = vadd.f32 %v28177_v53, %v27742_v39  ;;  %v19774_v5 = vpack.c.bf16 %v18872_v18, %v18871_v36  ;;  %v18739_v22 = vadd.f32 %v28177_v53, %v27764_v7 }
 0x4b7   :  { %v18120_v9 = vsel %vm18073_vm0, %v10149_v29, %v20796_v8  ;;  %v20821_v47 = vunpack.i.l.bf16 %v20820_v51  ;;  %v1045_v40 = vcombine.high %v80_v46, %v80_v46  ;;  %v18744_v28 = vadd.f32 %v28177_v53, %v27852_v61 }
 0x4b8   :  { %v18121_v48 = vsel %vm18073_vm0, %v10166_v63, %v20797_v44  ;;  %v18170_v12 = vsel %vm18123_vm1, %v18120_v9, %v20801_v55  ;;  %19775 = vmatprep.subr.bf16.mxu1 %v19774_v5  ;;  %v1044_v35 = vcombine.high %v28224_v38, %v28224_v38  ;;  %v18873_v33 = vmax.f32 %v18736_v19, 0.0 }
 0x4b9   :  { %v18171_v4 = vsel %vm18123_vm1, %v18121_v48, %v20802_v60  ;;  %v18220_v11 = vsel %vm18173_vm2, %v18170_v12, %v20806_v45  ;;  %19777 = vmatpush3.bf16.msra.mxu1 %v28507_v6  ;;  %v18874_v44 = vmax.f32 %v18739_v22, 0.0  ;;  %v1052_v50 = vrot.slane %v80_v46, %v21405_v31 }
 0x4ba   :  { %v20825_v2 = vpop.permute.xlu0 %20824  ;;  %v18221_v37 = vsel %vm18173_vm2, %v18171_v4, %v20807_v15  ;;  %v18270_v42 = vsel %vm18223_vm3, %v18220_v11, %v20811_v58  ;;  %v1059_v52 = vrot.slane %v1045_v40, %v21405_v31  ;;  %v18875_v38 = vmax.f32 %v18744_v28, 0.0 }
 0x4bb   :  { %v20826_v39 = vunpack.i.l.bf16 %v20825_v2  ;;  %v18271_v7 = vsel %vm18223_vm3, %v18221_v37, %v20812_v57  ;;  %v20827_v25 = vunpack.i.h.bf16 %v20825_v2  ;;  %v18320_v41 = vsel %vm18273_vm4, %v18270_v42, %v20816_v26 }
 0x4bc   :  { %v18321_v20 = vsel %vm18273_vm4, %v18271_v7, %v20817_v10  ;;  %v18370_v8 = vsel %vm18323_vm5, %v18320_v41, %v20821_v47  ;;  %v19778_v13 = vpack.c.bf16 %v18874_v44, %v18873_v33  ;;  %v18747_v60 = vadd.f32 %v28177_v53, %v27861_v59 }
 0x4bd   :  { %v18371_v61 = vsel %vm18323_vm5, %v18321_v20, %v20822_v21  ;;  %v18420_v17 = vsel %vm18373_vm6, %v18370_v8, %v20826_v39  ;;  %v18752_v30 = vadd.f32 %v28177_v53, %v27871_v56  ;;  %v18755_v54 = vadd.f32 %v28177_v53, %v27884_v49  ;;  %v18902_v8 = vld [vmem:[%s28422_s3] sm:$0xff] }
 0x4be   :  { %v18421_v24 = vsel %vm18373_vm6, %v18371_v61, %v20827_v25  ;;  %v18760_v55 = vadd.f32 %v28177_v53, %v28149_v16  ;;  %19779 = vmatprep.subr.bf16.mxu1 %v19778_v13  ;;  %v18876_v15 = vmax.f32 %v18747_v60, 0.0  ;;  %v18763_v45 = vadd.f32 %v28177_v53, %v28155_v27 }
 0x4bf   :  { %v1060_v59 = vcombine.high %v1052_v50, %v1052_v50  ;;  %19781 = vmatpush3.bf16.msra.mxu1 %v27636_v14  ;;  %v18877_v57 = vmax.f32 %v18752_v30, 0.0  ;;  %v18878_v58 = vmax.f32 %v18755_v54, 0.0  ;;  %v10167_v10 = vcombine.low %v1044_v35, %v1052_v50 }
 0x4c0   :  { %v20830_v34 = vpop.permute.xlu1 %20829  ;;  %v18879_v29 = vmax.f32 %v18760_v55, 0.0  ;;  %v19782_v63 = vpack.c.bf16 %v18876_v15, %v18875_v38  ;;  %v18880_v36 = vmax.f32 %v18763_v45, 0.0  ;;  %v18911_v61 = vrot.slane %v18902_v8, %v21405_v31 }
 0x4c1   :  { %v20832_v0 = vunpack.i.h.bf16 %v20830_v34  ;;  %v20831_v51 = vunpack.i.l.bf16 %v20830_v34  ;;  %v19786_v18 = vpack.c.bf16 %v18878_v58, %v18877_v57  ;;  %v10168_v26 = vcombine.low %v1060_v59, %v1059_v52 }
 0x4c2   :  { %19783 = vmatprep.subr.bf16.mxu1 %v19782_v63  ;;  %v19790_v46 = vpack.c.bf16 %v18880_v36, %v18879_v29  ;;  %v10175_v27 = vrot.slane %v10167_v10, %v21405_v31  ;;  %v18919_v50 = vcombine.high %v18911_v61, %v18911_v61 }
 0x4c3   :  { %v18470_v56 = vsel %vm18423_vm9, %v18420_v17, %v20831_v51  ;;  %v18471_v49 = vsel %vm18423_vm9, %v18421_v24, %v20832_v0  ;;  %19785 = vmatpush3.bf16.msra.mxu1 %v27845_v23  ;;  %v11163_v14 = vpop.permute.xlu0 %11162  ;;  %v10182_v21 = vrot.slane %v10168_v26, %v21405_v31 }
 0x4c4   :  { %v18496_v16 = vpack.c.bf16 %v18471_v49, %v18470_v56  ;;  %19787 = vmatprep.subr.bf16.mxu1 %v19786_v18  ;;  %v12143_v9 = vpop.permute.xlu1 %12142 }
 0x4c5   :  { %v10183_v19 = vcombine.low %v10175_v27, %v10182_v21  ;;  %v21287_v21 = vmov 0.0|0.0  }
 0x4c6   :  { %19728 = vmatmul.mubr.msk.bf16.gmra.mrb[24].mxu1 %vm18541_vm10, %v18496_v16  ;;  %v18904_v16 = vcombine.high %v18902_v8, %v18902_v8 }
 0x4c7   :  { %19731 = vmatprep.mubr.msk.bf16.mxu1 %vm21286_vm8, %v28454_v62  ;;  %19789 = vmatpush3.bf16.msra.mxu1 %v27939_v3  ;;  %v18122_v23 = vsel %vm18073_vm0, %v10183_v19, %v11163_v14 }
 0x4c8   :  { %19791 = vmatprep.subr.bf16.mxu1 %v19790_v46  ;;  %v18172_v3 = vsel %vm18123_vm1, %v18122_v23, %v12143_v9  ;;  %v28316_v26 = vrot.slane %v18904_v16, %v21405_v31 }
 0x4ca   :  { %v13123_v5 = vpop.permute.xlu0 %13122  ;;  %v18920_v27 = vcombine.high %v28316_v26, %v28316_v26 }
 0x4cb   :  { %19793 = vmatpush3.bf16.msra.mxu1 %v28008_v43  ;;  %v18222_v39 = vsel %vm18173_vm2, %v18172_v3, %v13123_v5 }
 0x4cc   :  { %v14103_v40 = vpop.permute.xlu1 %14102 }
 0x4cd   :  { %v18272_v42 = vsel %vm18223_vm3, %v18222_v39, %v14103_v40 }
 0x4ce   :  { %v18791_v48 = vpop.f32.mrb[0].mxu1 }
 0x4cf   :  { %v18792_v22 = vadd.f32 %v28177_v53, %v18791_v48  ;;  %v19705_v12 = vpop.f32.mrb[1].mxu1 }
 0x4d0   :  { %v18794_v4 = vpop.f32.mrb[2].mxu1 }
 0x4d1   :  { %v18795_v47 = vadd.f32 %v28177_v53, %v18794_v4  ;;  %v19706_v2 = vpop.f32.mrb[3].mxu1  ;;  %v18887_v11 = vmax.f32 %v18792_v22, 0.0  ;;  %v15083_v28 = vpop.permute.xlu0 %15082 }
 0x4d2   :  { %v18322_v7 = vsel %vm18273_vm4, %v18272_v42, %v15083_v28  ;;  %v16063_v25 = vpop.permute.xlu1 %16062 }
 0x4d3   :  { %v18888_v37 = vmax.f32 %v18795_v47, 0.0  ;;  %v18372_v6 = vsel %vm18323_vm5, %v18322_v7, %v16063_v25 }
 0x4d5   :  { %v28296_v43 = vpack.c.bf16 %v18888_v37, %v18887_v11 }
 0x4dc   :  { %v17043_v35 = vpop.permute.xlu0 %17042 }
 0x4dd   :  { %v18422_v41 = vsel %vm18373_vm6, %v18372_v6, %v17043_v35 }
 0x4df   :  { %v18023_v20 = vpop.permute.xlu1 %18022 }
 0x4e0   :  { %v18472_v33 = vsel %vm18423_vm9, %v18422_v41, %v18023_v20 }
 0x4e1   :  { %v18497_v44 = vpack.c.bf16 %v18472_v33, %v18472_v33 }
 0x4e3   :  { %19732 = vmatmul.mubr.msk.bf16.gmra.mrb[28].mxu1 %vm18541_vm10, %v18497_v44 }
 0x4e4   :  { %18990 = vmatprep.mubr.f32.mxu1 %v18919_v50 }
 0x4fd   :  { %v18767_v52 = vpop.f32.mrb[56].mxu0 }
 0x4fe   :  { %v18768_v17 = vadd.f32 %v28177_v53, %v18767_v52  ;;  %v19693_v13 = vpop.f32.mrb[57].mxu0 }
 0x4ff   :  { %v18770_v38 = vpop.f32.mrb[58].mxu0 }
 0x500   :  { %v18771_v60 = vadd.f32 %v28177_v53, %v18770_v38  ;;  %v19694_v24 = vpop.f32.mrb[59].mxu0  ;;  %v18881_v34 = vmax.f32 %v18768_v17, 0.0 }
 0x502   :  { %v18882_v30 = vmax.f32 %v18771_v60, 0.0 }
 0x504   :  { %v19794_v54 = vpack.c.bf16 %v18882_v30, %v18881_v34 }
 0x506   :  { %19795 = vmatprep.subr.bf16.mxu1 %v19794_v54 }
 0x507   :  { %19797 = vmatpush3.bf16.msra.mxu1 %v28070_v32 }
 0x529   :  { %v18799_v55 = vpop.f32.mrb[4].mxu1 }
 0x52a   :  { %v18800_v0 = vadd.f32 %v28177_v53, %v18799_v55  ;;  %v19709_v51 = vpop.f32.mrb[5].mxu1 }
 0x52b   :  { %v18802_v15 = vpop.f32.mrb[6].mxu1 }
 0x52c   :  { %v18803_v45 = vadd.f32 %v28177_v53, %v18802_v15  ;;  %v19710_v59 = vpop.f32.mrb[7].mxu1  ;;  %v18889_v57 = vmax.f32 %v18800_v0, 0.0 }
 0x52e   :  { %v18890_v58 = vmax.f32 %v18803_v45, 0.0 }
 0x530   :  { %v19809_v29 = vpack.c.bf16 %v18890_v58, %v18889_v57 }
 0x543   :  { %v18775_v56 = vpop.f32.mrb[60].mxu0 }
 0x544   :  { %v18776_v49 = vadd.f32 %v28177_v53, %v18775_v56  ;;  %v19697_v63 = vpop.f32.mrb[61].mxu0 }
 0x545   :  { %v18778_v36 = vpop.f32.mrb[62].mxu0 }
 0x546   :  { %v18779_v18 = vadd.f32 %v28177_v53, %v18778_v36  ;;  %v19698_v32 = vpop.f32.mrb[63].mxu0  ;;  %v18883_v46 = vmax.f32 %v18776_v49, 0.0 }
 0x547   :  { %v19066_v32 = vld [vmem:[%s28423_s4] sm:$0xff] }
 0x548   :  { %v18884_v10 = vmax.f32 %v18779_v18, 0.0 }
 0x54a   :  { %v19798_v14 = vpack.c.bf16 %v18884_v10, %v18883_v46  ;;  %v19067_v46 = vld [vmem:[%s28423_s4 + $0x8] sm:$0xff] }
 0x54c   :  { %19799 = vmatprep.subr.bf16.mxu1 %v19798_v14 }
 0x54d   :  { %19801 = vmatpush3.bf16.msra.mxu1 %v28127_v1 }
 0x54e   :  { %19802 = vmatprep.subr.bf16.mxu1 %v21287_v21 }
 0x550   :  { %v18807_v19 = vpop.f32.mrb[8].mxu1  ;;  %18991 = vmatmul.mubr.f32.vlgmr.msra.gmra.mrb[32].mxu1 %v18911_v61 }
 0x551   :  { %v18808_v9 = vadd.f32 %v28177_v53, %v18807_v19  ;;  %v19713_v48 = vpop.f32.mrb[9].mxu1  ;;  %19541 = vmatprep.mubr.msk.f32.mxu1 %vm18073_vm0, %v18920_v27 }
 0x552   :  { %v18810_v5 = vpop.f32.mrb[10].mxu1  ;;  %v19827_v48 = vpack.c.bf16 %v19067_v46, %v19066_v32 }
 0x553   :  { %v18811_v31 = vadd.f32 %v28177_v53, %v18810_v5  ;;  %v19714_v22 = vpop.f32.mrb[11].mxu1  ;;  %v18891_v12 = vmax.f32 %v18808_v9, 0.0  ;;  %v19068_v5 = vld [vmem:[%s28423_s4 + $0x10] sm:$0xff] }
 0x554   :  { %v19070_v22 = vld [vmem:[%s28423_s4 + $0x20] sm:$0xff] }
 0x555   :  { %v18892_v4 = vmax.f32 %v18811_v31, 0.0  ;;  %v19069_v31 = vld [vmem:[%s28423_s4 + $0x18] sm:$0xff] }
 0x557   :  { %v19812_v1 = vpack.c.bf16 %v18892_v4, %v18891_v12  ;;  %v19071_v12 = vld [vmem:[%s28423_s4 + $0x28] sm:$0xff] }
 0x558   :  { %v19833_v4 = vpack.c.bf16 %v19071_v12, %v19070_v22 }
 0x55f   :  { %v18783_v23 = vpop.f32.mrb[64].mxu0 }
 0x560   :  { %v18784_v47 = vadd.f32 %v28177_v53, %v18783_v23  ;;  %v19701_v2 = vpop.f32.mrb[65].mxu0  ;;  %v19074_v23 = vld [vmem:[%s28423_s4 + $0x40] sm:$0xff] }
 0x561   :  { %v18786_v40 = vpop.f32.mrb[66].mxu0 }
 0x562   :  { %v18787_v11 = vadd.f32 %v28177_v53, %v18786_v40  ;;  %v19702_v37 = vpop.f32.mrb[67].mxu0  ;;  %v18885_v3 = vmax.f32 %v18784_v47, 0.0  ;;  %v19075_v47 = vld [vmem:[%s28423_s4 + $0x48] sm:$0xff]  ;;  %v19076_v40 = vld [vmem:[%s28423_s4 + $0x50] sm:$0xff] }
 0x563   :  { %v19839_v2 = vpack.c.bf16 %v19075_v47, %v19074_v23 }
 0x564   :  { %v18886_v39 = vmax.f32 %v18787_v11, 0.0  ;;  %v19077_v11 = vld [vmem:[%s28423_s4 + $0x58] sm:$0xff] }
 0x565   :  { %v19842_v37 = vpack.c.bf16 %v19077_v11, %v19076_v40 }
 0x566   :  { %v19803_v28 = vpack.c.bf16 %v18886_v39, %v18885_v3  ;;  %v18815_v42 = vpop.f32.mrb[12].mxu1  ;;  %v19078_v3 = vld [vmem:[%s28423_s4 + $0x60] sm:$0xff]  ;;  %v19079_v39 = vld [vmem:[%s28423_s4 + $0x68] sm:$0xff] }
 0x567   :  { %v18816_v7 = vadd.f32 %v28177_v53, %v18815_v42  ;;  %v19717_v25 = vpop.f32.mrb[13].mxu1  ;;  %v19080_v42 = vld [vmem:[%s28423_s4 + $0x70] sm:$0xff] }
 0x568   :  { %19804 = vmatpush1.bf16.msra.mxu1 %v19803_v28  ;;  %v18818_v35 = vpop.f32.mrb[14].mxu1  ;;  %v19845_v28 = vpack.c.bf16 %v19079_v39, %v19078_v3 }
 0x569   :  { %v18819_v6 = vadd.f32 %v28177_v53, %v18818_v35  ;;  %v19718_v41 = vpop.f32.mrb[15].mxu1  ;;  %19805 = vmatprep.subr.bf16.mxu1 %v21287_v21  ;;  %v18893_v20 = vmax.f32 %v18816_v7, 0.0  ;;  %v19081_v7 = vld [vmem:[%s28423_s4 + $0x78] sm:$0xff] }
 0x56a   :  { %v19848_v25 = vpack.c.bf16 %v19081_v7, %v19080_v42 }
 0x56b   :  { %v18894_v33 = vmax.f32 %v18819_v6, 0.0 }
 0x56c   :  { %19807 = vmatpush1.bf16.msra.mxu1 %v28296_v43 }
 0x56d   :  { %v19815_v44 = vpack.c.bf16 %v18894_v33, %v18893_v20  ;;  %19808 = vmatprep.subr.bf16.mxu1 %v21287_v21 }
 0x570   :  { %19810 = vmatpush1.bf16.msra.mxu1 %v19809_v29 }
 0x571   :  { %19811 = vmatprep.subr.bf16.mxu1 %v21287_v21 }
 0x574   :  { %19813 = vmatpush1.bf16.msra.mxu1 %v19812_v1 }
 0x575   :  { %19814 = vmatprep.subr.bf16.mxu1 %v21287_v21 }
 0x578   :  { %19816 = vmatpush1.bf16.msra.mxu1 %v19815_v44 }
 0x579   :  { %v18823_v8 = vpop.f32.mrb[16].mxu1  ;;  %19817 = vmatprep.subr.bf16.mxu1 %v21287_v21 }
 0x57a   :  { %v18824_v61 = vadd.f32 %v28177_v53, %v18823_v8  ;;  %v19721_v50 = vpop.f32.mrb[17].mxu1 }
 0x57b   :  { %v18826_v52 = vpop.f32.mrb[18].mxu1 }
 0x57c   :  { %v18827_v17 = vadd.f32 %v28177_v53, %v18826_v52  ;;  %v19722_v43 = vpop.f32.mrb[19].mxu1  ;;  %v18895_v13 = vmax.f32 %v18824_v61, 0.0 }
 0x57e   :  { %v18896_v38 = vmax.f32 %v18827_v17, 0.0 }
 0x580   :  { %v19818_v60 = vpack.c.bf16 %v18896_v38, %v18895_v13 }
 0x582   :  { %19819 = vmatpush1.bf16.msra.mxu1 %v19818_v60 }
 0x583   :  { %19820 = vmatprep.subr.bf16.mxu1 %v21287_v21 }
 0x584   :  { %v18831_v24 = vpop.f32.mrb[20].mxu1 }
 0x585   :  { %v18832_v34 = vadd.f32 %v28177_v53, %v18831_v24  ;;  %v19725_v30 = vpop.f32.mrb[21].mxu1 }
 0x586   :  { %v18834_v54 = vpop.f32.mrb[22].mxu1 }
 0x587   :  { %v18835_v55 = vadd.f32 %v28177_v53, %v18834_v54  ;;  %v19726_v0 = vpop.f32.mrb[23].mxu1  ;;  %v18897_v51 = vmax.f32 %v18832_v34, 0.0 }
 0x589   :  { %v18898_v15 = vmax.f32 %v18835_v55, 0.0 }
 0x58b   :  { %v19821_v45 = vpack.c.bf16 %v18898_v15, %v18897_v51 }
 0x58d   :  { %19822 = vmatpush1.bf16.msra.mxu1 %v19821_v45 }
 0x58e   :  { %19823 = vmatprep.subr.bf16.mxu1 %v21287_v21 }
 0x599   :  { %v18839_v59 = vpop.f32.mrb[24].mxu1 }
 0x59a   :  { %v18840_v57 = vadd.f32 %v28177_v53, %v18839_v59  ;;  %v19729_v58 = vpop.f32.mrb[25].mxu1 }
 0x59b   :  { %v18842_v29 = vpop.f32.mrb[26].mxu1 }
 0x59c   :  { %v18843_v56 = vadd.f32 %v28177_v53, %v18842_v29  ;;  %v19730_v49 = vpop.f32.mrb[27].mxu1  ;;  %v18899_v63 = vmax.f32 %v18840_v57, 0.0 }
 0x59e   :  { %v18900_v36 = vmax.f32 %v18843_v56, 0.0 }
 0x5a0   :  { %v19824_v16 = vpack.c.bf16 %v18900_v36, %v18899_v63 }
 0x5a2   :  { %19825 = vmatpush1.bf16.msra.mxu1 %v19824_v16 }
 0x5a3   :  { %19028 = vmatprep.subr.mxu1 %v28454_v62 }
 0x5b6   :  { %v18847_v18 = vpop.f32.mrb[28].mxu1 }
 0x5b7   :  { %v18848_v10 = vadd.f32 %v28177_v53, %v18847_v18  ;;  %v19733_v14 = vpop.f32.mrb[29].mxu1  ;;  %v19830_v53 = vpack.c.bf16 %v19069_v31, %v19068_v5 }
 0x5b8   :  { %v18850_v27 = vpop.f32.mrb[30].mxu1 }
 0x5b9   :  { %v18901_v19 = vmax.f32 %v18848_v10, 0.0  ;;  %v19734_v9 = vpop.f32.mrb[31].mxu1 }
 0x5bb   :  { %19029 = vmatpush1.msra.mxu1 %v18901_v19 }
 0x5bc   :  { %19061 = vmatmul.mubr.f32.vlgmr.msra.gmra.mrb[34].mxu1 %v28316_v26  ;;  %19826 = vmatprep.subr.bf16.mxu1 %v21287_v21  ;;  %v19072_v26 = vld [vmem:[%s28423_s4 + $0x30] sm:$0xff] }
 0x5bd   :  { %19828 = vmatpush3.bf16.msra.mxu1 %v19827_v48  ;;  %19767 = vmatprep.mubr.msk.f32.mxu1 %vm21286_vm8, %v28454_v62  ;;  %v19073_v62 = vld [vmem:[%s28423_s4 + $0x38] sm:$0xff]  ;;  %s21252_s4 = scalar_lea.vmem %s19167_s29, 32 }
 0x5be   :  { %19829 = vmatprep.subr.bf16.mxu1 %v21287_v21  ;;  %v19836_v1 = vpack.c.bf16 %v19073_v62, %v19072_v26  ;;  %p21253_p0 = scmp.ne.s32.totalorder %s19167_s29, %s21252_s4  ;;  %p21258_p2 = scmp.lt.s32.totalorder %s21252_s4, %s21252_s4 }
 0x5c0   :  { %p21259_p3 = por %p21258_p2, %p21257_p1 }
 0x5c1   :  { %19831 = vmatpush3.bf16.msra.mxu1 %v19830_v53 }
 0x5c2   :  { %19832 = vmatprep.subr.bf16.mxu1 %v21287_v21  ;;  %p21260_p4 = pnand %p21259_p3, %p21253_p0 }
 0x5c5   :  { %19834 = vmatpush3.bf16.msra.mxu1 %v19833_v4 }
 0x5c6   :  { %19835 = vmatprep.subr.bf16.mxu1 %v21287_v21 }
 0x5c9   :  { %19837 = vmatpush3.bf16.msra.mxu1 %v19836_v1 }
 0x5ca   :  { %19838 = vmatprep.subr.bf16.mxu1 %v21287_v21 }
 0x5cd   :  { %19840 = vmatpush3.bf16.msra.mxu1 %v19839_v2 }
 0x5ce   :  { %19841 = vmatprep.subr.bf16.mxu1 %v21287_v21 }
 0x5d1   :  { %19843 = vmatpush3.bf16.msra.mxu1 %v19842_v37 }
 0x5d2   :  { %19844 = vmatprep.subr.bf16.mxu1 %v21287_v21 }
 0x5d5   :  { %19846 = vmatpush3.bf16.msra.mxu1 %v19845_v28 }
 0x5d6   :  { %19847 = vmatprep.subr.bf16.mxu1 %v21287_v21  ;;  %v19542_v21 = vld [vmem:[%s28424_s5] ss:$0 sm:$0xff] }
 0x5d9   :  { %19849 = vmatpush3.bf16.msra.mxu1 %v19848_v25 }
 0x623   :  { %v19605_v35 = vpop.f32.mrb[32].mxu1 }
 0x624   :  { %v19606_v6 = vpop.f32.mrb[33].mxu1 }
 0x625   :  { %v19607_v41 = vadd.f32 %v19606_v6, %v19605_v35 }
 0x68f   :  { %v19062_v20 = vpop.f32.mrb[34].mxu1 }
 0x690   :  { %v19063_v33 = vadd.f32 %v19607_v41, %v19062_v20  ;;  %v19064_v44 = vpop.f32.mrb[35].mxu1 }
 0x692   :  { %19768 = vmatmul.mubr.f32.vlgmr.msra.gmra.mrb[36].mxu1 %v19063_v33 }
 0x765   :  { %v19155_v8 = vpop.f32.mrb[36].mxu1 }
 0x766   :  { %v19156_v61 = vadd.f32 %v19542_v21, %v19155_v8  ;;  %v19769_v50 = vpop.f32.mrb[37].mxu1 }
 0x768   :  { %19159 = vst [vmem:[#allocation2] sm:$0x3] %v19156_v61 }
 0x769   :  { %21263 = shalt.err (!%p21260_p4)
}
 0x76a   :  { %s21264_s8 = scalar_lea.hbm %s28425_s6, 32 }
 0x76b   :  { %p21265_p5 = scmp.ne.s32.totalorder %s28425_s6, %s21264_s8  ;;  %p21268_p6 = scmp.lt.u32.totalorder %s21264_s8, %s28425_s6 }
 0x76d   :  { %p21270_p7 = pnand %p21268_p6, %p21265_p5 }
 0x76f   :  { %21273 = shalt.err (!%p21270_p7)
}
 0x770   :  { %19169 = dma.vmem_to_hbm [thread:$0]  %s19167_s29, 32, %s28425_s6, [#allocation3]  }
 0x771   :  { %21274 = dma.done.wait [#allocation3], 32  }
 0x772   :  { %21275 = vsyncadd [#allocation3], 4294967264 }
 0x773   :  { %19173 = vsyncpa [#allocation3], 1 }

</bundles_post_ra>
